<compile_context>
chip_gen: v6e
topology: v6e:2x2x1
jax: 0.10.0
libtpu: 0.0.40
codegen_flags: <defaults>
</compile_context>

<pallas_src>
import functools
from math import log2

import numpy as np
import jax
import jax.numpy as jnp
from jax.experimental import pallas as pl
from jax.experimental.pallas import tpu as pltpu

# Fixed configuration (img_size=32, img_channel=1, num_feature=16, patch_grid_size=2).
# Per conv layer: (Cin, Cout, H_in); W_in == H_in, kernel 4, stride 2, pad 1.
LAYER_DIMS = ((1, 16, 32), (16, 32, 16), (32, 64, 8), (64, 128, 4))
NUM_LAYERS = len(LAYER_DIMS)
LANE_N = 256              # W_out * C_out == 256 for every layer in this config
FEAT_C = 128              # channels entering the classifier
GRID_HW = 2               # final feature map is 2 x 2 (== patch_grid_size)
BN_EPS = 1e-5
LRELU_SLOPE = 0.2


# ---------------------------------------------------------------------------
# In-kernel helpers (pure jnp, traced inside the Pallas kernel)
# ---------------------------------------------------------------------------
def _block_sum(v, c, w):
    """(1, w*c) -> (1, c): sum of the w lane-blocks of width c (static lane slices)."""
    out = v[:, 0:c]
    for t in range(1, w):
        out = out + v[:, t * c:(t + 1) * c]
    return out


def _block_bcast(v, w):
    """(1, c) -> (1, w*c): tile along lanes (static lane concat)."""
    return jnp.concatenate([v] * w, axis=-1)


# ---------------------------------------------------------------------------
# The fused Pallas kernel
# ---------------------------------------------------------------------------
def _fused_kernel(s0_ref, w0_ref, w1_ref, w2_ref, w3_ref, aff_ref, wc_ref, cb_ref,
                  out_ref, s1_ref, s2_ref, s3_ref, *, batch):
    w_refs = (w0_ref, w1_ref, w2_ref, w3_ref)
    act_refs = (s0_ref, s1_ref, s2_ref, s3_ref)

    # Zero the padded activation scratch buffers (the borders that stay zero ARE the
    # conv padding; interiors get overwritten below).
    for sref in (s1_ref, s2_ref, s3_ref):
        sref[...] = jnp.zeros(sref.shape, sref.dtype)

    feats = None
    for l, (cin, cout, hin) in enumerate(LAYER_DIMS):
        hout = hin // 2
        wout = hin // 2
        n = wout * cout                       # == LANE_N

        # ---- conv(4,4,s=2,p=1): 4 row-tap bf16 MXU matmuls (block-Toeplitz weights) ----
        accs = []
        for b in range(batch):
            acc = None
            for i in range(4):
                # padded input row (2*ho + i) == scratch[b, i % 2, ho + i // 2, :]
                tap = act_refs[l][b, i % 2, (i // 2):(i // 2) + hout, :]
                part = jnp.dot(tap.astype(jnp.bfloat16), w_refs[l][i],
                               preferred_element_type=jnp.float32)
                acc = part if acc is None else acc + part
            accs.append(acc)                  # (hout, n) f32, lane index = w*cout + c

        # ---- bias (layer 0) / train-mode BatchNorm (layers 1..3), all in f32 ----
        if l == 0:
            outs = [a + aff_ref[0:1, :] for a in accs]
        else:
            gamma = aff_ref[2 * l - 1:2 * l, :]
            beta = aff_ref[2 * l:2 * l + 1, :]
            inv_cnt = 1.0 / float(batch * hout * wout)
            s_tot = jnp.sum(accs[0], axis=0, keepdims=True)
            for a in accs[1:]:
                s_tot = s_tot + jnp.sum(a, axis=0, keepdims=True)
            mean = _block_bcast(_block_sum(s_tot, cout, wout), wout) * inv_cnt
            v_tot = jnp.sum(jnp.square(accs[0] - mean), axis=0, keepdims=True)
            for a in accs[1:]:
                v_tot = v_tot + jnp.sum(jnp.square(a - mean), axis=0, keepdims=True)
            var = _block_bcast(_block_sum(v_tot, cout, wout), wout) * inv_cnt
            scale = gamma * jax.lax.rsqrt(var + BN_EPS)
            shift = beta - mean * scale
            outs = [a * scale + shift for a in accs]

        # ---- LeakyReLU(0.2) ----
        outs = [jnp.where(o >= 0, o, LRELU_SLOPE * o) for o in outs]

        if l + 1 < NUM_LAYERS:
            # Scatter rows into the next layer's parity-split, zero-padded scratch:
            # unpadded row h -> padded row hp = h + 1 -> (parity, half) = (hp % 2, hp // 2);
            # interior lanes are [cout, cout + W*cout).
            nxt = act_refs[l + 1]
            for b in range(batch):
                ob = outs[b]
                for h in range(hout):
                    hp = h + 1
                    nxt[b, hp % 2, (hp // 2):(hp // 2) + 1, cout:cout + n] = ob[h:h + 1, :]
        else:
            feats = outs                      # per-b (2, 256) final features

    # ---- classifier: Linear(feat+one_hot coords, 1) == feature dot + per-(h,w) bias ----
    # Output row order matches torch's .transpose(1,3).reshape(-1, C): (b, w, h).
    wc = wc_ref[...]                          # (1, FEAT_C)
    for b in range(batch):
        fb = feats[b]                         # (H, W*FEAT_C) = (2, 256); fb[h, w*128 + c]
        for wcol in range(GRID_HW):
            prod = fb[:, wcol * FEAT_C:(wcol + 1) * FEAT_C] * wc
            logits = jnp.sum(prod, axis=-1, keepdims=True)             # (2, 1), rows = h
            logits = logits + cb_ref[wcol * GRID_HW:(wcol + 1) * GRID_HW, :]
            row0 = b * (GRID_HW * GRID_HW) + wcol * GRID_HW
            out_ref[row0:row0 + GRID_HW, :] = logits


# ---------------------------------------------------------------------------
# Host-side wrapper
# ---------------------------------------------------------------------------
def _full_spec(shape):
    zeros = (0,) * len(shape)
    return pl.BlockSpec(shape, lambda i, _z=zeros: _z)


def patch_discriminator_forward(x_nchw, fused):
    """x_nchw: (B, 1, 32, 32) -> (B * patch_grid_size**2, 1) logits (torch row order)."""
    b = x_nchw.shape[0]
    x = jnp.transpose(x_nchw, (0, 2, 3, 1)).astype(jnp.float32)        # NHWC (B,32,32,1)
    xp = jnp.pad(x, ((0, 0), (1, 1), (1, 1), (0, 0)))                  # (B,34,34,1)
    # Parity-split padded rows for layer 0: s0[b, r, a, wp] = xp[b, 2a + r, wp, 0]
    s0 = jnp.transpose(xp.reshape(b, 17, 2, 34), (0, 2, 1, 3))         # (B,2,17,34)

    args = (s0,) + tuple(fused["big"]) + (fused["aff"], fused["wc"], fused["cb"])
    kernel = functools.partial(_fused_kernel, batch=b)
    return pl.pallas_call(
        kernel,
        out_shape=jax.ShapeDtypeStruct((b * GRID_HW * GRID_HW, 1), jnp.float32),
        grid=(1,),
        in_specs=[_full_spec(a.shape) for a in args],
        out_specs=_full_spec((b * GRID_HW * GRID_HW, 1)),
        scratch_shapes=[
            pltpu.VMEM((b, 2, 9, 18 * 16), jnp.float32),   # layer-1 padded input
            pltpu.VMEM((b, 2, 5, 10 * 32), jnp.float32),   # layer-2 padded input
            pltpu.VMEM((b, 2, 3, 6 * 64), jnp.float32),    # layer-3 padded input
        ],
    )(*args)


# ---------------------------------------------------------------------------
# Parameter setup (PyTorch layout) + one-time repack for the fused kernel
# ---------------------------------------------------------------------------
def init_params(key, img_size=32, img_channel=1, num_feature=16, patch_grid_size=2):
    num_del = int(log2(patch_grid_size)) + 1
    num_hidden = int(log2(img_size)) - num_del
    params = []
    c_in, c_out = img_channel, num_feature
    key, k1, k2 = jax.random.split(key, 3)
    params.append(dict(
        w=0.02 * jax.random.normal(k1, (c_out, c_in, 4, 4), jnp.float32),
        b=0.01 * jax.random.normal(k2, (c_out,), jnp.float32),
        gamma=jnp.ones((c_out,), jnp.float32),
        beta=jnp.zeros((c_out,), jnp.float32),
        use_bn=False))
    for nh in range(num_hidden):
        c_in = (2 ** nh) * num_feature
        c_out = (2 ** (nh + 1)) * num_feature
        key, k1, k2 = jax.random.split(key, 3)
        params.append(dict(
            w=0.02 * jax.random.normal(k1, (c_out, c_in, 4, 4), jnp.float32),
            b=0.01 * jax.random.normal(k2, (c_out,), jnp.float32),
            gamma=jnp.ones((c_out,), jnp.float32),   # torch BN defaults (weight_init is a no-op)
            beta=jnp.zeros((c_out,), jnp.float32),
            use_bn=True))
    key, k1, k2 = jax.random.split(key, 3)
    cls_in = c_out + patch_grid_size ** 2
    cls = dict(w=0.02 * jax.random.normal(k1, (1, cls_in), jnp.float32),
               b=0.01 * jax.random.normal(k2, (1,), jnp.float32))
    return params, cls


def prepare_fused_params(conv_params, cls_params):
    """One-time repack of PyTorch-layout parameters into the fused kernel's inputs."""
    assert len(conv_params) == NUM_LAYERS
    big_ws = []
    for p, (cin, cout, hin) in zip(conv_params, LAYER_DIMS):
        w = np.asarray(p["w"], np.float32)             # (cout, cin, 4, 4) torch OIHW
        assert w.shape == (cout, cin, 4, 4)
        wout, wpad = hin // 2, hin + 2
        wt = np.transpose(w, (2, 3, 1, 0))             # (kh, kw, cin, cout)
        big = np.zeros((4, wpad * cin, wout * cout), np.float32)
        for i in range(4):                             # kernel row tap
            for j in range(4):                         # kernel col tap
                for wo in range(wout):                 # output column
                    wp = 2 * wo + j                    # padded input column
                    big[i, wp * cin:(wp + 1) * cin, wo * cout:(wo + 1) * cout] = wt[i, j]
        big_ws.append(jnp.asarray(big, jnp.bfloat16))  # bf16 MXU operands

    aff = np.zeros((2 * NUM_LAYERS - 1, LANE_N), np.float32)
    # layer 0: plain conv bias (no BN), broadcast over the W_out lane blocks
    aff[0] = np.tile(np.asarray(conv_params[0]["b"], np.float32), LAYER_DIMS[0][2] // 2)
    # layers 1..3: conv bias dropped -- exactly absorbed by train-mode BN mean subtraction
    for l in range(1, NUM_LAYERS):
        wout = LAYER_DIMS[l][2] // 2
        aff[2 * l - 1] = np.tile(np.asarray(conv_params[l]["gamma"], np.float32), wout)
        aff[2 * l] = np.tile(np.asarray(conv_params[l]["beta"], np.float32), wout)

    wcls = np.asarray(cls_params["w"], np.float32)     # (1, 132)
    bcls = float(np.asarray(cls_params["b"], np.float32)[0])
    wc = wcls[:, :FEAT_C]                              # (1, 128) feature weights
    # one_hot coords: output row (b, w, h) gets extra logit wcls[128 + h*W + w]; fold + bias
    coord = wcls[0, FEAT_C:].reshape(GRID_HW, GRID_HW)          # [h, w]
    cb = coord.T.reshape(GRID_HW * GRID_HW, 1) + bcls           # cb[w*2 + h]

    return dict(big=big_ws,
                aff=jnp.asarray(aff, jnp.float32),
                wc=jnp.asarray(wc, jnp.float32),
                cb=jnp.asarray(cb, jnp.float32))


if __name__ == "__main__":
    key = jax.random.PRNGKey(0)
    k_params, k_x = jax.random.split(key)
    conv_params, cls_params = init_params(k_params, img_size=32, img_channel=1,
                                          num_feature=16, patch_grid_size=2)
    fused = prepare_fused_params(conv_params, cls_params)

    # module asserts img_size >= 32, so the smallest valid input is (B, 1, 32, 32)
    x = jax.random.normal(k_x, (2, 1, 32, 32), jnp.float32)

    fwd = jax.jit(patch_discriminator_forward)
    y = jax.block_until_ready(fwd(x, fused))
    assert y.shape == (2 * 2 * 2, 1), y.shape       # (B * patch_grid_size**2, 1)
    assert bool(jnp.all(jnp.isfinite(y)))
    print("KERNEL_OK")
</pallas_src>

<mosaic_0001>
module attributes {stable_mosaic.version = 11 : i64} {
  func.func @_fused_kernel(%arg0: i32, %arg1: memref<2x2x17x34xf32, #tpu.memory_space<vmem>>, %arg2: memref<4x34x256xbf16, #tpu.memory_space<vmem>>, %arg3: memref<4x288x256xbf16, #tpu.memory_space<vmem>>, %arg4: memref<4x320x256xbf16, #tpu.memory_space<vmem>>, %arg5: memref<4x384x256xbf16, #tpu.memory_space<vmem>>, %arg6: memref<7x256xf32, #tpu.memory_space<vmem>>, %arg7: memref<1x128xf32, #tpu.memory_space<vmem>>, %arg8: memref<4x1xf32, #tpu.memory_space<vmem>>, %arg9: memref<8x1xf32, #tpu.memory_space<vmem>>, %arg10: memref<2x2x9x288xf32, #tpu.memory_space<vmem>>, %arg11: memref<2x2x5x320xf32, #tpu.memory_space<vmem>>, %arg12: memref<2x2x3x384xf32, #tpu.memory_space<vmem>>) attributes {dimension_semantics = [#tpu.dimension_semantics<arbitrary>], iteration_bounds = array<i64: 1>, scalar_prefetch = 0 : i64, scratch_operands = 3 : i64, tpu.core_type = #tpu.core_type<tc>, window_params = [{pipeline_mode = #tpu.pipeline_mode<synchronous>, transform_indices = @transform_0, window_bounds = array<i64: 2, 2, 17, 34>}, {pipeline_mode = #tpu.pipeline_mode<synchronous>, transform_indices = @transform_1, window_bounds = array<i64: 4, 34, 256>}, {pipeline_mode = #tpu.pipeline_mode<synchronous>, transform_indices = @transform_2, window_bounds = array<i64: 4, 288, 256>}, {pipeline_mode = #tpu.pipeline_mode<synchronous>, transform_indices = @transform_3, window_bounds = array<i64: 4, 320, 256>}, {pipeline_mode = #tpu.pipeline_mode<synchronous>, transform_indices = @transform_4, window_bounds = array<i64: 4, 384, 256>}, {pipeline_mode = #tpu.pipeline_mode<synchronous>, transform_indices = @transform_5, window_bounds = array<i64: 7, 256>}, {pipeline_mode = #tpu.pipeline_mode<synchronous>, transform_indices = @transform_6, window_bounds = array<i64: 1, 128>}, {pipeline_mode = #tpu.pipeline_mode<synchronous>, transform_indices = @transform_7, window_bounds = array<i64: 4, 1>}, {pipeline_mode = #tpu.pipeline_mode<synchronous>, transform_indices = @transform_8, window_bounds = array<i64: 8, 1>}]} {
    %cst = arith.constant 0.000000e+00 : f32
    %0 = vector.broadcast %cst : f32 to vector<2x2x9x288xf32>
    %c0 = arith.constant 0 : index
    %c0_0 = arith.constant 0 : index
    %c0_1 = arith.constant 0 : index
    %c0_2 = arith.constant 0 : index
    %1 = vector.load %arg10[%c0, %c0_0, %c0_1, %c0_2] : memref<2x2x9x288xf32, #tpu.memory_space<vmem>>, vector<2x2x9x288xf32>
    tpu.vector_store %arg10[%c0, %c0_0, %c0_1, %c0_2], %0 {strides = array<i32>} : memref<2x2x9x288xf32, #tpu.memory_space<vmem>>, vector<2x2x9x288xf32>,
    %cst_3 = arith.constant 0.000000e+00 : f32
    %2 = vector.broadcast %cst_3 : f32 to vector<2x2x5x320xf32>
    %c0_4 = arith.constant 0 : index
    %c0_5 = arith.constant 0 : index
    %c0_6 = arith.constant 0 : index
    %c0_7 = arith.constant 0 : index
    %3 = vector.load %arg11[%c0_4, %c0_5, %c0_6, %c0_7] : memref<2x2x5x320xf32, #tpu.memory_space<vmem>>, vector<2x2x5x320xf32>
    tpu.vector_store %arg11[%c0_4, %c0_5, %c0_6, %c0_7], %2 {strides = array<i32>} : memref<2x2x5x320xf32, #tpu.memory_space<vmem>>, vector<2x2x5x320xf32>,
    %cst_8 = arith.constant 0.000000e+00 : f32
    %4 = vector.broadcast %cst_8 : f32 to vector<2x2x3x384xf32>
    %c0_9 = arith.constant 0 : index
    %c0_10 = arith.constant 0 : index
    %c0_11 = arith.constant 0 : index
    %c0_12 = arith.constant 0 : index
    %5 = vector.load %arg12[%c0_9, %c0_10, %c0_11, %c0_12] : memref<2x2x3x384xf32, #tpu.memory_space<vmem>>, vector<2x2x3x384xf32>
    tpu.vector_store %arg12[%c0_9, %c0_10, %c0_11, %c0_12], %4 {strides = array<i32>} : memref<2x2x3x384xf32, #tpu.memory_space<vmem>>, vector<2x2x3x384xf32>,
    %c0_13 = arith.constant 0 : index
    %c0_14 = arith.constant 0 : index
    %c0_15 = arith.constant 0 : index
    %c0_16 = arith.constant 0 : index
    %6 = vector.load %arg1[%c0_13, %c0_14, %c0_15, %c0_16] : memref<2x2x17x34xf32, #tpu.memory_space<vmem>>, vector<1x1x16x34xf32>
    %7 = vector.shape_cast %6 : vector<1x1x16x34xf32> to vector<16x34xf32>
    %8 = arith.truncf %7 : vector<16x34xf32> to vector<16x34xbf16>
    %c0_17 = arith.constant 0 : index
    %c0_18 = arith.constant 0 : index
    %c0_19 = arith.constant 0 : index
    %9 = vector.load %arg2[%c0_17, %c0_18, %c0_19] : memref<4x34x256xbf16, #tpu.memory_space<vmem>>, vector<1x34x256xbf16>
    %10 = vector.shape_cast %9 : vector<1x34x256xbf16> to vector<34x256xbf16>
    %cst_20 = arith.constant dense<0.000000e+00> : vector<16x256xf32>
    %11 = tpu.matmul %8, %10, %cst_20 {dimension_numbers = #tpu.dot_dimension_numbers<[1], [0], [0], [1], [0, 0, 1, 1], [], []>} : vector<16x34xbf16>, vector<34x256xbf16>, vector<16x256xf32> -> vector<16x256xf32>
    %c0_21 = arith.constant 0 : index
    %c1 = arith.constant 1 : index
    %c0_22 = arith.constant 0 : index
    %c0_23 = arith.constant 0 : index
    %12 = vector.load %arg1[%c0_21, %c1, %c0_22, %c0_23] : memref<2x2x17x34xf32, #tpu.memory_space<vmem>>, vector<1x1x16x34xf32>
    %13 = vector.shape_cast %12 : vector<1x1x16x34xf32> to vector<16x34xf32>
    %14 = arith.truncf %13 : vector<16x34xf32> to vector<16x34xbf16>
    %c1_24 = arith.constant 1 : index
    %c0_25 = arith.constant 0 : index
    %c0_26 = arith.constant 0 : index
    %15 = vector.load %arg2[%c1_24, %c0_25, %c0_26] : memref<4x34x256xbf16, #tpu.memory_space<vmem>>, vector<1x34x256xbf16>
    %16 = vector.shape_cast %15 : vector<1x34x256xbf16> to vector<34x256xbf16>
    %cst_27 = arith.constant dense<0.000000e+00> : vector<16x256xf32>
    %17 = tpu.matmul %14, %16, %cst_27 {dimension_numbers = #tpu.dot_dimension_numbers<[1], [0], [0], [1], [0, 0, 1, 1], [], []>} : vector<16x34xbf16>, vector<34x256xbf16>, vector<16x256xf32> -> vector<16x256xf32>
    %18 = arith.addf %11, %17 : vector<16x256xf32>
    %c0_28 = arith.constant 0 : index
    %c0_29 = arith.constant 0 : index
    %c1_30 = arith.constant 1 : index
    %c0_31 = arith.constant 0 : index
    %19 = vector.load %arg1[%c0_28, %c0_29, %c1_30, %c0_31] : memref<2x2x17x34xf32, #tpu.memory_space<vmem>>, vector<1x1x16x34xf32>
    %20 = vector.shape_cast %19 : vector<1x1x16x34xf32> to vector<16x34xf32>
    %21 = arith.truncf %20 : vector<16x34xf32> to vector<16x34xbf16>
    %c2 = arith.constant 2 : index
    %c0_32 = arith.constant 0 : index
    %c0_33 = arith.constant 0 : index
    %22 = vector.load %arg2[%c2, %c0_32, %c0_33] : memref<4x34x256xbf16, #tpu.memory_space<vmem>>, vector<1x34x256xbf16>
    %23 = vector.shape_cast %22 : vector<1x34x256xbf16> to vector<34x256xbf16>
    %cst_34 = arith.constant dense<0.000000e+00> : vector<16x256xf32>
    %24 = tpu.matmul %21, %23, %cst_34 {dimension_numbers = #tpu.dot_dimension_numbers<[1], [0], [0], [1], [0, 0, 1, 1], [], []>} : vector<16x34xbf16>, vector<34x256xbf16>, vector<16x256xf32> -> vector<16x256xf32>
    %25 = arith.addf %18, %24 : vector<16x256xf32>
    %c0_35 = arith.constant 0 : index
    %c1_36 = arith.constant 1 : index
    %c1_37 = arith.constant 1 : index
    %c0_38 = arith.constant 0 : index
    %26 = vector.load %arg1[%c0_35, %c1_36, %c1_37, %c0_38] : memref<2x2x17x34xf32, #tpu.memory_space<vmem>>, vector<1x1x16x34xf32>
    %27 = vector.shape_cast %26 : vector<1x1x16x34xf32> to vector<16x34xf32>
    %28 = arith.truncf %27 : vector<16x34xf32> to vector<16x34xbf16>
    %c3 = arith.constant 3 : index
    %c0_39 = arith.constant 0 : index
    %c0_40 = arith.constant 0 : index
    %29 = vector.load %arg2[%c3, %c0_39, %c0_40] : memref<4x34x256xbf16, #tpu.memory_space<vmem>>, vector<1x34x256xbf16>
    %30 = vector.shape_cast %29 : vector<1x34x256xbf16> to vector<34x256xbf16>
    %cst_41 = arith.constant dense<0.000000e+00> : vector<16x256xf32>
    %31 = tpu.matmul %28, %30, %cst_41 {dimension_numbers = #tpu.dot_dimension_numbers<[1], [0], [0], [1], [0, 0, 1, 1], [], []>} : vector<16x34xbf16>, vector<34x256xbf16>, vector<16x256xf32> -> vector<16x256xf32>
    %32 = arith.addf %25, %31 : vector<16x256xf32>
    %c1_42 = arith.constant 1 : index
    %c0_43 = arith.constant 0 : index
    %c0_44 = arith.constant 0 : index
    %c0_45 = arith.constant 0 : index
    %33 = vector.load %arg1[%c1_42, %c0_43, %c0_44, %c0_45] : memref<2x2x17x34xf32, #tpu.memory_space<vmem>>, vector<1x1x16x34xf32>
    %34 = vector.shape_cast %33 : vector<1x1x16x34xf32> to vector<16x34xf32>
    %35 = arith.truncf %34 : vector<16x34xf32> to vector<16x34xbf16>
    %c0_46 = arith.constant 0 : index
    %c0_47 = arith.constant 0 : index
    %c0_48 = arith.constant 0 : index
    %36 = vector.load %arg2[%c0_46, %c0_47, %c0_48] : memref<4x34x256xbf16, #tpu.memory_space<vmem>>, vector<1x34x256xbf16>
    %37 = vector.shape_cast %36 : vector<1x34x256xbf16> to vector<34x256xbf16>
    %cst_49 = arith.constant dense<0.000000e+00> : vector<16x256xf32>
    %38 = tpu.matmul %35, %37, %cst_49 {dimension_numbers = #tpu.dot_dimension_numbers<[1], [0], [0], [1], [0, 0, 1, 1], [], []>} : vector<16x34xbf16>, vector<34x256xbf16>, vector<16x256xf32> -> vector<16x256xf32>
    %c1_50 = arith.constant 1 : index
    %c1_51 = arith.constant 1 : index
    %c0_52 = arith.constant 0 : index
    %c0_53 = arith.constant 0 : index
    %39 = vector.load %arg1[%c1_50, %c1_51, %c0_52, %c0_53] : memref<2x2x17x34xf32, #tpu.memory_space<vmem>>, vector<1x1x16x34xf32>
    %40 = vector.shape_cast %39 : vector<1x1x16x34xf32> to vector<16x34xf32>
    %41 = arith.truncf %40 : vector<16x34xf32> to vector<16x34xbf16>
    %c1_54 = arith.constant 1 : index
    %c0_55 = arith.constant 0 : index
    %c0_56 = arith.constant 0 : index
    %42 = vector.load %arg2[%c1_54, %c0_55, %c0_56] : memref<4x34x256xbf16, #tpu.memory_space<vmem>>, vector<1x34x256xbf16>
    %43 = vector.shape_cast %42 : vector<1x34x256xbf16> to vector<34x256xbf16>
    %cst_57 = arith.constant dense<0.000000e+00> : vector<16x256xf32>
    %44 = tpu.matmul %41, %43, %cst_57 {dimension_numbers = #tpu.dot_dimension_numbers<[1], [0], [0], [1], [0, 0, 1, 1], [], []>} : vector<16x34xbf16>, vector<34x256xbf16>, vector<16x256xf32> -> vector<16x256xf32>
    %45 = arith.addf %38, %44 : vector<16x256xf32>
    %c1_58 = arith.constant 1 : index
    %c0_59 = arith.constant 0 : index
    %c1_60 = arith.constant 1 : index
    %c0_61 = arith.constant 0 : index
    %46 = vector.load %arg1[%c1_58, %c0_59, %c1_60, %c0_61] : memref<2x2x17x34xf32, #tpu.memory_space<vmem>>, vector<1x1x16x34xf32>
    %47 = vector.shape_cast %46 : vector<1x1x16x34xf32> to vector<16x34xf32>
    %48 = arith.truncf %47 : vector<16x34xf32> to vector<16x34xbf16>
    %c2_62 = arith.constant 2 : index
    %c0_63 = arith.constant 0 : index
    %c0_64 = arith.constant 0 : index
    %49 = vector.load %arg2[%c2_62, %c0_63, %c0_64] : memref<4x34x256xbf16, #tpu.memory_space<vmem>>, vector<1x34x256xbf16>
    %50 = vector.shape_cast %49 : vector<1x34x256xbf16> to vector<34x256xbf16>
    %cst_65 = arith.constant dense<0.000000e+00> : vector<16x256xf32>
    %51 = tpu.matmul %48, %50, %cst_65 {dimension_numbers = #tpu.dot_dimension_numbers<[1], [0], [0], [1], [0, 0, 1, 1], [], []>} : vector<16x34xbf16>, vector<34x256xbf16>, vector<16x256xf32> -> vector<16x256xf32>
    %52 = arith.addf %45, %51 : vector<16x256xf32>
    %c1_66 = arith.constant 1 : index
    %c1_67 = arith.constant 1 : index
    %c1_68 = arith.constant 1 : index
    %c0_69 = arith.constant 0 : index
    %53 = vector.load %arg1[%c1_66, %c1_67, %c1_68, %c0_69] : memref<2x2x17x34xf32, #tpu.memory_space<vmem>>, vector<1x1x16x34xf32>
    %54 = vector.shape_cast %53 : vector<1x1x16x34xf32> to vector<16x34xf32>
    %55 = arith.truncf %54 : vector<16x34xf32> to vector<16x34xbf16>
    %c3_70 = arith.constant 3 : index
    %c0_71 = arith.constant 0 : index
    %c0_72 = arith.constant 0 : index
    %56 = vector.load %arg2[%c3_70, %c0_71, %c0_72] : memref<4x34x256xbf16, #tpu.memory_space<vmem>>, vector<1x34x256xbf16>
    %57 = vector.shape_cast %56 : vector<1x34x256xbf16> to vector<34x256xbf16>
    %cst_73 = arith.constant dense<0.000000e+00> : vector<16x256xf32>
    %58 = tpu.matmul %55, %57, %cst_73 {dimension_numbers = #tpu.dot_dimension_numbers<[1], [0], [0], [1], [0, 0, 1, 1], [], []>} : vector<16x34xbf16>, vector<34x256xbf16>, vector<16x256xf32> -> vector<16x256xf32>
    %59 = arith.addf %52, %58 : vector<16x256xf32>
    %c0_74 = arith.constant 0 : index
    %c0_75 = arith.constant 0 : index
    %60 = vector.load %arg6[%c0_74, %c0_75] : memref<7x256xf32, #tpu.memory_space<vmem>>, vector<1x256xf32>
    %61 = vector.broadcast %60 : vector<1x256xf32> to vector<16x256xf32>
    %62 = arith.addf %32, %61 : vector<16x256xf32>
    %c0_76 = arith.constant 0 : index
    %c0_77 = arith.constant 0 : index
    %63 = vector.load %arg6[%c0_76, %c0_77] : memref<7x256xf32, #tpu.memory_space<vmem>>, vector<1x256xf32>
    %64 = vector.broadcast %63 : vector<1x256xf32> to vector<16x256xf32>
    %65 = arith.addf %59, %64 : vector<16x256xf32>
    %cst_78 = arith.constant 0.000000e+00 : f32
    %66 = vector.broadcast %cst_78 : f32 to vector<16x256xf32>
    %67 = arith.cmpf oge, %62, %66 : vector<16x256xf32>
    %cst_79 = arith.constant 2.000000e-01 : f32
    %68 = vector.broadcast %cst_79 : f32 to vector<16x256xf32>
    %69 = arith.mulf %68, %62 : vector<16x256xf32>
    %70 = arith.select %67, %62, %69 : vector<16x256xi1>, vector<16x256xf32>
    %cst_80 = arith.constant 0.000000e+00 : f32
    %71 = vector.broadcast %cst_80 : f32 to vector<16x256xf32>
    %72 = arith.cmpf oge, %65, %71 : vector<16x256xf32>
    %cst_81 = arith.constant 2.000000e-01 : f32
    %73 = vector.broadcast %cst_81 : f32 to vector<16x256xf32>
    %74 = arith.mulf %73, %65 : vector<16x256xf32>
    %75 = arith.select %72, %65, %74 : vector<16x256xi1>, vector<16x256xf32>
    %76 = vector.extract_strided_slice %70 {offsets = [0, 0], sizes = [1, 256], strides = [1, 1]} : vector<16x256xf32> to vector<1x256xf32>
    %c0_82 = arith.constant 0 : index
    %c1_83 = arith.constant 1 : index
    %c0_84 = arith.constant 0 : index
    %c16 = arith.constant 16 : index
    %77 = vector.load %arg10[%c0_82, %c1_83, %c0_84, %c16] : memref<2x2x9x288xf32, #tpu.memory_space<vmem>>, vector<1x1x1x256xf32>
    %78 = vector.shape_cast %77 : vector<1x1x1x256xf32> to vector<1x256xf32>
    %79 = vector.shape_cast %76 : vector<1x256xf32> to vector<1x1x1x256xf32>
    tpu.vector_store %arg10[%c0_82, %c1_83, %c0_84, %c16], %79 {strides = array<i32>} : memref<2x2x9x288xf32, #tpu.memory_space<vmem>>, vector<1x1x1x256xf32>,
    %80 = vector.extract_strided_slice %70 {offsets = [1, 0], sizes = [1, 256], strides = [1, 1]} : vector<16x256xf32> to vector<1x256xf32>
    %c0_85 = arith.constant 0 : index
    %c0_86 = arith.constant 0 : index
    %c1_87 = arith.constant 1 : index
    %c16_88 = arith.constant 16 : index
    %81 = vector.load %arg10[%c0_85, %c0_86, %c1_87, %c16_88] : memref<2x2x9x288xf32, #tpu.memory_space<vmem>>, vector<1x1x1x256xf32>
    %82 = vector.shape_cast %81 : vector<1x1x1x256xf32> to vector<1x256xf32>
    %83 = vector.shape_cast %80 : vector<1x256xf32> to vector<1x1x1x256xf32>
    tpu.vector_store %arg10[%c0_85, %c0_86, %c1_87, %c16_88], %83 {strides = array<i32>} : memref<2x2x9x288xf32, #tpu.memory_space<vmem>>, vector<1x1x1x256xf32>,
    %84 = vector.extract_strided_slice %70 {offsets = [2, 0], sizes = [1, 256], strides = [1, 1]} : vector<16x256xf32> to vector<1x256xf32>
    %c0_89 = arith.constant 0 : index
    %c1_90 = arith.constant 1 : index
    %c1_91 = arith.constant 1 : index
    %c16_92 = arith.constant 16 : index
    %85 = vector.load %arg10[%c0_89, %c1_90, %c1_91, %c16_92] : memref<2x2x9x288xf32, #tpu.memory_space<vmem>>, vector<1x1x1x256xf32>
    %86 = vector.shape_cast %85 : vector<1x1x1x256xf32> to vector<1x256xf32>
    %87 = vector.shape_cast %84 : vector<1x256xf32> to vector<1x1x1x256xf32>
    tpu.vector_store %arg10[%c0_89, %c1_90, %c1_91, %c16_92], %87 {strides = array<i32>} : memref<2x2x9x288xf32, #tpu.memory_space<vmem>>, vector<1x1x1x256xf32>,
    %88 = vector.extract_strided_slice %70 {offsets = [3, 0], sizes = [1, 256], strides = [1, 1]} : vector<16x256xf32> to vector<1x256xf32>
    %c0_93 = arith.constant 0 : index
    %c0_94 = arith.constant 0 : index
    %c2_95 = arith.constant 2 : index
    %c16_96 = arith.constant 16 : index
    %89 = vector.load %arg10[%c0_93, %c0_94, %c2_95, %c16_96] : memref<2x2x9x288xf32, #tpu.memory_space<vmem>>, vector<1x1x1x256xf32>
    %90 = vector.shape_cast %89 : vector<1x1x1x256xf32> to vector<1x256xf32>
    %91 = vector.shape_cast %88 : vector<1x256xf32> to vector<1x1x1x256xf32>
    tpu.vector_store %arg10[%c0_93, %c0_94, %c2_95, %c16_96], %91 {strides = array<i32>} : memref<2x2x9x288xf32, #tpu.memory_space<vmem>>, vector<1x1x1x256xf32>,
    %92 = vector.extract_strided_slice %70 {offsets = [4, 0], sizes = [1, 256], strides = [1, 1]} : vector<16x256xf32> to vector<1x256xf32>
    %c0_97 = arith.constant 0 : index
    %c1_98 = arith.constant 1 : index
    %c2_99 = arith.constant 2 : index
    %c16_100 = arith.constant 16 : index
    %93 = vector.load %arg10[%c0_97, %c1_98, %c2_99, %c16_100] : memref<2x2x9x288xf32, #tpu.memory_space<vmem>>, vector<1x1x1x256xf32>
    %94 = vector.shape_cast %93 : vector<1x1x1x256xf32> to vector<1x256xf32>
    %95 = vector.shape_cast %92 : vector<1x256xf32> to vector<1x1x1x256xf32>
    tpu.vector_store %arg10[%c0_97, %c1_98, %c2_99, %c16_100], %95 {strides = array<i32>} : memref<2x2x9x288xf32, #tpu.memory_space<vmem>>, vector<1x1x1x256xf32>,
    %96 = vector.extract_strided_slice %70 {offsets = [5, 0], sizes = [1, 256], strides = [1, 1]} : vector<16x256xf32> to vector<1x256xf32>
    %c0_101 = arith.constant 0 : index
    %c0_102 = arith.constant 0 : index
    %c3_103 = arith.constant 3 : index
    %c16_104 = arith.constant 16 : index
    %97 = vector.load %arg10[%c0_101, %c0_102, %c3_103, %c16_104] : memref<2x2x9x288xf32, #tpu.memory_space<vmem>>, vector<1x1x1x256xf32>
    %98 = vector.shape_cast %97 : vector<1x1x1x256xf32> to vector<1x256xf32>
    %99 = vector.shape_cast %96 : vector<1x256xf32> to vector<1x1x1x256xf32>
    tpu.vector_store %arg10[%c0_101, %c0_102, %c3_103, %c16_104], %99 {strides = array<i32>} : memref<2x2x9x288xf32, #tpu.memory_space<vmem>>, vector<1x1x1x256xf32>,
    %100 = vector.extract_strided_slice %70 {offsets = [6, 0], sizes = [1, 256], strides = [1, 1]} : vector<16x256xf32> to vector<1x256xf32>
    %c0_105 = arith.constant 0 : index
    %c1_106 = arith.constant 1 : index
    %c3_107 = arith.constant 3 : index
    %c16_108 = arith.constant 16 : index
    %101 = vector.load %arg10[%c0_105, %c1_106, %c3_107, %c16_108] : memref<2x2x9x288xf32, #tpu.memory_space<vmem>>, vector<1x1x1x256xf32>
    %102 = vector.shape_cast %101 : vector<1x1x1x256xf32> to vector<1x256xf32>
    %103 = vector.shape_cast %100 : vector<1x256xf32> to vector<1x1x1x256xf32>
    tpu.vector_store %arg10[%c0_105, %c1_106, %c3_107, %c16_108], %103 {strides = array<i32>} : memref<2x2x9x288xf32, #tpu.memory_space<vmem>>, vector<1x1x1x256xf32>,
    %104 = vector.extract_strided_slice %70 {offsets = [7, 0], sizes = [1, 256], strides = [1, 1]} : vector<16x256xf32> to vector<1x256xf32>
    %c0_109 = arith.constant 0 : index
    %c0_110 = arith.constant 0 : index
    %c4 = arith.constant 4 : index
    %c16_111 = arith.constant 16 : index
    %105 = vector.load %arg10[%c0_109, %c0_110, %c4, %c16_111] : memref<2x2x9x288xf32, #tpu.memory_space<vmem>>, vector<1x1x1x256xf32>
    %106 = vector.shape_cast %105 : vector<1x1x1x256xf32> to vector<1x256xf32>
    %107 = vector.shape_cast %104 : vector<1x256xf32> to vector<1x1x1x256xf32>
    tpu.vector_store %arg10[%c0_109, %c0_110, %c4, %c16_111], %107 {strides = array<i32>} : memref<2x2x9x288xf32, #tpu.memory_space<vmem>>, vector<1x1x1x256xf32>,
    %108 = vector.extract_strided_slice %70 {offsets = [8, 0], sizes = [1, 256], strides = [1, 1]} : vector<16x256xf32> to vector<1x256xf32>
    %c0_112 = arith.constant 0 : index
    %c1_113 = arith.constant 1 : index
    %c4_114 = arith.constant 4 : index
    %c16_115 = arith.constant 16 : index
    %109 = vector.load %arg10[%c0_112, %c1_113, %c4_114, %c16_115] : memref<2x2x9x288xf32, #tpu.memory_space<vmem>>, vector<1x1x1x256xf32>
    %110 = vector.shape_cast %109 : vector<1x1x1x256xf32> to vector<1x256xf32>
    %111 = vector.shape_cast %108 : vector<1x256xf32> to vector<1x1x1x256xf32>
    tpu.vector_store %arg10[%c0_112, %c1_113, %c4_114, %c16_115], %111 {strides = array<i32>} : memref<2x2x9x288xf32, #tpu.memory_space<vmem>>, vector<1x1x1x256xf32>,
    %112 = vector.extract_strided_slice %70 {offsets = [9, 0], sizes = [1, 256], strides = [1, 1]} : vector<16x256xf32> to vector<1x256xf32>
    %c0_116 = arith.constant 0 : index
    %c0_117 = arith.constant 0 : index
    %c5 = arith.constant 5 : index
    %c16_118 = arith.constant 16 : index
    %113 = vector.load %arg10[%c0_116, %c0_117, %c5, %c16_118] : memref<2x2x9x288xf32, #tpu.memory_space<vmem>>, vector<1x1x1x256xf32>
    %114 = vector.shape_cast %113 : vector<1x1x1x256xf32> to vector<1x256xf32>
    %115 = vector.shape_cast %112 : vector<1x256xf32> to vector<1x1x1x256xf32>
    tpu.vector_store %arg10[%c0_116, %c0_117, %c5, %c16_118], %115 {strides = array<i32>} : memref<2x2x9x288xf32, #tpu.memory_space<vmem>>, vector<1x1x1x256xf32>,
    %116 = vector.extract_strided_slice %70 {offsets = [10, 0], sizes = [1, 256], strides = [1, 1]} : vector<16x256xf32> to vector<1x256xf32>
    %c0_119 = arith.constant 0 : index
    %c1_120 = arith.constant 1 : index
    %c5_121 = arith.constant 5 : index
    %c16_122 = arith.constant 16 : index
    %117 = vector.load %arg10[%c0_119, %c1_120, %c5_121, %c16_122] : memref<2x2x9x288xf32, #tpu.memory_space<vmem>>, vector<1x1x1x256xf32>
    %118 = vector.shape_cast %117 : vector<1x1x1x256xf32> to vector<1x256xf32>
    %119 = vector.shape_cast %116 : vector<1x256xf32> to vector<1x1x1x256xf32>
    tpu.vector_store %arg10[%c0_119, %c1_120, %c5_121, %c16_122], %119 {strides = array<i32>} : memref<2x2x9x288xf32, #tpu.memory_space<vmem>>, vector<1x1x1x256xf32>,
    %120 = vector.extract_strided_slice %70 {offsets = [11, 0], sizes = [1, 256], strides = [1, 1]} : vector<16x256xf32> to vector<1x256xf32>
    %c0_123 = arith.constant 0 : index
    %c0_124 = arith.constant 0 : index
    %c6 = arith.constant 6 : index
    %c16_125 = arith.constant 16 : index
    %121 = vector.load %arg10[%c0_123, %c0_124, %c6, %c16_125] : memref<2x2x9x288xf32, #tpu.memory_space<vmem>>, vector<1x1x1x256xf32>
    %122 = vector.shape_cast %121 : vector<1x1x1x256xf32> to vector<1x256xf32>
    %123 = vector.shape_cast %120 : vector<1x256xf32> to vector<1x1x1x256xf32>
    tpu.vector_store %arg10[%c0_123, %c0_124, %c6, %c16_125], %123 {strides = array<i32>} : memref<2x2x9x288xf32, #tpu.memory_space<vmem>>, vector<1x1x1x256xf32>,
    %124 = vector.extract_strided_slice %70 {offsets = [12, 0], sizes = [1, 256], strides = [1, 1]} : vector<16x256xf32> to vector<1x256xf32>
    %c0_126 = arith.constant 0 : index
    %c1_127 = arith.constant 1 : index
    %c6_128 = arith.constant 6 : index
    %c16_129 = arith.constant 16 : index
    %125 = vector.load %arg10[%c0_126, %c1_127, %c6_128, %c16_129] : memref<2x2x9x288xf32, #tpu.memory_space<vmem>>, vector<1x1x1x256xf32>
    %126 = vector.shape_cast %125 : vector<1x1x1x256xf32> to vector<1x256xf32>
    %127 = vector.shape_cast %124 : vector<1x256xf32> to vector<1x1x1x256xf32>
    tpu.vector_store %arg10[%c0_126, %c1_127, %c6_128, %c16_129], %127 {strides = array<i32>} : memref<2x2x9x288xf32, #tpu.memory_space<vmem>>, vector<1x1x1x256xf32>,
    %128 = vector.extract_strided_slice %70 {offsets = [13, 0], sizes = [1, 256], strides = [1, 1]} : vector<16x256xf32> to vector<1x256xf32>
    %c0_130 = arith.constant 0 : index
    %c0_131 = arith.constant 0 : index
    %c7 = arith.constant 7 : index
    %c16_132 = arith.constant 16 : index
    %129 = vector.load %arg10[%c0_130, %c0_131, %c7, %c16_132] : memref<2x2x9x288xf32, #tpu.memory_space<vmem>>, vector<1x1x1x256xf32>
    %130 = vector.shape_cast %129 : vector<1x1x1x256xf32> to vector<1x256xf32>
    %131 = vector.shape_cast %128 : vector<1x256xf32> to vector<1x1x1x256xf32>
    tpu.vector_store %arg10[%c0_130, %c0_131, %c7, %c16_132], %131 {strides = array<i32>} : memref<2x2x9x288xf32, #tpu.memory_space<vmem>>, vector<1x1x1x256xf32>,
    %132 = vector.extract_strided_slice %70 {offsets = [14, 0], sizes = [1, 256], strides = [1, 1]} : vector<16x256xf32> to vector<1x256xf32>
    %c0_133 = arith.constant 0 : index
    %c1_134 = arith.constant 1 : index
    %c7_135 = arith.constant 7 : index
    %c16_136 = arith.constant 16 : index
    %133 = vector.load %arg10[%c0_133, %c1_134, %c7_135, %c16_136] : memref<2x2x9x288xf32, #tpu.memory_space<vmem>>, vector<1x1x1x256xf32>
    %134 = vector.shape_cast %133 : vector<1x1x1x256xf32> to vector<1x256xf32>
    %135 = vector.shape_cast %132 : vector<1x256xf32> to vector<1x1x1x256xf32>
    tpu.vector_store %arg10[%c0_133, %c1_134, %c7_135, %c16_136], %135 {strides = array<i32>} : memref<2x2x9x288xf32, #tpu.memory_space<vmem>>, vector<1x1x1x256xf32>,
    %136 = vector.extract_strided_slice %70 {offsets = [15, 0], sizes = [1, 256], strides = [1, 1]} : vector<16x256xf32> to vector<1x256xf32>
    %c0_137 = arith.constant 0 : index
    %c0_138 = arith.constant 0 : index
    %c8 = arith.constant 8 : index
    %c16_139 = arith.constant 16 : index
    %137 = vector.load %arg10[%c0_137, %c0_138, %c8, %c16_139] : memref<2x2x9x288xf32, #tpu.memory_space<vmem>>, vector<1x1x1x256xf32>
    %138 = vector.shape_cast %137 : vector<1x1x1x256xf32> to vector<1x256xf32>
    %139 = vector.shape_cast %136 : vector<1x256xf32> to vector<1x1x1x256xf32>
    tpu.vector_store %arg10[%c0_137, %c0_138, %c8, %c16_139], %139 {strides = array<i32>} : memref<2x2x9x288xf32, #tpu.memory_space<vmem>>, vector<1x1x1x256xf32>,
    %140 = vector.extract_strided_slice %75 {offsets = [0, 0], sizes = [1, 256], strides = [1, 1]} : vector<16x256xf32> to vector<1x256xf32>
    %c1_140 = arith.constant 1 : index
    %c1_141 = arith.constant 1 : index
    %c0_142 = arith.constant 0 : index
    %c16_143 = arith.constant 16 : index
    %141 = vector.load %arg10[%c1_140, %c1_141, %c0_142, %c16_143] : memref<2x2x9x288xf32, #tpu.memory_space<vmem>>, vector<1x1x1x256xf32>
    %142 = vector.shape_cast %141 : vector<1x1x1x256xf32> to vector<1x256xf32>
    %143 = vector.shape_cast %140 : vector<1x256xf32> to vector<1x1x1x256xf32>
    tpu.vector_store %arg10[%c1_140, %c1_141, %c0_142, %c16_143], %143 {strides = array<i32>} : memref<2x2x9x288xf32, #tpu.memory_space<vmem>>, vector<1x1x1x256xf32>,
    %144 = vector.extract_strided_slice %75 {offsets = [1, 0], sizes = [1, 256], strides = [1, 1]} : vector<16x256xf32> to vector<1x256xf32>
    %c1_144 = arith.constant 1 : index
    %c0_145 = arith.constant 0 : index
    %c1_146 = arith.constant 1 : index
    %c16_147 = arith.constant 16 : index
    %145 = vector.load %arg10[%c1_144, %c0_145, %c1_146, %c16_147] : memref<2x2x9x288xf32, #tpu.memory_space<vmem>>, vector<1x1x1x256xf32>
    %146 = vector.shape_cast %145 : vector<1x1x1x256xf32> to vector<1x256xf32>
    %147 = vector.shape_cast %144 : vector<1x256xf32> to vector<1x1x1x256xf32>
    tpu.vector_store %arg10[%c1_144, %c0_145, %c1_146, %c16_147], %147 {strides = array<i32>} : memref<2x2x9x288xf32, #tpu.memory_space<vmem>>, vector<1x1x1x256xf32>,
    %148 = vector.extract_strided_slice %75 {offsets = [2, 0], sizes = [1, 256], strides = [1, 1]} : vector<16x256xf32> to vector<1x256xf32>
    %c1_148 = arith.constant 1 : index
    %c1_149 = arith.constant 1 : index
    %c1_150 = arith.constant 1 : index
    %c16_151 = arith.constant 16 : index
    %149 = vector.load %arg10[%c1_148, %c1_149, %c1_150, %c16_151] : memref<2x2x9x288xf32, #tpu.memory_space<vmem>>, vector<1x1x1x256xf32>
    %150 = vector.shape_cast %149 : vector<1x1x1x256xf32> to vector<1x256xf32>
    %151 = vector.shape_cast %148 : vector<1x256xf32> to vector<1x1x1x256xf32>
    tpu.vector_store %arg10[%c1_148, %c1_149, %c1_150, %c16_151], %151 {strides = array<i32>} : memref<2x2x9x288xf32, #tpu.memory_space<vmem>>, vector<1x1x1x256xf32>,
    %152 = vector.extract_strided_slice %75 {offsets = [3, 0], sizes = [1, 256], strides = [1, 1]} : vector<16x256xf32> to vector<1x256xf32>
    %c1_152 = arith.constant 1 : index
    %c0_153 = arith.constant 0 : index
    %c2_154 = arith.constant 2 : index
    %c16_155 = arith.constant 16 : index
    %153 = vector.load %arg10[%c1_152, %c0_153, %c2_154, %c16_155] : memref<2x2x9x288xf32, #tpu.memory_space<vmem>>, vector<1x1x1x256xf32>
    %154 = vector.shape_cast %153 : vector<1x1x1x256xf32> to vector<1x256xf32>
    %155 = vector.shape_cast %152 : vector<1x256xf32> to vector<1x1x1x256xf32>
    tpu.vector_store %arg10[%c1_152, %c0_153, %c2_154, %c16_155], %155 {strides = array<i32>} : memref<2x2x9x288xf32, #tpu.memory_space<vmem>>, vector<1x1x1x256xf32>,
    %156 = vector.extract_strided_slice %75 {offsets = [4, 0], sizes = [1, 256], strides = [1, 1]} : vector<16x256xf32> to vector<1x256xf32>
    %c1_156 = arith.constant 1 : index
    %c1_157 = arith.constant 1 : index
    %c2_158 = arith.constant 2 : index
    %c16_159 = arith.constant 16 : index
    %157 = vector.load %arg10[%c1_156, %c1_157, %c2_158, %c16_159] : memref<2x2x9x288xf32, #tpu.memory_space<vmem>>, vector<1x1x1x256xf32>
    %158 = vector.shape_cast %157 : vector<1x1x1x256xf32> to vector<1x256xf32>
    %159 = vector.shape_cast %156 : vector<1x256xf32> to vector<1x1x1x256xf32>
    tpu.vector_store %arg10[%c1_156, %c1_157, %c2_158, %c16_159], %159 {strides = array<i32>} : memref<2x2x9x288xf32, #tpu.memory_space<vmem>>, vector<1x1x1x256xf32>,
    %160 = vector.extract_strided_slice %75 {offsets = [5, 0], sizes = [1, 256], strides = [1, 1]} : vector<16x256xf32> to vector<1x256xf32>
    %c1_160 = arith.constant 1 : index
    %c0_161 = arith.constant 0 : index
    %c3_162 = arith.constant 3 : index
    %c16_163 = arith.constant 16 : index
    %161 = vector.load %arg10[%c1_160, %c0_161, %c3_162, %c16_163] : memref<2x2x9x288xf32, #tpu.memory_space<vmem>>, vector<1x1x1x256xf32>
    %162 = vector.shape_cast %161 : vector<1x1x1x256xf32> to vector<1x256xf32>
    %163 = vector.shape_cast %160 : vector<1x256xf32> to vector<1x1x1x256xf32>
    tpu.vector_store %arg10[%c1_160, %c0_161, %c3_162, %c16_163], %163 {strides = array<i32>} : memref<2x2x9x288xf32, #tpu.memory_space<vmem>>, vector<1x1x1x256xf32>,
    %164 = vector.extract_strided_slice %75 {offsets = [6, 0], sizes = [1, 256], strides = [1, 1]} : vector<16x256xf32> to vector<1x256xf32>
    %c1_164 = arith.constant 1 : index
    %c1_165 = arith.constant 1 : index
    %c3_166 = arith.constant 3 : index
    %c16_167 = arith.constant 16 : index
    %165 = vector.load %arg10[%c1_164, %c1_165, %c3_166, %c16_167] : memref<2x2x9x288xf32, #tpu.memory_space<vmem>>, vector<1x1x1x256xf32>
    %166 = vector.shape_cast %165 : vector<1x1x1x256xf32> to vector<1x256xf32>
    %167 = vector.shape_cast %164 : vector<1x256xf32> to vector<1x1x1x256xf32>
    tpu.vector_store %arg10[%c1_164, %c1_165, %c3_166, %c16_167], %167 {strides = array<i32>} : memref<2x2x9x288xf32, #tpu.memory_space<vmem>>, vector<1x1x1x256xf32>,
    %168 = vector.extract_strided_slice %75 {offsets = [7, 0], sizes = [1, 256], strides = [1, 1]} : vector<16x256xf32> to vector<1x256xf32>
    %c1_168 = arith.constant 1 : index
    %c0_169 = arith.constant 0 : index
    %c4_170 = arith.constant 4 : index
    %c16_171 = arith.constant 16 : index
    %169 = vector.load %arg10[%c1_168, %c0_169, %c4_170, %c16_171] : memref<2x2x9x288xf32, #tpu.memory_space<vmem>>, vector<1x1x1x256xf32>
    %170 = vector.shape_cast %169 : vector<1x1x1x256xf32> to vector<1x256xf32>
    %171 = vector.shape_cast %168 : vector<1x256xf32> to vector<1x1x1x256xf32>
    tpu.vector_store %arg10[%c1_168, %c0_169, %c4_170, %c16_171], %171 {strides = array<i32>} : memref<2x2x9x288xf32, #tpu.memory_space<vmem>>, vector<1x1x1x256xf32>,
    %172 = vector.extract_strided_slice %75 {offsets = [8, 0], sizes = [1, 256], strides = [1, 1]} : vector<16x256xf32> to vector<1x256xf32>
    %c1_172 = arith.constant 1 : index
    %c1_173 = arith.constant 1 : index
    %c4_174 = arith.constant 4 : index
    %c16_175 = arith.constant 16 : index
    %173 = vector.load %arg10[%c1_172, %c1_173, %c4_174, %c16_175] : memref<2x2x9x288xf32, #tpu.memory_space<vmem>>, vector<1x1x1x256xf32>
    %174 = vector.shape_cast %173 : vector<1x1x1x256xf32> to vector<1x256xf32>
    %175 = vector.shape_cast %172 : vector<1x256xf32> to vector<1x1x1x256xf32>
    tpu.vector_store %arg10[%c1_172, %c1_173, %c4_174, %c16_175], %175 {strides = array<i32>} : memref<2x2x9x288xf32, #tpu.memory_space<vmem>>, vector<1x1x1x256xf32>,
    %176 = vector.extract_strided_slice %75 {offsets = [9, 0], sizes = [1, 256], strides = [1, 1]} : vector<16x256xf32> to vector<1x256xf32>
    %c1_176 = arith.constant 1 : index
    %c0_177 = arith.constant 0 : index
    %c5_178 = arith.constant 5 : index
    %c16_179 = arith.constant 16 : index
    %177 = vector.load %arg10[%c1_176, %c0_177, %c5_178, %c16_179] : memref<2x2x9x288xf32, #tpu.memory_space<vmem>>, vector<1x1x1x256xf32>
    %178 = vector.shape_cast %177 : vector<1x1x1x256xf32> to vector<1x256xf32>
    %179 = vector.shape_cast %176 : vector<1x256xf32> to vector<1x1x1x256xf32>
    tpu.vector_store %arg10[%c1_176, %c0_177, %c5_178, %c16_179], %179 {strides = array<i32>} : memref<2x2x9x288xf32, #tpu.memory_space<vmem>>, vector<1x1x1x256xf32>,
    %180 = vector.extract_strided_slice %75 {offsets = [10, 0], sizes = [1, 256], strides = [1, 1]} : vector<16x256xf32> to vector<1x256xf32>
    %c1_180 = arith.constant 1 : index
    %c1_181 = arith.constant 1 : index
    %c5_182 = arith.constant 5 : index
    %c16_183 = arith.constant 16 : index
    %181 = vector.load %arg10[%c1_180, %c1_181, %c5_182, %c16_183] : memref<2x2x9x288xf32, #tpu.memory_space<vmem>>, vector<1x1x1x256xf32>
    %182 = vector.shape_cast %181 : vector<1x1x1x256xf32> to vector<1x256xf32>
    %183 = vector.shape_cast %180 : vector<1x256xf32> to vector<1x1x1x256xf32>
    tpu.vector_store %arg10[%c1_180, %c1_181, %c5_182, %c16_183], %183 {strides = array<i32>} : memref<2x2x9x288xf32, #tpu.memory_space<vmem>>, vector<1x1x1x256xf32>,
    %184 = vector.extract_strided_slice %75 {offsets = [11, 0], sizes = [1, 256], strides = [1, 1]} : vector<16x256xf32> to vector<1x256xf32>
    %c1_184 = arith.constant 1 : index
    %c0_185 = arith.constant 0 : index
    %c6_186 = arith.constant 6 : index
    %c16_187 = arith.constant 16 : index
    %185 = vector.load %arg10[%c1_184, %c0_185, %c6_186, %c16_187] : memref<2x2x9x288xf32, #tpu.memory_space<vmem>>, vector<1x1x1x256xf32>
    %186 = vector.shape_cast %185 : vector<1x1x1x256xf32> to vector<1x256xf32>
    %187 = vector.shape_cast %184 : vector<1x256xf32> to vector<1x1x1x256xf32>
    tpu.vector_store %arg10[%c1_184, %c0_185, %c6_186, %c16_187], %187 {strides = array<i32>} : memref<2x2x9x288xf32, #tpu.memory_space<vmem>>, vector<1x1x1x256xf32>,
    %188 = vector.extract_strided_slice %75 {offsets = [12, 0], sizes = [1, 256], strides = [1, 1]} : vector<16x256xf32> to vector<1x256xf32>
    %c1_188 = arith.constant 1 : index
    %c1_189 = arith.constant 1 : index
    %c6_190 = arith.constant 6 : index
    %c16_191 = arith.constant 16 : index
    %189 = vector.load %arg10[%c1_188, %c1_189, %c6_190, %c16_191] : memref<2x2x9x288xf32, #tpu.memory_space<vmem>>, vector<1x1x1x256xf32>
    %190 = vector.shape_cast %189 : vector<1x1x1x256xf32> to vector<1x256xf32>
    %191 = vector.shape_cast %188 : vector<1x256xf32> to vector<1x1x1x256xf32>
    tpu.vector_store %arg10[%c1_188, %c1_189, %c6_190, %c16_191], %191 {strides = array<i32>} : memref<2x2x9x288xf32, #tpu.memory_space<vmem>>, vector<1x1x1x256xf32>,
    %192 = vector.extract_strided_slice %75 {offsets = [13, 0], sizes = [1, 256], strides = [1, 1]} : vector<16x256xf32> to vector<1x256xf32>
    %c1_192 = arith.constant 1 : index
    %c0_193 = arith.constant 0 : index
    %c7_194 = arith.constant 7 : index
    %c16_195 = arith.constant 16 : index
    %193 = vector.load %arg10[%c1_192, %c0_193, %c7_194, %c16_195] : memref<2x2x9x288xf32, #tpu.memory_space<vmem>>, vector<1x1x1x256xf32>
    %194 = vector.shape_cast %193 : vector<1x1x1x256xf32> to vector<1x256xf32>
    %195 = vector.shape_cast %192 : vector<1x256xf32> to vector<1x1x1x256xf32>
    tpu.vector_store %arg10[%c1_192, %c0_193, %c7_194, %c16_195], %195 {strides = array<i32>} : memref<2x2x9x288xf32, #tpu.memory_space<vmem>>, vector<1x1x1x256xf32>,
    %196 = vector.extract_strided_slice %75 {offsets = [14, 0], sizes = [1, 256], strides = [1, 1]} : vector<16x256xf32> to vector<1x256xf32>
    %c1_196 = arith.constant 1 : index
    %c1_197 = arith.constant 1 : index
    %c7_198 = arith.constant 7 : index
    %c16_199 = arith.constant 16 : index
    %197 = vector.load %arg10[%c1_196, %c1_197, %c7_198, %c16_199] : memref<2x2x9x288xf32, #tpu.memory_space<vmem>>, vector<1x1x1x256xf32>
    %198 = vector.shape_cast %197 : vector<1x1x1x256xf32> to vector<1x256xf32>
    %199 = vector.shape_cast %196 : vector<1x256xf32> to vector<1x1x1x256xf32>
    tpu.vector_store %arg10[%c1_196, %c1_197, %c7_198, %c16_199], %199 {strides = array<i32>} : memref<2x2x9x288xf32, #tpu.memory_space<vmem>>, vector<1x1x1x256xf32>,
    %200 = vector.extract_strided_slice %75 {offsets = [15, 0], sizes = [1, 256], strides = [1, 1]} : vector<16x256xf32> to vector<1x256xf32>
    %c1_200 = arith.constant 1 : index
    %c0_201 = arith.constant 0 : index
    %c8_202 = arith.constant 8 : index
    %c16_203 = arith.constant 16 : index
    %201 = vector.load %arg10[%c1_200, %c0_201, %c8_202, %c16_203] : memref<2x2x9x288xf32, #tpu.memory_space<vmem>>, vector<1x1x1x256xf32>
    %202 = vector.shape_cast %201 : vector<1x1x1x256xf32> to vector<1x256xf32>
    %203 = vector.shape_cast %200 : vector<1x256xf32> to vector<1x1x1x256xf32>
    tpu.vector_store %arg10[%c1_200, %c0_201, %c8_202, %c16_203], %203 {strides = array<i32>} : memref<2x2x9x288xf32, #tpu.memory_space<vmem>>, vector<1x1x1x256xf32>,
    %c0_204 = arith.constant 0 : index
    %c0_205 = arith.constant 0 : index
    %c0_206 = arith.constant 0 : index
    %c0_207 = arith.constant 0 : index
    %204 = vector.load %arg10[%c0_204, %c0_205, %c0_206, %c0_207] : memref<2x2x9x288xf32, #tpu.memory_space<vmem>>, vector<1x1x8x288xf32>
    %205 = vector.shape_cast %204 : vector<1x1x8x288xf32> to vector<8x288xf32>
    %206 = arith.truncf %205 : vector<8x288xf32> to vector<8x288xbf16>
    %c0_208 = arith.constant 0 : index
    %c0_209 = arith.constant 0 : index
    %c0_210 = arith.constant 0 : index
    %207 = vector.load %arg3[%c0_208, %c0_209, %c0_210] : memref<4x288x256xbf16, #tpu.memory_space<vmem>>, vector<1x288x256xbf16>
    %208 = vector.shape_cast %207 : vector<1x288x256xbf16> to vector<288x256xbf16>
    %cst_211 = arith.constant dense<0.000000e+00> : vector<8x256xf32>
    %209 = tpu.matmul %206, %208, %cst_211 {dimension_numbers = #tpu.dot_dimension_numbers<[1], [0], [0], [1], [0, 0, 1, 1], [], []>} : vector<8x288xbf16>, vector<288x256xbf16>, vector<8x256xf32> -> vector<8x256xf32>
    %c0_212 = arith.constant 0 : index
    %c1_213 = arith.constant 1 : index
    %c0_214 = arith.constant 0 : index
    %c0_215 = arith.constant 0 : index
    %210 = vector.load %arg10[%c0_212, %c1_213, %c0_214, %c0_215] : memref<2x2x9x288xf32, #tpu.memory_space<vmem>>, vector<1x1x8x288xf32>
    %211 = vector.shape_cast %210 : vector<1x1x8x288xf32> to vector<8x288xf32>
    %212 = arith.truncf %211 : vector<8x288xf32> to vector<8x288xbf16>
    %c1_216 = arith.constant 1 : index
    %c0_217 = arith.constant 0 : index
    %c0_218 = arith.constant 0 : index
    %213 = vector.load %arg3[%c1_216, %c0_217, %c0_218] : memref<4x288x256xbf16, #tpu.memory_space<vmem>>, vector<1x288x256xbf16>
    %214 = vector.shape_cast %213 : vector<1x288x256xbf16> to vector<288x256xbf16>
    %cst_219 = arith.constant dense<0.000000e+00> : vector<8x256xf32>
    %215 = tpu.matmul %212, %214, %cst_219 {dimension_numbers = #tpu.dot_dimension_numbers<[1], [0], [0], [1], [0, 0, 1, 1], [], []>} : vector<8x288xbf16>, vector<288x256xbf16>, vector<8x256xf32> -> vector<8x256xf32>
    %216 = arith.addf %209, %215 : vector<8x256xf32>
    %c0_220 = arith.constant 0 : index
    %c0_221 = arith.constant 0 : index
    %c1_222 = arith.constant 1 : index
    %c0_223 = arith.constant 0 : index
    %217 = vector.load %arg10[%c0_220, %c0_221, %c1_222, %c0_223] : memref<2x2x9x288xf32, #tpu.memory_space<vmem>>, vector<1x1x8x288xf32>
    %218 = vector.shape_cast %217 : vector<1x1x8x288xf32> to vector<8x288xf32>
    %219 = arith.truncf %218 : vector<8x288xf32> to vector<8x288xbf16>
    %c2_224 = arith.constant 2 : index
    %c0_225 = arith.constant 0 : index
    %c0_226 = arith.constant 0 : index
    %220 = vector.load %arg3[%c2_224, %c0_225, %c0_226] : memref<4x288x256xbf16, #tpu.memory_space<vmem>>, vector<1x288x256xbf16>
    %221 = vector.shape_cast %220 : vector<1x288x256xbf16> to vector<288x256xbf16>
    %cst_227 = arith.constant dense<0.000000e+00> : vector<8x256xf32>
    %222 = tpu.matmul %219, %221, %cst_227 {dimension_numbers = #tpu.dot_dimension_numbers<[1], [0], [0], [1], [0, 0, 1, 1], [], []>} : vector<8x288xbf16>, vector<288x256xbf16>, vector<8x256xf32> -> vector<8x256xf32>
    %223 = arith.addf %216, %222 : vector<8x256xf32>
    %c0_228 = arith.constant 0 : index
    %c1_229 = arith.constant 1 : index
    %c1_230 = arith.constant 1 : index
    %c0_231 = arith.constant 0 : index
    %224 = vector.load %arg10[%c0_228, %c1_229, %c1_230, %c0_231] : memref<2x2x9x288xf32, #tpu.memory_space<vmem>>, vector<1x1x8x288xf32>
    %225 = vector.shape_cast %224 : vector<1x1x8x288xf32> to vector<8x288xf32>
    %226 = arith.truncf %225 : vector<8x288xf32> to vector<8x288xbf16>
    %c3_232 = arith.constant 3 : index
    %c0_233 = arith.constant 0 : index
    %c0_234 = arith.constant 0 : index
    %227 = vector.load %arg3[%c3_232, %c0_233, %c0_234] : memref<4x288x256xbf16, #tpu.memory_space<vmem>>, vector<1x288x256xbf16>
    %228 = vector.shape_cast %227 : vector<1x288x256xbf16> to vector<288x256xbf16>
    %cst_235 = arith.constant dense<0.000000e+00> : vector<8x256xf32>
    %229 = tpu.matmul %226, %228, %cst_235 {dimension_numbers = #tpu.dot_dimension_numbers<[1], [0], [0], [1], [0, 0, 1, 1], [], []>} : vector<8x288xbf16>, vector<288x256xbf16>, vector<8x256xf32> -> vector<8x256xf32>
    %230 = arith.addf %223, %229 : vector<8x256xf32>
    %c1_236 = arith.constant 1 : index
    %c0_237 = arith.constant 0 : index
    %c0_238 = arith.constant 0 : index
    %c0_239 = arith.constant 0 : index
    %231 = vector.load %arg10[%c1_236, %c0_237, %c0_238, %c0_239] : memref<2x2x9x288xf32, #tpu.memory_space<vmem>>, vector<1x1x8x288xf32>
    %232 = vector.shape_cast %231 : vector<1x1x8x288xf32> to vector<8x288xf32>
    %233 = arith.truncf %232 : vector<8x288xf32> to vector<8x288xbf16>
    %c0_240 = arith.constant 0 : index
    %c0_241 = arith.constant 0 : index
    %c0_242 = arith.constant 0 : index
    %234 = vector.load %arg3[%c0_240, %c0_241, %c0_242] : memref<4x288x256xbf16, #tpu.memory_space<vmem>>, vector<1x288x256xbf16>
    %235 = vector.shape_cast %234 : vector<1x288x256xbf16> to vector<288x256xbf16>
    %cst_243 = arith.constant dense<0.000000e+00> : vector<8x256xf32>
    %236 = tpu.matmul %233, %235, %cst_243 {dimension_numbers = #tpu.dot_dimension_numbers<[1], [0], [0], [1], [0, 0, 1, 1], [], []>} : vector<8x288xbf16>, vector<288x256xbf16>, vector<8x256xf32> -> vector<8x256xf32>
    %c1_244 = arith.constant 1 : index
    %c1_245 = arith.constant 1 : index
    %c0_246 = arith.constant 0 : index
    %c0_247 = arith.constant 0 : index
    %237 = vector.load %arg10[%c1_244, %c1_245, %c0_246, %c0_247] : memref<2x2x9x288xf32, #tpu.memory_space<vmem>>, vector<1x1x8x288xf32>
    %238 = vector.shape_cast %237 : vector<1x1x8x288xf32> to vector<8x288xf32>
    %239 = arith.truncf %238 : vector<8x288xf32> to vector<8x288xbf16>
    %c1_248 = arith.constant 1 : index
    %c0_249 = arith.constant 0 : index
    %c0_250 = arith.constant 0 : index
    %240 = vector.load %arg3[%c1_248, %c0_249, %c0_250] : memref<4x288x256xbf16, #tpu.memory_space<vmem>>, vector<1x288x256xbf16>
    %241 = vector.shape_cast %240 : vector<1x288x256xbf16> to vector<288x256xbf16>
    %cst_251 = arith.constant dense<0.000000e+00> : vector<8x256xf32>
    %242 = tpu.matmul %239, %241, %cst_251 {dimension_numbers = #tpu.dot_dimension_numbers<[1], [0], [0], [1], [0, 0, 1, 1], [], []>} : vector<8x288xbf16>, vector<288x256xbf16>, vector<8x256xf32> -> vector<8x256xf32>
    %243 = arith.addf %236, %242 : vector<8x256xf32>
    %c1_252 = arith.constant 1 : index
    %c0_253 = arith.constant 0 : index
    %c1_254 = arith.constant 1 : index
    %c0_255 = arith.constant 0 : index
    %244 = vector.load %arg10[%c1_252, %c0_253, %c1_254, %c0_255] : memref<2x2x9x288xf32, #tpu.memory_space<vmem>>, vector<1x1x8x288xf32>
    %245 = vector.shape_cast %244 : vector<1x1x8x288xf32> to vector<8x288xf32>
    %246 = arith.truncf %245 : vector<8x288xf32> to vector<8x288xbf16>
    %c2_256 = arith.constant 2 : index
    %c0_257 = arith.constant 0 : index
    %c0_258 = arith.constant 0 : index
    %247 = vector.load %arg3[%c2_256, %c0_257, %c0_258] : memref<4x288x256xbf16, #tpu.memory_space<vmem>>, vector<1x288x256xbf16>
    %248 = vector.shape_cast %247 : vector<1x288x256xbf16> to vector<288x256xbf16>
    %cst_259 = arith.constant dense<0.000000e+00> : vector<8x256xf32>
    %249 = tpu.matmul %246, %248, %cst_259 {dimension_numbers = #tpu.dot_dimension_numbers<[1], [0], [0], [1], [0, 0, 1, 1], [], []>} : vector<8x288xbf16>, vector<288x256xbf16>, vector<8x256xf32> -> vector<8x256xf32>
    %250 = arith.addf %243, %249 : vector<8x256xf32>
    %c1_260 = arith.constant 1 : index
    %c1_261 = arith.constant 1 : index
    %c1_262 = arith.constant 1 : index
    %c0_263 = arith.constant 0 : index
    %251 = vector.load %arg10[%c1_260, %c1_261, %c1_262, %c0_263] : memref<2x2x9x288xf32, #tpu.memory_space<vmem>>, vector<1x1x8x288xf32>
    %252 = vector.shape_cast %251 : vector<1x1x8x288xf32> to vector<8x288xf32>
    %253 = arith.truncf %252 : vector<8x288xf32> to vector<8x288xbf16>
    %c3_264 = arith.constant 3 : index
    %c0_265 = arith.constant 0 : index
    %c0_266 = arith.constant 0 : index
    %254 = vector.load %arg3[%c3_264, %c0_265, %c0_266] : memref<4x288x256xbf16, #tpu.memory_space<vmem>>, vector<1x288x256xbf16>
    %255 = vector.shape_cast %254 : vector<1x288x256xbf16> to vector<288x256xbf16>
    %cst_267 = arith.constant dense<0.000000e+00> : vector<8x256xf32>
    %256 = tpu.matmul %253, %255, %cst_267 {dimension_numbers = #tpu.dot_dimension_numbers<[1], [0], [0], [1], [0, 0, 1, 1], [], []>} : vector<8x288xbf16>, vector<288x256xbf16>, vector<8x256xf32> -> vector<8x256xf32>
    %257 = arith.addf %250, %256 : vector<8x256xf32>
    %c1_268 = arith.constant 1 : index
    %c0_269 = arith.constant 0 : index
    %258 = vector.load %arg6[%c1_268, %c0_269] : memref<7x256xf32, #tpu.memory_space<vmem>>, vector<1x256xf32>
    %c2_270 = arith.constant 2 : index
    %c0_271 = arith.constant 0 : index
    %259 = vector.load %arg6[%c2_270, %c0_271] : memref<7x256xf32, #tpu.memory_space<vmem>>, vector<1x256xf32>
    %cst_272 = arith.constant dense<0.000000e+00> : vector<256xf32>
    %260 = vector.multi_reduction <add>, %230, %cst_272 [0] : vector<8x256xf32> to vector<256xf32>
    %261 = vector.shape_cast %260 : vector<256xf32> to vector<1x256xf32>
    %cst_273 = arith.constant dense<0.000000e+00> : vector<256xf32>
    %262 = vector.multi_reduction <add>, %257, %cst_273 [0] : vector<8x256xf32> to vector<256xf32>
    %263 = vector.shape_cast %262 : vector<256xf32> to vector<1x256xf32>
    %264 = arith.addf %261, %263 : vector<1x256xf32>
    %265 = vector.extract_strided_slice %264 {offsets = [0, 0], sizes = [1, 32], strides = [1, 1]} : vector<1x256xf32> to vector<1x32xf32>
    %266 = vector.extract_strided_slice %264 {offsets = [0, 32], sizes = [1, 32], strides = [1, 1]} : vector<1x256xf32> to vector<1x32xf32>
    %267 = arith.addf %265, %266 : vector<1x32xf32>
    %268 = vector.extract_strided_slice %264 {offsets = [0, 64], sizes = [1, 32], strides = [1, 1]} : vector<1x256xf32> to vector<1x32xf32>
    %269 = arith.addf %267, %268 : vector<1x32xf32>
    %270 = vector.extract_strided_slice %264 {offsets = [0, 96], sizes = [1, 32], strides = [1, 1]} : vector<1x256xf32> to vector<1x32xf32>
    %271 = arith.addf %269, %270 : vector<1x32xf32>
    %272 = vector.extract_strided_slice %264 {offsets = [0, 128], sizes = [1, 32], strides = [1, 1]} : vector<1x256xf32> to vector<1x32xf32>
    %273 = arith.addf %271, %272 : vector<1x32xf32>
    %274 = vector.extract_strided_slice %264 {offsets = [0, 160], sizes = [1, 32], strides = [1, 1]} : vector<1x256xf32> to vector<1x32xf32>
    %275 = arith.addf %273, %274 : vector<1x32xf32>
    %276 = vector.extract_strided_slice %264 {offsets = [0, 192], sizes = [1, 32], strides = [1, 1]} : vector<1x256xf32> to vector<1x32xf32>
    %277 = arith.addf %275, %276 : vector<1x32xf32>
    %278 = vector.extract_strided_slice %264 {offsets = [0, 224], sizes = [1, 32], strides = [1, 1]} : vector<1x256xf32> to vector<1x32xf32>
    %279 = arith.addf %277, %278 : vector<1x32xf32>
    %280 = tpu.concatenate %279, %279, %279, %279, %279, %279, %279, %279 in 1 : vector<1x32xf32>, vector<1x32xf32>, vector<1x32xf32>, vector<1x32xf32>, vector<1x32xf32>, vector<1x32xf32>, vector<1x32xf32>, vector<1x32xf32> -> vector<1x256xf32>
    %cst_274 = arith.constant 7.812500e-03 : f32
    %281 = vector.broadcast %cst_274 : f32 to vector<1x256xf32>
    %282 = arith.mulf %280, %281 : vector<1x256xf32>
    %283 = vector.broadcast %282 : vector<1x256xf32> to vector<8x256xf32>
    %284 = arith.subf %230, %283 : vector<8x256xf32>
    %285 = arith.mulf %284, %284 : vector<8x256xf32>
    %cst_275 = arith.constant dense<0.000000e+00> : vector<256xf32>
    %286 = vector.multi_reduction <add>, %285, %cst_275 [0] : vector<8x256xf32> to vector<256xf32>
    %287 = vector.shape_cast %286 : vector<256xf32> to vector<1x256xf32>
    %288 = vector.broadcast %282 : vector<1x256xf32> to vector<8x256xf32>
    %289 = arith.subf %257, %288 : vector<8x256xf32>
    %290 = arith.mulf %289, %289 : vector<8x256xf32>
    %cst_276 = arith.constant dense<0.000000e+00> : vector<256xf32>
    %291 = vector.multi_reduction <add>, %290, %cst_276 [0] : vector<8x256xf32> to vector<256xf32>
    %292 = vector.shape_cast %291 : vector<256xf32> to vector<1x256xf32>
    %293 = arith.addf %287, %292 : vector<1x256xf32>
    %294 = vector.extract_strided_slice %293 {offsets = [0, 0], sizes = [1, 32], strides = [1, 1]} : vector<1x256xf32> to vector<1x32xf32>
    %295 = vector.extract_strided_slice %293 {offsets = [0, 32], sizes = [1, 32], strides = [1, 1]} : vector<1x256xf32> to vector<1x32xf32>
    %296 = arith.addf %294, %295 : vector<1x32xf32>
    %297 = vector.extract_strided_slice %293 {offsets = [0, 64], sizes = [1, 32], strides = [1, 1]} : vector<1x256xf32> to vector<1x32xf32>
    %298 = arith.addf %296, %297 : vector<1x32xf32>
    %299 = vector.extract_strided_slice %293 {offsets = [0, 96], sizes = [1, 32], strides = [1, 1]} : vector<1x256xf32> to vector<1x32xf32>
    %300 = arith.addf %298, %299 : vector<1x32xf32>
    %301 = vector.extract_strided_slice %293 {offsets = [0, 128], sizes = [1, 32], strides = [1, 1]} : vector<1x256xf32> to vector<1x32xf32>
    %302 = arith.addf %300, %301 : vector<1x32xf32>
    %303 = vector.extract_strided_slice %293 {offsets = [0, 160], sizes = [1, 32], strides = [1, 1]} : vector<1x256xf32> to vector<1x32xf32>
    %304 = arith.addf %302, %303 : vector<1x32xf32>
    %305 = vector.extract_strided_slice %293 {offsets = [0, 192], sizes = [1, 32], strides = [1, 1]} : vector<1x256xf32> to vector<1x32xf32>
    %306 = arith.addf %304, %305 : vector<1x32xf32>
    %307 = vector.extract_strided_slice %293 {offsets = [0, 224], sizes = [1, 32], strides = [1, 1]} : vector<1x256xf32> to vector<1x32xf32>
    %308 = arith.addf %306, %307 : vector<1x32xf32>
    %309 = tpu.concatenate %308, %308, %308, %308, %308, %308, %308, %308 in 1 : vector<1x32xf32>, vector<1x32xf32>, vector<1x32xf32>, vector<1x32xf32>, vector<1x32xf32>, vector<1x32xf32>, vector<1x32xf32>, vector<1x32xf32> -> vector<1x256xf32>
    %cst_277 = arith.constant 7.812500e-03 : f32
    %310 = vector.broadcast %cst_277 : f32 to vector<1x256xf32>
    %311 = arith.mulf %309, %310 : vector<1x256xf32>
    %cst_278 = arith.constant 9.99999974E-6 : f32
    %312 = vector.broadcast %cst_278 : f32 to vector<1x256xf32>
    %313 = arith.addf %311, %312 : vector<1x256xf32>
    %314 = math.rsqrt %313 : vector<1x256xf32>
    %315 = arith.mulf %258, %314 : vector<1x256xf32>
    %316 = arith.mulf %282, %315 : vector<1x256xf32>
    %317 = arith.subf %259, %316 : vector<1x256xf32>
    %318 = vector.broadcast %315 : vector<1x256xf32> to vector<8x256xf32>
    %319 = arith.mulf %230, %318 : vector<8x256xf32>
    %320 = vector.broadcast %317 : vector<1x256xf32> to vector<8x256xf32>
    %321 = arith.addf %319, %320 : vector<8x256xf32>
    %322 = vector.broadcast %315 : vector<1x256xf32> to vector<8x256xf32>
    %323 = arith.mulf %257, %322 : vector<8x256xf32>
    %324 = vector.broadcast %317 : vector<1x256xf32> to vector<8x256xf32>
    %325 = arith.addf %323, %324 : vector<8x256xf32>
    %cst_279 = arith.constant 0.000000e+00 : f32
    %326 = vector.broadcast %cst_279 : f32 to vector<8x256xf32>
    %327 = arith.cmpf oge, %321, %326 : vector<8x256xf32>
    %cst_280 = arith.constant 2.000000e-01 : f32
    %328 = vector.broadcast %cst_280 : f32 to vector<8x256xf32>
    %329 = arith.mulf %328, %321 : vector<8x256xf32>
    %330 = arith.select %327, %321, %329 : vector<8x256xi1>, vector<8x256xf32>
    %cst_281 = arith.constant 0.000000e+00 : f32
    %331 = vector.broadcast %cst_281 : f32 to vector<8x256xf32>
    %332 = arith.cmpf oge, %325, %331 : vector<8x256xf32>
    %cst_282 = arith.constant 2.000000e-01 : f32
    %333 = vector.broadcast %cst_282 : f32 to vector<8x256xf32>
    %334 = arith.mulf %333, %325 : vector<8x256xf32>
    %335 = arith.select %332, %325, %334 : vector<8x256xi1>, vector<8x256xf32>
    %336 = vector.extract_strided_slice %330 {offsets = [0, 0], sizes = [1, 256], strides = [1, 1]} : vector<8x256xf32> to vector<1x256xf32>
    %c0_283 = arith.constant 0 : index
    %c1_284 = arith.constant 1 : index
    %c0_285 = arith.constant 0 : index
    %c32 = arith.constant 32 : index
    %337 = vector.load %arg11[%c0_283, %c1_284, %c0_285, %c32] : memref<2x2x5x320xf32, #tpu.memory_space<vmem>>, vector<1x1x1x256xf32>
    %338 = vector.shape_cast %337 : vector<1x1x1x256xf32> to vector<1x256xf32>
    %339 = vector.shape_cast %336 : vector<1x256xf32> to vector<1x1x1x256xf32>
    tpu.vector_store %arg11[%c0_283, %c1_284, %c0_285, %c32], %339 {strides = array<i32>} : memref<2x2x5x320xf32, #tpu.memory_space<vmem>>, vector<1x1x1x256xf32>,
    %340 = vector.extract_strided_slice %330 {offsets = [1, 0], sizes = [1, 256], strides = [1, 1]} : vector<8x256xf32> to vector<1x256xf32>
    %c0_286 = arith.constant 0 : index
    %c0_287 = arith.constant 0 : index
    %c1_288 = arith.constant 1 : index
    %c32_289 = arith.constant 32 : index
    %341 = vector.load %arg11[%c0_286, %c0_287, %c1_288, %c32_289] : memref<2x2x5x320xf32, #tpu.memory_space<vmem>>, vector<1x1x1x256xf32>
    %342 = vector.shape_cast %341 : vector<1x1x1x256xf32> to vector<1x256xf32>
    %343 = vector.shape_cast %340 : vector<1x256xf32> to vector<1x1x1x256xf32>
    tpu.vector_store %arg11[%c0_286, %c0_287, %c1_288, %c32_289], %343 {strides = array<i32>} : memref<2x2x5x320xf32, #tpu.memory_space<vmem>>, vector<1x1x1x256xf32>,
    %344 = vector.extract_strided_slice %330 {offsets = [2, 0], sizes = [1, 256], strides = [1, 1]} : vector<8x256xf32> to vector<1x256xf32>
    %c0_290 = arith.constant 0 : index
    %c1_291 = arith.constant 1 : index
    %c1_292 = arith.constant 1 : index
    %c32_293 = arith.constant 32 : index
    %345 = vector.load %arg11[%c0_290, %c1_291, %c1_292, %c32_293] : memref<2x2x5x320xf32, #tpu.memory_space<vmem>>, vector<1x1x1x256xf32>
    %346 = vector.shape_cast %345 : vector<1x1x1x256xf32> to vector<1x256xf32>
    %347 = vector.shape_cast %344 : vector<1x256xf32> to vector<1x1x1x256xf32>
    tpu.vector_store %arg11[%c0_290, %c1_291, %c1_292, %c32_293], %347 {strides = array<i32>} : memref<2x2x5x320xf32, #tpu.memory_space<vmem>>, vector<1x1x1x256xf32>,
    %348 = vector.extract_strided_slice %330 {offsets = [3, 0], sizes = [1, 256], strides = [1, 1]} : vector<8x256xf32> to vector<1x256xf32>
    %c0_294 = arith.constant 0 : index
    %c0_295 = arith.constant 0 : index
    %c2_296 = arith.constant 2 : index
    %c32_297 = arith.constant 32 : index
    %349 = vector.load %arg11[%c0_294, %c0_295, %c2_296, %c32_297] : memref<2x2x5x320xf32, #tpu.memory_space<vmem>>, vector<1x1x1x256xf32>
    %350 = vector.shape_cast %349 : vector<1x1x1x256xf32> to vector<1x256xf32>
    %351 = vector.shape_cast %348 : vector<1x256xf32> to vector<1x1x1x256xf32>
    tpu.vector_store %arg11[%c0_294, %c0_295, %c2_296, %c32_297], %351 {strides = array<i32>} : memref<2x2x5x320xf32, #tpu.memory_space<vmem>>, vector<1x1x1x256xf32>,
    %352 = vector.extract_strided_slice %330 {offsets = [4, 0], sizes = [1, 256], strides = [1, 1]} : vector<8x256xf32> to vector<1x256xf32>
    %c0_298 = arith.constant 0 : index
    %c1_299 = arith.constant 1 : index
    %c2_300 = arith.constant 2 : index
    %c32_301 = arith.constant 32 : index
    %353 = vector.load %arg11[%c0_298, %c1_299, %c2_300, %c32_301] : memref<2x2x5x320xf32, #tpu.memory_space<vmem>>, vector<1x1x1x256xf32>
    %354 = vector.shape_cast %353 : vector<1x1x1x256xf32> to vector<1x256xf32>
    %355 = vector.shape_cast %352 : vector<1x256xf32> to vector<1x1x1x256xf32>
    tpu.vector_store %arg11[%c0_298, %c1_299, %c2_300, %c32_301], %355 {strides = array<i32>} : memref<2x2x5x320xf32, #tpu.memory_space<vmem>>, vector<1x1x1x256xf32>,
    %356 = vector.extract_strided_slice %330 {offsets = [5, 0], sizes = [1, 256], strides = [1, 1]} : vector<8x256xf32> to vector<1x256xf32>
    %c0_302 = arith.constant 0 : index
    %c0_303 = arith.constant 0 : index
    %c3_304 = arith.constant 3 : index
    %c32_305 = arith.constant 32 : index
    %357 = vector.load %arg11[%c0_302, %c0_303, %c3_304, %c32_305] : memref<2x2x5x320xf32, #tpu.memory_space<vmem>>, vector<1x1x1x256xf32>
    %358 = vector.shape_cast %357 : vector<1x1x1x256xf32> to vector<1x256xf32>
    %359 = vector.shape_cast %356 : vector<1x256xf32> to vector<1x1x1x256xf32>
    tpu.vector_store %arg11[%c0_302, %c0_303, %c3_304, %c32_305], %359 {strides = array<i32>} : memref<2x2x5x320xf32, #tpu.memory_space<vmem>>, vector<1x1x1x256xf32>,
    %360 = vector.extract_strided_slice %330 {offsets = [6, 0], sizes = [1, 256], strides = [1, 1]} : vector<8x256xf32> to vector<1x256xf32>
    %c0_306 = arith.constant 0 : index
    %c1_307 = arith.constant 1 : index
    %c3_308 = arith.constant 3 : index
    %c32_309 = arith.constant 32 : index
    %361 = vector.load %arg11[%c0_306, %c1_307, %c3_308, %c32_309] : memref<2x2x5x320xf32, #tpu.memory_space<vmem>>, vector<1x1x1x256xf32>
    %362 = vector.shape_cast %361 : vector<1x1x1x256xf32> to vector<1x256xf32>
    %363 = vector.shape_cast %360 : vector<1x256xf32> to vector<1x1x1x256xf32>
    tpu.vector_store %arg11[%c0_306, %c1_307, %c3_308, %c32_309], %363 {strides = array<i32>} : memref<2x2x5x320xf32, #tpu.memory_space<vmem>>, vector<1x1x1x256xf32>,
    %364 = vector.extract_strided_slice %330 {offsets = [7, 0], sizes = [1, 256], strides = [1, 1]} : vector<8x256xf32> to vector<1x256xf32>
    %c0_310 = arith.constant 0 : index
    %c0_311 = arith.constant 0 : index
    %c4_312 = arith.constant 4 : index
    %c32_313 = arith.constant 32 : index
    %365 = vector.load %arg11[%c0_310, %c0_311, %c4_312, %c32_313] : memref<2x2x5x320xf32, #tpu.memory_space<vmem>>, vector<1x1x1x256xf32>
    %366 = vector.shape_cast %365 : vector<1x1x1x256xf32> to vector<1x256xf32>
    %367 = vector.shape_cast %364 : vector<1x256xf32> to vector<1x1x1x256xf32>
    tpu.vector_store %arg11[%c0_310, %c0_311, %c4_312, %c32_313], %367 {strides = array<i32>} : memref<2x2x5x320xf32, #tpu.memory_space<vmem>>, vector<1x1x1x256xf32>,
    %368 = vector.extract_strided_slice %335 {offsets = [0, 0], sizes = [1, 256], strides = [1, 1]} : vector<8x256xf32> to vector<1x256xf32>
    %c1_314 = arith.constant 1 : index
    %c1_315 = arith.constant 1 : index
    %c0_316 = arith.constant 0 : index
    %c32_317 = arith.constant 32 : index
    %369 = vector.load %arg11[%c1_314, %c1_315, %c0_316, %c32_317] : memref<2x2x5x320xf32, #tpu.memory_space<vmem>>, vector<1x1x1x256xf32>
    %370 = vector.shape_cast %369 : vector<1x1x1x256xf32> to vector<1x256xf32>
    %371 = vector.shape_cast %368 : vector<1x256xf32> to vector<1x1x1x256xf32>
    tpu.vector_store %arg11[%c1_314, %c1_315, %c0_316, %c32_317], %371 {strides = array<i32>} : memref<2x2x5x320xf32, #tpu.memory_space<vmem>>, vector<1x1x1x256xf32>,
    %372 = vector.extract_strided_slice %335 {offsets = [1, 0], sizes = [1, 256], strides = [1, 1]} : vector<8x256xf32> to vector<1x256xf32>
    %c1_318 = arith.constant 1 : index
    %c0_319 = arith.constant 0 : index
    %c1_320 = arith.constant 1 : index
    %c32_321 = arith.constant 32 : index
    %373 = vector.load %arg11[%c1_318, %c0_319, %c1_320, %c32_321] : memref<2x2x5x320xf32, #tpu.memory_space<vmem>>, vector<1x1x1x256xf32>
    %374 = vector.shape_cast %373 : vector<1x1x1x256xf32> to vector<1x256xf32>
    %375 = vector.shape_cast %372 : vector<1x256xf32> to vector<1x1x1x256xf32>
    tpu.vector_store %arg11[%c1_318, %c0_319, %c1_320, %c32_321], %375 {strides = array<i32>} : memref<2x2x5x320xf32, #tpu.memory_space<vmem>>, vector<1x1x1x256xf32>,
    %376 = vector.extract_strided_slice %335 {offsets = [2, 0], sizes = [1, 256], strides = [1, 1]} : vector<8x256xf32> to vector<1x256xf32>
    %c1_322 = arith.constant 1 : index
    %c1_323 = arith.constant 1 : index
    %c1_324 = arith.constant 1 : index
    %c32_325 = arith.constant 32 : index
    %377 = vector.load %arg11[%c1_322, %c1_323, %c1_324, %c32_325] : memref<2x2x5x320xf32, #tpu.memory_space<vmem>>, vector<1x1x1x256xf32>
    %378 = vector.shape_cast %377 : vector<1x1x1x256xf32> to vector<1x256xf32>
    %379 = vector.shape_cast %376 : vector<1x256xf32> to vector<1x1x1x256xf32>
    tpu.vector_store %arg11[%c1_322, %c1_323, %c1_324, %c32_325], %379 {strides = array<i32>} : memref<2x2x5x320xf32, #tpu.memory_space<vmem>>, vector<1x1x1x256xf32>,
    %380 = vector.extract_strided_slice %335 {offsets = [3, 0], sizes = [1, 256], strides = [1, 1]} : vector<8x256xf32> to vector<1x256xf32>
    %c1_326 = arith.constant 1 : index
    %c0_327 = arith.constant 0 : index
    %c2_328 = arith.constant 2 : index
    %c32_329 = arith.constant 32 : index
    %381 = vector.load %arg11[%c1_326, %c0_327, %c2_328, %c32_329] : memref<2x2x5x320xf32, #tpu.memory_space<vmem>>, vector<1x1x1x256xf32>
    %382 = vector.shape_cast %381 : vector<1x1x1x256xf32> to vector<1x256xf32>
    %383 = vector.shape_cast %380 : vector<1x256xf32> to vector<1x1x1x256xf32>
    tpu.vector_store %arg11[%c1_326, %c0_327, %c2_328, %c32_329], %383 {strides = array<i32>} : memref<2x2x5x320xf32, #tpu.memory_space<vmem>>, vector<1x1x1x256xf32>,
    %384 = vector.extract_strided_slice %335 {offsets = [4, 0], sizes = [1, 256], strides = [1, 1]} : vector<8x256xf32> to vector<1x256xf32>
    %c1_330 = arith.constant 1 : index
    %c1_331 = arith.constant 1 : index
    %c2_332 = arith.constant 2 : index
    %c32_333 = arith.constant 32 : index
    %385 = vector.load %arg11[%c1_330, %c1_331, %c2_332, %c32_333] : memref<2x2x5x320xf32, #tpu.memory_space<vmem>>, vector<1x1x1x256xf32>
    %386 = vector.shape_cast %385 : vector<1x1x1x256xf32> to vector<1x256xf32>
    %387 = vector.shape_cast %384 : vector<1x256xf32> to vector<1x1x1x256xf32>
    tpu.vector_store %arg11[%c1_330, %c1_331, %c2_332, %c32_333], %387 {strides = array<i32>} : memref<2x2x5x320xf32, #tpu.memory_space<vmem>>, vector<1x1x1x256xf32>,
    %388 = vector.extract_strided_slice %335 {offsets = [5, 0], sizes = [1, 256], strides = [1, 1]} : vector<8x256xf32> to vector<1x256xf32>
    %c1_334 = arith.constant 1 : index
    %c0_335 = arith.constant 0 : index
    %c3_336 = arith.constant 3 : index
    %c32_337 = arith.constant 32 : index
    %389 = vector.load %arg11[%c1_334, %c0_335, %c3_336, %c32_337] : memref<2x2x5x320xf32, #tpu.memory_space<vmem>>, vector<1x1x1x256xf32>
    %390 = vector.shape_cast %389 : vector<1x1x1x256xf32> to vector<1x256xf32>
    %391 = vector.shape_cast %388 : vector<1x256xf32> to vector<1x1x1x256xf32>
    tpu.vector_store %arg11[%c1_334, %c0_335, %c3_336, %c32_337], %391 {strides = array<i32>} : memref<2x2x5x320xf32, #tpu.memory_space<vmem>>, vector<1x1x1x256xf32>,
    %392 = vector.extract_strided_slice %335 {offsets = [6, 0], sizes = [1, 256], strides = [1, 1]} : vector<8x256xf32> to vector<1x256xf32>
    %c1_338 = arith.constant 1 : index
    %c1_339 = arith.constant 1 : index
    %c3_340 = arith.constant 3 : index
    %c32_341 = arith.constant 32 : index
    %393 = vector.load %arg11[%c1_338, %c1_339, %c3_340, %c32_341] : memref<2x2x5x320xf32, #tpu.memory_space<vmem>>, vector<1x1x1x256xf32>
    %394 = vector.shape_cast %393 : vector<1x1x1x256xf32> to vector<1x256xf32>
    %395 = vector.shape_cast %392 : vector<1x256xf32> to vector<1x1x1x256xf32>
    tpu.vector_store %arg11[%c1_338, %c1_339, %c3_340, %c32_341], %395 {strides = array<i32>} : memref<2x2x5x320xf32, #tpu.memory_space<vmem>>, vector<1x1x1x256xf32>,
    %396 = vector.extract_strided_slice %335 {offsets = [7, 0], sizes = [1, 256], strides = [1, 1]} : vector<8x256xf32> to vector<1x256xf32>
    %c1_342 = arith.constant 1 : index
    %c0_343 = arith.constant 0 : index
    %c4_344 = arith.constant 4 : index
    %c32_345 = arith.constant 32 : index
    %397 = vector.load %arg11[%c1_342, %c0_343, %c4_344, %c32_345] : memref<2x2x5x320xf32, #tpu.memory_space<vmem>>, vector<1x1x1x256xf32>
    %398 = vector.shape_cast %397 : vector<1x1x1x256xf32> to vector<1x256xf32>
    %399 = vector.shape_cast %396 : vector<1x256xf32> to vector<1x1x1x256xf32>
    tpu.vector_store %arg11[%c1_342, %c0_343, %c4_344, %c32_345], %399 {strides = array<i32>} : memref<2x2x5x320xf32, #tpu.memory_space<vmem>>, vector<1x1x1x256xf32>,
    %c0_346 = arith.constant 0 : index
    %c0_347 = arith.constant 0 : index
    %c0_348 = arith.constant 0 : index
    %c0_349 = arith.constant 0 : index
    %400 = vector.load %arg11[%c0_346, %c0_347, %c0_348, %c0_349] : memref<2x2x5x320xf32, #tpu.memory_space<vmem>>, vector<1x1x4x320xf32>
    %401 = vector.shape_cast %400 : vector<1x1x4x320xf32> to vector<4x320xf32>
    %402 = arith.truncf %401 : vector<4x320xf32> to vector<4x320xbf16>
    %c0_350 = arith.constant 0 : index
    %c0_351 = arith.constant 0 : index
    %c0_352 = arith.constant 0 : index
    %403 = vector.load %arg4[%c0_350, %c0_351, %c0_352] : memref<4x320x256xbf16, #tpu.memory_space<vmem>>, vector<1x320x256xbf16>
    %404 = vector.shape_cast %403 : vector<1x320x256xbf16> to vector<320x256xbf16>
    %cst_353 = arith.constant dense<0.000000e+00> : vector<4x256xf32>
    %405 = tpu.matmul %402, %404, %cst_353 {dimension_numbers = #tpu.dot_dimension_numbers<[1], [0], [0], [1], [0, 0, 1, 1], [], []>} : vector<4x320xbf16>, vector<320x256xbf16>, vector<4x256xf32> -> vector<4x256xf32>
    %c0_354 = arith.constant 0 : index
    %c1_355 = arith.constant 1 : index
    %c0_356 = arith.constant 0 : index
    %c0_357 = arith.constant 0 : index
    %406 = vector.load %arg11[%c0_354, %c1_355, %c0_356, %c0_357] : memref<2x2x5x320xf32, #tpu.memory_space<vmem>>, vector<1x1x4x320xf32>
    %407 = vector.shape_cast %406 : vector<1x1x4x320xf32> to vector<4x320xf32>
    %408 = arith.truncf %407 : vector<4x320xf32> to vector<4x320xbf16>
    %c1_358 = arith.constant 1 : index
    %c0_359 = arith.constant 0 : index
    %c0_360 = arith.constant 0 : index
    %409 = vector.load %arg4[%c1_358, %c0_359, %c0_360] : memref<4x320x256xbf16, #tpu.memory_space<vmem>>, vector<1x320x256xbf16>
    %410 = vector.shape_cast %409 : vector<1x320x256xbf16> to vector<320x256xbf16>
    %cst_361 = arith.constant dense<0.000000e+00> : vector<4x256xf32>
    %411 = tpu.matmul %408, %410, %cst_361 {dimension_numbers = #tpu.dot_dimension_numbers<[1], [0], [0], [1], [0, 0, 1, 1], [], []>} : vector<4x320xbf16>, vector<320x256xbf16>, vector<4x256xf32> -> vector<4x256xf32>
    %412 = arith.addf %405, %411 : vector<4x256xf32>
    %c0_362 = arith.constant 0 : index
    %c0_363 = arith.constant 0 : index
    %c1_364 = arith.constant 1 : index
    %c0_365 = arith.constant 0 : index
    %413 = vector.load %arg11[%c0_362, %c0_363, %c1_364, %c0_365] : memref<2x2x5x320xf32, #tpu.memory_space<vmem>>, vector<1x1x4x320xf32>
    %414 = vector.shape_cast %413 : vector<1x1x4x320xf32> to vector<4x320xf32>
    %415 = arith.truncf %414 : vector<4x320xf32> to vector<4x320xbf16>
    %c2_366 = arith.constant 2 : index
    %c0_367 = arith.constant 0 : index
    %c0_368 = arith.constant 0 : index
    %416 = vector.load %arg4[%c2_366, %c0_367, %c0_368] : memref<4x320x256xbf16, #tpu.memory_space<vmem>>, vector<1x320x256xbf16>
    %417 = vector.shape_cast %416 : vector<1x320x256xbf16> to vector<320x256xbf16>
    %cst_369 = arith.constant dense<0.000000e+00> : vector<4x256xf32>
    %418 = tpu.matmul %415, %417, %cst_369 {dimension_numbers = #tpu.dot_dimension_numbers<[1], [0], [0], [1], [0, 0, 1, 1], [], []>} : vector<4x320xbf16>, vector<320x256xbf16>, vector<4x256xf32> -> vector<4x256xf32>
    %419 = arith.addf %412, %418 : vector<4x256xf32>
    %c0_370 = arith.constant 0 : index
    %c1_371 = arith.constant 1 : index
    %c1_372 = arith.constant 1 : index
    %c0_373 = arith.constant 0 : index
    %420 = vector.load %arg11[%c0_370, %c1_371, %c1_372, %c0_373] : memref<2x2x5x320xf32, #tpu.memory_space<vmem>>, vector<1x1x4x320xf32>
    %421 = vector.shape_cast %420 : vector<1x1x4x320xf32> to vector<4x320xf32>
    %422 = arith.truncf %421 : vector<4x320xf32> to vector<4x320xbf16>
    %c3_374 = arith.constant 3 : index
    %c0_375 = arith.constant 0 : index
    %c0_376 = arith.constant 0 : index
    %423 = vector.load %arg4[%c3_374, %c0_375, %c0_376] : memref<4x320x256xbf16, #tpu.memory_space<vmem>>, vector<1x320x256xbf16>
    %424 = vector.shape_cast %423 : vector<1x320x256xbf16> to vector<320x256xbf16>
    %cst_377 = arith.constant dense<0.000000e+00> : vector<4x256xf32>
    %425 = tpu.matmul %422, %424, %cst_377 {dimension_numbers = #tpu.dot_dimension_numbers<[1], [0], [0], [1], [0, 0, 1, 1], [], []>} : vector<4x320xbf16>, vector<320x256xbf16>, vector<4x256xf32> -> vector<4x256xf32>
    %426 = arith.addf %419, %425 : vector<4x256xf32>
    %c1_378 = arith.constant 1 : index
    %c0_379 = arith.constant 0 : index
    %c0_380 = arith.constant 0 : index
    %c0_381 = arith.constant 0 : index
    %427 = vector.load %arg11[%c1_378, %c0_379, %c0_380, %c0_381] : memref<2x2x5x320xf32, #tpu.memory_space<vmem>>, vector<1x1x4x320xf32>
    %428 = vector.shape_cast %427 : vector<1x1x4x320xf32> to vector<4x320xf32>
    %429 = arith.truncf %428 : vector<4x320xf32> to vector<4x320xbf16>
    %c0_382 = arith.constant 0 : index
    %c0_383 = arith.constant 0 : index
    %c0_384 = arith.constant 0 : index
    %430 = vector.load %arg4[%c0_382, %c0_383, %c0_384] : memref<4x320x256xbf16, #tpu.memory_space<vmem>>, vector<1x320x256xbf16>
    %431 = vector.shape_cast %430 : vector<1x320x256xbf16> to vector<320x256xbf16>
    %cst_385 = arith.constant dense<0.000000e+00> : vector<4x256xf32>
    %432 = tpu.matmul %429, %431, %cst_385 {dimension_numbers = #tpu.dot_dimension_numbers<[1], [0], [0], [1], [0, 0, 1, 1], [], []>} : vector<4x320xbf16>, vector<320x256xbf16>, vector<4x256xf32> -> vector<4x256xf32>
    %c1_386 = arith.constant 1 : index
    %c1_387 = arith.constant 1 : index
    %c0_388 = arith.constant 0 : index
    %c0_389 = arith.constant 0 : index
    %433 = vector.load %arg11[%c1_386, %c1_387, %c0_388, %c0_389] : memref<2x2x5x320xf32, #tpu.memory_space<vmem>>, vector<1x1x4x320xf32>
    %434 = vector.shape_cast %433 : vector<1x1x4x320xf32> to vector<4x320xf32>
    %435 = arith.truncf %434 : vector<4x320xf32> to vector<4x320xbf16>
    %c1_390 = arith.constant 1 : index
    %c0_391 = arith.constant 0 : index
    %c0_392 = arith.constant 0 : index
    %436 = vector.load %arg4[%c1_390, %c0_391, %c0_392] : memref<4x320x256xbf16, #tpu.memory_space<vmem>>, vector<1x320x256xbf16>
    %437 = vector.shape_cast %436 : vector<1x320x256xbf16> to vector<320x256xbf16>
    %cst_393 = arith.constant dense<0.000000e+00> : vector<4x256xf32>
    %438 = tpu.matmul %435, %437, %cst_393 {dimension_numbers = #tpu.dot_dimension_numbers<[1], [0], [0], [1], [0, 0, 1, 1], [], []>} : vector<4x320xbf16>, vector<320x256xbf16>, vector<4x256xf32> -> vector<4x256xf32>
    %439 = arith.addf %432, %438 : vector<4x256xf32>
    %c1_394 = arith.constant 1 : index
    %c0_395 = arith.constant 0 : index
    %c1_396 = arith.constant 1 : index
    %c0_397 = arith.constant 0 : index
    %440 = vector.load %arg11[%c1_394, %c0_395, %c1_396, %c0_397] : memref<2x2x5x320xf32, #tpu.memory_space<vmem>>, vector<1x1x4x320xf32>
    %441 = vector.shape_cast %440 : vector<1x1x4x320xf32> to vector<4x320xf32>
    %442 = arith.truncf %441 : vector<4x320xf32> to vector<4x320xbf16>
    %c2_398 = arith.constant 2 : index
    %c0_399 = arith.constant 0 : index
    %c0_400 = arith.constant 0 : index
    %443 = vector.load %arg4[%c2_398, %c0_399, %c0_400] : memref<4x320x256xbf16, #tpu.memory_space<vmem>>, vector<1x320x256xbf16>
    %444 = vector.shape_cast %443 : vector<1x320x256xbf16> to vector<320x256xbf16>
    %cst_401 = arith.constant dense<0.000000e+00> : vector<4x256xf32>
    %445 = tpu.matmul %442, %444, %cst_401 {dimension_numbers = #tpu.dot_dimension_numbers<[1], [0], [0], [1], [0, 0, 1, 1], [], []>} : vector<4x320xbf16>, vector<320x256xbf16>, vector<4x256xf32> -> vector<4x256xf32>
    %446 = arith.addf %439, %445 : vector<4x256xf32>
    %c1_402 = arith.constant 1 : index
    %c1_403 = arith.constant 1 : index
    %c1_404 = arith.constant 1 : index
    %c0_405 = arith.constant 0 : index
    %447 = vector.load %arg11[%c1_402, %c1_403, %c1_404, %c0_405] : memref<2x2x5x320xf32, #tpu.memory_space<vmem>>, vector<1x1x4x320xf32>
    %448 = vector.shape_cast %447 : vector<1x1x4x320xf32> to vector<4x320xf32>
    %449 = arith.truncf %448 : vector<4x320xf32> to vector<4x320xbf16>
    %c3_406 = arith.constant 3 : index
    %c0_407 = arith.constant 0 : index
    %c0_408 = arith.constant 0 : index
    %450 = vector.load %arg4[%c3_406, %c0_407, %c0_408] : memref<4x320x256xbf16, #tpu.memory_space<vmem>>, vector<1x320x256xbf16>
    %451 = vector.shape_cast %450 : vector<1x320x256xbf16> to vector<320x256xbf16>
    %cst_409 = arith.constant dense<0.000000e+00> : vector<4x256xf32>
    %452 = tpu.matmul %449, %451, %cst_409 {dimension_numbers = #tpu.dot_dimension_numbers<[1], [0], [0], [1], [0, 0, 1, 1], [], []>} : vector<4x320xbf16>, vector<320x256xbf16>, vector<4x256xf32> -> vector<4x256xf32>
    %453 = arith.addf %446, %452 : vector<4x256xf32>
    %c3_410 = arith.constant 3 : index
    %c0_411 = arith.constant 0 : index
    %454 = vector.load %arg6[%c3_410, %c0_411] : memref<7x256xf32, #tpu.memory_space<vmem>>, vector<1x256xf32>
    %c4_412 = arith.constant 4 : index
    %c0_413 = arith.constant 0 : index
    %455 = vector.load %arg6[%c4_412, %c0_413] : memref<7x256xf32, #tpu.memory_space<vmem>>, vector<1x256xf32>
    %cst_414 = arith.constant dense<0.000000e+00> : vector<256xf32>
    %456 = vector.multi_reduction <add>, %426, %cst_414 [0] : vector<4x256xf32> to vector<256xf32>
    %457 = vector.shape_cast %456 : vector<256xf32> to vector<1x256xf32>
    %cst_415 = arith.constant dense<0.000000e+00> : vector<256xf32>
    %458 = vector.multi_reduction <add>, %453, %cst_415 [0] : vector<4x256xf32> to vector<256xf32>
    %459 = vector.shape_cast %458 : vector<256xf32> to vector<1x256xf32>
    %460 = arith.addf %457, %459 : vector<1x256xf32>
    %461 = vector.extract_strided_slice %460 {offsets = [0, 0], sizes = [1, 64], strides = [1, 1]} : vector<1x256xf32> to vector<1x64xf32>
    %462 = vector.extract_strided_slice %460 {offsets = [0, 64], sizes = [1, 64], strides = [1, 1]} : vector<1x256xf32> to vector<1x64xf32>
    %463 = arith.addf %461, %462 : vector<1x64xf32>
    %464 = vector.extract_strided_slice %460 {offsets = [0, 128], sizes = [1, 64], strides = [1, 1]} : vector<1x256xf32> to vector<1x64xf32>
    %465 = arith.addf %463, %464 : vector<1x64xf32>
    %466 = vector.extract_strided_slice %460 {offsets = [0, 192], sizes = [1, 64], strides = [1, 1]} : vector<1x256xf32> to vector<1x64xf32>
    %467 = arith.addf %465, %466 : vector<1x64xf32>
    %468 = tpu.concatenate %467, %467, %467, %467 in 1 : vector<1x64xf32>, vector<1x64xf32>, vector<1x64xf32>, vector<1x64xf32> -> vector<1x256xf32>
    %cst_416 = arith.constant 3.125000e-02 : f32
    %469 = vector.broadcast %cst_416 : f32 to vector<1x256xf32>
    %470 = arith.mulf %468, %469 : vector<1x256xf32>
    %471 = vector.broadcast %470 : vector<1x256xf32> to vector<4x256xf32>
    %472 = arith.subf %426, %471 : vector<4x256xf32>
    %473 = arith.mulf %472, %472 : vector<4x256xf32>
    %cst_417 = arith.constant dense<0.000000e+00> : vector<256xf32>
    %474 = vector.multi_reduction <add>, %473, %cst_417 [0] : vector<4x256xf32> to vector<256xf32>
    %475 = vector.shape_cast %474 : vector<256xf32> to vector<1x256xf32>
    %476 = vector.broadcast %470 : vector<1x256xf32> to vector<4x256xf32>
    %477 = arith.subf %453, %476 : vector<4x256xf32>
    %478 = arith.mulf %477, %477 : vector<4x256xf32>
    %cst_418 = arith.constant dense<0.000000e+00> : vector<256xf32>
    %479 = vector.multi_reduction <add>, %478, %cst_418 [0] : vector<4x256xf32> to vector<256xf32>
    %480 = vector.shape_cast %479 : vector<256xf32> to vector<1x256xf32>
    %481 = arith.addf %475, %480 : vector<1x256xf32>
    %482 = vector.extract_strided_slice %481 {offsets = [0, 0], sizes = [1, 64], strides = [1, 1]} : vector<1x256xf32> to vector<1x64xf32>
    %483 = vector.extract_strided_slice %481 {offsets = [0, 64], sizes = [1, 64], strides = [1, 1]} : vector<1x256xf32> to vector<1x64xf32>
    %484 = arith.addf %482, %483 : vector<1x64xf32>
    %485 = vector.extract_strided_slice %481 {offsets = [0, 128], sizes = [1, 64], strides = [1, 1]} : vector<1x256xf32> to vector<1x64xf32>
    %486 = arith.addf %484, %485 : vector<1x64xf32>
    %487 = vector.extract_strided_slice %481 {offsets = [0, 192], sizes = [1, 64], strides = [1, 1]} : vector<1x256xf32> to vector<1x64xf32>
    %488 = arith.addf %486, %487 : vector<1x64xf32>
    %489 = tpu.concatenate %488, %488, %488, %488 in 1 : vector<1x64xf32>, vector<1x64xf32>, vector<1x64xf32>, vector<1x64xf32> -> vector<1x256xf32>
    %cst_419 = arith.constant 3.125000e-02 : f32
    %490 = vector.broadcast %cst_419 : f32 to vector<1x256xf32>
    %491 = arith.mulf %489, %490 : vector<1x256xf32>
    %cst_420 = arith.constant 9.99999974E-6 : f32
    %492 = vector.broadcast %cst_420 : f32 to vector<1x256xf32>
    %493 = arith.addf %491, %492 : vector<1x256xf32>
    %494 = math.rsqrt %493 : vector<1x256xf32>
    %495 = arith.mulf %454, %494 : vector<1x256xf32>
    %496 = arith.mulf %470, %495 : vector<1x256xf32>
    %497 = arith.subf %455, %496 : vector<1x256xf32>
    %498 = vector.broadcast %495 : vector<1x256xf32> to vector<4x256xf32>
    %499 = arith.mulf %426, %498 : vector<4x256xf32>
    %500 = vector.broadcast %497 : vector<1x256xf32> to vector<4x256xf32>
    %501 = arith.addf %499, %500 : vector<4x256xf32>
    %502 = vector.broadcast %495 : vector<1x256xf32> to vector<4x256xf32>
    %503 = arith.mulf %453, %502 : vector<4x256xf32>
    %504 = vector.broadcast %497 : vector<1x256xf32> to vector<4x256xf32>
    %505 = arith.addf %503, %504 : vector<4x256xf32>
    %cst_421 = arith.constant 0.000000e+00 : f32
    %506 = vector.broadcast %cst_421 : f32 to vector<4x256xf32>
    %507 = arith.cmpf oge, %501, %506 : vector<4x256xf32>
    %cst_422 = arith.constant 2.000000e-01 : f32
    %508 = vector.broadcast %cst_422 : f32 to vector<4x256xf32>
    %509 = arith.mulf %508, %501 : vector<4x256xf32>
    %510 = arith.select %507, %501, %509 : vector<4x256xi1>, vector<4x256xf32>
    %cst_423 = arith.constant 0.000000e+00 : f32
    %511 = vector.broadcast %cst_423 : f32 to vector<4x256xf32>
    %512 = arith.cmpf oge, %505, %511 : vector<4x256xf32>
    %cst_424 = arith.constant 2.000000e-01 : f32
    %513 = vector.broadcast %cst_424 : f32 to vector<4x256xf32>
    %514 = arith.mulf %513, %505 : vector<4x256xf32>
    %515 = arith.select %512, %505, %514 : vector<4x256xi1>, vector<4x256xf32>
    %516 = vector.extract_strided_slice %510 {offsets = [0, 0], sizes = [1, 256], strides = [1, 1]} : vector<4x256xf32> to vector<1x256xf32>
    %c0_425 = arith.constant 0 : index
    %c1_426 = arith.constant 1 : index
    %c0_427 = arith.constant 0 : index
    %c64 = arith.constant 64 : index
    %517 = vector.load %arg12[%c0_425, %c1_426, %c0_427, %c64] : memref<2x2x3x384xf32, #tpu.memory_space<vmem>>, vector<1x1x1x256xf32>
    %518 = vector.shape_cast %517 : vector<1x1x1x256xf32> to vector<1x256xf32>
    %519 = vector.shape_cast %516 : vector<1x256xf32> to vector<1x1x1x256xf32>
    tpu.vector_store %arg12[%c0_425, %c1_426, %c0_427, %c64], %519 {strides = array<i32>} : memref<2x2x3x384xf32, #tpu.memory_space<vmem>>, vector<1x1x1x256xf32>,
    %520 = vector.extract_strided_slice %510 {offsets = [1, 0], sizes = [1, 256], strides = [1, 1]} : vector<4x256xf32> to vector<1x256xf32>
    %c0_428 = arith.constant 0 : index
    %c0_429 = arith.constant 0 : index
    %c1_430 = arith.constant 1 : index
    %c64_431 = arith.constant 64 : index
    %521 = vector.load %arg12[%c0_428, %c0_429, %c1_430, %c64_431] : memref<2x2x3x384xf32, #tpu.memory_space<vmem>>, vector<1x1x1x256xf32>
    %522 = vector.shape_cast %521 : vector<1x1x1x256xf32> to vector<1x256xf32>
    %523 = vector.shape_cast %520 : vector<1x256xf32> to vector<1x1x1x256xf32>
    tpu.vector_store %arg12[%c0_428, %c0_429, %c1_430, %c64_431], %523 {strides = array<i32>} : memref<2x2x3x384xf32, #tpu.memory_space<vmem>>, vector<1x1x1x256xf32>,
    %524 = vector.extract_strided_slice %510 {offsets = [2, 0], sizes = [1, 256], strides = [1, 1]} : vector<4x256xf32> to vector<1x256xf32>
    %c0_432 = arith.constant 0 : index
    %c1_433 = arith.constant 1 : index
    %c1_434 = arith.constant 1 : index
    %c64_435 = arith.constant 64 : index
    %525 = vector.load %arg12[%c0_432, %c1_433, %c1_434, %c64_435] : memref<2x2x3x384xf32, #tpu.memory_space<vmem>>, vector<1x1x1x256xf32>
    %526 = vector.shape_cast %525 : vector<1x1x1x256xf32> to vector<1x256xf32>
    %527 = vector.shape_cast %524 : vector<1x256xf32> to vector<1x1x1x256xf32>
    tpu.vector_store %arg12[%c0_432, %c1_433, %c1_434, %c64_435], %527 {strides = array<i32>} : memref<2x2x3x384xf32, #tpu.memory_space<vmem>>, vector<1x1x1x256xf32>,
    %528 = vector.extract_strided_slice %510 {offsets = [3, 0], sizes = [1, 256], strides = [1, 1]} : vector<4x256xf32> to vector<1x256xf32>
    %c0_436 = arith.constant 0 : index
    %c0_437 = arith.constant 0 : index
    %c2_438 = arith.constant 2 : index
    %c64_439 = arith.constant 64 : index
    %529 = vector.load %arg12[%c0_436, %c0_437, %c2_438, %c64_439] : memref<2x2x3x384xf32, #tpu.memory_space<vmem>>, vector<1x1x1x256xf32>
    %530 = vector.shape_cast %529 : vector<1x1x1x256xf32> to vector<1x256xf32>
    %531 = vector.shape_cast %528 : vector<1x256xf32> to vector<1x1x1x256xf32>
    tpu.vector_store %arg12[%c0_436, %c0_437, %c2_438, %c64_439], %531 {strides = array<i32>} : memref<2x2x3x384xf32, #tpu.memory_space<vmem>>, vector<1x1x1x256xf32>,
    %532 = vector.extract_strided_slice %515 {offsets = [0, 0], sizes = [1, 256], strides = [1, 1]} : vector<4x256xf32> to vector<1x256xf32>
    %c1_440 = arith.constant 1 : index
    %c1_441 = arith.constant 1 : index
    %c0_442 = arith.constant 0 : index
    %c64_443 = arith.constant 64 : index
    %533 = vector.load %arg12[%c1_440, %c1_441, %c0_442, %c64_443] : memref<2x2x3x384xf32, #tpu.memory_space<vmem>>, vector<1x1x1x256xf32>
    %534 = vector.shape_cast %533 : vector<1x1x1x256xf32> to vector<1x256xf32>
    %535 = vector.shape_cast %532 : vector<1x256xf32> to vector<1x1x1x256xf32>
    tpu.vector_store %arg12[%c1_440, %c1_441, %c0_442, %c64_443], %535 {strides = array<i32>} : memref<2x2x3x384xf32, #tpu.memory_space<vmem>>, vector<1x1x1x256xf32>,
    %536 = vector.extract_strided_slice %515 {offsets = [1, 0], sizes = [1, 256], strides = [1, 1]} : vector<4x256xf32> to vector<1x256xf32>
    %c1_444 = arith.constant 1 : index
    %c0_445 = arith.constant 0 : index
    %c1_446 = arith.constant 1 : index
    %c64_447 = arith.constant 64 : index
    %537 = vector.load %arg12[%c1_444, %c0_445, %c1_446, %c64_447] : memref<2x2x3x384xf32, #tpu.memory_space<vmem>>, vector<1x1x1x256xf32>
    %538 = vector.shape_cast %537 : vector<1x1x1x256xf32> to vector<1x256xf32>
    %539 = vector.shape_cast %536 : vector<1x256xf32> to vector<1x1x1x256xf32>
    tpu.vector_store %arg12[%c1_444, %c0_445, %c1_446, %c64_447], %539 {strides = array<i32>} : memref<2x2x3x384xf32, #tpu.memory_space<vmem>>, vector<1x1x1x256xf32>,
    %540 = vector.extract_strided_slice %515 {offsets = [2, 0], sizes = [1, 256], strides = [1, 1]} : vector<4x256xf32> to vector<1x256xf32>
    %c1_448 = arith.constant 1 : index
    %c1_449 = arith.constant 1 : index
    %c1_450 = arith.constant 1 : index
    %c64_451 = arith.constant 64 : index
    %541 = vector.load %arg12[%c1_448, %c1_449, %c1_450, %c64_451] : memref<2x2x3x384xf32, #tpu.memory_space<vmem>>, vector<1x1x1x256xf32>
    %542 = vector.shape_cast %541 : vector<1x1x1x256xf32> to vector<1x256xf32>
    %543 = vector.shape_cast %540 : vector<1x256xf32> to vector<1x1x1x256xf32>
    tpu.vector_store %arg12[%c1_448, %c1_449, %c1_450, %c64_451], %543 {strides = array<i32>} : memref<2x2x3x384xf32, #tpu.memory_space<vmem>>, vector<1x1x1x256xf32>,
    %544 = vector.extract_strided_slice %515 {offsets = [3, 0], sizes = [1, 256], strides = [1, 1]} : vector<4x256xf32> to vector<1x256xf32>
    %c1_452 = arith.constant 1 : index
    %c0_453 = arith.constant 0 : index
    %c2_454 = arith.constant 2 : index
    %c64_455 = arith.constant 64 : index
    %545 = vector.load %arg12[%c1_452, %c0_453, %c2_454, %c64_455] : memref<2x2x3x384xf32, #tpu.memory_space<vmem>>, vector<1x1x1x256xf32>
    %546 = vector.shape_cast %545 : vector<1x1x1x256xf32> to vector<1x256xf32>
    %547 = vector.shape_cast %544 : vector<1x256xf32> to vector<1x1x1x256xf32>
    tpu.vector_store %arg12[%c1_452, %c0_453, %c2_454, %c64_455], %547 {strides = array<i32>} : memref<2x2x3x384xf32, #tpu.memory_space<vmem>>, vector<1x1x1x256xf32>,
    %c0_456 = arith.constant 0 : index
    %c0_457 = arith.constant 0 : index
    %c0_458 = arith.constant 0 : index
    %c0_459 = arith.constant 0 : index
    %548 = vector.load %arg12[%c0_456, %c0_457, %c0_458, %c0_459] : memref<2x2x3x384xf32, #tpu.memory_space<vmem>>, vector<1x1x2x384xf32>
    %549 = vector.shape_cast %548 : vector<1x1x2x384xf32> to vector<2x384xf32>
    %550 = arith.truncf %549 : vector<2x384xf32> to vector<2x384xbf16>
    %c0_460 = arith.constant 0 : index
    %c0_461 = arith.constant 0 : index
    %c0_462 = arith.constant 0 : index
    %551 = vector.load %arg5[%c0_460, %c0_461, %c0_462] : memref<4x384x256xbf16, #tpu.memory_space<vmem>>, vector<1x384x256xbf16>
    %552 = vector.shape_cast %551 : vector<1x384x256xbf16> to vector<384x256xbf16>
    %cst_463 = arith.constant dense<0.000000e+00> : vector<2x256xf32>
    %553 = tpu.matmul %550, %552, %cst_463 {dimension_numbers = #tpu.dot_dimension_numbers<[1], [0], [0], [1], [0, 0, 1, 1], [], []>} : vector<2x384xbf16>, vector<384x256xbf16>, vector<2x256xf32> -> vector<2x256xf32>
    %c0_464 = arith.constant 0 : index
    %c1_465 = arith.constant 1 : index
    %c0_466 = arith.constant 0 : index
    %c0_467 = arith.constant 0 : index
    %554 = vector.load %arg12[%c0_464, %c1_465, %c0_466, %c0_467] : memref<2x2x3x384xf32, #tpu.memory_space<vmem>>, vector<1x1x2x384xf32>
    %555 = vector.shape_cast %554 : vector<1x1x2x384xf32> to vector<2x384xf32>
    %556 = arith.truncf %555 : vector<2x384xf32> to vector<2x384xbf16>
    %c1_468 = arith.constant 1 : index
    %c0_469 = arith.constant 0 : index
    %c0_470 = arith.constant 0 : index
    %557 = vector.load %arg5[%c1_468, %c0_469, %c0_470] : memref<4x384x256xbf16, #tpu.memory_space<vmem>>, vector<1x384x256xbf16>
    %558 = vector.shape_cast %557 : vector<1x384x256xbf16> to vector<384x256xbf16>
    %cst_471 = arith.constant dense<0.000000e+00> : vector<2x256xf32>
    %559 = tpu.matmul %556, %558, %cst_471 {dimension_numbers = #tpu.dot_dimension_numbers<[1], [0], [0], [1], [0, 0, 1, 1], [], []>} : vector<2x384xbf16>, vector<384x256xbf16>, vector<2x256xf32> -> vector<2x256xf32>
    %560 = arith.addf %553, %559 : vector<2x256xf32>
    %c0_472 = arith.constant 0 : index
    %c0_473 = arith.constant 0 : index
    %c1_474 = arith.constant 1 : index
    %c0_475 = arith.constant 0 : index
    %561 = vector.load %arg12[%c0_472, %c0_473, %c1_474, %c0_475] : memref<2x2x3x384xf32, #tpu.memory_space<vmem>>, vector<1x1x2x384xf32>
    %562 = vector.shape_cast %561 : vector<1x1x2x384xf32> to vector<2x384xf32>
    %563 = arith.truncf %562 : vector<2x384xf32> to vector<2x384xbf16>
    %c2_476 = arith.constant 2 : index
    %c0_477 = arith.constant 0 : index
    %c0_478 = arith.constant 0 : index
    %564 = vector.load %arg5[%c2_476, %c0_477, %c0_478] : memref<4x384x256xbf16, #tpu.memory_space<vmem>>, vector<1x384x256xbf16>
    %565 = vector.shape_cast %564 : vector<1x384x256xbf16> to vector<384x256xbf16>
    %cst_479 = arith.constant dense<0.000000e+00> : vector<2x256xf32>
    %566 = tpu.matmul %563, %565, %cst_479 {dimension_numbers = #tpu.dot_dimension_numbers<[1], [0], [0], [1], [0, 0, 1, 1], [], []>} : vector<2x384xbf16>, vector<384x256xbf16>, vector<2x256xf32> -> vector<2x256xf32>
    %567 = arith.addf %560, %566 : vector<2x256xf32>
    %c0_480 = arith.constant 0 : index
    %c1_481 = arith.constant 1 : index
    %c1_482 = arith.constant 1 : index
    %c0_483 = arith.constant 0 : index
    %568 = vector.load %arg12[%c0_480, %c1_481, %c1_482, %c0_483] : memref<2x2x3x384xf32, #tpu.memory_space<vmem>>, vector<1x1x2x384xf32>
    %569 = vector.shape_cast %568 : vector<1x1x2x384xf32> to vector<2x384xf32>
    %570 = arith.truncf %569 : vector<2x384xf32> to vector<2x384xbf16>
    %c3_484 = arith.constant 3 : index
    %c0_485 = arith.constant 0 : index
    %c0_486 = arith.constant 0 : index
    %571 = vector.load %arg5[%c3_484, %c0_485, %c0_486] : memref<4x384x256xbf16, #tpu.memory_space<vmem>>, vector<1x384x256xbf16>
    %572 = vector.shape_cast %571 : vector<1x384x256xbf16> to vector<384x256xbf16>
    %cst_487 = arith.constant dense<0.000000e+00> : vector<2x256xf32>
    %573 = tpu.matmul %570, %572, %cst_487 {dimension_numbers = #tpu.dot_dimension_numbers<[1], [0], [0], [1], [0, 0, 1, 1], [], []>} : vector<2x384xbf16>, vector<384x256xbf16>, vector<2x256xf32> -> vector<2x256xf32>
    %574 = arith.addf %567, %573 : vector<2x256xf32>
    %c1_488 = arith.constant 1 : index
    %c0_489 = arith.constant 0 : index
    %c0_490 = arith.constant 0 : index
    %c0_491 = arith.constant 0 : index
    %575 = vector.load %arg12[%c1_488, %c0_489, %c0_490, %c0_491] : memref<2x2x3x384xf32, #tpu.memory_space<vmem>>, vector<1x1x2x384xf32>
    %576 = vector.shape_cast %575 : vector<1x1x2x384xf32> to vector<2x384xf32>
    %577 = arith.truncf %576 : vector<2x384xf32> to vector<2x384xbf16>
    %c0_492 = arith.constant 0 : index
    %c0_493 = arith.constant 0 : index
    %c0_494 = arith.constant 0 : index
    %578 = vector.load %arg5[%c0_492, %c0_493, %c0_494] : memref<4x384x256xbf16, #tpu.memory_space<vmem>>, vector<1x384x256xbf16>
    %579 = vector.shape_cast %578 : vector<1x384x256xbf16> to vector<384x256xbf16>
    %cst_495 = arith.constant dense<0.000000e+00> : vector<2x256xf32>
    %580 = tpu.matmul %577, %579, %cst_495 {dimension_numbers = #tpu.dot_dimension_numbers<[1], [0], [0], [1], [0, 0, 1, 1], [], []>} : vector<2x384xbf16>, vector<384x256xbf16>, vector<2x256xf32> -> vector<2x256xf32>
    %c1_496 = arith.constant 1 : index
    %c1_497 = arith.constant 1 : index
    %c0_498 = arith.constant 0 : index
    %c0_499 = arith.constant 0 : index
    %581 = vector.load %arg12[%c1_496, %c1_497, %c0_498, %c0_499] : memref<2x2x3x384xf32, #tpu.memory_space<vmem>>, vector<1x1x2x384xf32>
    %582 = vector.shape_cast %581 : vector<1x1x2x384xf32> to vector<2x384xf32>
    %583 = arith.truncf %582 : vector<2x384xf32> to vector<2x384xbf16>
    %c1_500 = arith.constant 1 : index
    %c0_501 = arith.constant 0 : index
    %c0_502 = arith.constant 0 : index
    %584 = vector.load %arg5[%c1_500, %c0_501, %c0_502] : memref<4x384x256xbf16, #tpu.memory_space<vmem>>, vector<1x384x256xbf16>
    %585 = vector.shape_cast %584 : vector<1x384x256xbf16> to vector<384x256xbf16>
    %cst_503 = arith.constant dense<0.000000e+00> : vector<2x256xf32>
    %586 = tpu.matmul %583, %585, %cst_503 {dimension_numbers = #tpu.dot_dimension_numbers<[1], [0], [0], [1], [0, 0, 1, 1], [], []>} : vector<2x384xbf16>, vector<384x256xbf16>, vector<2x256xf32> -> vector<2x256xf32>
    %587 = arith.addf %580, %586 : vector<2x256xf32>
    %c1_504 = arith.constant 1 : index
    %c0_505 = arith.constant 0 : index
    %c1_506 = arith.constant 1 : index
    %c0_507 = arith.constant 0 : index
    %588 = vector.load %arg12[%c1_504, %c0_505, %c1_506, %c0_507] : memref<2x2x3x384xf32, #tpu.memory_space<vmem>>, vector<1x1x2x384xf32>
    %589 = vector.shape_cast %588 : vector<1x1x2x384xf32> to vector<2x384xf32>
    %590 = arith.truncf %589 : vector<2x384xf32> to vector<2x384xbf16>
    %c2_508 = arith.constant 2 : index
    %c0_509 = arith.constant 0 : index
    %c0_510 = arith.constant 0 : index
    %591 = vector.load %arg5[%c2_508, %c0_509, %c0_510] : memref<4x384x256xbf16, #tpu.memory_space<vmem>>, vector<1x384x256xbf16>
    %592 = vector.shape_cast %591 : vector<1x384x256xbf16> to vector<384x256xbf16>
    %cst_511 = arith.constant dense<0.000000e+00> : vector<2x256xf32>
    %593 = tpu.matmul %590, %592, %cst_511 {dimension_numbers = #tpu.dot_dimension_numbers<[1], [0], [0], [1], [0, 0, 1, 1], [], []>} : vector<2x384xbf16>, vector<384x256xbf16>, vector<2x256xf32> -> vector<2x256xf32>
    %594 = arith.addf %587, %593 : vector<2x256xf32>
    %c1_512 = arith.constant 1 : index
    %c1_513 = arith.constant 1 : index
    %c1_514 = arith.constant 1 : index
    %c0_515 = arith.constant 0 : index
    %595 = vector.load %arg12[%c1_512, %c1_513, %c1_514, %c0_515] : memref<2x2x3x384xf32, #tpu.memory_space<vmem>>, vector<1x1x2x384xf32>
    %596 = vector.shape_cast %595 : vector<1x1x2x384xf32> to vector<2x384xf32>
    %597 = arith.truncf %596 : vector<2x384xf32> to vector<2x384xbf16>
    %c3_516 = arith.constant 3 : index
    %c0_517 = arith.constant 0 : index
    %c0_518 = arith.constant 0 : index
    %598 = vector.load %arg5[%c3_516, %c0_517, %c0_518] : memref<4x384x256xbf16, #tpu.memory_space<vmem>>, vector<1x384x256xbf16>
    %599 = vector.shape_cast %598 : vector<1x384x256xbf16> to vector<384x256xbf16>
    %cst_519 = arith.constant dense<0.000000e+00> : vector<2x256xf32>
    %600 = tpu.matmul %597, %599, %cst_519 {dimension_numbers = #tpu.dot_dimension_numbers<[1], [0], [0], [1], [0, 0, 1, 1], [], []>} : vector<2x384xbf16>, vector<384x256xbf16>, vector<2x256xf32> -> vector<2x256xf32>
    %601 = arith.addf %594, %600 : vector<2x256xf32>
    %c5_520 = arith.constant 5 : index
    %c0_521 = arith.constant 0 : index
    %602 = vector.load %arg6[%c5_520, %c0_521] : memref<7x256xf32, #tpu.memory_space<vmem>>, vector<1x256xf32>
    %c6_522 = arith.constant 6 : index
    %c0_523 = arith.constant 0 : index
    %603 = vector.load %arg6[%c6_522, %c0_523] : memref<7x256xf32, #tpu.memory_space<vmem>>, vector<1x256xf32>
    %cst_524 = arith.constant dense<0.000000e+00> : vector<256xf32>
    %604 = vector.multi_reduction <add>, %574, %cst_524 [0] : vector<2x256xf32> to vector<256xf32>
    %605 = vector.shape_cast %604 : vector<256xf32> to vector<1x256xf32>
    %cst_525 = arith.constant dense<0.000000e+00> : vector<256xf32>
    %606 = vector.multi_reduction <add>, %601, %cst_525 [0] : vector<2x256xf32> to vector<256xf32>
    %607 = vector.shape_cast %606 : vector<256xf32> to vector<1x256xf32>
    %608 = arith.addf %605, %607 : vector<1x256xf32>
    %609 = vector.extract_strided_slice %608 {offsets = [0, 0], sizes = [1, 128], strides = [1, 1]} : vector<1x256xf32> to vector<1x128xf32>
    %610 = vector.extract_strided_slice %608 {offsets = [0, 128], sizes = [1, 128], strides = [1, 1]} : vector<1x256xf32> to vector<1x128xf32>
    %611 = arith.addf %609, %610 : vector<1x128xf32>
    %612 = tpu.concatenate %611, %611 in 1 : vector<1x128xf32>, vector<1x128xf32> -> vector<1x256xf32>
    %cst_526 = arith.constant 1.250000e-01 : f32
    %613 = vector.broadcast %cst_526 : f32 to vector<1x256xf32>
    %614 = arith.mulf %612, %613 : vector<1x256xf32>
    %615 = vector.broadcast %614 : vector<1x256xf32> to vector<2x256xf32>
    %616 = arith.subf %574, %615 : vector<2x256xf32>
    %617 = arith.mulf %616, %616 : vector<2x256xf32>
    %cst_527 = arith.constant dense<0.000000e+00> : vector<256xf32>
    %618 = vector.multi_reduction <add>, %617, %cst_527 [0] : vector<2x256xf32> to vector<256xf32>
    %619 = vector.shape_cast %618 : vector<256xf32> to vector<1x256xf32>
    %620 = vector.broadcast %614 : vector<1x256xf32> to vector<2x256xf32>
    %621 = arith.subf %601, %620 : vector<2x256xf32>
    %622 = arith.mulf %621, %621 : vector<2x256xf32>
    %cst_528 = arith.constant dense<0.000000e+00> : vector<256xf32>
    %623 = vector.multi_reduction <add>, %622, %cst_528 [0] : vector<2x256xf32> to vector<256xf32>
    %624 = vector.shape_cast %623 : vector<256xf32> to vector<1x256xf32>
    %625 = arith.addf %619, %624 : vector<1x256xf32>
    %626 = vector.extract_strided_slice %625 {offsets = [0, 0], sizes = [1, 128], strides = [1, 1]} : vector<1x256xf32> to vector<1x128xf32>
    %627 = vector.extract_strided_slice %625 {offsets = [0, 128], sizes = [1, 128], strides = [1, 1]} : vector<1x256xf32> to vector<1x128xf32>
    %628 = arith.addf %626, %627 : vector<1x128xf32>
    %629 = tpu.concatenate %628, %628 in 1 : vector<1x128xf32>, vector<1x128xf32> -> vector<1x256xf32>
    %cst_529 = arith.constant 1.250000e-01 : f32
    %630 = vector.broadcast %cst_529 : f32 to vector<1x256xf32>
    %631 = arith.mulf %629, %630 : vector<1x256xf32>
    %cst_530 = arith.constant 9.99999974E-6 : f32
    %632 = vector.broadcast %cst_530 : f32 to vector<1x256xf32>
    %633 = arith.addf %631, %632 : vector<1x256xf32>
    %634 = math.rsqrt %633 : vector<1x256xf32>
    %635 = arith.mulf %602, %634 : vector<1x256xf32>
    %636 = arith.mulf %614, %635 : vector<1x256xf32>
    %637 = arith.subf %603, %636 : vector<1x256xf32>
    %638 = vector.broadcast %635 : vector<1x256xf32> to vector<2x256xf32>
    %639 = arith.mulf %574, %638 : vector<2x256xf32>
    %640 = vector.broadcast %637 : vector<1x256xf32> to vector<2x256xf32>
    %641 = arith.addf %639, %640 : vector<2x256xf32>
    %642 = vector.broadcast %635 : vector<1x256xf32> to vector<2x256xf32>
    %643 = arith.mulf %601, %642 : vector<2x256xf32>
    %644 = vector.broadcast %637 : vector<1x256xf32> to vector<2x256xf32>
    %645 = arith.addf %643, %644 : vector<2x256xf32>
    %cst_531 = arith.constant 0.000000e+00 : f32
    %646 = vector.broadcast %cst_531 : f32 to vector<2x256xf32>
    %647 = arith.cmpf oge, %641, %646 : vector<2x256xf32>
    %cst_532 = arith.constant 2.000000e-01 : f32
    %648 = vector.broadcast %cst_532 : f32 to vector<2x256xf32>
    %649 = arith.mulf %648, %641 : vector<2x256xf32>
    %650 = arith.select %647, %641, %649 : vector<2x256xi1>, vector<2x256xf32>
    %cst_533 = arith.constant 0.000000e+00 : f32
    %651 = vector.broadcast %cst_533 : f32 to vector<2x256xf32>
    %652 = arith.cmpf oge, %645, %651 : vector<2x256xf32>
    %cst_534 = arith.constant 2.000000e-01 : f32
    %653 = vector.broadcast %cst_534 : f32 to vector<2x256xf32>
    %654 = arith.mulf %653, %645 : vector<2x256xf32>
    %655 = arith.select %652, %645, %654 : vector<2x256xi1>, vector<2x256xf32>
    %c0_535 = arith.constant 0 : index
    %c0_536 = arith.constant 0 : index
    %656 = vector.load %arg7[%c0_535, %c0_536] : memref<1x128xf32, #tpu.memory_space<vmem>>, vector<1x128xf32>
    %657 = vector.extract_strided_slice %650 {offsets = [0, 0], sizes = [2, 128], strides = [1, 1]} : vector<2x256xf32> to vector<2x128xf32>
    %658 = vector.broadcast %656 : vector<1x128xf32> to vector<2x128xf32>
    %659 = arith.mulf %657, %658 : vector<2x128xf32>
    %cst_537 = arith.constant dense<0.000000e+00> : vector<2xf32>
    %660 = vector.multi_reduction <add>, %659, %cst_537 [1] : vector<2x128xf32> to vector<2xf32>
    %661 = vector.shape_cast %660 : vector<2xf32> to vector<2x1xf32>
    %c0_538 = arith.constant 0 : index
    %c0_539 = arith.constant 0 : index
    %662 = vector.load %arg8[%c0_538, %c0_539] : memref<4x1xf32, #tpu.memory_space<vmem>>, vector<2x1xf32>
    %663 = arith.addf %661, %662 : vector<2x1xf32>
    %c0_540 = arith.constant 0 : index
    %c0_541 = arith.constant 0 : index
    %664 = vector.load %arg9[%c0_540, %c0_541] : memref<8x1xf32, #tpu.memory_space<vmem>>, vector<2x1xf32>
    tpu.vector_store %arg9[%c0_540, %c0_541], %663 {strides = array<i32>} : memref<8x1xf32, #tpu.memory_space<vmem>>, vector<2x1xf32>,
    %665 = vector.extract_strided_slice %650 {offsets = [0, 128], sizes = [2, 128], strides = [1, 1]} : vector<2x256xf32> to vector<2x128xf32>
    %666 = vector.broadcast %656 : vector<1x128xf32> to vector<2x128xf32>
    %667 = arith.mulf %665, %666 : vector<2x128xf32>
    %cst_542 = arith.constant dense<0.000000e+00> : vector<2xf32>
    %668 = vector.multi_reduction <add>, %667, %cst_542 [1] : vector<2x128xf32> to vector<2xf32>
    %669 = vector.shape_cast %668 : vector<2xf32> to vector<2x1xf32>
    %c2_543 = arith.constant 2 : index
    %c0_544 = arith.constant 0 : index
    %670 = vector.load %arg8[%c2_543, %c0_544] : memref<4x1xf32, #tpu.memory_space<vmem>>, vector<2x1xf32>
    %671 = arith.addf %669, %670 : vector<2x1xf32>
    %c2_545 = arith.constant 2 : index
    %c0_546 = arith.constant 0 : index
    %672 = vector.load %arg9[%c2_545, %c0_546] : memref<8x1xf32, #tpu.memory_space<vmem>>, vector<2x1xf32>
    tpu.vector_store %arg9[%c2_545, %c0_546], %671 {strides = array<i32>} : memref<8x1xf32, #tpu.memory_space<vmem>>, vector<2x1xf32>,
    %673 = vector.extract_strided_slice %655 {offsets = [0, 0], sizes = [2, 128], strides = [1, 1]} : vector<2x256xf32> to vector<2x128xf32>
    %674 = vector.broadcast %656 : vector<1x128xf32> to vector<2x128xf32>
    %675 = arith.mulf %673, %674 : vector<2x128xf32>
    %cst_547 = arith.constant dense<0.000000e+00> : vector<2xf32>
    %676 = vector.multi_reduction <add>, %675, %cst_547 [1] : vector<2x128xf32> to vector<2xf32>
    %677 = vector.shape_cast %676 : vector<2xf32> to vector<2x1xf32>
    %c0_548 = arith.constant 0 : index
    %c0_549 = arith.constant 0 : index
    %678 = vector.load %arg8[%c0_548, %c0_549] : memref<4x1xf32, #tpu.memory_space<vmem>>, vector<2x1xf32>
    %679 = arith.addf %677, %678 : vector<2x1xf32>
    %c4_550 = arith.constant 4 : index
    %c0_551 = arith.constant 0 : index
    %680 = vector.load %arg9[%c4_550, %c0_551] : memref<8x1xf32, #tpu.memory_space<vmem>>, vector<2x1xf32>
    tpu.vector_store %arg9[%c4_550, %c0_551], %679 {strides = array<i32>} : memref<8x1xf32, #tpu.memory_space<vmem>>, vector<2x1xf32>,
    %681 = vector.extract_strided_slice %655 {offsets = [0, 128], sizes = [2, 128], strides = [1, 1]} : vector<2x256xf32> to vector<2x128xf32>
    %682 = vector.broadcast %656 : vector<1x128xf32> to vector<2x128xf32>
    %683 = arith.mulf %681, %682 : vector<2x128xf32>
    %cst_552 = arith.constant dense<0.000000e+00> : vector<2xf32>
    %684 = vector.multi_reduction <add>, %683, %cst_552 [1] : vector<2x128xf32> to vector<2xf32>
    %685 = vector.shape_cast %684 : vector<2xf32> to vector<2x1xf32>
    %c2_553 = arith.constant 2 : index
    %c0_554 = arith.constant 0 : index
    %686 = vector.load %arg8[%c2_553, %c0_554] : memref<4x1xf32, #tpu.memory_space<vmem>>, vector<2x1xf32>
    %687 = arith.addf %685, %686 : vector<2x1xf32>
    %c6_555 = arith.constant 6 : index
    %c0_556 = arith.constant 0 : index
    %688 = vector.load %arg9[%c6_555, %c0_556] : memref<8x1xf32, #tpu.memory_space<vmem>>, vector<2x1xf32>
    tpu.vector_store %arg9[%c6_555, %c0_556], %687 {strides = array<i32>} : memref<8x1xf32, #tpu.memory_space<vmem>>, vector<2x1xf32>,
    return
  }
  func.func @transform_0(%arg0: i32) -> (i32, i32, i32, i32) {
    %c0_i32 = arith.constant 0 : i32
    %c0_i32_0 = arith.constant 0 : i32
    %c0_i32_1 = arith.constant 0 : i32
    %c0_i32_2 = arith.constant 0 : i32
    %c0_i32_3 = arith.constant 0 : i32
    return %c0_i32, %c0_i32_0, %c0_i32_1, %c0_i32_2 : i32, i32, i32, i32
  }
  func.func @transform_1(%arg0: i32) -> (i32, i32, i32) {
    %c0_i32 = arith.constant 0 : i32
    %c0_i32_0 = arith.constant 0 : i32
    %c0_i32_1 = arith.constant 0 : i32
    %c0_i32_2 = arith.constant 0 : i32
    return %c0_i32, %c0_i32_0, %c0_i32_1 : i32, i32, i32
  }
  func.func @transform_2(%arg0: i32) -> (i32, i32, i32) {
    %c0_i32 = arith.constant 0 : i32
    %c0_i32_0 = arith.constant 0 : i32
    %c0_i32_1 = arith.constant 0 : i32
    %c0_i32_2 = arith.constant 0 : i32
    return %c0_i32, %c0_i32_0, %c0_i32_1 : i32, i32, i32
  }
  func.func @transform_3(%arg0: i32) -> (i32, i32, i32) {
    %c0_i32 = arith.constant 0 : i32
    %c0_i32_0 = arith.constant 0 : i32
    %c0_i32_1 = arith.constant 0 : i32
    %c0_i32_2 = arith.constant 0 : i32
    return %c0_i32, %c0_i32_0, %c0_i32_1 : i32, i32, i32
  }
  func.func @transform_4(%arg0: i32) -> (i32, i32, i32) {
    %c0_i32 = arith.constant 0 : i32
    %c0_i32_0 = arith.constant 0 : i32
    %c0_i32_1 = arith.constant 0 : i32
    %c0_i32_2 = arith.constant 0 : i32
    return %c0_i32, %c0_i32_0, %c0_i32_1 : i32, i32, i32
  }
  func.func @transform_5(%arg0: i32) -> (i32, i32) {
    %c0_i32 = arith.constant 0 : i32
    %c0_i32_0 = arith.constant 0 : i32
    %c0_i32_1 = arith.constant 0 : i32
    return %c0_i32, %c0_i32_0 : i32, i32
  }
  func.func @transform_6(%arg0: i32) -> (i32, i32) {
    %c0_i32 = arith.constant 0 : i32
    %c0_i32_0 = arith.constant 0 : i32
    %c0_i32_1 = arith.constant 0 : i32
    return %c0_i32, %c0_i32_0 : i32, i32
  }
  func.func @transform_7(%arg0: i32) -> (i32, i32) {
    %c0_i32 = arith.constant 0 : i32
    %c0_i32_0 = arith.constant 0 : i32
    %c0_i32_1 = arith.constant 0 : i32
    return %c0_i32, %c0_i32_0 : i32, i32
  }
  func.func @transform_8(%arg0: i32) -> (i32, i32) {
    %c0_i32 = arith.constant 0 : i32
    %c0_i32_0 = arith.constant 0 : i32
    %c0_i32_1 = arith.constant 0 : i32
    return %c0_i32, %c0_i32_0 : i32, i32
  }
}

</mosaic_0001>

<bundles_post_ra>
// kernel: patch_discriminator_forward.1
= control target key start
LH: loop header
LB: loop body
LE: loop exit
PB: predicated region body
PF: predicated region fallthrough
CT: control target
= control target key end

     0   :  { %13 = vsyncpa [#allocation6], 0  ;;  %s11852_s0 = inlined_call_operand.vmem [shape: f32[2,2,17,34], index: 0, kind: input, shape index: {}]   ;;  %s11853_s1 = inlined_call_operand.vmem [shape: bf16[4,34,256], index: 1, kind: input, shape index: {}]   ;;  %s11854_s2 = inlined_call_operand.hbm [shape: bf16[4,288,256], index: 2, kind: input, shape index: {}]   ;;  %s11855_s3 = inlined_call_operand.hbm [shape: bf16[4,320,256], index: 3, kind: input, shape index: {}]   ;;  %s11856_s4 = inlined_call_operand.hbm [shape: bf16[4,384,256], index: 4, kind: input, shape index: {}]   ;;  %s11857_s5 = inlined_call_operand.vmem [shape: f32[7,256], index: 5, kind: input, shape index: {}]   ;;  %s11858_s6 = inlined_call_operand.vmem [shape: f32[1,128], index: 6, kind: input, shape index: {}]   ;;  %s11859_s7 = inlined_call_operand.vmem [shape: f32[4,1], index: 7, kind: input, shape index: {}]   ;;  %s11860_s8 = inlined_call_operand.vmem [shape: f32[8,1], index: 8, kind: output, shape index: {}]  }
   0x1   :  { %14 = vsyncpa [#allocation8], 0  ;;  %s9220_s27 = smov [#allocation7]   ;;  %s9221_s29 = smov [#allocation5]  }
   0x2   :  { %s36_s28 = sshll.u32 %s9220_s27, 4  ;;  %s24_s30 = sshll.u32 %s9221_s29, 4  ;;  %s37_s28 = int_to_ptr.vmem [resolvable:$true] %s36_s28  ;;  %s25_s30 = int_to_ptr.vmem [resolvable:$true] %s24_s30 }
   0x3   :  { %s9164_s9 = scalar_lea.vmem %s37_s28, 20480  ;;  %p9169_p1 = scmp.lt.s32.totalorder %s37_s28, %s37_s28 }
   0x4   :  { %p9165_p0 = scmp.ne.s32.totalorder %s37_s28, %s9164_s9  ;;  %p9170_p2 = scmp.lt.s32.totalorder %s9164_s9, %s9164_s9 }
   0x6   :  { %p9171_p3 = por %p9170_p2, %p9169_p1 }
   0x8   :  { %p9172_p4 = pnand %p9171_p3, %p9165_p0 }
   0xa   :  { %9175 = shalt.err (!%p9172_p4)
}
   0xb   :  { %s9222_s10 = smov 128   ;;  %s9223_s11 = smov 8  }
   0xc   :  { %42 = dma.hbm_to_vmem [thread:$0]  %s11855_s3, 20480, %s37_s28, [#allocation8], %s9222_s10, %s9222_s10, %s9223_s11  }
   0xd   :  { %s9184_s14 = scalar_lea.vmem %s25_s30, 18432  ;;  %p9189_p6 = scmp.lt.s32.totalorder %s25_s30, %s25_s30 }
   0xe   :  { %p9185_p5 = scmp.ne.s32.totalorder %s25_s30, %s9184_s14  ;;  %p9190_p7 = scmp.lt.s32.totalorder %s9184_s14, %s9184_s14 }
  0x10   :  { %p9191_p8 = por %p9190_p7, %p9189_p6 }
  0x12   :  { %p9192_p9 = pnand %p9191_p8, %p9185_p5 }
  0x14   :  { %9195 = shalt.err (!%p9192_p9)
}
  0x15   :  { %30 = dma.hbm_to_vmem [thread:$0]  %s11854_s2, 18432, %s25_s30, [#allocation6], %s9222_s10, %s9222_s10, %s9223_s11  }
  0x16   :  { %s9224_s17 = smov [#allocation9]  }
  0x17   :  { %s48_s18 = sshll.u32 %s9224_s17, 4  ;;  %s49_s18 = int_to_ptr.vmem [resolvable:$true] %s48_s18 }
  0x18   :  { %s9204_s19 = scalar_lea.vmem %s49_s18, 24576  ;;  %p9209_p11 = scmp.lt.s32.totalorder %s49_s18, %s49_s18 }
  0x19   :  { %p9205_p10 = scmp.ne.s32.totalorder %s49_s18, %s9204_s19  ;;  %p9210_p12 = scmp.lt.s32.totalorder %s9204_s19, %s9204_s19 }
  0x1b   :  { %p9211_p13 = por %p9210_p12, %p9209_p11 }
  0x1d   :  { %p9212_p0 = pnand %p9211_p13, %p9205_p10 }
  0x1f   :  { %9215 = shalt.err (!%p9212_p0)
}
  0x20   :  { %54 = dma.hbm_to_vmem [thread:$0]  %s11856_s4, 24576, %s49_s18, [#allocation8], %s9222_s10, %s9222_s10, %s9223_s11  }
  0x21   :  { %9216 = dma.done.wait [#allocation6], 18432  }
  0x22   :  { %9217 = vsyncadd [#allocation6], 4294948864 }
  0x23   :  { %9218 = dma.done.wait [#allocation8], 45056  }
  0x24   :  { %9219 = vsyncadd [#allocation8], 4294922240  ;;  %v11865_v0 = vmov 0   ;;  %v7696_v1 = vld [vmem:[%s11853_s1 + $0x48] sm:$0x11]  ;;  %vm165_vm0 = vcmask 1040384  }
  0x25   :  { %204 = vmatprep.mubr.bf16.mxu0 %v11865_v0  ;;  %281 = vmatprep.mubr.bf16.mxu1 %v11865_v0  ;;  %v125_v2 = vld [vmem:[%s11853_s1 + $0x20] sm:$0x11]  ;;  %v9294_v3 = vcombine.high %v7696_v1, %v7696_v1  ;;  %v7701_v5 = vcombine.low %v7696_v1, %v7696_v1  ;;  %v9306_v8 = vld [vmem:[%s11853_s1 + $0x14] ss:$8 sps:$4 sm:$0xff]   ;;  %v9328_v12 = vld [vmem:[%s11853_s1 + $0x10] ss:$8 sps:$4 sm:$0xff]  }
  0x26   :  { %v9296_v4 = vcombine.high %v125_v2, %v125_v2  ;;  %v7709_v6 = vcombine.low %v125_v2, %v125_v2  ;;  %v9301_v7 = vld [vmem:[%s11853_s1 + $0x3c] ss:$8 sps:$4 sm:$0xff]   ;;  %v9321_v11 = vld [vmem:[%s11853_s1 + $0x38] ss:$8 sps:$4 sm:$0xff]   ;;  %v9335_v13 = vld [vmem:[%s11853_s1 + $0x2c] ss:$8 sps:$4 sm:$0xff]  }
  0x27   :  { %7703 = vmatprep.subr.msk.bf16.mxu0 %vm165_vm0, %v9294_v3  ;;  %v9313_v9 = vsel %vm165_vm0, %v7701_v5, 0  ;;  %v9340_v14 = vld [vmem:[%s11853_s1 + $0x4] ss:$8 sps:$4 sm:$0xff]   ;;  %v9345_v15 = vld [vmem:[%s11853_s1 + $0x28] ss:$8 sps:$4 sm:$0xff]   ;;  %v7690_v17 = vld [vmem:[%s11852_s0 + $0x18] sm:$0xff] }
  0x28   :  { %7711 = vmatprep.subr.msk.bf16.mxu1 %vm165_vm0, %v9296_v4  ;;  %v9316_v10 = vsel %vm165_vm0, %v7709_v6, 0  ;;  %183 = vmatpush1.bf16.msra.mxu0 %v9313_v9  ;;  %v9350_v16 = vld [vmem:[%s11853_s1] ss:$8 sps:$4 sm:$0xff]   ;;  %v7717_v20 = vld [vmem:[%s11853_s1 + $0x70] sm:$0x11]  ;;  %vm161_vm1 = vcmask 277504  }
  0x29   :  { %260 = vmatpush1.bf16.msra.mxu1 %v9316_v10  ;;  %184 = vmatprep.subr.bf16.mxu0 %v9301_v7  ;;  %v7691_v18 = vld [vmem:[%s11852_s0 + $0x20] sm:$0xff]  ;;  %v7732_v21 = vld [vmem:[%s11853_s1 + $0x98] sm:$0x11]  ;;  %v119_v22 = vld [vmem:[%s11852_s0 + $0x8] sm:$0xff]  ;;  %v9372_v23 = vcombine.high %v7717_v20, %v7717_v20  ;;  %v7722_v25 = vcombine.low %v7717_v20, %v7717_v20  ;;  %vm73_vm2 = vcmask 261120   ;;  %v11863_v6 = vmov 0.0  }
  0x2a   :  { %261 = vmatprep.subr.bf16.mxu1 %v9306_v8  ;;  %v118_v19 = vld [vmem:[%s11852_s0] sm:$0xff]  ;;  %v9376_v24 = vcombine.high %v7732_v21, %v7732_v21  ;;  %v7737_v26 = vcombine.low %v7732_v21, %v7732_v21  ;;  %v129_v27 = vpack.c.bf16 %v7691_v18, %v7690_v17  ;;  %v8313_v32 = vld [vmem:[%s11853_s1 + $0x8c] ss:$8 sps:$4 sm:$0xff]   ;;  %v8311_v34 = vld [vmem:[%s11853_s1 + $0x88] ss:$8 sps:$4 sm:$0xff]   ;;  %79 = vst [vmem:[#allocation2 + $0x30] sm:$0xff] %v11863_v6  ;;  %v11861_v17 = vlaneseq }
  0x2b   :  { %v120_v28 = vpack.c.bf16 %v119_v22, %v118_v19  ;;  %v330_v29 = vsel %vm165_vm0, %v7722_v25, 0  ;;  %v8310_v31 = vld [vmem:[%s11853_s1 + $0x64] ss:$8 sps:$4 sm:$0xff]   ;;  %v8308_v33 = vld [vmem:[%s11853_s1 + $0x60] ss:$8 sps:$4 sm:$0xff]   ;;  %v7744_v46 = vld [vmem:[%s11852_s0 + $0x50] sm:$0xff] }
  0x2c   :  { %185 = vmatpush1.bf16.msra.mxu0 %v9321_v11  ;;  %v420_v30 = vsel %vm165_vm0, %v7737_v26, 0  ;;  %v8316_v35 = vld [vmem:[%s11853_s1 + $0x54] ss:$8 sps:$4 sm:$0xff]   ;;  %v8314_v37 = vld [vmem:[%s11853_s1 + $0x50] ss:$8 sps:$4 sm:$0xff]   ;;  %v292_v39 = vld [vmem:[%s11852_s0 + $0x1] sm:$0xff] }
  0x2d   :  { %262 = vmatpush1.bf16.msra.mxu1 %v9328_v12  ;;  %186 = vmatprep.subr.bf16.mxu0 %v9335_v13  ;;  %v8319_v36 = vld [vmem:[%s11853_s1 + $0x7c] ss:$8 sps:$4 sm:$0xff]   ;;  %v8317_v38 = vld [vmem:[%s11853_s1 + $0x78] ss:$8 sps:$4 sm:$0xff]   ;;  %v293_v40 = vld [vmem:[%s11852_s0 + $0x9] sm:$0xff]  ;;  %80 = vst [vmem:[#allocation2 + $0x38] sm:$0xff] %v11863_v6 }
  0x2e   :  { %263 = vmatprep.subr.bf16.mxu1 %v9340_v14  ;;  %v7726_v41 = vld [vmem:[%s11852_s0 + $0x19] sm:$0xff]  ;;  %v7727_v42 = vld [vmem:[%s11852_s0 + $0x21] sm:$0xff]  ;;  %v294_v43 = vpack.c.bf16 %v293_v40, %v292_v39  ;;  %v7741_v47 = vld [vmem:[%s11852_s0 + $0x30] sm:$0xff]  ;;  %81 = vst.msk [vmem:[#allocation2 + $0x40] sm:$0xff] %vm73_vm2, %v11863_v6  ;;  %v681_v20 = vshrl.u32 %v11861_v17, 7  ;;  %s9228_s19 = smov 16  }
  0x2f   :  { %v384_v44 = vpack.c.bf16 %v7727_v42, %v7726_v41  ;;  %v7743_v45 = vld [vmem:[%s11852_s0 + $0x48] sm:$0xff]  ;;  %v7742_v48 = vld [vmem:[%s11852_s0 + $0x38] sm:$0xff]  ;;  %71 = vst [vmem:[#allocation2] sm:$0xff] %v11863_v6  ;;  %72 = vst [vmem:[#allocation2 + $0x8] sm:$0xff] %v11863_v6  ;;  %vm77_vm7 = vcmask 253952   ;;  %vm747_vm12 = vcmp.ge.s32.totalorder %v11861_v17, 16 }
  0x30   :  { %187 = vmatpush1.bf16.msra.mxu0 %v9345_v15  ;;  %v479_v49 = vpack.c.bf16 %v7744_v46, %v7743_v45  ;;  %v475_v50 = vpack.c.bf16 %v7742_v48, %v7741_v47  ;;  %v7749_v51 = vld [vmem:[%s11852_s0 + $0x31] sm:$0xff]  ;;  %v7750_v52 = vld [vmem:[%s11852_s0 + $0x39] sm:$0xff]  ;;  %v7753_v53 = vld [vmem:[%s11852_s0 + $0x49] sm:$0xff]  ;;  %74 = vst.msk [vmem:[#allocation2 + $0x10] sm:$0xff] %vm73_vm2, %v11863_v6  ;;  %vm748_vm13 = vcmp.lt.s32.totalorder %v11861_v17, 272  ;;  %vm742_vm14 = vcmask 130048  }
  0x31   :  { %264 = vmatpush1.bf16.msra.mxu1 %v9350_v16  ;;  %7724 = vmatprep.subr.msk.bf16.mxu0 %vm165_vm0, %v9372_v23  ;;  %v7754_v54 = vld [vmem:[%s11852_s0 + $0x51] sm:$0xff]  ;;  %v574_v55 = vpack.c.bf16 %v7750_v52, %v7749_v51  ;;  %v8320_v57 = vld [vmem:[#allocation5 + $0x190] ss:$8 sps:$4 sm:$0xff]   ;;  %v8322_v58 = vld [vmem:[#allocation5 + $0x194] ss:$8 sps:$4 sm:$0xff]   ;;  %85 = vst [vmem:[#allocation2 + $0x60] sm:$0xff] %v11863_v6 }
  0x32   :  { %7739 = vmatprep.subr.msk.bf16.mxu1 %vm165_vm0, %v9376_v24  ;;  %v627_v56 = vpack.c.bf16 %v7754_v54, %v7753_v53  ;;  %v8325_v59 = vld [vmem:[#allocation5 + $0x184] ss:$8 sps:$4 sm:$0xff]   ;;  %v8323_v60 = vld [vmem:[#allocation5 + $0x180] ss:$8 sps:$4 sm:$0xff]   ;;  %v8328_v61 = vld [vmem:[#allocation5 + $0x174] ss:$8 sps:$4 sm:$0xff]  }
  0x33   :  { %7704 = vmatmul.mubr.msk.bf16.vlgmr.msra.gmra.mxu0 %vm161_vm1, %v129_v27  ;;  %v8326_v62 = vld [vmem:[#allocation5 + $0x170] ss:$8 sps:$4 sm:$0xff]   ;;  %v8331_v63 = vld [vmem:[#allocation5 + $0x164] ss:$8 sps:$4 sm:$0xff]   ;;  %v8329_v1 = vld [vmem:[#allocation5 + $0x160] ss:$8 sps:$4 sm:$0xff]  }
  0x34   :  { %7712 = vmatmul.mubr.msk.bf16.vlgmr.msra.gmra.mxu1 %vm161_vm1, %v120_v28  ;;  %346 = vmatpush1.bf16.msra.mxu0 %v330_v29  ;;  %v8334_v2 = vld [vmem:[#allocation5 + $0x154] ss:$8 sps:$4 sm:$0xff]   ;;  %v8335_v5 = vld [vmem:[#allocation5 + $0x140] ss:$8 sps:$4 sm:$0xff]   ;;  %75 = vst [vmem:[#allocation2 + $0x18] sm:$0x1] %v11863_v6  ;;  %vm9625_vm15 = vmand %vm747_vm12, %vm748_vm13 }
  0x35   :  { %436 = vmatpush1.bf16.msra.mxu1 %v420_v30  ;;  %347 = vmatprep.subr.bf16.mxu0 %v8310_v31  ;;  %76 = vst [vmem:[#allocation2 + $0x20] sm:$0x1] %v11863_v6  ;;  %82 = vst [vmem:[#allocation2 + $0x48] sm:$0x1] %v11863_v6  ;;  %v9525_v28 = vsub.s32 1, %v681_v20  ;;  %s9229_s3 = smov 64  }
  0x36   :  { %437 = vmatprep.subr.bf16.mxu1 %v8313_v32  ;;  %367 = vmatprep.mubr.bf16.mxu0 %v11865_v0  ;;  %83 = vst [vmem:[#allocation2 + $0x50] sm:$0x1] %v11863_v6  ;;  %86 = vst [vmem:[#allocation2 + $0x68] sm:$0xff] %v11863_v6  ;;  %v678_v26 = vld [vmem:[%s11857_s5] ss:$8 sm:$0x3] }
  0x37   :  { %457 = vmatprep.mubr.bf16.mxu1 %v11865_v0  ;;  %87 = vst.msk [vmem:[#allocation2 + $0x70] sm:$0xff] %vm73_vm2, %v11863_v6  ;;  %88 = vst [vmem:[#allocation2 + $0x78] sm:$0x1] %v11863_v6  ;;  %v9531_v41 = vrot.slane %v678_v26, %v9525_v28  ;;  %v8352_v53 = vld [vmem:[#allocation5 + $0x1f4] ss:$8 sps:$4 sm:$0xff]   ;;  %s9230_s20 = smov 96  }
  0x38   :  { %348 = vmatpush1.bf16.msra.mxu0 %v8308_v33  ;;  %89 = vst [vmem:[#allocation2 + $0x80] sm:$0x1] %v11863_v6  ;;  %91 = vst [vmem:[#allocation2 + $0x90] sm:$0xff] %v11863_v6  ;;  %s9231_s2 = smov 32  }
  0x39   :  { %438 = vmatpush1.bf16.msra.mxu1 %v8311_v34  ;;  %349 = vmatprep.subr.bf16.mxu0 %v8316_v35  ;;  %92 = vst [vmem:[#allocation2 + $0x98] sm:$0xff] %v11863_v6  ;;  %93 = vst.msk [vmem:[#allocation2 + $0xa0] sm:$0xff] %vm73_vm2, %v11863_v6 }
  0x3a   :  { %439 = vmatprep.subr.bf16.mxu1 %v8319_v36  ;;  %94 = vst [vmem:[#allocation2 + $0xa8] sm:$0x1] %v11863_v6  ;;  %95 = vst [vmem:[#allocation2 + $0xb0] sm:$0x1] %v11863_v6 }
  0x3b   :  { %97 = vst [vmem:[#allocation3] sm:$0x1f] %v11863_v6  ;;  %98 = vst [vmem:[#allocation3 + $0x8] sm:$0x1f] %v11863_v6 }
  0x3c   :  { %350 = vmatpush1.bf16.msra.mxu0 %v8314_v37  ;;  %101 = vst [vmem:[#allocation3 + $0x18] sm:$0x1f] %v11863_v6  ;;  %102 = vst [vmem:[#allocation3 + $0x20] sm:$0x1f] %v11863_v6 }
  0x3d   :  { %440 = vmatpush1.bf16.msra.mxu1 %v8317_v38  ;;  %7745 = vmatprep.subr.msk.bf16.mxu0 %vm165_vm0, %v9294_v3  ;;  %v8332_v3 = vld [vmem:[#allocation5 + $0x150] ss:$8 sps:$4 sm:$0xff]   ;;  %104 = vst [vmem:[#allocation3 + $0x30] sm:$0x1f] %v11863_v6  ;;  %105 = vst [vmem:[#allocation3 + $0x38] sm:$0x1f] %v11863_v6 }
  0x3e   :  { %7747 = vmatprep.subr.msk.bf16.mxu1 %vm165_vm0, %v9296_v4  ;;  %v8337_v4 = vld [vmem:[#allocation5 + $0x144] ss:$8 sps:$4 sm:$0xff]   ;;  %107 = vst [vmem:[#allocation3 + $0x48] sm:$0x1f] %v11863_v6  ;;  %108 = vst [vmem:[#allocation3 + $0x50] sm:$0x1f] %v11863_v6 }
  0x3f   :  { %7725 = vmatmul.mubr.msk.bf16.vlgmr.msra.gmra.mxu0 %vm161_vm1, %v294_v43  ;;  %110 = vst [vmem:[#allocation4] sm:$0x77] %v11863_v6  ;;  %111 = vst [vmem:[#allocation4 + $0x8] sm:$0x7] %v11863_v6  ;;  %v2147_v17 = vld [vmem:[#allocation2 + $0x50] sm:$0x1] }
  0x40   :  { %7740 = vmatmul.mubr.msk.bf16.vlgmr.msra.gmra.mxu1 %vm161_vm1, %v384_v44  ;;  %494 = vmatpush1.bf16.msra.mxu0 %v9313_v9  ;;  %112 = vst [vmem:[#allocation4 + $0xc] sm:$0x77] %v11863_v6  ;;  %113 = vst [vmem:[#allocation4 + $0x14] sm:$0x7] %v11863_v6  ;;  %v8343_v9 = vld [vmem:[#allocation5 + $0x124] ss:$8 sps:$4 sm:$0xff]  }
  0x41   :  { %540 = vmatpush1.bf16.msra.mxu1 %v9316_v10  ;;  %495 = vmatprep.subr.bf16.mxu0 %v9301_v7  ;;  %114 = vst [vmem:[#allocation4 + $0x18] sm:$0x77] %v11863_v6  ;;  %115 = vst [vmem:[#allocation4 + $0x20] sm:$0x7] %v11863_v6  ;;  %v8340_v7 = vld [vmem:[#allocation5 + $0x134] ss:$8 sps:$4 sm:$0xff]  }
  0x42   :  { %541 = vmatprep.subr.bf16.mxu1 %v9306_v8  ;;  %515 = vmatprep.mubr.bf16.mxu0 %v11865_v0  ;;  %116 = vst [vmem:[#allocation4 + $0x24] sm:$0x77] %v11863_v6  ;;  %117 = vst [vmem:[#allocation4 + $0x2c] sm:$0x7] %v11863_v6  ;;  %v8338_v8 = vld [vmem:[#allocation5 + $0x130] ss:$8 sps:$4 sm:$0xff]  }
  0x43   :  { %561 = vmatprep.mubr.bf16.mxu1 %v11865_v0  ;;  %v8341_v10 = vld [vmem:[#allocation5 + $0x120] ss:$8 sps:$4 sm:$0xff]   ;;  %12127 = vst [vmem:[#allocation13_spill] sm:$0xff] %v9525_v28  ;;  %78 = vst.msk [vmem:[#allocation2 + $0x28] sm:$0x1] %vm77_vm7, %v11863_v6 }
  0x44   :  { %496 = vmatpush1.bf16.msra.mxu0 %v9321_v11  ;;  %v8346_v11 = vld [vmem:[#allocation5 + $0x214] ss:$8 sps:$4 sm:$0xff]   ;;  %84 = vst.msk [vmem:[#allocation2 + $0x58] sm:$0x1] %vm77_vm7, %v11863_v6  ;;  %96 = vst.msk [vmem:[#allocation2 + $0xb8] sm:$0x1] %vm77_vm7, %v11863_v6 }
  0x45   :  { %542 = vmatpush1.bf16.msra.mxu1 %v9328_v12  ;;  %497 = vmatprep.subr.bf16.mxu0 %v9335_v13  ;;  %v8344_v12 = vld [vmem:[#allocation5 + $0x210] ss:$8 sps:$4 sm:$0xff]   ;;  %v8349_v13 = vld [vmem:[#allocation5 + $0x204] ss:$8 sps:$4 sm:$0xff]   ;;  %90 = vst.msk [vmem:[#allocation2 + $0x88] sm:$0x1] %vm77_vm7, %v11863_v6 }
  0x46   :  { %543 = vmatprep.subr.bf16.mxu1 %v9340_v14  ;;  %v8347_v14 = vld [vmem:[#allocation5 + $0x200] ss:$8 sps:$4 sm:$0xff]  }
  0x47   :  { %v9894_v6 = vld [vmem:[#allocation5 + $0x80] ss:$8 sps:$4 sm:$0xff]  }
  0x48   :  { %498 = vmatpush1.bf16.msra.mxu0 %v9345_v15  ;;  %12142 = vst [vmem:[#allocation26_spill] sm:$0xff] %v9894_v6 }
  0x49   :  { %544 = vmatpush1.bf16.msra.mxu1 %v9350_v16  ;;  %7751 = vmatprep.subr.msk.bf16.mxu0 %vm165_vm0, %v9372_v23  ;;  %v9520_v23 = vsub.s32 0, %v681_v20 }
  0x4a   :  { %7755 = vmatprep.subr.msk.bf16.mxu1 %vm165_vm0, %v9376_v24  ;;  %vm2967_vm0 = vcmask 523264  }
  0x4b   :  { %7746 = vmatmul.mubr.msk.bf16.vlgmr.msra.gmra.mxu0 %vm161_vm1, %v479_v49  ;;  %12126 = vst [vmem:[#allocation12_spill] sm:$0xff] %v9520_v23 }
  0x4c   :  { %7748 = vmatmul.mubr.msk.bf16.vlgmr.msra.gmra.mxu1 %vm161_vm1, %v475_v50  ;;  %589 = vmatpush1.bf16.msra.mxu0 %v330_v29 }
  0x4d   :  { %642 = vmatpush1.bf16.msra.mxu1 %v420_v30  ;;  %590 = vmatprep.subr.bf16.mxu0 %v8310_v31 }
  0x4e   :  { %643 = vmatprep.subr.bf16.mxu1 %v8313_v32  ;;  %610 = vmatprep.mubr.bf16.mxu0 %v11865_v0 }
  0x4f   :  { %663 = vmatprep.mubr.bf16.mxu1 %v11865_v0 }
  0x50   :  { %591 = vmatpush1.bf16.msra.mxu0 %v8308_v33  ;;  %v9528_v33 = vrot.slane %v678_v26, %v9520_v23  ;;  %v9902_v23 = vld [vmem:[#allocation5 + $0x354] ss:$8 sps:$4 sm:$0xff]  }
  0x51   :  { %644 = vmatpush1.bf16.msra.mxu1 %v8311_v34  ;;  %592 = vmatprep.subr.bf16.mxu0 %v8316_v35  ;;  %v9227_v34 = vmov 1966171168   ;;  %12145 = vst [vmem:[#allocation29_spill] sm:$0xff] %v9902_v23 }
  0x52   :  { %645 = vmatprep.subr.bf16.mxu1 %v8319_v36  ;;  %v726_v35 = vunpack.c.l.s4 %v9227_v34 }
  0x54   :  { %593 = vmatpush1.bf16.msra.mxu0 %v8314_v37  ;;  %v727_v48 = vunpack.c.0.s8 %v726_v35  ;;  %v8359_v35 = vld [vmem:[#allocation5 + $0x1c0] ss:$8 sps:$4 sm:$0xff]  }
  0x55   :  { %646 = vmatpush1.bf16.msra.mxu1 %v8317_v38  ;;  %1460 = vmatprep.subr.bf16.mxu0 %v8322_v58 }
  0x57   :  { %7752 = vmatmul.mubr.msk.bf16.vlgmr.msra.gmra.mxu0 %vm161_vm1, %v574_v55  ;;  %v8350_v55 = vld [vmem:[#allocation5 + $0x1f0] ss:$8 sps:$4 sm:$0xff]  }
  0x58   :  { %7756 = vmatmul.mubr.msk.bf16.vlgmr.msra.gmra.mxu1 %vm161_vm1, %v627_v56  ;;  %1461 = vmatpush1.bf16.msra.mxu0 %v8320_v57  ;;  %vm2969_vm1 = vcmask 785408  }
  0x59   :  { %1533 = vmatprep.mubr.bf16.mxu1 %v11865_v0  ;;  %1462 = vmatprep.subr.bf16.mxu0 %v8325_v59  ;;  %v9536_v59 = vsub.s32 %v727_v48, %v681_v20  ;;  %v8365_v48 = vld [vmem:[#allocation5 + $0x1b0] ss:$8 sps:$4 sm:$0xff]  }
  0x5b   :  { %12128 = vst [vmem:[#allocation14_spill] sm:$0xff] %v9536_v59 }
  0x5c   :  { %1463 = vmatpush1.bf16.msra.mxu0 %v8323_v60 }
  0x5d   :  { %1464 = vmatprep.subr.bf16.mxu0 %v8328_v61 }
  0x60   :  { %1465 = vmatpush1.bf16.msra.mxu0 %v8326_v62 }
  0x61   :  { %1466 = vmatprep.subr.bf16.mxu0 %v8331_v63  ;;  %v8355_v63 = vld [vmem:[#allocation5 + $0x1e4] ss:$8 sps:$4 sm:$0xff]  }
  0x64   :  { %1467 = vmatpush1.bf16.msra.mxu0 %v8329_v1 }
  0x65   :  { %1468 = vmatprep.subr.bf16.mxu0 %v8334_v2 }
  0x68   :  { %1469 = vmatpush1.bf16.msra.mxu0 %v8332_v3 }
  0x69   :  { %1470 = vmatprep.subr.bf16.mxu0 %v8337_v4 }
  0x6c   :  { %1471 = vmatpush1.bf16.msra.mxu0 %v8335_v5 }
  0x6d   :  { %1472 = vmatprep.subr.bf16.mxu0 %v8340_v7 }
  0x70   :  { %1473 = vmatpush1.bf16.msra.mxu0 %v8338_v8  ;;  %v8353_v8 = vld [vmem:[#allocation5 + $0x1e0] ss:$8 sps:$4 sm:$0xff]  }
  0x71   :  { %1474 = vmatprep.subr.bf16.mxu0 %v8343_v9 }
  0x74   :  { %1475 = vmatpush1.bf16.msra.mxu0 %v8341_v10 }
  0x75   :  { %1476 = vmatprep.subr.bf16.mxu0 %v8346_v11 }
  0x78   :  { %1477 = vmatpush2.bf16.msra.mxu0 %v8344_v12 }
  0x79   :  { %1478 = vmatprep.subr.bf16.mxu0 %v8349_v13 }
  0x7c   :  { %1479 = vmatpush2.bf16.msra.mxu0 %v8347_v14  ;;  %v8358_v14 = vld [vmem:[#allocation5 + $0x1d4] ss:$8 sps:$4 sm:$0xff]  }
  0x7d   :  { %1480 = vmatprep.subr.bf16.mxu0 %v8352_v53 }
  0x80   :  { %1481 = vmatpush2.bf16.msra.mxu0 %v8350_v55  ;;  %v8368_v55 = vld [vmem:[#allocation5 + $0x220] ss:$8 sps:$4 sm:$0xff]  }
  0x81   :  { %1482 = vmatprep.subr.bf16.mxu0 %v8355_v63 }
  0x84   :  { %1483 = vmatpush2.bf16.msra.mxu0 %v8353_v8 }
  0x85   :  { %1484 = vmatprep.subr.bf16.mxu0 %v8358_v14 }
  0xf3   :  { %v206_v15 = vpop.f32.mrf.mxu0 }
  0xf4   :  { %v283_v16 = vpop.f32.mrf.mxu1 }
  0xf5   :  { %v208_v18 = vpop.f32.mrf.mxu0  ;;  %v284_v27 = vadd.f32 %v283_v16, %v206_v15 }
  0xf6   :  { %v285_v19 = vpop.f32.mrf.mxu1 }
  0xf7   :  { %v210_v21 = vpop.f32.mrf.mxu0  ;;  %v286_v31 = vadd.f32 %v285_v19, %v208_v18 }
  0xf8   :  { %v287_v22 = vpop.f32.mrf.mxu1 }
  0xf9   :  { %v212_v24 = vpop.f32.mrf.mxu0  ;;  %v288_v38 = vadd.f32 %v287_v22, %v210_v21  ;;  %v8356_v22 = vld [vmem:[#allocation5 + $0x1d0] ss:$8 sps:$4 sm:$0xff]  }
  0xfa   :  { %v289_v25 = vpop.f32.mrf.mxu1  ;;  %1485 = vmatpush2.bf16.msra.mxu0 %v8356_v22 }
  0xfb   :  { %v290_v47 = vadd.f32 %v289_v25, %v212_v24 }
  0xff   :  { %v369_v29 = vpop.f32.mrf.mxu0 }
 0x100   :  { %v459_v30 = vpop.f32.mrf.mxu1  ;;  %v378_v32 = vadd.f32 %v369_v29, %v284_v27  ;;  %v8361_v27 = vld [vmem:[#allocation5 + $0x1c4] ss:$8 sps:$4 sm:$0xff]  }
 0x101   :  { %v371_v36 = vpop.f32.mrf.mxu0  ;;  %1486 = vmatprep.subr.bf16.mxu0 %v8361_v27 }
 0x102   :  { %v461_v37 = vpop.f32.mrf.mxu1  ;;  %v468_v39 = vadd.f32 %v459_v30, %v378_v32  ;;  %v379_v40 = vadd.f32 %v371_v36, %v286_v31  ;;  %1487 = vmatpush2.bf16.msra.mxu0 %v8359_v35  ;;  %v8385_v35 = vld [vmem:[#allocation5 + $0x114] ss:$8 sps:$4 sm:$0xff]  }
 0x103   :  { %v373_v42 = vpop.f32.mrf.mxu0 }
 0x104   :  { %v690_v43 = vadd.f32 %v9528_v33, %v468_v39  ;;  %v469_v44 = vadd.f32 %v461_v37, %v379_v40  ;;  %v380_v45 = vadd.f32 %v373_v42, %v288_v38  ;;  %v463_v46 = vpop.f32.mrf.mxu1  ;;  %v8364_v38 = vld [vmem:[#allocation5 + $0x234] ss:$8 sps:$4 sm:$0xff]   ;;  %v8362_v39 = vld [vmem:[#allocation5 + $0x230] ss:$8 sps:$4 sm:$0xff]  }
 0x105   :  { %v375_v49 = vpop.f32.mrf.mxu0  ;;  %1513 = vmatprep.subr.bf16.mxu1 %v8364_v38  ;;  %v8367_v42 = vld [vmem:[#allocation5 + $0x1b4] ss:$8 sps:$4 sm:$0xff]  }
 0x106   :  { %v702_v50 = vmul.f32 0.2, %v690_v43  ;;  %v691_v51 = vadd.f32 %v9531_v41, %v469_v44  ;;  %v470_v52 = vadd.f32 %v463_v46, %v380_v45  ;;  %vm698_vm3 = vcmp.ge.f32.partialorder %v690_v43, 0.0  ;;  %v465_v58 = vpop.f32.mrf.mxu1  ;;  %1514 = vmatpush1.bf16.msra.mxu1 %v8362_v39  ;;  %1488 = vmatprep.subr.bf16.mxu0 %v8367_v42 }
 0x107   :  { %v381_v54 = vadd.f32 %v375_v49, %v290_v47  ;;  %1489 = vmatpush2.bf16.msra.mxu0 %v8365_v48 }
 0x108   :  { %vm699_vm4 = vcmp.ge.f32.partialorder %v691_v51, 0.0  ;;  %v703_v56 = vmul.f32 0.2, %v691_v51  ;;  %v692_v57 = vadd.f32 %v9528_v33, %v470_v52  ;;  %v706_v61 = vsel %vm698_vm3, %v690_v43, %v702_v50 }
 0x109   :  { %v471_v60 = vadd.f32 %v465_v58, %v381_v54  ;;  %vm99_vm3 = vcmask 520192  }
 0x10a   :  { %v707_v62 = vsel %vm699_vm4, %v691_v51, %v703_v56  ;;  %v704_v1 = vmul.f32 0.2, %v692_v57  ;;  %vm700_vm5 = vcmp.ge.f32.partialorder %v692_v57, 0.0  ;;  %v8370_v51 = vld [vmem:[#allocation5 + $0x224] ss:$8 sps:$4 sm:$0xff]  }
 0x10b   :  { %v693_v2 = vadd.f32 %v9531_v41, %v471_v60  ;;  %v786_v3 = vcombine.high %v706_v61, %v707_v62  ;;  %v724_v4 = vcombine.low %v706_v61, %v707_v62  ;;  %v517_v5 = vpop.f32.mrf.mxu0  ;;  %1515 = vmatprep.subr.bf16.mxu1 %v8370_v51  ;;  %v8373_v60 = vld [vmem:[#allocation5 + $0x1a4] ss:$8 sps:$4 sm:$0xff]  }
 0x10c   :  { %v563_v7 = vpop.f32.mrf.mxu1  ;;  %v708_v15 = vsel %vm700_vm5, %v692_v57, %v704_v1  ;;  %1516 = vmatpush1.bf16.msra.mxu1 %v8368_v55  ;;  %1490 = vmatprep.subr.bf16.mxu0 %v8373_v60 }
 0x10d   :  { %vm701_vm6 = vcmp.ge.f32.partialorder %v693_v2, 0.0  ;;  %v705_v9 = vmul.f32 0.2, %v693_v2  ;;  %v9540_v10 = vrot.slane %v786_v3, %v9536_v59  ;;  %v9543_v11 = vrot.slane %v724_v4, %v9536_v59  ;;  %v519_v12 = vpop.f32.mrf.mxu0 }
 0x10e   :  { %v565_v13 = vpop.f32.mrf.mxu1  ;;  %v564_v37 = vadd.f32 %v563_v7, %v517_v5  ;;  %v8376_v7 = vld [vmem:[#allocation5 + $0x74] ss:$8 sps:$4 sm:$0xff]  }
 0x10f   :  { %v709_v16 = vsel %vm701_vm6, %v693_v2, %v705_v9  ;;  %v800_v18 = vrot.slane %v9540_v10, %v9536_v59  ;;  %v738_v19 = vrot.slane %v9543_v11, %v9536_v59  ;;  %v521_v20 = vpop.f32.mrf.mxu0  ;;  %v566_v40 = vadd.f32 %v565_v13, %v519_v12  ;;  %v8371_v2 = vld [vmem:[#allocation5 + $0x1a0] ss:$8 sps:$4 sm:$0xff]   ;;  %1725 = vmatprep.subr.bf16.mxu1 %v8376_v7 }
 0x110   :  { %v567_v21 = vpop.f32.mrf.mxu1  ;;  %v845_v24 = vcombine.low %v708_v15, %v709_v16  ;;  %v902_v25 = vcombine.high %v708_v15, %v709_v16  ;;  %v752_v43 = vcombine.high %v9543_v11, %v9543_v11  ;;  %v809_v52 = vcombine.high %v9540_v10, %v9540_v10  ;;  %1491 = vmatpush2.bf16.msra.mxu0 %v8371_v2 }
 0x111   :  { %801 = vrot.lane.b32.xlu1 %v800_v18, %s9228_s19  ;;  %739 = vrot.lane.b32.xlu0 %v738_v19, %s9228_s19  ;;  %v825_v29 = vcombine.high %v800_v18, %v800_v18  ;;  %v768_v30 = vcombine.high %v738_v19, %v738_v19  ;;  %v523_v32 = vpop.f32.mrf.mxu0  ;;  %v568_v49 = vadd.f32 %v567_v21, %v521_v20 }
 0x112   :  { %v9552_v26 = vrot.slane %v845_v24, %v9536_v59  ;;  %v9555_v31 = vrot.slane %v902_v25, %v9536_v59  ;;  %v569_v34 = vpop.f32.mrf.mxu1  ;;  %v759_v62 = vrot.slane %v752_v43, %v9536_v59  ;;  %v816_v8 = vrot.slane %v809_v52, %v9536_v59  ;;  %1778 = vmatprep.subr.bf16.mxu0 %v8385_v35 }
 0x113   :  { %v570_v56 = vadd.f32 %v569_v34, %v523_v32 }
 0x114   :  { %v859_v36 = vrot.slane %v9552_v26, %v9536_v59  ;;  %v916_v45 = vrot.slane %v9555_v31, %v9536_v59  ;;  %v777_v14 = vcombine.high %v759_v62, %v759_v62  ;;  %v868_v15 = vcombine.high %v9552_v26, %v9552_v26 }
 0x115   :  { %826 = vrot.lane.b32.xlu1 %v825_v29, %s9228_s19  ;;  %769 = vrot.lane.b32.xlu0 %v768_v30, %s9228_s19  ;;  %v834_v22 = vcombine.high %v816_v8, %v816_v8  ;;  %v925_v24 = vcombine.high %v9555_v31, %v9555_v31 }
 0x116   :  { %v884_v44 = vcombine.high %v859_v36, %v859_v36  ;;  %v941_v61 = vcombine.high %v916_v45, %v916_v45  ;;  %v875_v26 = vrot.slane %v868_v15, %v9536_v59 }
 0x117   :  { %v612_v46 = vpop.f32.mrf.mxu0 }
 0x118   :  { %v665_v47 = vpop.f32.mrf.mxu1  ;;  %v621_v50 = vadd.f32 %v612_v46, %v564_v37  ;;  %v893_v37 = vcombine.high %v875_v26, %v875_v26 }
 0x119   :  { %885 = vrot.lane.b32.xlu1 %v884_v44, %s9228_s19  ;;  %860 = vrot.lane.b32.xlu0 %v859_v36, %s9228_s19  ;;  %v614_v53 = vpop.f32.mrf.mxu0 }
 0x11a   :  { %v667_v54 = vpop.f32.mrf.mxu1  ;;  %v622_v57 = vadd.f32 %v614_v53, %v566_v40  ;;  %v674_v58 = vadd.f32 %v665_v47, %v621_v50 }
 0x11b   :  { %v616_v63 = vpop.f32.mrf.mxu0 }
 0x11c   :  { %v669_v1 = vpop.f32.mrf.mxu1  ;;  %v694_v3 = vadd.f32 %v9528_v33, %v674_v58  ;;  %v675_v4 = vadd.f32 %v667_v54, %v622_v57  ;;  %v623_v5 = vadd.f32 %v616_v63, %v568_v49 }
 0x11d   :  { %942 = vrot.lane.b32.xlu1 %v941_v61, %s9228_s19  ;;  %917 = vrot.lane.b32.xlu0 %v916_v45, %s9228_s19  ;;  %v618_v9 = vpop.f32.mrf.mxu0 }
 0x11e   :  { %v671_v10 = vpop.f32.mrf.mxu1  ;;  %vm710_vm8 = vcmp.ge.f32.partialorder %v694_v3, 0.0  ;;  %v714_v11 = vmul.f32 0.2, %v694_v3  ;;  %v695_v12 = vadd.f32 %v9531_v41, %v675_v4  ;;  %v624_v13 = vadd.f32 %v618_v9, %v570_v56 }
 0x11f   :  { %v676_v16 = vadd.f32 %v669_v1, %v623_v5  ;;  %v9858_v5 = vld [vmem:[#allocation5 + $0xb0] ss:$8 sps:$4 sm:$0xff]  }
 0x120   :  { %v718_v18 = vsel %vm710_vm8, %v694_v3, %v714_v11  ;;  %vm711_vm9 = vcmp.ge.f32.partialorder %v695_v12, 0.0  ;;  %v715_v19 = vmul.f32 0.2, %v695_v12  ;;  %v677_v20 = vadd.f32 %v671_v10, %v624_v13 }
 0x121   :  { %778 = vrot.lane.b32.xlu1 %v777_v14, %s9228_s19  ;;  %760 = vrot.lane.b32.xlu0 %v759_v62, %s9228_s19  ;;  %v696_v21 = vadd.f32 %v9528_v33, %v676_v16 }
 0x122   :  { %v719_v25 = vsel %vm711_vm9, %v695_v12, %v715_v19  ;;  %v697_v27 = vadd.f32 %v9531_v41, %v677_v20  ;;  %v932_v41 = vrot.slane %v925_v24, %v9536_v59 }
 0x123   :  { %v961_v29 = vcombine.low %v718_v18, %v719_v25  ;;  %vm712_vm10 = vcmp.ge.f32.partialorder %v696_v21, 0.0  ;;  %v716_v30 = vmul.f32 0.2, %v696_v21  ;;  %v1019_v34 = vcombine.high %v718_v18, %v719_v25 }
 0x124   :  { %vm713_vm11 = vcmp.ge.f32.partialorder %v697_v27, 0.0  ;;  %v717_v32 = vmul.f32 0.2, %v697_v27  ;;  %v950_v42 = vcombine.high %v932_v41, %v932_v41 }
 0x125   :  { %835 = vrot.lane.b32.xlu1 %v834_v22, %s9228_s19  ;;  %817 = vrot.lane.b32.xlu0 %v816_v8, %s9228_s19  ;;  %v968_v33 = vrot.slane %v961_v29, %v9536_v59  ;;  %v720_v36 = vsel %vm712_vm10, %v696_v21, %v716_v30  ;;  %v1026_v40 = vrot.slane %v1019_v34, %v9536_v59 }
 0x126   :  { %v721_v31 = vsel %vm713_vm11, %v697_v27, %v717_v32 }
 0x127   :  { %v1078_v38 = vcombine.low %v720_v36, %v721_v31  ;;  %v975_v39 = vrot.slane %v968_v33, %v9536_v59  ;;  %v1135_v43 = vcombine.high %v720_v36, %v721_v31  ;;  %v1033_v45 = vrot.slane %v1026_v40, %v9536_v59 }
 0x128   :  { %v984_v52 = vcombine.high %v968_v33, %v968_v33  ;;  %v1042_v55 = vcombine.high %v1026_v40, %v1026_v40 }
 0x129   :  { %894 = vrot.lane.b32.xlu1 %v893_v37, %s9228_s19  ;;  %876 = vrot.lane.b32.xlu0 %v875_v26, %s9228_s19  ;;  %v1001_v44 = vcombine.high %v975_v39, %v975_v39  ;;  %v1085_v46 = vrot.slane %v1078_v38, %v9536_v59  ;;  %v1058_v47 = vcombine.high %v1033_v45, %v1033_v45 }
 0x12a   :  { %v1142_v49 = vrot.slane %v1135_v43, %v9536_v59  ;;  %v991_v54 = vrot.slane %v984_v52, %v9536_v59  ;;  %v1049_v57 = vrot.slane %v1042_v55, %v9536_v59 }
 0x12b   :  { %v1092_v48 = vrot.slane %v1085_v46, %v9536_v59  ;;  %v1101_v58 = vcombine.high %v1085_v46, %v1085_v46 }
 0x12c   :  { %v1149_v51 = vrot.slane %v1142_v49, %v9536_v59  ;;  %v1010_v56 = vcombine.high %v991_v54, %v991_v54  ;;  %v1067_v60 = vcombine.high %v1049_v57, %v1049_v57  ;;  %v1158_v62 = vcombine.high %v1142_v49, %v1142_v49 }
 0x12d   :  { %951 = vrot.lane.b32.xlu1 %v950_v42, %s9228_s19  ;;  %933 = vrot.lane.b32.xlu0 %v932_v41, %s9228_s19  ;;  %v1117_v50 = vcombine.high %v1092_v48, %v1092_v48  ;;  %v1108_v61 = vrot.slane %v1101_v58, %v9536_v59  ;;  %v9659_v42 = vld [vmem:[#allocation5 + $0x70] ss:$8 sps:$4 sm:$0xff]  }
 0x12e   :  { %v1174_v53 = vcombine.high %v1149_v51, %v1149_v51  ;;  %v1165_v1 = vrot.slane %v1158_v62, %v9536_v59  ;;  %v9900_v59 = vld [vmem:[#allocation5 + $0x2f4] ss:$8 sps:$4 sm:$0xff]  }
 0x12f   :  { %v1126_v63 = vcombine.high %v1108_v61, %v1108_v61  ;;  %12144 = vst [vmem:[#allocation28_spill] sm:$0xff] %v9900_v59 }
 0x130   :  { %v1183_v2 = vcombine.high %v1165_v1, %v1165_v1 }
 0x131   :  { %1002 = vrot.lane.b32.xlu1 %v1001_v44, %s9228_s19  ;;  %976 = vrot.lane.b32.xlu0 %v975_v39, %s9228_s19 }
 0x135   :  { %1059 = vrot.lane.b32.xlu1 %v1058_v47, %s9228_s19  ;;  %1034 = vrot.lane.b32.xlu0 %v1033_v45, %s9228_s19 }
 0x139   :  { %1118 = vrot.lane.b32.xlu1 %v1117_v50, %s9228_s19  ;;  %1093 = vrot.lane.b32.xlu0 %v1092_v48, %s9228_s19 }
 0x13d   :  { %1175 = vrot.lane.b32.xlu1 %v1174_v53, %s9228_s19  ;;  %1150 = vrot.lane.b32.xlu0 %v1149_v51, %s9228_s19  ;;  %v9667_v53 = vld [vmem:[#allocation5 + $0x64] ss:$8 sps:$4 sm:$0xff]  }
 0x141   :  { %1011 = vrot.lane.b32.xlu1 %v1010_v56, %s9228_s19  ;;  %992 = vrot.lane.b32.xlu0 %v991_v54, %s9228_s19  ;;  %v9669_v54 = vld [vmem:[#allocation5 + $0x110] ss:$8 sps:$4 sm:$0xff]  }
 0x145   :  { %1068 = vrot.lane.b32.xlu1 %v1067_v60, %s9228_s19  ;;  %1050 = vrot.lane.b32.xlu0 %v1049_v57, %s9228_s19  ;;  %v9671_v57 = vld [vmem:[#allocation5 + $0x104] ss:$8 sps:$4 sm:$0xff]  }
 0x149   :  { %1127 = vrot.lane.b32.xlu1 %v1126_v63, %s9228_s19  ;;  %1109 = vrot.lane.b32.xlu0 %v1108_v61, %s9228_s19  ;;  %v9677_v61 = vld [vmem:[#allocation5 + $0x60] ss:$8 sps:$4 sm:$0xff]  }
 0x14d   :  { %1184 = vrot.lane.b32.xlu1 %v1183_v2, %s9228_s19  ;;  %1166 = vrot.lane.b32.xlu0 %v1165_v1, %s9228_s19  ;;  %v9684_v1 = vld [vmem:[#allocation5 + $0x54] ss:$8 sps:$4 sm:$0xff]   ;;  %v9687_v2 = vld [vmem:[#allocation5 + $0x100] ss:$8 sps:$4 sm:$0xff]  }
 0x183   :  { %v802_v3 = vpop.permute.xlu1 %801  ;;  %v740_v4 = vpop.permute.xlu0 %739 }
 0x184   :  { %v803_v7 = vrot.slane %v802_v3, 7  ;;  %v741_v8 = vrot.slane %v740_v4, 7 }
 0x186   :  { %v804_v9 = vsel %vm742_vm14, %v803_v7, %v802_v3  ;;  %v743_v10 = vsel %vm742_vm14, %v741_v8, %v740_v4  ;;  %v9691_v7 = vld [vmem:[#allocation5 + $0x2b4] ss:$8 sps:$4 sm:$0xff]  }
 0x187   :  { %807 = vst.msk [vmem:[#allocation2 + $0x32] ss:$8 sm:$0x7] %vm9625_vm15, %v804_v9  ;;  %750 = vst.msk [vmem:[#allocation2 + $0x30] ss:$8 sm:$0x7] %vm9625_vm15, %v743_v10  ;;  %v827_v11 = vpop.permute.xlu1 %826  ;;  %v770_v12 = vpop.permute.xlu0 %769 }
 0x188   :  { %v828_v13 = vrot.slane %v827_v11, 7  ;;  %v771_v14 = vrot.slane %v770_v12, 7  ;;  %v9696_v10 = vld [vmem:[#allocation5 + $0x50] ss:$8 sps:$4 sm:$0xff]  }
 0x18a   :  { %v829_v15 = vsel %vm742_vm14, %v828_v13, %v827_v11  ;;  %v772_v16 = vsel %vm742_vm14, %v771_v14, %v770_v12  ;;  %v9703_v11 = vld [vmem:[#allocation5 + $0x44] ss:$8 sps:$4 sm:$0xff]  }
 0x18b   :  { %832 = vst.msk [vmem:[#allocation2 + $0x33] ss:$8 sm:$0x7] %vm9625_vm15, %v829_v15  ;;  %775 = vst.msk [vmem:[#allocation2 + $0x31] ss:$8 sm:$0x7] %vm9625_vm15, %v772_v16  ;;  %v886_v18 = vpop.permute.xlu1 %885  ;;  %v861_v19 = vpop.permute.xlu0 %860 }
 0x18c   :  { %v887_v20 = vrot.slane %v886_v18, 7  ;;  %v862_v21 = vrot.slane %v861_v19, 7  ;;  %v9708_v16 = vld [vmem:[#allocation5 + $0x40] ss:$8 sps:$4 sm:$0xff]  }
 0x18e   :  { %v888_v22 = vsel %vm742_vm14, %v887_v20, %v886_v18  ;;  %v863_v24 = vsel %vm742_vm14, %v862_v21, %v861_v19  ;;  %v9713_v20 = vld [vmem:[#allocation5 + $0x34] ss:$8 sps:$4 sm:$0xff]  }
 0x18f   :  { %891 = vst.msk [vmem:[#allocation2 + $0x35] ss:$8 sm:$0x7] %vm9625_vm15, %v888_v22  ;;  %866 = vst.msk [vmem:[#allocation2 + $0x34] ss:$8 sm:$0x7] %vm9625_vm15, %v863_v24  ;;  %v943_v25 = vpop.permute.xlu1 %942  ;;  %v918_v27 = vpop.permute.xlu0 %917 }
 0x190   :  { %v944_v26 = vrot.slane %v943_v25, 7  ;;  %v919_v29 = vrot.slane %v918_v27, 7 }
 0x192   :  { %v945_v30 = vsel %vm742_vm14, %v944_v26, %v943_v25  ;;  %v920_v32 = vsel %vm742_vm14, %v919_v29, %v918_v27  ;;  %v9719_v27 = vld [vmem:[#allocation5 + $0x30] ss:$8 sps:$4 sm:$0xff]  }
 0x193   :  { %948 = vst.msk [vmem:[#allocation2 + $0x37] ss:$8 sm:$0x7] %vm9625_vm15, %v945_v30  ;;  %923 = vst.msk [vmem:[#allocation2 + $0x36] ss:$8 sm:$0x7] %vm9625_vm15, %v920_v32  ;;  %v779_v34 = vpop.permute.xlu1 %778  ;;  %v761_v33 = vpop.permute.xlu0 %760 }
 0x194   :  { %v780_v35 = vrot.slane %v779_v34, 7  ;;  %v762_v36 = vrot.slane %v761_v33, 7  ;;  %v9721_v26 = vld [vmem:[#allocation5 + $0x2b0] ss:$8 sps:$4 sm:$0xff]  }
 0x196   :  { %v781_v31 = vsel %vm742_vm14, %v780_v35, %v779_v34  ;;  %v763_v37 = vsel %vm742_vm14, %v762_v36, %v761_v33 }
 0x197   :  { %784 = vst.msk [vmem:[#allocation2 + $0x2] ss:$8 sm:$0x7] %vm9625_vm15, %v781_v31  ;;  %766 = vst.msk [vmem:[#allocation2 + $0x1] ss:$8 sm:$0x7] %vm9625_vm15, %v763_v37  ;;  %v836_v41 = vpop.permute.xlu1 %835  ;;  %v818_v38 = vpop.permute.xlu0 %817 }
 0x198   :  { %v837_v39 = vrot.slane %v836_v41, 7  ;;  %v819_v40 = vrot.slane %v818_v38, 7  ;;  %v9727_v31 = vld [vmem:[#allocation5 + $0x24] ss:$8 sps:$4 sm:$0xff]  }
 0x199   :  { %v9729_v37 = vld [vmem:[#allocation5 + $0x2a4] ss:$8 sps:$4 sm:$0xff]  }
 0x19a   :  { %v838_v43 = vsel %vm742_vm14, %v837_v39, %v836_v41  ;;  %v820_v44 = vsel %vm742_vm14, %v819_v40, %v818_v38  ;;  %v1235_v45 = vld [vmem:[#allocation2 + $0x38] sm:$0xff]  ;;  %v1236_v46 = vld [vmem:[#allocation2 + $0x40] sm:$0xff]  ;;  %v1234_v47 = vld [vmem:[#allocation2 + $0x30] sm:$0xff] }
 0x19b   :  { %841 = vst.msk [vmem:[#allocation2 + $0x4] ss:$8 sm:$0x7] %vm9625_vm15, %v838_v43  ;;  %823 = vst.msk [vmem:[#allocation2 + $0x3] ss:$8 sm:$0x7] %vm9625_vm15, %v820_v44  ;;  %v895_v48 = vpop.permute.xlu1 %894  ;;  %v877_v49 = vpop.permute.xlu0 %876  ;;  %v1238_v50 = vpack.c.bf16 %v1235_v45, %v1235_v45  ;;  %v1239_v51 = vpack.c.bf16 %v1236_v46, %v1236_v46  ;;  %v1237_v52 = vpack.c.bf16 %v1234_v47, %v1234_v47 }
 0x19c   :  { %v896_v55 = vrot.slane %v895_v48, 7  ;;  %v878_v56 = vrot.slane %v877_v49, 7  ;;  %v9738_v45 = vld [vmem:[#allocation5 + $0x20] ss:$8 sps:$4 sm:$0xff]  }
 0x19d   :  { %1492 = vmatprep.mubr.bf16.mxu0 %v1238_v50  ;;  %7793 = vmatmul.mubr.msk.bf16.vlgmr.msra.gmra.mxu1 %vm73_vm2, %v1239_v51  ;;  %v9740_v46 = vld [vmem:[#allocation5 + $0x2a0] ss:$8 sps:$4 sm:$0xff]   ;;  %v9746_v50 = vld [vmem:[#allocation5 + $0x294] ss:$8 sps:$4 sm:$0xff]  }
 0x19e   :  { %v897_v58 = vsel %vm742_vm14, %v896_v55, %v895_v48  ;;  %v879_v60 = vsel %vm742_vm14, %v878_v56, %v877_v49  ;;  %1726 = vmatpush1.bf16.msra.mxu1 %v9659_v42  ;;  %1493 = vmatmul.mubr.bf16.vlgmr.msra.gmra.mxu0 %v1237_v52  ;;  %v9744_v49 = vld [vmem:[#allocation5 + $0x14] ss:$8 sps:$4 sm:$0xff]   ;;  %v2144_v28 = vld [vmem:[#allocation2 + $0x38] sm:$0xfe] }
 0x19f   :  { %900 = vst.msk [vmem:[#allocation2 + $0x6] ss:$8 sm:$0x7] %vm9625_vm15, %v897_v58  ;;  %882 = vst.msk [vmem:[#allocation2 + $0x5] ss:$8 sm:$0x7] %vm9625_vm15, %v879_v60  ;;  %v952_v62 = vpop.permute.xlu1 %951  ;;  %v934_v63 = vpop.permute.xlu0 %933  ;;  %1727 = vmatprep.subr.bf16.mxu1 %v9667_v53  ;;  %1779 = vmatpush1.bf16.msra.mxu0 %v9669_v54 }
 0x1a0   :  { %v953_v3 = vrot.slane %v952_v62, 7  ;;  %v935_v4 = vrot.slane %v934_v63, 7  ;;  %1780 = vmatprep.subr.bf16.mxu0 %v9671_v57  ;;  %1798 = vmatprep.mubr.bf16.mxu0 %v11865_v0  ;;  %v9896_v0 = vld [vmem:[#allocation5 + $0x300] ss:$8 sps:$4 sm:$0xff]  }
 0x1a1   :  { %12143 = vst [vmem:[#allocation27_spill] sm:$0xff] %v9896_v0 }
 0x1a2   :  { %v954_v8 = vsel %vm742_vm14, %v953_v3, %v952_v62  ;;  %v936_v9 = vsel %vm742_vm14, %v935_v4, %v934_v63  ;;  %1728 = vmatpush1.bf16.msra.mxu1 %v9677_v61  ;;  %v9756_v3 = vld [vmem:[#allocation5 + $0x10] ss:$8 sps:$4 sm:$0xff]  }
 0x1a3   :  { %957 = vst.msk [vmem:[#allocation2 + $0x18] ss:$8 sm:$0x7] %vm9625_vm15, %v954_v8  ;;  %939 = vst.msk [vmem:[#allocation2 + $0x7] ss:$8 sm:$0x7] %vm9625_vm15, %v936_v9  ;;  %1729 = vmatprep.subr.bf16.mxu1 %v9684_v1  ;;  %1781 = vmatpush1.bf16.msra.mxu0 %v9687_v2  ;;  %v1003_v12 = vpop.permute.xlu1 %1002  ;;  %v977_v13 = vpop.permute.xlu0 %976 }
 0x1a4   :  { %2059 = vmatprep.subr.bf16.mxu0 %v9691_v7  ;;  %v1004_v14 = vrot.slane %v1003_v12, 7  ;;  %v978_v15 = vrot.slane %v977_v13, 7  ;;  %v9758_v4 = vld [vmem:[#allocation5 + $0x290] ss:$8 sps:$4 sm:$0xff]   ;;  %v9763_v9 = vld [vmem:[#allocation5 + $0x4] ss:$8 sps:$4 sm:$0xff]  }
 0x1a6   :  { %1730 = vmatpush1.bf16.msra.mxu1 %v9696_v10  ;;  %v1005_v18 = vsel %vm742_vm14, %v1004_v14, %v1003_v12  ;;  %v979_v19 = vsel %vm742_vm14, %v978_v15, %v977_v13  ;;  %v9765_v12 = vld [vmem:[#allocation5 + $0x284] ss:$8 sps:$4 sm:$0xff]  }
 0x1a7   :  { %1731 = vmatprep.subr.bf16.mxu1 %v9703_v11  ;;  %1008 = vst.msk [vmem:[#allocation2 + $0x91] ss:$8 sm:$0x7] %vm9625_vm15, %v1005_v18  ;;  %982 = vst.msk [vmem:[#allocation2 + $0x90] ss:$8 sm:$0x7] %vm9625_vm15, %v979_v19  ;;  %v1060_v21 = vpop.permute.xlu1 %1059  ;;  %v1035_v22 = vpop.permute.xlu0 %1034 }
 0x1a8   :  { %v1061_v24 = vrot.slane %v1060_v21, 7  ;;  %v1036_v25 = vrot.slane %v1035_v22, 7 }
 0x1aa   :  { %1732 = vmatpush1.bf16.msra.mxu1 %v9708_v16  ;;  %v1193_v29 = vld [vmem:[#allocation2 + $0x8] sm:$0xff]  ;;  %v1194_v30 = vld [vmem:[#allocation2 + $0x10] sm:$0xff]  ;;  %v1062_v34 = vsel %vm742_vm14, %v1061_v24, %v1060_v21  ;;  %v1037_v33 = vsel %vm742_vm14, %v1036_v25, %v1035_v22  ;;  %v1811_v41 = vld [vmem:[#allocation2 + $0x20] sm:$0x1] }
 0x1ab   :  { %v1808_v32 = vld [vmem:[#allocation2 + $0x8] sm:$0xfe]  ;;  %1733 = vmatprep.subr.bf16.mxu1 %v9713_v20  ;;  %v1196_v35 = vpack.c.bf16 %v1193_v29, %v1193_v29  ;;  %v1197_v36 = vpack.c.bf16 %v1194_v30, %v1194_v30  ;;  %1065 = vst.msk [vmem:[#allocation2 + $0x93] ss:$8 sm:$0x7] %vm9625_vm15, %v1062_v34  ;;  %v1119_v38 = vpop.permute.xlu1 %1118  ;;  %v1094_v39 = vpop.permute.xlu0 %1093 }
 0x1ac   :  { %1040 = vst.msk [vmem:[#allocation2 + $0x92] ss:$8 sm:$0x7] %vm9625_vm15, %v1037_v33  ;;  %v1814_v40 = vpack.c.bf16 %v1811_v41, %v1808_v32  ;;  %v1120_v43 = vrot.slane %v1119_v38, 7  ;;  %v1095_v44 = vrot.slane %v1094_v39, 7 }
 0x1ad   :  { %1757 = vmatprep.mubr.bf16.mxu1 %v1196_v35  ;;  %7830 = vmatmul.mubr.msk.bf16.vlgmr.msra.gmra.mxu0 %vm73_vm2, %v1197_v36  ;;  %v9774_v21 = vld [vmem:[#allocation5] ss:$8 sps:$4 sm:$0xff]   ;;  %v9782_v29 = vld [vmem:[#allocation5 + $0xf4] ss:$8 sps:$4 sm:$0xff]   ;;  %v9792_v36 = vld [vmem:[#allocation5 + $0xf0] ss:$8 sps:$4 sm:$0xff]  }
 0x1ae   :  { %1734 = vmatpush1.bf16.msra.mxu1 %v9719_v27  ;;  %2060 = vmatpush1.bf16.msra.mxu0 %v9721_v26  ;;  %v1863_v47 = vshll.u32 %v1814_v40, 16  ;;  %v1861_v48 = vshrl.u32 %v1814_v40, 16  ;;  %v1121_v56 = vsel %vm742_vm14, %v1120_v43, %v1119_v38  ;;  %v1096_v58 = vsel %vm742_vm14, %v1095_v44, %v1094_v39  ;;  %v9776_v22 = vld [vmem:[#allocation5 + $0x280] ss:$8 sps:$4 sm:$0xff]   ;;  %v9784_v30 = vld [vmem:[#allocation5 + $0x274] ss:$8 sps:$4 sm:$0xff]  }
 0x1af   :  { %1735 = vmatprep.subr.bf16.mxu1 %v9727_v31  ;;  %2061 = vmatprep.subr.bf16.mxu0 %v9729_v37  ;;  %v1176_v51 = vpop.permute.xlu1 %1175  ;;  %v1151_v52 = vpop.permute.xlu0 %1150  ;;  %1124 = vst.msk [vmem:[#allocation2 + $0x95] ss:$8 sm:$0x7] %vm9625_vm15, %v1121_v56  ;;  %1099 = vst.msk [vmem:[#allocation2 + $0x94] ss:$8 sm:$0x7] %vm9625_vm15, %v1096_v58 }
 0x1b0   :  { %v1865_v55 = vrot.slane %v1863_v47, 1  ;;  %v1177_v60 = vrot.slane %v1176_v51, 7  ;;  %v1152_v62 = vrot.slane %v1151_v52, 7  ;;  %v9794_v41 = vld [vmem:[#allocation5 + $0x270] ss:$8 sps:$4 sm:$0xff]  }
 0x1b1   :  { %v9800_v40 = vld [vmem:[#allocation5 + $0xe4] ss:$8 sps:$4 sm:$0xff]  }
 0x1b2   :  { %1736 = vmatpush1.bf16.msra.mxu1 %v9738_v45  ;;  %2062 = vmatpush1.bf16.msra.mxu0 %v9740_v46  ;;  %v1866_v63 = vor.u32 %v1865_v55, %v1861_v48  ;;  %v1178_v8 = vsel %vm742_vm14, %v1177_v60, %v1176_v51  ;;  %v1153_v13 = vsel %vm742_vm14, %v1152_v62, %v1151_v52  ;;  %v9802_v43 = vld [vmem:[#allocation5 + $0x264] ss:$8 sps:$4 sm:$0xff]   ;;  %v9810_v52 = vld [vmem:[#allocation5 + $0xe0] ss:$8 sps:$4 sm:$0xff]   ;;  %v9818_v60 = vld [vmem:[#allocation5 + $0xd4] ss:$8 sps:$4 sm:$0xff]  }
 0x1b3   :  { %1737 = vmatprep.subr.bf16.mxu1 %v9744_v49  ;;  %2063 = vmatprep.subr.bf16.mxu0 %v9746_v50  ;;  %1181 = vst.msk [vmem:[#allocation2 + $0x97] ss:$8 sm:$0x7] %vm9625_vm15, %v1178_v8  ;;  %v1012_v14 = vpop.permute.xlu1 %1011  ;;  %v993_v15 = vpop.permute.xlu0 %992  ;;  %1156 = vst.msk [vmem:[#allocation2 + $0x96] ss:$8 sm:$0x7] %vm9625_vm15, %v1153_v13 }
 0x1b4   :  { %2091 = vmatprep.mubr.bf16.mxu0 %v1866_v63  ;;  %v1013_v18 = vrot.slane %v1012_v14, 7  ;;  %v994_v19 = vrot.slane %v993_v15, 7  ;;  %v9812_v55 = vld [vmem:[#allocation5 + $0x260] ss:$8 sps:$4 sm:$0xff]   ;;  %v9820_v62 = vld [vmem:[#allocation5 + $0x254] ss:$8 sps:$4 sm:$0xff]  }
 0x1b6   :  { %1738 = vmatpush1.bf16.msra.mxu1 %v9756_v3  ;;  %2064 = vmatpush1.bf16.msra.mxu0 %v9758_v4  ;;  %v1014_v24 = vsel %vm742_vm14, %v1013_v18, %v1012_v14  ;;  %v995_v25 = vsel %vm742_vm14, %v994_v19, %v993_v15  ;;  %v9828_v15 = vld [vmem:[#allocation5 + $0xd0] ss:$8 sps:$4 sm:$0xff]  }
 0x1b7   :  { %1739 = vmatprep.subr.bf16.mxu1 %v9763_v9  ;;  %2065 = vmatprep.subr.bf16.mxu0 %v9765_v12  ;;  %1017 = vst.msk [vmem:[#allocation2 + $0x62] ss:$8 sm:$0x7] %vm9625_vm15, %v1014_v24  ;;  %999 = vst.msk [vmem:[#allocation2 + $0x61] ss:$8 sm:$0x7] %vm9625_vm15, %v995_v25  ;;  %v1069_v32 = vpop.permute.xlu1 %1068  ;;  %v1051_v34 = vpop.permute.xlu0 %1050 }
 0x1b8   :  { %v1070_v33 = vrot.slane %v1069_v32, 7  ;;  %v1052_v35 = vrot.slane %v1051_v34, 7  ;;  %v9830_v18 = vld [vmem:[#allocation5 + $0x250] ss:$8 sps:$4 sm:$0xff]   ;;  %v9836_v25 = vld [vmem:[#allocation5 + $0xc4] ss:$8 sps:$4 sm:$0xff]  }
 0x1ba   :  { %1740 = vmatpush1.bf16.msra.mxu1 %v9774_v21  ;;  %2066 = vmatpush1.bf16.msra.mxu0 %v9776_v22  ;;  %v1071_v38 = vsel %vm742_vm14, %v1070_v33, %v1069_v32  ;;  %v1053_v39 = vsel %vm742_vm14, %v1052_v35, %v1051_v34  ;;  %v9838_v32 = vld [vmem:[#allocation5 + $0x244] ss:$8 sps:$4 sm:$0xff]   ;;  %v9846_v34 = vld [vmem:[#allocation5 + $0xc0] ss:$8 sps:$4 sm:$0xff]   ;;  %v9852_v35 = vld [vmem:[#allocation5 + $0xb4] ss:$8 sps:$4 sm:$0xff]  }
 0x1bb   :  { %1741 = vmatprep.subr.bf16.mxu1 %v9782_v29  ;;  %2067 = vmatprep.subr.bf16.mxu0 %v9784_v30  ;;  %1074 = vst.msk [vmem:[#allocation2 + $0x64] ss:$8 sm:$0x7] %vm9625_vm15, %v1071_v38  ;;  %1056 = vst.msk [vmem:[#allocation2 + $0x63] ss:$8 sm:$0x7] %vm9625_vm15, %v1053_v39  ;;  %v1128_v44 = vpop.permute.xlu1 %1127  ;;  %v1110_v47 = vpop.permute.xlu0 %1109 }
 0x1bc   :  { %v1129_v48 = vrot.slane %v1128_v44, 7  ;;  %v1111_v51 = vrot.slane %v1110_v47, 7  ;;  %v9848_v33 = vld [vmem:[#allocation5 + $0x240] ss:$8 sps:$4 sm:$0xff]   ;;  %v9854_v38 = vld [vmem:[#allocation5 + $0x334] ss:$8 sps:$4 sm:$0xff]  }
 0x1bd   :  { %v9860_v39 = vld [vmem:[#allocation5 + $0x330] ss:$8 sps:$4 sm:$0xff]  }
 0x1be   :  { %1742 = vmatpush2.bf16.msra.mxu1 %v9792_v36  ;;  %2068 = vmatpush1.bf16.msra.mxu0 %v9794_v41  ;;  %v1130_v56 = vsel %vm742_vm14, %v1129_v48, %v1128_v44  ;;  %v1112_v58 = vsel %vm742_vm14, %v1111_v51, %v1110_v47  ;;  %12131 = vst [vmem:[#allocation15_spill] sm:$0xff] %v9860_v39  ;;  %v9864_v44 = vld [vmem:[#allocation5 + $0xa4] ss:$8 sps:$4 sm:$0xff]   ;;  %v9870_v48 = vld [vmem:[#allocation5 + $0xa0] ss:$8 sps:$4 sm:$0xff]  }
 0x1bf   :  { %1743 = vmatprep.subr.bf16.mxu1 %v9800_v40  ;;  %2069 = vmatprep.subr.bf16.mxu0 %v9802_v43  ;;  %1133 = vst.msk [vmem:[#allocation2 + $0x66] ss:$8 sm:$0x7] %vm9625_vm15, %v1130_v56  ;;  %1115 = vst.msk [vmem:[#allocation2 + $0x65] ss:$8 sm:$0x7] %vm9625_vm15, %v1112_v58  ;;  %v1185_v63 = vpop.permute.xlu1 %1184  ;;  %v1167_v8 = vpop.permute.xlu0 %1166 }
 0x1c0   :  { %v1186_v13 = vrot.slane %v1185_v63, 7  ;;  %v1168_v14 = vrot.slane %v1167_v8, 7  ;;  %12132 = vst [vmem:[#allocation16_spill] sm:$0xff] %v9864_v44  ;;  %v9866_v47 = vld [vmem:[#allocation5 + $0x324] ss:$8 sps:$4 sm:$0xff]   ;;  %12134 = vst [vmem:[#allocation18_spill] sm:$0xff] %v9870_v48 }
 0x1c1   :  { %12133 = vst [vmem:[#allocation17_spill] sm:$0xff] %v9866_v47  ;;  %v9872_v51 = vld [vmem:[#allocation5 + $0x320] ss:$8 sps:$4 sm:$0xff]   ;;  %v9876_v56 = vld [vmem:[#allocation5 + $0x94] ss:$8 sps:$4 sm:$0xff]  }
 0x1c2   :  { %1744 = vmatpush2.bf16.msra.mxu1 %v9810_v52  ;;  %2070 = vmatpush1.bf16.msra.mxu0 %v9812_v55  ;;  %v1187_v19 = vsel %vm742_vm14, %v1186_v13, %v1185_v63  ;;  %v1169_v24 = vsel %vm742_vm14, %v1168_v14, %v1167_v8  ;;  %12135 = vst [vmem:[#allocation19_spill] sm:$0xff] %v9872_v51  ;;  %12136 = vst [vmem:[#allocation20_spill] sm:$0xff] %v9876_v56  ;;  %v9878_v58 = vld [vmem:[#allocation5 + $0x314] ss:$8 sps:$4 sm:$0xff]   ;;  %v9882_v63 = vld [vmem:[#allocation5 + $0x90] ss:$8 sps:$4 sm:$0xff]  }
 0x1c3   :  { %1745 = vmatprep.subr.bf16.mxu1 %v9818_v60  ;;  %2071 = vmatprep.subr.bf16.mxu0 %v9820_v62  ;;  %1190 = vst.msk [vmem:[#allocation2 + $0x78] ss:$8 sm:$0x7] %vm9625_vm15, %v1187_v19  ;;  %1172 = vst.msk [vmem:[#allocation2 + $0x67] ss:$8 sm:$0x7] %vm9625_vm15, %v1169_v24 }
 0x1c4   :  { %12137 = vst [vmem:[#allocation21_spill] sm:$0xff] %v9878_v58  ;;  %12138 = vst [vmem:[#allocation22_spill] sm:$0xff] %v9882_v63  ;;  %v9884_v8 = vld [vmem:[#allocation5 + $0x310] ss:$8 sps:$4 sm:$0xff]   ;;  %v9888_v13 = vld [vmem:[#allocation5 + $0x84] ss:$8 sps:$4 sm:$0xff]  }
 0x1c5   :  { %12139 = vst [vmem:[#allocation23_spill] sm:$0xff] %v9884_v8  ;;  %12140 = vst [vmem:[#allocation24_spill] sm:$0xff] %v9888_v13  ;;  %v9890_v14 = vld [vmem:[#allocation5 + $0x304] ss:$8 sps:$4 sm:$0xff]   ;;  %v1812_v24 = vld [vmem:[#allocation2 + $0x28] sm:$0x1] }
 0x1c6   :  { %1746 = vmatpush2.bf16.msra.mxu1 %v9828_v15  ;;  %2072 = vmatpush1.bf16.msra.mxu0 %v9830_v18  ;;  %12141 = vst [vmem:[#allocation25_spill] sm:$0xff] %v9890_v14  ;;  %v1809_v19 = vld [vmem:[#allocation2 + $0x10] sm:$0xfe] }
 0x1c7   :  { %1747 = vmatprep.subr.bf16.mxu1 %v9836_v25  ;;  %2073 = vmatprep.subr.bf16.mxu0 %v9838_v32 }
 0x1ca   :  { %1748 = vmatpush2.bf16.msra.mxu1 %v9846_v34  ;;  %2074 = vmatpush1.bf16.msra.mxu0 %v9848_v33 }
 0x1cb   :  { %1749 = vmatprep.subr.bf16.mxu1 %v9852_v35  ;;  %2075 = vmatprep.subr.bf16.mxu0 %v9854_v38 }
 0x1ce   :  { %1750 = vmatpush2.bf16.msra.mxu1 %v9858_v5  ;;  %2076 = vmatpush2.bf16.msra.mxu0 %v9860_v39  ;;  %v9933_v39 = vld [vmem:[#allocation5 + $0x3d0] ss:$8 sps:$4 sm:$0xff]  }
 0x1cf   :  { %1751 = vmatprep.subr.bf16.mxu1 %v9864_v44  ;;  %2077 = vmatprep.subr.bf16.mxu0 %v9866_v47 }
 0x1d2   :  { %1752 = vmatpush2.bf16.msra.mxu1 %v9870_v48  ;;  %2078 = vmatpush2.bf16.msra.mxu0 %v9872_v51  ;;  %v2150_v51 = vpack.c.bf16 %v2147_v17, %v2144_v28  ;;  %v1810_v17 = vld [vmem:[#allocation2 + $0x18] sm:$0x1] }
 0x1d3   :  { %1753 = vmatprep.subr.bf16.mxu1 %v9876_v56  ;;  %2079 = vmatprep.subr.bf16.mxu0 %v9878_v58  ;;  %v1815_v58 = vpack.c.bf16 %v1812_v24, %v1809_v19  ;;  %v1192_v56 = vld [vmem:[#allocation2] sm:$0xff] }
 0x1d4   :  { %v1195_v48 = vpack.c.bf16 %v1192_v56, %v1192_v56  ;;  %v1807_v24 = vld [vmem:[#allocation2] sm:$0xfe]  ;;  %v2199_v28 = vshll.u32 %v2150_v51, 16  ;;  %v9920_v56 = vld [vmem:[#allocation5 + $0x340] ss:$8 sps:$4 sm:$0xff]  }
 0x1d5   :  { %v1870_v19 = vshll.u32 %v1815_v58, 16  ;;  %12151 = vst [vmem:[#allocation35_spill] sm:$0xff] %v9920_v56  ;;  %v1813_v47 = vpack.c.bf16 %v1810_v17, %v1807_v24  ;;  %v1868_v44 = vshrl.u32 %v1815_v58, 16  ;;  %v9939_v17 = vld [vmem:[#allocation5 + $0x3c4] ss:$8 sps:$4 sm:$0xff]  }
 0x1d6   :  { %1754 = vmatpush2.bf16.msra.mxu1 %v9882_v63  ;;  %2080 = vmatpush2.bf16.msra.mxu0 %v9884_v8  ;;  %v9906_v8 = vld [vmem:[#allocation5 + $0x2f0] ss:$8 sps:$4 sm:$0xff]  }
 0x1d7   :  { %1755 = vmatprep.subr.bf16.mxu1 %v9888_v13  ;;  %2081 = vmatprep.subr.bf16.mxu0 %v9890_v14  ;;  %12146 = vst [vmem:[#allocation30_spill] sm:$0xff] %v9906_v8  ;;  %v9908_v63 = vld [vmem:[#allocation5 + $0x350] ss:$8 sps:$4 sm:$0xff]   ;;  %v9912_v14 = vld [vmem:[#allocation5 + $0x2e4] ss:$8 sps:$4 sm:$0xff]   ;;  %v1856_v24 = vshll.u32 %v1813_v47, 16 }
 0x1d8   :  { %12147 = vst [vmem:[#allocation31_spill] sm:$0xff] %v9908_v63  ;;  %12148 = vst [vmem:[#allocation32_spill] sm:$0xff] %v9912_v14  ;;  %v9914_v13 = vld [vmem:[#allocation5 + $0x344] ss:$8 sps:$4 sm:$0xff]   ;;  %v2145_v58 = vld [vmem:[#allocation2 + $0x40] sm:$0xfe] }
 0x1d9   :  { %12149 = vst [vmem:[#allocation33_spill] sm:$0xff] %v9914_v13 }
 0x1da   :  { %1756 = vmatpush2.bf16.msra.mxu1 %v9894_v6  ;;  %2082 = vmatpush2.bf16.msra.mxu0 %v9896_v0  ;;  %v9918_v0 = vld [vmem:[#allocation5 + $0x2e0] ss:$8 sps:$4 sm:$0xff]   ;;  %v9926_v6 = vld [vmem:[#allocation5 + $0x3d4] ss:$8 sps:$4 sm:$0xff]  }
 0x1db   :  { %2083 = vmatprep.subr.bf16.mxu0 %v9900_v59  ;;  %2112 = vmatprep.subr.bf16.mxu1 %v9902_v23  ;;  %12150 = vst [vmem:[#allocation34_spill] sm:$0xff] %v9918_v0  ;;  %v9924_v23 = vld [vmem:[#allocation5 + $0x2d4] ss:$8 sps:$4 sm:$0xff]   ;;  %v1872_v59 = vrot.slane %v1870_v19, 1  ;;  %12153 = vst [vmem:[#allocation37_spill] sm:$0xff] %v9926_v6  ;;  %v2197_v19 = vshrl.u32 %v2150_v51, 16 }
 0x1dc   :  { %12152 = vst [vmem:[#allocation36_spill] sm:$0xff] %v9924_v23  ;;  %v9949_v51 = vld [vmem:[#allocation5 + $0x3b4] ss:$8 sps:$4 sm:$0xff]  }
 0x1dd   :  { %1758 = vmatmul.mubr.bf16.vlgmr.msra.gmra.mxu1 %v1195_v48  ;;  %v12154_v48 = vmov 0   ;;  %12157 = vst [vmem:[#allocation40_spill] sm:$0xff] %v9949_v51 }
 0x1de   :  { %2084 = vmatpush2.bf16.msra.mxu0 %v9906_v8  ;;  %2113 = vmatpush1.bf16.msra.mxu1 %v9908_v63  ;;  %v2201_v8 = vrot.slane %v2199_v28, 1  ;;  %v9931_v63 = vld [vmem:[#allocation5 + $0x2d0] ss:$8 sps:$4 sm:$0xff]   ;;  %v2148_v28 = vld [vmem:[#allocation2 + $0x58] sm:$0x1] }
 0x1df   :  { %2085 = vmatprep.subr.bf16.mxu0 %v9912_v14  ;;  %2114 = vmatprep.subr.bf16.mxu1 %v9914_v13  ;;  %v1873_v13 = vor.u32 %v1872_v59, %v1868_v44  ;;  %v9937_v14 = vld [vmem:[#allocation5 + $0x2c4] ss:$8 sps:$4 sm:$0xff]   ;;  %v9946_v59 = vld [vmem:[#allocation5 + $0x3c0] ss:$8 sps:$4 sm:$0xff]   ;;  %v1858_v44 = vrot.slane %v1856_v24, 1 }
 0x1e0   :  { %2132 = vmatprep.mubr.bf16.mxu1 %v12154_v48  ;;  %12155 = vst [vmem:[#allocation38_spill] sm:$0xff] %v9937_v14  ;;  %12156 = vst [vmem:[#allocation39_spill] sm:$0xff] %v9946_v59  ;;  %v9962_v24 = vld [vmem:[#allocation5 + $0x3a4] ss:$8 sps:$4 sm:$0xff]  }
 0x1e1   :  { %12161 = vst [vmem:[#allocation44_spill] sm:$0xff] %v9962_v24 }
 0x1e2   :  { %2086 = vmatpush2.bf16.msra.mxu0 %v9918_v0  ;;  %2115 = vmatpush1.bf16.msra.mxu1 %v9920_v56  ;;  %v2202_v56 = vor.u32 %v2201_v8, %v2197_v19  ;;  %v9944_v0 = vld [vmem:[#allocation5 + $0x2c0] ss:$8 sps:$4 sm:$0xff]   ;;  %v1854_v8 = vshrl.u32 %v1813_v47, 16  ;;  %v9958_v19 = vld [vmem:[#allocation5 + $0x470] ss:$8 sps:$4 sm:$0xff]  }
 0x1e3   :  { %2087 = vmatprep.subr.bf16.mxu0 %v9924_v23  ;;  %2395 = vmatprep.subr.bf16.mxu1 %v9926_v6  ;;  %v9951_v6 = vld [vmem:[#allocation5 + $0x474] ss:$8 sps:$4 sm:$0xff]   ;;  %v2151_v23 = vpack.c.bf16 %v2148_v28, %v2145_v58  ;;  %12160 = vst [vmem:[#allocation43_spill] sm:$0xff] %v9958_v19  ;;  %v9968_v47 = vld [vmem:[#allocation5 + $0x3a0] ss:$8 sps:$4 sm:$0xff]  }
 0x1e4   :  { %12158 = vst [vmem:[#allocation41_spill] sm:$0xff] %v9951_v6  ;;  %12163 = vst [vmem:[#allocation46_spill] sm:$0xff] %v9968_v47  ;;  %v9970_v28 = vld [vmem:[#allocation5 + $0x460] ss:$8 sps:$4 sm:$0xff]  }
 0x1e5   :  { %7867 = vmatmul.mubr.msk.bf16.vlgmr.msra.gmra.mxu1 %vm73_vm2, %v1873_v13  ;;  %v9956_v13 = vld [vmem:[#allocation5 + $0x3b0] ss:$8 sps:$4 sm:$0xff]   ;;  %v2206_v58 = vshll.u32 %v2151_v23, 16  ;;  %12164 = vst [vmem:[#allocation47_spill] sm:$0xff] %v9970_v28 }
 0x1e6   :  { %2088 = vmatpush2.bf16.msra.mxu0 %v9931_v63  ;;  %2396 = vmatpush1.bf16.msra.mxu1 %v9933_v39  ;;  %12159 = vst [vmem:[#allocation42_spill] sm:$0xff] %v9956_v13 }
 0x1e7   :  { %2427 = vmatprep.mubr.bf16.mxu1 %v2202_v56  ;;  %2089 = vmatprep.subr.bf16.mxu0 %v9937_v14  ;;  %v1859_v56 = vor.u32 %v1858_v44, %v1854_v8  ;;  %v9964_v14 = vld [vmem:[#allocation5 + $0x464] ss:$8 sps:$4 sm:$0xff]   ;;  %v9974_v44 = vld [vmem:[#allocation5 + $0x394] ss:$8 sps:$4 sm:$0xff]   ;;  %v2208_v8 = vrot.slane %v2206_v58, 1 }
 0x1e8   :  { %2397 = vmatprep.subr.bf16.mxu1 %v9939_v17  ;;  %12162 = vst [vmem:[#allocation45_spill] sm:$0xff] %v9964_v14  ;;  %12165 = vst [vmem:[#allocation48_spill] sm:$0xff] %v9974_v44  ;;  %v9986_v58 = vld [vmem:[#allocation5 + $0x380] ss:$8 sps:$4 sm:$0xff]  }
 0x1e9   :  { %12168 = vst [vmem:[#allocation51_spill] sm:$0xff] %v9986_v58 }
 0x1ea   :  { %2090 = vmatpush2.bf16.msra.mxu0 %v9944_v0  ;;  %2398 = vmatpush1.bf16.msra.mxu1 %v9946_v59  ;;  %v9106_v59 = vld [vmem:[#allocation5 + $0x1c4] ss:$8 sps:$4 sm:$0xff]  }
 0x1eb   :  { %2399 = vmatprep.subr.bf16.mxu1 %v9949_v51  ;;  %2448 = vmatprep.subr.bf16.mxu0 %v9951_v6  ;;  %v2204_v6 = vshrl.u32 %v2151_v23, 16  ;;  %v2486_v51 = vld [vmem:[#allocation2 + $0x98] sm:$0xff]  ;;  %v9079_v23 = vld [vmem:[#allocation5 + $0x190] ss:$8 sps:$4 sm:$0xff]  }
 0x1ed   :  { %2092 = vmatmul.mubr.bf16.vlgmr.msra.gmra.mxu0 %v1859_v56  ;;  %v9979_v56 = vld [vmem:[#allocation5 + $0x390] ss:$8 sps:$4 sm:$0xff]  }
 0x1ee   :  { %2400 = vmatpush1.bf16.msra.mxu1 %v9956_v13  ;;  %2449 = vmatpush1.bf16.msra.mxu0 %v9958_v19  ;;  %12166 = vst [vmem:[#allocation49_spill] sm:$0xff] %v9979_v56  ;;  %v2209_v19 = vor.u32 %v2208_v8, %v2204_v6  ;;  %v9078_v13 = vld [vmem:[#allocation5 + $0x194] ss:$8 sps:$4 sm:$0xff]   ;;  %v9081_v6 = vld [vmem:[#allocation5 + $0x180] ss:$8 sps:$4 sm:$0xff]  }
 0x1ef   :  { %2401 = vmatprep.subr.bf16.mxu1 %v9962_v24  ;;  %2450 = vmatprep.subr.bf16.mxu0 %v9964_v14  ;;  %v9982_v24 = vld [vmem:[#allocation5 + $0x384] ss:$8 sps:$4 sm:$0xff]   ;;  %v2489_v14 = vpack.c.bf16 %v2486_v51, %v2486_v51  ;;  %v9992_v51 = vld [vmem:[#allocation5 + $0x370] ss:$8 sps:$4 sm:$0xff]  }
 0x1f0   :  { %2468 = vmatprep.mubr.bf16.mxu0 %v12154_v48  ;;  %12167 = vst [vmem:[#allocation50_spill] sm:$0xff] %v9982_v24  ;;  %12170 = vst [vmem:[#allocation53_spill] sm:$0xff] %v9992_v51  ;;  %v9083_v8 = vld [vmem:[#allocation5 + $0x170] ss:$8 sps:$4 sm:$0xff]  }
 0x1f2   :  { %2402 = vmatpush1.bf16.msra.mxu1 %v9968_v47  ;;  %2451 = vmatpush1.bf16.msra.mxu0 %v9970_v28  ;;  %v9080_v28 = vld [vmem:[#allocation5 + $0x184] ss:$8 sps:$4 sm:$0xff]   ;;  %v9989_v47 = vld [vmem:[#allocation5 + $0x374] ss:$8 sps:$4 sm:$0xff]  }
 0x1f3   :  { %2403 = vmatprep.subr.bf16.mxu1 %v9974_v44  ;;  %2494 = vmatprep.subr.bf16.mxu0 %v9078_v13  ;;  %12169 = vst [vmem:[#allocation52_spill] sm:$0xff] %v9989_v47  ;;  %v9082_v13 = vld [vmem:[#allocation5 + $0x174] ss:$8 sps:$4 sm:$0xff]  }
 0x1f4   :  { %v9103_v44 = vld [vmem:[#allocation5 + $0x234] ss:$8 sps:$4 sm:$0xff]  }
 0x1f5   :  { %7904 = vmatmul.mubr.msk.bf16.vlgmr.msra.gmra.mxu0 %vm73_vm2, %v2209_v19  ;;  %v9995_v19 = vld [vmem:[#allocation5 + $0x364] ss:$8 sps:$4 sm:$0xff]  }
 0x1f6   :  { %2404 = vmatpush1.bf16.msra.mxu1 %v9979_v56  ;;  %2495 = vmatpush1.bf16.msra.mxu0 %v9079_v23  ;;  %12171 = vst [vmem:[#allocation54_spill] sm:$0xff] %v9995_v19  ;;  %v10001_v23 = vld [vmem:[#allocation5 + $0x454] ss:$8 sps:$4 sm:$0xff]  }
 0x1f7   :  { %2405 = vmatprep.subr.bf16.mxu1 %v9982_v24  ;;  %2496 = vmatprep.subr.bf16.mxu0 %v9080_v28  ;;  %v9998_v28 = vld [vmem:[#allocation5 + $0x360] ss:$8 sps:$4 sm:$0xff]   ;;  %12173 = vst [vmem:[#allocation56_spill] sm:$0xff] %v10001_v23 }
 0x1f8   :  { %2526 = vmatprep.mubr.bf16.mxu0 %v2489_v14  ;;  %12172 = vst [vmem:[#allocation55_spill] sm:$0xff] %v9998_v28  ;;  %v9084_v14 = vld [vmem:[#allocation5 + $0x164] ss:$8 sps:$4 sm:$0xff]  }
 0x1fa   :  { %2406 = vmatpush1.bf16.msra.mxu1 %v9986_v58  ;;  %2497 = vmatpush1.bf16.msra.mxu0 %v9081_v6  ;;  %v9085_v6 = vld [vmem:[#allocation5 + $0x160] ss:$8 sps:$4 sm:$0xff]   ;;  %v2146_v58 = vld [vmem:[#allocation2 + $0x48] sm:$0x1] }
 0x1fb   :  { %2407 = vmatprep.subr.bf16.mxu1 %v9989_v47  ;;  %2498 = vmatprep.subr.bf16.mxu0 %v9082_v13  ;;  %v10004_v47 = vld [vmem:[#allocation5 + $0x450] ss:$8 sps:$4 sm:$0xff]   ;;  %v9086_v13 = vld [vmem:[#allocation5 + $0x154] ss:$8 sps:$4 sm:$0xff]  }
 0x1fc   :  { %12174 = vst [vmem:[#allocation57_spill] sm:$0xff] %v10004_v47 }
 0x1fe   :  { %2408 = vmatpush1.bf16.msra.mxu1 %v9992_v51  ;;  %2499 = vmatpush1.bf16.msra.mxu0 %v9083_v8  ;;  %v10007_v51 = vld [vmem:[#allocation5 + $0x444] ss:$8 sps:$4 sm:$0xff]   ;;  %v9087_v8 = vld [vmem:[#allocation5 + $0x150] ss:$8 sps:$4 sm:$0xff]  }
 0x1ff   :  { %2409 = vmatprep.subr.bf16.mxu1 %v9995_v19  ;;  %2500 = vmatprep.subr.bf16.mxu0 %v9084_v14  ;;  %12175 = vst [vmem:[#allocation58_spill] sm:$0xff] %v10007_v51  ;;  %v10010_v19 = vld [vmem:[#allocation5 + $0x440] ss:$8 sps:$4 sm:$0xff]   ;;  %v9088_v14 = vld [vmem:[#allocation5 + $0x144] ss:$8 sps:$4 sm:$0xff]  }
 0x200   :  { %12176 = vst [vmem:[#allocation59_spill] sm:$0xff] %v10010_v19 }
 0x202   :  { %2410 = vmatpush1.bf16.msra.mxu1 %v9998_v28  ;;  %2501 = vmatpush1.bf16.msra.mxu0 %v9085_v6  ;;  %v10013_v28 = vld [vmem:[#allocation5 + $0x434] ss:$8 sps:$4 sm:$0xff]   ;;  %v9089_v6 = vld [vmem:[#allocation5 + $0x140] ss:$8 sps:$4 sm:$0xff]  }
 0x203   :  { %2411 = vmatprep.subr.bf16.mxu1 %v10001_v23  ;;  %2502 = vmatprep.subr.bf16.mxu0 %v9086_v13  ;;  %12177 = vst [vmem:[#allocation60_spill] sm:$0xff] %v10013_v28  ;;  %v10016_v23 = vld [vmem:[#allocation5 + $0x430] ss:$8 sps:$4 sm:$0xff]   ;;  %v9090_v13 = vld [vmem:[#allocation5 + $0x134] ss:$8 sps:$4 sm:$0xff]  }
 0x204   :  { %12178 = vst [vmem:[#allocation61_spill] sm:$0xff] %v10016_v23 }
 0x206   :  { %2412 = vmatpush2.bf16.msra.mxu1 %v10004_v47  ;;  %2503 = vmatpush1.bf16.msra.mxu0 %v9087_v8  ;;  %v10019_v47 = vld [vmem:[#allocation5 + $0x424] ss:$8 sps:$4 sm:$0xff]   ;;  %v9091_v8 = vld [vmem:[#allocation5 + $0x130] ss:$8 sps:$4 sm:$0xff]  }
 0x207   :  { %2413 = vmatprep.subr.bf16.mxu1 %v10007_v51  ;;  %2504 = vmatprep.subr.bf16.mxu0 %v9088_v14  ;;  %12179 = vst [vmem:[#allocation62_spill] sm:$0xff] %v10019_v47  ;;  %v10022_v51 = vld [vmem:[#allocation5 + $0x420] ss:$8 sps:$4 sm:$0xff]   ;;  %v9092_v14 = vld [vmem:[#allocation5 + $0x124] ss:$8 sps:$4 sm:$0xff]  }
 0x208   :  { %12180 = vst [vmem:[#allocation63_spill] sm:$0xff] %v10022_v51 }
 0x20a   :  { %2414 = vmatpush2.bf16.msra.mxu1 %v10010_v19  ;;  %2505 = vmatpush1.bf16.msra.mxu0 %v9089_v6  ;;  %v10025_v19 = vld [vmem:[#allocation5 + $0x414] ss:$8 sps:$4 sm:$0xff]   ;;  %v9093_v6 = vld [vmem:[#allocation5 + $0x120] ss:$8 sps:$4 sm:$0xff]  }
 0x20b   :  { %2415 = vmatprep.subr.bf16.mxu1 %v10013_v28  ;;  %2506 = vmatprep.subr.bf16.mxu0 %v9090_v13  ;;  %12181 = vst [vmem:[#allocation64_spill] sm:$0xff] %v10025_v19  ;;  %v10028_v28 = vld [vmem:[#allocation5 + $0x410] ss:$8 sps:$4 sm:$0xff]   ;;  %v9094_v13 = vld [vmem:[#allocation5 + $0x214] ss:$8 sps:$4 sm:$0xff]  }
 0x20c   :  { %12182 = vst [vmem:[#allocation65_spill] sm:$0xff] %v10028_v28 }
 0x20e   :  { %2416 = vmatpush2.bf16.msra.mxu1 %v10016_v23  ;;  %2507 = vmatpush1.bf16.msra.mxu0 %v9091_v8  ;;  %v10031_v23 = vld [vmem:[#allocation5 + $0x404] ss:$8 sps:$4 sm:$0xff]  }
 0x20f   :  { %2417 = vmatprep.subr.bf16.mxu1 %v10019_v47  ;;  %2508 = vmatprep.subr.bf16.mxu0 %v9092_v14  ;;  %12183 = vst [vmem:[#allocation66_spill] sm:$0xff] %v10031_v23  ;;  %v2143_v8 = vld [vmem:[#allocation2 + $0x30] sm:$0xfe]  ;;  %v9095_v47 = vld [vmem:[#allocation5 + $0x210] ss:$8 sps:$4 sm:$0xff]  }
 0x210   :  { %v10034_v14 = vld [vmem:[#allocation5 + $0x400] ss:$8 sps:$4 sm:$0xff]   ;;  %v2149_v24 = vpack.c.bf16 %v2146_v58, %v2143_v8  ;;  %v9100_v58 = vld [vmem:[#allocation5 + $0x1e4] ss:$8 sps:$4 sm:$0xff]  }
 0x211   :  { %12184 = vst [vmem:[#allocation67_spill] sm:$0xff] %v10034_v14 }
 0x212   :  { %2418 = vmatpush2.bf16.msra.mxu1 %v10022_v51  ;;  %2509 = vmatpush1.bf16.msra.mxu0 %v9093_v6  ;;  %v9096_v51 = vld [vmem:[#allocation5 + $0x204] ss:$8 sps:$4 sm:$0xff]   ;;  %v10037_v6 = vld [vmem:[#allocation5 + $0x3f4] ss:$8 sps:$4 sm:$0xff]   ;;  %v2192_v56 = vshll.u32 %v2149_v24, 16 }
 0x213   :  { %2419 = vmatprep.subr.bf16.mxu1 %v10025_v19  ;;  %2510 = vmatprep.subr.bf16.mxu0 %v9094_v13  ;;  %12185 = vst [vmem:[#allocation68_spill] sm:$0xff] %v10037_v6  ;;  %v9097_v13 = vld [vmem:[#allocation5 + $0x200] ss:$8 sps:$4 sm:$0xff]   ;;  %v10040_v19 = vld [vmem:[#allocation5 + $0x3f0] ss:$8 sps:$4 sm:$0xff]  }
 0x214   :  { %12186 = vst [vmem:[#allocation69_spill] sm:$0xff] %v10040_v19  ;;  %v2194_v8 = vrot.slane %v2192_v56, 1  ;;  %v9108_v56 = vld [vmem:[#allocation5 + $0x1c0] ss:$8 sps:$4 sm:$0xff]  }
 0x216   :  { %2420 = vmatpush2.bf16.msra.mxu1 %v10028_v28  ;;  %2511 = vmatpush2.bf16.msra.mxu0 %v9095_v47  ;;  %v9098_v28 = vld [vmem:[#allocation5 + $0x1f4] ss:$8 sps:$4 sm:$0xff]   ;;  %v10043_v47 = vld [vmem:[#allocation5 + $0x3e4] ss:$8 sps:$4 sm:$0xff]  }
 0x217   :  { %2421 = vmatprep.subr.bf16.mxu1 %v10031_v23  ;;  %2512 = vmatprep.subr.bf16.mxu0 %v9096_v51  ;;  %12187 = vst [vmem:[#allocation70_spill] sm:$0xff] %v10043_v47  ;;  %v9099_v23 = vld [vmem:[#allocation5 + $0x1f0] ss:$8 sps:$4 sm:$0xff]   ;;  %v10046_v51 = vld [vmem:[#allocation5 + $0x3e0] ss:$8 sps:$4 sm:$0xff]  }
 0x21a   :  { %2422 = vmatpush2.bf16.msra.mxu1 %v10034_v14  ;;  %2513 = vmatpush2.bf16.msra.mxu0 %v9097_v13  ;;  %v2190_v13 = vshrl.u32 %v2149_v24, 16  ;;  %v9102_v14 = vld [vmem:[#allocation5 + $0x1d4] ss:$8 sps:$4 sm:$0xff]  }
 0x21b   :  { %2423 = vmatprep.subr.bf16.mxu1 %v10037_v6  ;;  %2514 = vmatprep.subr.bf16.mxu0 %v9098_v28  ;;  %v9101_v6 = vld [vmem:[#allocation5 + $0x1e0] ss:$8 sps:$4 sm:$0xff]   ;;  %v2487_v24 = vld [vmem:[#allocation2 + $0xa0] sm:$0xff] }
 0x21c   :  { %v2195_v28 = vor.u32 %v2194_v8, %v2190_v13  ;;  %v9111_v8 = vld [vmem:[#allocation5 + $0x74] ss:$8 sps:$4 sm:$0xff]   ;;  %v9112_v13 = vld [vmem:[#allocation5 + $0x1b0] ss:$8 sps:$4 sm:$0xff]  }
 0x21e   :  { %2424 = vmatpush2.bf16.msra.mxu1 %v10040_v19  ;;  %2515 = vmatpush2.bf16.msra.mxu0 %v9099_v23  ;;  %v9104_v19 = vld [vmem:[#allocation5 + $0x1d0] ss:$8 sps:$4 sm:$0xff]  }
 0x21f   :  { %2425 = vmatprep.subr.bf16.mxu1 %v10043_v47  ;;  %2516 = vmatprep.subr.bf16.mxu0 %v9100_v58  ;;  %v9105_v23 = vld [vmem:[#allocation5 + $0x230] ss:$8 sps:$4 sm:$0xff]   ;;  %v9107_v47 = vld [vmem:[#allocation5 + $0x224] ss:$8 sps:$4 sm:$0xff]  }
 0x220   :  { %v2480_v58 = vld [vmem:[#allocation2 + $0x68] sm:$0xff] }
 0x222   :  { %2426 = vmatpush2.bf16.msra.mxu1 %v10046_v51  ;;  %2517 = vmatpush2.bf16.msra.mxu0 %v9101_v6  ;;  %v9109_v6 = vld [vmem:[#allocation5 + $0x220] ss:$8 sps:$4 sm:$0xff]  }
 0x223   :  { %2518 = vmatprep.subr.bf16.mxu0 %v9102_v14  ;;  %2547 = vmatprep.subr.bf16.mxu1 %v9103_v44  ;;  %v9110_v14 = vld [vmem:[#allocation5 + $0x1b4] ss:$8 sps:$4 sm:$0xff]   ;;  %v2490_v44 = vpack.c.bf16 %v2487_v24, %v2487_v24 }
 0x225   :  { %2428 = vmatmul.mubr.bf16.vlgmr.msra.gmra.mxu1 %v2195_v28  ;;  %v9113_v28 = vld [vmem:[#allocation5 + $0x1a4] ss:$8 sps:$4 sm:$0xff]  }
 0x226   :  { %2519 = vmatpush2.bf16.msra.mxu0 %v9104_v19  ;;  %2548 = vmatpush1.bf16.msra.mxu1 %v9105_v23  ;;  %v2483_v19 = vpack.c.bf16 %v2480_v58, %v2480_v58  ;;  %v2485_v23 = vld [vmem:[#allocation2 + $0x90] sm:$0xff]  ;;  %v9115_v58 = vld [vmem:[#allocation5 + $0x114] ss:$8 sps:$4 sm:$0xff]  }
 0x227   :  { %2520 = vmatprep.subr.bf16.mxu0 %v9106_v59  ;;  %2549 = vmatprep.subr.bf16.mxu1 %v9107_v47  ;;  %v2662_v59 = vld [vmem:[#allocation2 + $0x68] sm:$0xfe]  ;;  %v2665_v47 = vld [vmem:[#allocation2 + $0x80] sm:$0x1]  ;;  %v2488_v24 = vpack.c.bf16 %v2485_v23, %v2485_v23 }
 0x228   :  { %2567 = vmatprep.mubr.bf16.mxu1 %v12154_v48 }
 0x22a   :  { %2521 = vmatpush2.bf16.msra.mxu0 %v9108_v56  ;;  %2550 = vmatpush1.bf16.msra.mxu1 %v9109_v6  ;;  %v2668_v56 = vpack.c.bf16 %v2665_v47, %v2662_v59  ;;  %v9114_v6 = vld [vmem:[#allocation5 + $0x1a0] ss:$8 sps:$4 sm:$0xff]  }
 0x22b   :  { %2522 = vmatprep.subr.bf16.mxu0 %v9110_v14  ;;  %2579 = vmatprep.subr.bf16.mxu1 %v9111_v8  ;;  %v12205_v8 = vld [vmem:[#allocation32_spill] sm:$0xff] }
 0x22c   :  { %v2678_v14 = vshrl.u32 %v2668_v56, 16 }
 0x22d   :  { %7905 = vmatmul.mubr.msk.bf16.vlgmr.msra.gmra.mxu1 %vm73_vm2, %v2490_v44 }
 0x22e   :  { %2523 = vmatpush2.bf16.msra.mxu0 %v9112_v13  ;;  %2580 = vmatpush1.bf16.msra.mxu1 %v9659_v42  ;;  %v2680_v42 = vshll.u32 %v2668_v56, 16 }
 0x22f   :  { %2611 = vmatprep.mubr.bf16.mxu1 %v2483_v19  ;;  %2524 = vmatprep.subr.bf16.mxu0 %v9113_v28  ;;  %v12206_v19 = vld [vmem:[#allocation33_spill] sm:$0xff] }
 0x230   :  { %2581 = vmatprep.subr.bf16.mxu1 %v9667_v53  ;;  %v2481_v53 = vld [vmem:[#allocation2 + $0x70] sm:$0xff] }
 0x232   :  { %2525 = vmatpush2.bf16.msra.mxu0 %v9114_v6  ;;  %2582 = vmatpush1.bf16.msra.mxu1 %v9677_v61  ;;  %v2682_v61 = vrot.slane %v2680_v42, 1  ;;  %v12207_v6 = vld [vmem:[#allocation34_spill] sm:$0xff]  ;;  %v12209_v42 = vld [vmem:[#allocation36_spill] sm:$0xff] }
 0x233   :  { %2583 = vmatprep.subr.bf16.mxu1 %v9684_v1  ;;  %2632 = vmatprep.subr.bf16.mxu0 %v9115_v58  ;;  %v2484_v1 = vpack.c.bf16 %v2481_v53, %v2481_v53 }
 0x235   :  { %2527 = vmatmul.mubr.bf16.vlgmr.msra.gmra.mxu0 %v2488_v24  ;;  %v12208_v24 = vld [vmem:[#allocation35_spill] sm:$0xff] }
 0x236   :  { %2584 = vmatpush1.bf16.msra.mxu1 %v9696_v10  ;;  %2633 = vmatpush1.bf16.msra.mxu0 %v9669_v54  ;;  %v2683_v54 = vor.u32 %v2682_v61, %v2678_v14  ;;  %v12210_v14 = vld [vmem:[#allocation37_spill] sm:$0xff] }
 0x237   :  { %2585 = vmatprep.subr.bf16.mxu1 %v9703_v11  ;;  %2634 = vmatprep.subr.bf16.mxu0 %v9671_v57 }
 0x238   :  { %2652 = vmatprep.mubr.bf16.mxu0 %v12154_v48 }
 0x23a   :  { %2586 = vmatpush1.bf16.msra.mxu1 %v9708_v16  ;;  %2635 = vmatpush1.bf16.msra.mxu0 %v9687_v2  ;;  %v12188_v2 = vld [vmem:[#allocation15_spill] sm:$0xff]  ;;  %v12189_v16 = vld [vmem:[#allocation16_spill] sm:$0xff] }
 0x23b   :  { %2587 = vmatprep.subr.bf16.mxu1 %v9713_v20  ;;  %2696 = vmatprep.subr.bf16.mxu0 %v9691_v7  ;;  %v12190_v20 = vld [vmem:[#allocation17_spill] sm:$0xff] }
 0x23d   :  { %7906 = vmatmul.mubr.msk.bf16.vlgmr.msra.gmra.mxu0 %vm73_vm2, %v2484_v1  ;;  %v2782_v1 = vld [vmem:[#allocation2 + $0xa0] sm:$0xfe] }
 0x23e   :  { %2588 = vmatpush1.bf16.msra.mxu1 %v9719_v27  ;;  %2697 = vmatpush1.bf16.msra.mxu0 %v9721_v26 }
 0x23f   :  { %2728 = vmatprep.mubr.bf16.mxu0 %v2683_v54  ;;  %2589 = vmatprep.subr.bf16.mxu1 %v9727_v31  ;;  %v2785_v54 = vld [vmem:[#allocation2 + $0xb8] sm:$0x1] }
 0x240   :  { %2698 = vmatprep.subr.bf16.mxu0 %v9729_v37  ;;  %v12191_v37 = vld [vmem:[#allocation18_spill] sm:$0xff] }
 0x242   :  { %2590 = vmatpush1.bf16.msra.mxu1 %v9738_v45  ;;  %2699 = vmatpush1.bf16.msra.mxu0 %v9740_v46  ;;  %v12192_v45 = vld [vmem:[#allocation19_spill] sm:$0xff] }
 0x243   :  { %2591 = vmatprep.subr.bf16.mxu1 %v9744_v49  ;;  %2700 = vmatprep.subr.bf16.mxu0 %v9746_v50  ;;  %v12193_v50 = vld [vmem:[#allocation20_spill] sm:$0xff] }
 0x246   :  { %2592 = vmatpush1.bf16.msra.mxu1 %v9756_v3  ;;  %2701 = vmatpush1.bf16.msra.mxu0 %v9758_v4  ;;  %v12194_v3 = vld [vmem:[#allocation21_spill] sm:$0xff] }
 0x247   :  { %2593 = vmatprep.subr.bf16.mxu1 %v9763_v9  ;;  %2702 = vmatprep.subr.bf16.mxu0 %v9765_v12  ;;  %v2663_v9 = vld [vmem:[#allocation2 + $0x70] sm:$0xfe]  ;;  %v2666_v12 = vld [vmem:[#allocation2 + $0x88] sm:$0x1] }
 0x24a   :  { %2594 = vmatpush1.bf16.msra.mxu1 %v9774_v21  ;;  %2703 = vmatpush1.bf16.msra.mxu0 %v9776_v22  ;;  %v12195_v21 = vld [vmem:[#allocation22_spill] sm:$0xff]  ;;  %v12196_v22 = vld [vmem:[#allocation23_spill] sm:$0xff] }
 0x24b   :  { %2595 = vmatprep.subr.bf16.mxu1 %v9782_v29  ;;  %2704 = vmatprep.subr.bf16.mxu0 %v9784_v30  ;;  %v2781_v29 = vld [vmem:[#allocation2 + $0x98] sm:$0xfe]  ;;  %v2784_v30 = vld [vmem:[#allocation2 + $0xb0] sm:$0x1] }
 0x24e   :  { %2596 = vmatpush2.bf16.msra.mxu1 %v9792_v36  ;;  %2705 = vmatpush1.bf16.msra.mxu0 %v9794_v41  ;;  %v12197_v36 = vld [vmem:[#allocation24_spill] sm:$0xff]  ;;  %v12198_v41 = vld [vmem:[#allocation25_spill] sm:$0xff] }
 0x24f   :  { %2597 = vmatprep.subr.bf16.mxu1 %v9800_v40  ;;  %2706 = vmatprep.subr.bf16.mxu0 %v9802_v43  ;;  %v2669_v40 = vpack.c.bf16 %v2666_v12, %v2663_v9  ;;  %v2479_v43 = vld [vmem:[#allocation2 + $0x60] sm:$0xff]  ;;  %v12222_v12 = vld [vmem:[#allocation49_spill] sm:$0xff] }
 0x251   :  { %v2685_v13 = vshrl.u32 %v2669_v40, 16 }
 0x252   :  { %2598 = vmatpush2.bf16.msra.mxu1 %v9810_v52  ;;  %2707 = vmatpush1.bf16.msra.mxu0 %v9812_v55  ;;  %v2787_v52 = vpack.c.bf16 %v2784_v30, %v2781_v29  ;;  %v12199_v55 = vld [vmem:[#allocation26_spill] sm:$0xff]  ;;  %v12225_v29 = vld [vmem:[#allocation52_spill] sm:$0xff]  ;;  %v12226_v30 = vld [vmem:[#allocation53_spill] sm:$0xff] }
 0x253   :  { %2599 = vmatprep.subr.bf16.mxu1 %v9818_v60  ;;  %2708 = vmatprep.subr.bf16.mxu0 %v9820_v62  ;;  %v12200_v60 = vld [vmem:[#allocation27_spill] sm:$0xff]  ;;  %v2482_v62 = vpack.c.bf16 %v2479_v43, %v2479_v43  ;;  %v12230_v43 = vld [vmem:[#allocation57_spill] sm:$0xff] }
 0x254   :  { %v2797_v23 = vshrl.u32 %v2787_v52, 16 }
 0x256   :  { %2600 = vmatpush2.bf16.msra.mxu1 %v9828_v15  ;;  %2709 = vmatpush1.bf16.msra.mxu0 %v9830_v18  ;;  %v12201_v15 = vld [vmem:[#allocation28_spill] sm:$0xff]  ;;  %v12202_v18 = vld [vmem:[#allocation29_spill] sm:$0xff] }
 0x257   :  { %2601 = vmatprep.subr.bf16.mxu1 %v9836_v25  ;;  %2710 = vmatprep.subr.bf16.mxu0 %v9838_v32  ;;  %v2687_v25 = vshll.u32 %v2669_v40, 16  ;;  %v2661_v32 = vld [vmem:[#allocation2 + $0x60] sm:$0xfe]  ;;  %v12229_v40 = vld [vmem:[#allocation56_spill] sm:$0xff] }
 0x259   :  { %v2689_v59 = vrot.slane %v2687_v25, 1 }
 0x25a   :  { %2602 = vmatpush2.bf16.msra.mxu1 %v9846_v34  ;;  %2711 = vmatpush1.bf16.msra.mxu0 %v9848_v33  ;;  %v2664_v34 = vld [vmem:[#allocation2 + $0x78] sm:$0x1] }
 0x25b   :  { %2603 = vmatprep.subr.bf16.mxu1 %v9852_v35  ;;  %2712 = vmatprep.subr.bf16.mxu0 %v9854_v38  ;;  %v2799_v35 = vshll.u32 %v2787_v52, 16  ;;  %v12203_v38 = vld [vmem:[#allocation30_spill] sm:$0xff]  ;;  %v2667_v47 = vpack.c.bf16 %v2664_v34, %v2661_v32  ;;  %v2690_v53 = vor.u32 %v2689_v59, %v2685_v13  ;;  %v12237_v13 = vld [vmem:[#allocation64_spill] sm:$0xff] }
 0x25c   :  { %v12231_v52 = vld [vmem:[#allocation58_spill] sm:$0xff]  ;;  %v2780_v59 = vld [vmem:[#allocation2 + $0x90] sm:$0xfe] }
 0x25d   :  { %v1535_v57 = vpop.f32.mrf.mxu1  ;;  %v2801_v56 = vrot.slane %v2799_v35, 1  ;;  %v2673_v61 = vshll.u32 %v2667_v47, 16  ;;  %v12235_v32 = vld [vmem:[#allocation62_spill] sm:$0xff] }
 0x25e   :  { %2604 = vmatpush2.bf16.msra.mxu1 %v9858_v5  ;;  %2713 = vmatpush2.bf16.msra.mxu0 %v12188_v2  ;;  %v1494_v7 = vpop.f32.mrf.mxu0  ;;  %v12204_v5 = vld [vmem:[#allocation31_spill] sm:$0xff]  ;;  %v12211_v2 = vld [vmem:[#allocation38_spill] sm:$0xff] }
 0x25f   :  { %v10100_v10 = vadd.f32 %v1535_v57, %v1494_v7  ;;  %v1537_v11 = vpop.f32.mrf.mxu1  ;;  %2605 = vmatprep.subr.bf16.mxu1 %v12189_v16  ;;  %2714 = vmatprep.subr.bf16.mxu0 %v12190_v20  ;;  %v2802_v57 = vor.u32 %v2801_v56, %v2797_v23  ;;  %v2671_v7 = vshrl.u32 %v2667_v47, 16  ;;  %v2788_v16 = vpack.c.bf16 %v2785_v54, %v2782_v1  ;;  %v12212_v20 = vld [vmem:[#allocation39_spill] sm:$0xff]  ;;  %v12239_v56 = vld [vmem:[#allocation66_spill] sm:$0xff] }
 0x260   :  { %v1496_v27 = vpop.f32.mrf.mxu0  ;;  %v2783_v47 = vld [vmem:[#allocation2 + $0xa8] sm:$0x1]  ;;  %v12243_v1 = vld [vmem:[#allocation70_spill] sm:$0xff] }
 0x261   :  { %v10104_v26 = vadd.f32 %v1537_v11, %v1496_v27  ;;  %v1539_v31 = vpop.f32.mrf.mxu1  ;;  %v2675_v11 = vrot.slane %v2673_v61, 1 }
 0x262   :  { %2606 = vmatpush2.bf16.msra.mxu1 %v12191_v37  ;;  %2715 = vmatpush2.bf16.msra.mxu0 %v12192_v45  ;;  %v1498_v46 = vpop.f32.mrf.mxu0  ;;  %v12213_v31 = vld [vmem:[#allocation40_spill] sm:$0xff]  ;;  %v12214_v37 = vld [vmem:[#allocation41_spill] sm:$0xff]  ;;  %v12216_v45 = vld [vmem:[#allocation43_spill] sm:$0xff] }
 0x263   :  { %v1540_v49 = vpop.f32.mrf.mxu1  ;;  %2607 = vmatprep.subr.bf16.mxu1 %v12193_v50  ;;  %2716 = vmatprep.subr.bf16.mxu0 %v12194_v3  ;;  %v2676_v27 = vor.u32 %v2675_v11, %v2671_v7  ;;  %v12217_v46 = vld [vmem:[#allocation44_spill] sm:$0xff]  ;;  %v12220_v3 = vld [vmem:[#allocation47_spill] sm:$0xff] }
 0x264   :  { %v1499_v4 = vpop.f32.mrf.mxu0  ;;  %v12218_v49 = vld [vmem:[#allocation45_spill] sm:$0xff] }
 0x265   :  { %v12221_v4 = vld [vmem:[#allocation48_spill] sm:$0xff] }
 0x266   :  { %2608 = vmatpush2.bf16.msra.mxu1 %v12195_v21  ;;  %2717 = vmatpush2.bf16.msra.mxu0 %v12196_v22  ;;  %v12223_v21 = vld [vmem:[#allocation50_spill] sm:$0xff]  ;;  %v12224_v22 = vld [vmem:[#allocation51_spill] sm:$0xff] }
 0x267   :  { %2609 = vmatprep.subr.bf16.mxu1 %v12197_v36  ;;  %2718 = vmatprep.subr.bf16.mxu0 %v12198_v41  ;;  %v12227_v36 = vld [vmem:[#allocation54_spill] sm:$0xff]  ;;  %v12228_v41 = vld [vmem:[#allocation55_spill] sm:$0xff] }
 0x26a   :  { %2610 = vmatpush2.bf16.msra.mxu1 %v12199_v55  ;;  %2719 = vmatpush2.bf16.msra.mxu0 %v12200_v60  ;;  %v12232_v55 = vld [vmem:[#allocation59_spill] sm:$0xff]  ;;  %v12233_v60 = vld [vmem:[#allocation60_spill] sm:$0xff] }
 0x26b   :  { %2720 = vmatprep.subr.bf16.mxu0 %v12201_v15  ;;  %2749 = vmatprep.subr.bf16.mxu1 %v12202_v18  ;;  %v12234_v18 = vld [vmem:[#allocation61_spill] sm:$0xff] }
 0x26d   :  { %2612 = vmatmul.mubr.bf16.vlgmr.msra.gmra.mxu1 %v2482_v62  ;;  %v10118_v33 = vpop.f32.mrf.mxu0 }
 0x26e   :  { %2721 = vmatpush2.bf16.msra.mxu0 %v12203_v38  ;;  %2750 = vmatpush1.bf16.msra.mxu1 %v12204_v5 }
 0x26f   :  { %v10122_v44 = vpop.f32.mrf.mxu0  ;;  %2722 = vmatprep.subr.bf16.mxu0 %v12205_v8  ;;  %2751 = vmatprep.subr.bf16.mxu1 %v12206_v19  ;;  %v12236_v8 = vld [vmem:[#allocation63_spill] sm:$0xff] }
 0x270   :  { %2769 = vmatprep.mubr.bf16.mxu1 %v12154_v48 }
 0x271   :  { %v1804_v28 = vpop.f32.mrf.mxu0 }
 0x272   :  { %2723 = vmatpush2.bf16.msra.mxu0 %v12207_v6  ;;  %2752 = vmatpush1.bf16.msra.mxu1 %v12208_v24  ;;  %v12238_v28 = vld [vmem:[#allocation65_spill] sm:$0xff]  ;;  %v2786_v6 = vpack.c.bf16 %v2783_v47, %v2780_v59  ;;  %v12240_v24 = vld [vmem:[#allocation67_spill] sm:$0xff] }
 0x273   :  { %v1805_v58 = vpop.f32.mrf.mxu0  ;;  %2724 = vmatprep.subr.bf16.mxu0 %v12209_v42  ;;  %2815 = vmatprep.subr.bf16.mxu1 %v12210_v14  ;;  %v12242_v14 = vld [vmem:[#allocation69_spill] sm:$0xff] }
 0x274   :  { %v12241_v58 = vld [vmem:[#allocation68_spill] sm:$0xff]  ;;  %v2790_v54 = vshrl.u32 %v2786_v6, 16 }
 0x275   :  { %7907 = vmatmul.mubr.msk.bf16.vlgmr.msra.gmra.mxu1 %vm73_vm2, %v2690_v53 }
 0x276   :  { %2725 = vmatpush2.bf16.msra.mxu0 %v9931_v63  ;;  %2816 = vmatpush1.bf16.msra.mxu1 %v9933_v39  ;;  %v2806_v63 = vshll.u32 %v2788_v16, 16  ;;  %v12215_v39 = vld [vmem:[#allocation42_spill] sm:$0xff] }
 0x277   :  { %2847 = vmatprep.mubr.bf16.mxu1 %v2802_v57  ;;  %2726 = vmatprep.subr.bf16.mxu0 %v12211_v2 }
 0x278   :  { %2817 = vmatprep.subr.bf16.mxu1 %v9939_v17  ;;  %v2804_v17 = vshrl.u32 %v2788_v16, 16  ;;  %v2808_v50 = vrot.slane %v2806_v63, 1 }
 0x27a   :  { %2727 = vmatpush2.bf16.msra.mxu0 %v9944_v0  ;;  %2818 = vmatpush1.bf16.msra.mxu1 %v12212_v20  ;;  %v12219_v0 = vld [vmem:[#allocation46_spill] sm:$0xff]  ;;  %v2809_v9 = vor.u32 %v2808_v50, %v2804_v17 }
 0x27b   :  { %2819 = vmatprep.subr.bf16.mxu1 %v12213_v31  ;;  %2868 = vmatprep.subr.bf16.mxu0 %v12214_v37 }
 0x27d   :  { %2729 = vmatmul.mubr.bf16.vlgmr.msra.gmra.mxu0 %v2676_v27 }
 0x27e   :  { %2820 = vmatpush1.bf16.msra.mxu1 %v12215_v39  ;;  %2869 = vmatpush1.bf16.msra.mxu0 %v12216_v45 }
 0x27f   :  { %2821 = vmatprep.subr.bf16.mxu1 %v12217_v46  ;;  %2870 = vmatprep.subr.bf16.mxu0 %v12218_v49 }
 0x280   :  { %2888 = vmatprep.mubr.bf16.mxu0 %v12154_v48 }
 0x282   :  { %2822 = vmatpush1.bf16.msra.mxu1 %v12219_v0  ;;  %2871 = vmatpush1.bf16.msra.mxu0 %v12220_v3 }
 0x283   :  { %2823 = vmatprep.subr.bf16.mxu1 %v12221_v4 }
 0x285   :  { %7908 = vmatmul.mubr.msk.bf16.vlgmr.msra.gmra.mxu0 %vm73_vm2, %v2809_v9 }
 0x286   :  { %2824 = vmatpush1.bf16.msra.mxu1 %v12222_v12 }
 0x287   :  { %2825 = vmatprep.subr.bf16.mxu1 %v12223_v21 }
 0x28a   :  { %2826 = vmatpush1.bf16.msra.mxu1 %v12224_v22 }
 0x28b   :  { %2827 = vmatprep.subr.bf16.mxu1 %v12225_v29 }
 0x28e   :  { %2828 = vmatpush1.bf16.msra.mxu1 %v12226_v30 }
 0x28f   :  { %2829 = vmatprep.subr.bf16.mxu1 %v12227_v36 }
 0x292   :  { %2830 = vmatpush1.bf16.msra.mxu1 %v12228_v41 }
 0x293   :  { %2831 = vmatprep.subr.bf16.mxu1 %v12229_v40 }
 0x296   :  { %2832 = vmatpush2.bf16.msra.mxu1 %v12230_v43 }
 0x297   :  { %2833 = vmatprep.subr.bf16.mxu1 %v12231_v52 }
 0x29a   :  { %2834 = vmatpush2.bf16.msra.mxu1 %v12232_v55 }
 0x29b   :  { %2835 = vmatprep.subr.bf16.mxu1 %v12233_v60 }
 0x29d   :  { %v1759_v62 = vpop.f32.mrf.mxu1 }
 0x29e   :  { %v1760_v15 = vadd.f32 %v1759_v62, %v10100_v10  ;;  %2836 = vmatpush2.bf16.msra.mxu1 %v12234_v18 }
 0x29f   :  { %v1761_v25 = vpop.f32.mrf.mxu1  ;;  %2837 = vmatprep.subr.bf16.mxu1 %v12235_v32 }
 0x2a0   :  { %v1801_v34 = vadd.f32 %v10118_v33, %v1760_v15  ;;  %v1762_v35 = vadd.f32 %v1761_v25, %v10104_v26 }
 0x2a1   :  { %v1763_v38 = vpop.f32.mrf.mxu1 }
 0x2a2   :  { %v1803_v5 = vadd.f32 %v10122_v44, %v1762_v35  ;;  %2838 = vmatpush2.bf16.msra.mxu1 %v12236_v8  ;;  %v2792_v44 = vshll.u32 %v2786_v6, 16 }
 0x2a3   :  { %v1764_v19 = vpop.f32.mrf.mxu1  ;;  %2839 = vmatprep.subr.bf16.mxu1 %v12237_v13 }
 0x2a4   :  { %v2794_v57 = vrot.slane %v2792_v44, 1 }
 0x2a5   :  { %v2134_v10 = vpop.f32.mrf.mxu1 }
 0x2a6   :  { %2840 = vmatpush2.bf16.msra.mxu1 %v12238_v28  ;;  %v2795_v27 = vor.u32 %v2794_v57, %v2790_v54 }
 0x2a7   :  { %v2136_v23 = vpop.f32.mrf.mxu1  ;;  %2841 = vmatprep.subr.bf16.mxu1 %v12239_v56 }
 0x2a9   :  { %v2138_v33 = vpop.f32.mrf.mxu1 }
 0x2aa   :  { %2842 = vmatpush2.bf16.msra.mxu1 %v12240_v24 }
 0x2ab   :  { %v2139_v26 = vpop.f32.mrf.mxu1  ;;  %2843 = vmatprep.subr.bf16.mxu1 %v12241_v58 }
 0x2ad   :  { %v2093_v42 = vpop.f32.mrf.mxu0 }
 0x2ae   :  { %v2135_v53 = vadd.f32 %v2134_v10, %v2093_v42  ;;  %2844 = vmatpush2.bf16.msra.mxu1 %v12242_v14 }
 0x2af   :  { %v2095_v61 = vpop.f32.mrf.mxu0  ;;  %2845 = vmatprep.subr.bf16.mxu1 %v12243_v1 }
 0x2b0   :  { %v2141_v2 = vadd.f32 %v2135_v53, %v1801_v34  ;;  %v2137_v7 = vadd.f32 %v2136_v23, %v2095_v61 }
 0x2b1   :  { %v2097_v11 = vpop.f32.mrf.mxu0 }
 0x2b2   :  { %v2142_v16 = vadd.f32 %v2137_v7, %v1803_v5  ;;  %2846 = vmatpush2.bf16.msra.mxu1 %v10046_v51 }
 0x2b3   :  { %v2098_v20 = vpop.f32.mrf.mxu0 }
 0x2b5   :  { %v2470_v31 = vpop.f32.mrf.mxu0  ;;  %2848 = vmatmul.mubr.bf16.vlgmr.msra.gmra.mxu1 %v2795_v27 }
 0x2b6   :  { %3739 = vmatprep.mubr.bf16.mxu1 %v12154_v48 }
 0x2b7   :  { %v2472_v37 = vpop.f32.mrf.mxu0 }
 0x2b9   :  { %v2474_v63 = vpop.f32.mrf.mxu0 }
 0x2bb   :  { %v2475_v39 = vpop.f32.mrf.mxu0 }
 0x2e5   :  { %v2429_v45 = vpop.f32.mrf.mxu1 }
 0x2e6   :  { %v2471_v46 = vadd.f32 %v2470_v31, %v2429_v45 }
 0x2e7   :  { %v2431_v49 = vpop.f32.mrf.mxu1 }
 0x2e8   :  { %v10177_v17 = vadd.f32 %v2471_v46, %v2141_v2  ;;  %v2473_v50 = vadd.f32 %v2472_v37, %v2431_v49 }
 0x2e9   :  { %v2433_v0 = vpop.f32.mrf.mxu1 }
 0x2ea   :  { %v10179_v3 = vadd.f32 %v2473_v50, %v2142_v16  ;;  %v2903_v58 = vrot.slane %v10177_v17, 4 }
 0x2eb   :  { %v2434_v4 = vpop.f32.mrf.mxu1 }
 0x2ec   :  { %v2904_v42 = vadd.f32 %v2903_v58, %v10177_v17  ;;  %v2909_v53 = vrot.slane %v10179_v3, 4 }
 0x2ed   :  { %v2569_v51 = vpop.f32.mrf.mxu1 }
 0x2ee   :  { %v2905_v57 = vrot.slane %v2904_v42, 2  ;;  %v2910_v2 = vadd.f32 %v2909_v53, %v10179_v3 }
 0x2ef   :  { %v2571_v9 = vpop.f32.mrf.mxu1 }
 0x2f0   :  { %v2911_v37 = vrot.slane %v2910_v2, 2  ;;  %v2906_v45 = vadd.f32 %v2905_v57, %v2904_v42 }
 0x2f1   :  { %v2573_v12 = vpop.f32.mrf.mxu1 }
 0x2f2   :  { %v2907_v0 = vrot.slane %v2906_v45, 1 }
 0x2f3   :  { %v2574_v21 = vpop.f32.mrf.mxu1 }
 0x2f4   :  { %v2908_v21 = vadd.f32 %v2907_v0, %v2906_v45 }
 0x2f5   :  { %v2528_v22 = vpop.f32.mrf.mxu0 }
 0x2f6   :  { %v2570_v29 = vadd.f32 %v2569_v51, %v2528_v22  ;;  %v2912_v51 = vadd.f32 %v2911_v37, %v2910_v2 }
 0x2f7   :  { %v2530_v30 = vpop.f32.mrf.mxu0 }
 0x2f8   :  { %v2572_v36 = vadd.f32 %v2571_v9, %v2530_v30 }
 0x2f9   :  { %v2532_v41 = vpop.f32.mrf.mxu0 }
 0x2fb   :  { %v2533_v40 = vpop.f32.mrf.mxu0 }
 0x2fd   :  { %v2654_v43 = vpop.f32.mrf.mxu0 }
 0x2ff   :  { %v2656_v52 = vpop.f32.mrf.mxu0 }
 0x301   :  { %v2658_v55 = vpop.f32.mrf.mxu0 }
 0x303   :  { %v2659_v60 = vpop.f32.mrf.mxu0 }
 0x32d   :  { %v2613_v62 = vpop.f32.mrf.mxu1 }
 0x32e   :  { %v2614_v15 = vadd.f32 %v2613_v62, %v2570_v29  ;;  %v2913_v29 = vrot.slane %v2912_v51, 1 }
 0x32f   :  { %v2615_v18 = vpop.f32.mrf.mxu1 }
 0x330   :  { %v2655_v25 = vadd.f32 %v2654_v43, %v2614_v15  ;;  %v2616_v32 = vadd.f32 %v2615_v18, %v2572_v36  ;;  %v2914_v40 = vadd.f32 %v2913_v29, %v2912_v51 }
 0x331   :  { %v2617_v34 = vpop.f32.mrf.mxu1 }
 0x332   :  { %v2657_v35 = vadd.f32 %v2656_v52, %v2616_v32 }
 0x333   :  { %v2618_v38 = vpop.f32.mrf.mxu1 }
 0x335   :  { %v2771_v5 = vpop.f32.mrf.mxu1 }
 0x337   :  { %v2773_v8 = vpop.f32.mrf.mxu1 }
 0x339   :  { %v2775_v19 = vpop.f32.mrf.mxu1 }
 0x33b   :  { %v2776_v13 = vpop.f32.mrf.mxu1 }
 0x33d   :  { %v2730_v59 = vpop.f32.mrf.mxu0 }
 0x33e   :  { %v2772_v44 = vadd.f32 %v2771_v5, %v2730_v59 }
 0x33f   :  { %v2732_v47 = vpop.f32.mrf.mxu0 }
 0x340   :  { %v2774_v10 = vadd.f32 %v2773_v8, %v2732_v47  ;;  %v2778_v61 = vadd.f32 %v2772_v44, %v2655_v25 }
 0x341   :  { %v2734_v28 = vpop.f32.mrf.mxu0 }
 0x342   :  { %v2779_v23 = vadd.f32 %v2774_v10, %v2657_v35 }
 0x343   :  { %v2735_v56 = vpop.f32.mrf.mxu0 }
 0x344   :  { %v12244_v56 = vld [vmem:[#allocation12_spill] sm:$0xff] }
 0x345   :  { %v2890_v6 = vpop.f32.mrf.mxu0 }
 0x347   :  { %v2892_v33 = vpop.f32.mrf.mxu0 }
 0x349   :  { %v2894_v24 = vpop.f32.mrf.mxu0 }
 0x34b   :  { %v2895_v26 = vpop.f32.mrf.mxu0 }
 0x375   :  { %v2849_v14 = vpop.f32.mrf.mxu1 }
 0x376   :  { %v2891_v1 = vadd.f32 %v2890_v6, %v2849_v14 }
 0x377   :  { %v2851_v54 = vpop.f32.mrf.mxu1 }
 0x378   :  { %v10185_v7 = vadd.f32 %v2891_v1, %v2778_v61  ;;  %v2893_v11 = vadd.f32 %v2892_v33, %v2851_v54 }
 0x379   :  { %v2853_v16 = vpop.f32.mrf.mxu1 }
 0x37a   :  { %v2915_v20 = vrot.slane %v10185_v7, 4  ;;  %v10188_v27 = vadd.f32 %v2893_v11, %v2779_v23 }
 0x37b   :  { %v2854_v31 = vpop.f32.mrf.mxu1 }
 0x37c   :  { %v2916_v63 = vadd.f32 %v2915_v20, %v10185_v7  ;;  %v2921_v39 = vrot.slane %v10188_v27, 4 }
 0x37e   :  { %v2917_v46 = vrot.slane %v2916_v63, 2  ;;  %v2922_v49 = vadd.f32 %v2921_v39, %v10188_v27 }
 0x380   :  { %v2923_v50 = vrot.slane %v2922_v49, 2  ;;  %v2918_v4 = vadd.f32 %v2917_v46, %v2916_v63 }
 0x382   :  { %v2919_v9 = vrot.slane %v2918_v4, 1  ;;  %v2924_v12 = vadd.f32 %v2923_v50, %v2922_v49 }
 0x384   :  { %v2920_v22 = vadd.f32 %v2919_v9, %v2918_v4  ;;  %v2925_v30 = vrot.slane %v2924_v12, 1 }
 0x386   :  { %v2927_v36 = vadd.f32 %v2920_v22, %v2908_v21  ;;  %v2926_v41 = vadd.f32 %v2925_v30, %v2924_v12 }
 0x388   :  { %2934 = vrot.lane.b32.xlu1 %v2927_v36, %s9229_s3  ;;  %2930 = vrot.lane.b32.xlu0 %v2927_v36, %s9230_s20  ;;  %v2928_v43 = vadd.f32 %v2926_v41, %v2914_v40 }
 0x38c   :  { %2944 = vrot.lane.b32.xlu1 %v2928_v43, %s9230_s20  ;;  %2938 = vrot.lane.b32.xlu0 %v2927_v36, %s9231_s2 }
 0x390   :  { %2952 = vrot.lane.b32.xlu1 %v2928_v43, %s9231_s2  ;;  %2948 = vrot.lane.b32.xlu0 %v2928_v43, %s9229_s3 }
 0x3fa   :  { %v2935_v52 = vpop.permute.xlu1 %2934  ;;  %v2931_v55 = vpop.permute.xlu0 %2930 }
 0x3fb   :  { %v2933_v60 = vadd.f32 %v2931_v55, %v2927_v36 }
 0x3fd   :  { %v2937_v62 = vadd.f32 %v2935_v52, %v2933_v60 }
 0x3fe   :  { %v2939_v15 = vpop.permute.xlu0 %2938  ;;  %v2945_v25 = vpop.permute.xlu1 %2944 }
 0x3ff   :  { %v2941_v18 = vadd.f32 %v2939_v15, %v2937_v62 }
 0x401   :  { %v2942_v32 = vadd.f32 %v2941_v18, %v2928_v43 }
 0x402   :  { %v2949_v35 = vpop.permute.xlu0 %2948  ;;  %v2953_v5 = vpop.permute.xlu1 %2952 }
 0x403   :  { %v2947_v34 = vadd.f32 %v2945_v25, %v2942_v32 }
 0x405   :  { %v2951_v38 = vadd.f32 %v2949_v35, %v2947_v34 }
 0x407   :  { %v2955_v8 = vadd.f32 %v2953_v5, %v2951_v38  ;;  %v10222_v38 = vld [vmem:[#allocation7 + $0x1b0] ss:$8 sps:$4 sm:$0xff]   ;;  %v10224_v5 = vld [vmem:[#allocation7 + $0x1b4] ss:$8 sps:$4 sm:$0xff]  }
 0x408   :  { %3666 = vmatprep.subr.bf16.mxu0 %v10224_v5 }
 0x409   :  { %2960 = vrot.lane.b32.xlu1 %v2955_v8, %s9229_s3  ;;  %2957 = vrot.lane.b32.xlu0 %v2955_v8, %s9231_s2 }
 0x40a   :  { %3667 = vmatpush1.bf16.msra.mxu0 %v10222_v38 }
 0x40d   :  { %2963 = vrot.lane.b32.xlu0 %v2955_v8, %s9230_s20 }
 0x47b   :  { %v2958_v19 = vpop.permute.xlu0 %2957  ;;  %v2961_v13 = vpop.permute.xlu1 %2960 }
 0x47c   :  { %v2966_v59 = vsel %vm73_vm2, %v2955_v8, %v2958_v19  ;;  %v10226_v8 = vld [vmem:[#allocation7 + $0x1a4] ss:$8 sps:$4 sm:$0xff]   ;;  %v10230_v19 = vld [vmem:[#allocation7 + $0x1a0] ss:$8 sps:$4 sm:$0xff]  }
 0x47d   :  { %v2968_v47 = vsel %vm2967_vm0, %v2966_v59, %v2961_v13  ;;  %3668 = vmatprep.subr.bf16.mxu0 %v10226_v8  ;;  %v10233_v13 = vld [vmem:[#allocation7 + $0x194] ss:$8 sps:$4 sm:$0xff]   ;;  %v10236_v59 = vld [vmem:[#allocation7 + $0x190] ss:$8 sps:$4 sm:$0xff]  }
 0x47e   :  { %3669 = vmatpush1.bf16.msra.mxu0 %v10230_v19 }
 0x47f   :  { %v2964_v10 = vpop.permute.xlu0 %2963  ;;  %3670 = vmatprep.subr.bf16.mxu0 %v10233_v13 }
 0x480   :  { %v2970_v28 = vsel %vm2969_vm1, %v2968_v47, %v2964_v10  ;;  %v10239_v47 = vld [vmem:[#allocation7 + $0x184] ss:$8 sps:$4 sm:$0xff]   ;;  %v12245_v10 = vmov 0.0  }
 0x481   :  { %v10205_v23 = vmul.f32 0.0078125, %v2970_v28  ;;  %103 = vst.msk [vmem:[#allocation3 + $0x28] sm:$0x1f] %vm99_vm3, %v12245_v10  ;;  %100 = vst.msk [vmem:[#allocation3 + $0x10] sm:$0x1f] %vm99_vm3, %v12245_v10 }
 0x482   :  { %106 = vst.msk [vmem:[#allocation3 + $0x40] sm:$0x1f] %vm99_vm3, %v12245_v10  ;;  %109 = vst.msk [vmem:[#allocation3 + $0x58] sm:$0x1f] %vm99_vm3, %v12245_v10  ;;  %3671 = vmatpush1.bf16.msra.mxu0 %v10236_v59  ;;  %v10246_v28 = vld [vmem:[#allocation7 + $0x180] ss:$8 sps:$4 sm:$0xff]  }
 0x483   :  { %v2975_v6 = vrot.slane %v10205_v23, %v12244_v56  ;;  %3672 = vmatprep.subr.bf16.mxu0 %v10239_v47  ;;  %v10305_v10 = vld [vmem:[#allocation7 + $0x1f4] ss:$8 sps:$4 sm:$0xff]  }
 0x485   :  { %v2976_v33 = vsub.f32 %v10177_v17, %v2975_v6  ;;  %v2977_v24 = vsub.f32 %v10179_v3, %v2975_v6  ;;  %v2992_v26 = vsub.f32 %v10185_v7, %v2975_v6  ;;  %v2993_v58 = vsub.f32 %v10188_v27, %v2975_v6  ;;  %v10249_v6 = vld [vmem:[#allocation7 + $0x174] ss:$8 sps:$4 sm:$0xff]  }
 0x486   :  { %3673 = vmatpush1.bf16.msra.mxu0 %v10246_v28 }
 0x487   :  { %v2978_v44 = vmul.f32 %v2976_v33, %v2976_v33  ;;  %v2979_v42 = vmul.f32 %v2977_v24, %v2977_v24  ;;  %v2994_v53 = vmul.f32 %v2992_v26, %v2992_v26  ;;  %v2995_v14 = vmul.f32 %v2993_v58, %v2993_v58  ;;  %v10252_v33 = vld [vmem:[#allocation7 + $0x170] ss:$8 sps:$4 sm:$0xff]   ;;  %3674 = vmatprep.subr.bf16.mxu0 %v10249_v6  ;;  %v10255_v24 = vld [vmem:[#allocation7 + $0x164] ss:$8 sps:$4 sm:$0xff]   ;;  %v10258_v26 = vld [vmem:[#allocation7 + $0x160] ss:$8 sps:$4 sm:$0xff]  }
 0x488   :  { %v10261_v58 = vld [vmem:[#allocation7 + $0x154] ss:$8 sps:$4 sm:$0xff]  }
 0x489   :  { %v2980_v61 = vrot.slane %v2978_v44, 4  ;;  %v2996_v1 = vrot.slane %v2994_v53, 4  ;;  %v2986_v54 = vrot.slane %v2979_v42, 4  ;;  %v3002_v57 = vrot.slane %v2995_v14, 4 }
 0x48a   :  { %3675 = vmatpush1.bf16.msra.mxu0 %v10252_v33 }
 0x48b   :  { %v2981_v2 = vadd.f32 %v2980_v61, %v2978_v44  ;;  %v2997_v11 = vadd.f32 %v2996_v1, %v2994_v53  ;;  %v2987_v16 = vadd.f32 %v2986_v54, %v2979_v42  ;;  %v3003_v20 = vadd.f32 %v3002_v57, %v2995_v14  ;;  %3676 = vmatprep.subr.bf16.mxu0 %v10255_v24  ;;  %v10264_v44 = vld [vmem:[#allocation7 + $0x150] ss:$8 sps:$4 sm:$0xff]   ;;  %v10267_v42 = vld [vmem:[#allocation7 + $0x144] ss:$8 sps:$4 sm:$0xff]   ;;  %v10270_v53 = vld [vmem:[#allocation7 + $0x140] ss:$8 sps:$4 sm:$0xff]  }
 0x48c   :  { %v10273_v14 = vld [vmem:[#allocation7 + $0x234] ss:$8 sps:$4 sm:$0xff]   ;;  %v10276_v61 = vld [vmem:[#allocation7 + $0x230] ss:$8 sps:$4 sm:$0xff]   ;;  %v8565_v1 = vld [vmem:[#allocation7 + $0x224] ss:$8 sps:$4 sm:$0xff]  }
 0x48d   :  { %v2982_v31 = vrot.slane %v2981_v2, 2  ;;  %v2998_v37 = vrot.slane %v2997_v11, 2  ;;  %v2988_v63 = vrot.slane %v2987_v16, 2  ;;  %v3004_v39 = vrot.slane %v3003_v20, 2  ;;  %v8563_v54 = vld [vmem:[#allocation7 + $0x220] ss:$8 sps:$4 sm:$0xff]  }
 0x48e   :  { %3677 = vmatpush1.bf16.msra.mxu0 %v10258_v26  ;;  %v8568_v57 = vld [vmem:[#allocation7 + $0x214] ss:$8 sps:$4 sm:$0xff]  }
 0x48f   :  { %v2983_v45 = vadd.f32 %v2982_v31, %v2981_v2  ;;  %v2999_v46 = vadd.f32 %v2998_v37, %v2997_v11  ;;  %v2989_v49 = vadd.f32 %v2988_v63, %v2987_v16  ;;  %v3005_v50 = vadd.f32 %v3004_v39, %v3003_v20  ;;  %3678 = vmatprep.subr.bf16.mxu0 %v10261_v58  ;;  %v8566_v2 = vld [vmem:[#allocation7 + $0x210] ss:$8 sps:$4 sm:$0xff]   ;;  %v8571_v11 = vld [vmem:[#allocation7 + $0x204] ss:$8 sps:$4 sm:$0xff]   ;;  %v8569_v37 = vld [vmem:[#allocation7 + $0x200] ss:$8 sps:$4 sm:$0xff]  }
 0x491   :  { %v2984_v0 = vrot.slane %v2983_v45, 1  ;;  %v3000_v4 = vrot.slane %v2999_v46, 1  ;;  %v2990_v51 = vrot.slane %v2989_v49, 1  ;;  %v3006_v9 = vrot.slane %v3005_v50, 1 }
 0x492   :  { %3679 = vmatpush1.bf16.msra.mxu0 %v10264_v44 }
 0x493   :  { %v2985_v12 = vadd.f32 %v2984_v0, %v2983_v45  ;;  %v3001_v21 = vadd.f32 %v3000_v4, %v2999_v46  ;;  %v2991_v29 = vadd.f32 %v2990_v51, %v2989_v49  ;;  %v3007_v30 = vadd.f32 %v3006_v9, %v3005_v50  ;;  %3680 = vmatprep.subr.bf16.mxu0 %v10267_v42  ;;  %v12246_v4 = vld [vmem:[#allocation14_spill] sm:$0xff] }
 0x494   :  { %v7909_v9 = vld [vmem:[%s11857_s5 + $0x1] ss:$8 sm:$0x3] }
 0x495   :  { %v3008_v22 = vadd.f32 %v3001_v21, %v2985_v12  ;;  %v3009_v36 = vadd.f32 %v3007_v30, %v2991_v29  ;;  %v12247_v29 = vld [vmem:[#allocation13_spill] sm:$0xff] }
 0x496   :  { %3681 = vmatpush1.bf16.msra.mxu0 %v10270_v53 }
 0x497   :  { %3015 = vrot.lane.b32.xlu0 %v3008_v22, %s9229_s3  ;;  %3011 = vrot.lane.b32.xlu1 %v3008_v22, %s9230_s20 }
 0x498   :  { %3682 = vmatprep.subr.bf16.mxu0 %v10273_v14 }
 0x49a   :  { %3683 = vmatpush2.bf16.msra.mxu0 %v10276_v61 }
 0x49b   :  { %3025 = vrot.lane.b32.xlu0 %v3009_v36, %s9230_s20  ;;  %3019 = vrot.lane.b32.xlu1 %v3008_v22, %s9231_s2 }
 0x49c   :  { %3684 = vmatprep.subr.bf16.mxu0 %v8565_v1 }
 0x49e   :  { %3685 = vmatpush2.bf16.msra.mxu0 %v8563_v54 }
 0x49f   :  { %3033 = vrot.lane.b32.xlu0 %v3009_v36, %s9231_s2  ;;  %3029 = vrot.lane.b32.xlu1 %v3009_v36, %s9229_s3 }
 0x4a0   :  { %3686 = vmatprep.subr.bf16.mxu0 %v8568_v57 }
 0x4a2   :  { %3687 = vmatpush2.bf16.msra.mxu0 %v8566_v2 }
 0x4a3   :  { %3688 = vmatprep.subr.bf16.mxu0 %v8571_v11 }
 0x4a6   :  { %3689 = vmatpush2.bf16.msra.mxu0 %v8569_v37 }
 0x4a7   :  { %3690 = vmatprep.subr.bf16.mxu0 %v10305_v10 }
 0x509   :  { %v3016_v41 = vpop.permute.xlu0 %3015  ;;  %v3012_v40 = vpop.permute.xlu1 %3011 }
 0x50a   :  { %v3014_v43 = vadd.f32 %v3012_v40, %v3008_v22 }
 0x50c   :  { %v3018_v52 = vadd.f32 %v3016_v41, %v3014_v43 }
 0x50d   :  { %v3020_v55 = vpop.permute.xlu1 %3019  ;;  %v3026_v62 = vpop.permute.xlu0 %3025 }
 0x50e   :  { %v3022_v60 = vadd.f32 %v3020_v55, %v3018_v52  ;;  %v7910_v52 = vld [vmem:[%s11857_s5 + $0x2] ss:$8 sm:$0x3] }
 0x510   :  { %v3023_v15 = vadd.f32 %v3022_v60, %v3009_v36 }
 0x511   :  { %v3030_v25 = vpop.permute.xlu1 %3029  ;;  %v3034_v34 = vpop.permute.xlu0 %3033 }
 0x512   :  { %v3028_v18 = vadd.f32 %v3026_v62, %v3023_v15 }
 0x514   :  { %v3032_v32 = vadd.f32 %v3030_v25, %v3028_v18 }
 0x516   :  { %v3036_v35 = vadd.f32 %v3034_v34, %v3032_v32  ;;  %v10301_v32 = vld [vmem:[#allocation7 + $0x274] ss:$8 sps:$4 sm:$0xff]  }
 0x517   :  { %3715 = vmatprep.subr.bf16.mxu1 %v10301_v32 }
 0x518   :  { %3041 = vrot.lane.b32.xlu0 %v3036_v35, %s9229_s3  ;;  %3038 = vrot.lane.b32.xlu1 %v3036_v35, %s9231_s2 }
 0x51c   :  { %3044 = vrot.lane.b32.xlu1 %v3036_v35, %s9230_s20 }
 0x58a   :  { %v3039_v16 = vpop.permute.xlu1 %3038  ;;  %v3042_v20 = vpop.permute.xlu0 %3041 }
 0x58b   :  { %v3047_v31 = vsel %vm73_vm2, %v3036_v35, %v3039_v16  ;;  %v10303_v35 = vld [vmem:[#allocation7 + $0x270] ss:$8 sps:$4 sm:$0xff]  }
 0x58c   :  { %v3048_v63 = vsel %vm2967_vm0, %v3047_v31, %v3042_v20  ;;  %3716 = vmatpush1.bf16.msra.mxu1 %v10303_v35  ;;  %v10315_v20 = vld [vmem:[#allocation7 + $0x260] ss:$8 sps:$4 sm:$0xff]   ;;  %v10319_v31 = vld [vmem:[#allocation7 + $0x1e4] ss:$8 sps:$4 sm:$0xff]  }
 0x58e   :  { %v3045_v39 = vpop.permute.xlu1 %3044 }
 0x58f   :  { %v3049_v45 = vsel %vm2969_vm1, %v3048_v63, %v3045_v39  ;;  %v10321_v39 = vld [vmem:[#allocation7 + $0x1e0] ss:$8 sps:$4 sm:$0xff]  }
 0x590   :  { %v3050_v46 = vmul.f32 0.0078125, %v3049_v45 }
 0x592   :  { %v3051_v49 = vadd.f32 1e-05, %v3050_v46 }
 0x594   :  { %9072 = vrsqrt.f32 %v3051_v49 }
 0x5a1   :  { %v9073_v50 = vpop.eup %9072 }
 0x5a2   :  { %v3054_v0 = vcombine.low %v9073_v50, %v9073_v50  ;;  %v10329_v50 = vld [vmem:[#allocation7 + $0x254] ss:$8 sps:$4 sm:$0xff]  }
 0x5a4   :  { %v3061_v51 = vrot.slane %v3054_v0, %v12246_v4 }
 0x5a6   :  { %v3068_v12 = vrot.slane %v3061_v51, %v12246_v4  ;;  %v10331_v51 = vld [vmem:[#allocation7 + $0x250] ss:$8 sps:$4 sm:$0xff]  }
 0x5a8   :  { %v3070_v21 = vmul.f32 %v7909_v9, %v3068_v12  ;;  %v10333_v9 = vld [vmem:[#allocation7 + $0x1d4] ss:$8 sps:$4 sm:$0xff]  }
 0x5aa   :  { %v3075_v22 = vrot.slane %v3070_v21, %v12244_v56  ;;  %v3079_v30 = vrot.slane %v3070_v21, %v12247_v29  ;;  %v10337_v21 = vld [vmem:[#allocation7 + $0x1d0] ss:$8 sps:$4 sm:$0xff]  }
 0x5ac   :  { %v3082_v36 = vmul.f32 %v3075_v22, %v10205_v23  ;;  %v3083_v41 = vmul.f32 %v3079_v30, %v10205_v23  ;;  %v3103_v62 = vmul.f32 %v3075_v22, %v10177_v17  ;;  %v3104_v15 = vmul.f32 %v3079_v30, %v10179_v3  ;;  %v10310_v17 = vld [vmem:[#allocation7 + $0x1f0] ss:$8 sps:$4 sm:$0xff]  }
 0x5ad   :  { %v3118_v1 = vmul.f32 %v3075_v22, %v10185_v7  ;;  %v3119_v54 = vmul.f32 %v3079_v30, %v10188_v27  ;;  %3691 = vmatpush2.bf16.msra.mxu0 %v10310_v17  ;;  %v10317_v27 = vld [vmem:[#allocation7 + $0x264] ss:$8 sps:$4 sm:$0xff]  }
 0x5ae   :  { %v3086_v40 = vcombine.low %v3082_v36, %v3083_v41  ;;  %3717 = vmatprep.subr.bf16.mxu1 %v10317_v27  ;;  %3692 = vmatprep.subr.bf16.mxu0 %v10319_v31  ;;  %v10342_v41 = vld [vmem:[#allocation7 + $0x244] ss:$8 sps:$4 sm:$0xff]  }
 0x5af   :  { %3718 = vmatpush1.bf16.msra.mxu1 %v10315_v20 }
 0x5b0   :  { %v3093_v43 = vrot.slane %v3086_v40, %v12246_v4  ;;  %3719 = vmatprep.subr.bf16.mxu1 %v10329_v50 }
 0x5b1   :  { %3693 = vmatpush2.bf16.msra.mxu0 %v10321_v39 }
 0x5b2   :  { %v3100_v55 = vrot.slane %v3093_v43, %v12246_v4  ;;  %3694 = vmatprep.subr.bf16.mxu0 %v10333_v9 }
 0x5b3   :  { %3720 = vmatpush1.bf16.msra.mxu1 %v10331_v51 }
 0x5b4   :  { %v3102_v60 = vsub.f32 %v7910_v52, %v3100_v55  ;;  %v10345_v52 = vld [vmem:[#allocation7 + $0x240] ss:$8 sps:$4 sm:$0xff]   ;;  %v10347_v55 = vld [vmem:[#allocation7 + $0x1c4] ss:$8 sps:$4 sm:$0xff]   ;;  %3721 = vmatprep.subr.bf16.mxu1 %v10342_v41 }
 0x5b5   :  { %3695 = vmatpush2.bf16.msra.mxu0 %v10337_v21 }
 0x5b6   :  { %v3109_v18 = vrot.slane %v3102_v60, %v12244_v56  ;;  %v3113_v25 = vrot.slane %v3102_v60, %v12247_v29  ;;  %v10351_v60 = vld [vmem:[#allocation7 + $0x1c0] ss:$8 sps:$4 sm:$0xff]   ;;  %3696 = vmatprep.subr.bf16.mxu0 %v10347_v55 }
 0x5b7   :  { %3722 = vmatpush1.bf16.msra.mxu1 %v10345_v52 }
 0x5b8   :  { %v3116_v23 = vadd.f32 %v3109_v18, %v3103_v62  ;;  %v3117_v34 = vadd.f32 %v3113_v25, %v3104_v15  ;;  %v3120_v2 = vadd.f32 %v3118_v1, %v3109_v18  ;;  %v3121_v7 = vadd.f32 %v3119_v54, %v3113_v25 }
 0x5b9   :  { %3697 = vmatpush2.bf16.msra.mxu0 %v10351_v60 }
 0x5ba   :  { %vm3122_vm4 = vcmp.ge.f32.partialorder %v3116_v23, 0.0  ;;  %vm3123_vm5 = vcmp.ge.f32.partialorder %v3117_v34, 0.0  ;;  %v3124_v3 = vmul.f32 0.2, %v3116_v23  ;;  %v3125_v57 = vmul.f32 0.2, %v3117_v34 }
 0x5bb   :  { %v3130_v49 = vmul.f32 0.2, %v3120_v2  ;;  %v3131_v0 = vmul.f32 0.2, %v3121_v7  ;;  %vm3128_vm6 = vcmp.ge.f32.partialorder %v3120_v2, 0.0  ;;  %vm3129_vm7 = vcmp.ge.f32.partialorder %v3121_v7, 0.0 }
 0x5bc   :  { %v3126_v11 = vsel %vm3122_vm4, %v3116_v23, %v3124_v3  ;;  %v3127_v16 = vsel %vm3123_vm5, %v3117_v34, %v3125_v57  ;;  %v10357_v23 = vld [vmem:[#allocation7 + $0x74] ss:$8 sps:$4 sm:$0xff]  }
 0x5bd   :  { %v3136_v37 = vcombine.low %v3126_v11, %v3127_v16  ;;  %v3196_v63 = vcombine.high %v3126_v11, %v3127_v16  ;;  %v3132_v40 = vsel %vm3128_vm6, %v3120_v2, %v3130_v49  ;;  %v3133_v43 = vsel %vm3129_vm7, %v3121_v7, %v3131_v0  ;;  %v10360_v34 = vld [vmem:[#allocation7 + $0x134] ss:$8 sps:$4 sm:$0xff]   ;;  %3951 = vmatprep.subr.bf16.mxu1 %v10357_v23 }
 0x5be   :  { %v3255_v25 = vcombine.low %v3132_v40, %v3133_v43  ;;  %4000 = vmatprep.subr.bf16.mxu0 %v10360_v34  ;;  %v3313_v57 = vcombine.high %v3132_v40, %v3133_v43  ;;  %v10502_v40 = vld [vmem:[#allocation7 + $0x2e0] ss:$8 sps:$4 sm:$0xff]  }
 0x5bf   :  { %v3143_v45 = vrot.slane %v3136_v37, %v12246_v4  ;;  %v3203_v46 = vrot.slane %v3196_v63, %v12246_v4  ;;  %12265 = vst [vmem:[#allocation29_spill] sm:$0xff] %v10502_v40 }
 0x5c0   :  { %v3262_v3 = vrot.slane %v3255_v25, %v12246_v4  ;;  %v3320_v16 = vrot.slane %v3313_v57, %v12246_v4 }
 0x5c1   :  { %v3150_v12 = vrot.slane %v3143_v45, %v12246_v4  ;;  %v3210_v30 = vrot.slane %v3203_v46, %v12246_v4  ;;  %v3162_v36 = vcombine.high %v3143_v45, %v3143_v45  ;;  %v3219_v18 = vcombine.high %v3203_v46, %v3203_v46 }
 0x5c2   :  { %v3269_v11 = vrot.slane %v3262_v3, %v12246_v4  ;;  %v3327_v37 = vrot.slane %v3320_v16, %v12246_v4  ;;  %v3278_v63 = vcombine.high %v3262_v3, %v3262_v3  ;;  %v3336_v49 = vcombine.high %v3320_v16, %v3320_v16 }
 0x5c3   :  { %3151 = vrot.lane.b32.xlu0 %v3150_v12, %s9231_s2  ;;  %v3178_v22 = vcombine.high %v3150_v12, %v3150_v12  ;;  %v3235_v62 = vcombine.high %v3210_v30, %v3210_v30  ;;  %v3169_v15 = vrot.slane %v3162_v36, %v12246_v4  ;;  %v3226_v54 = vrot.slane %v3219_v18, %v12246_v4 }
 0x5c4   :  { %v3295_v7 = vcombine.high %v3269_v11, %v3269_v11  ;;  %v3352_v45 = vcombine.high %v3327_v37, %v3327_v37  ;;  %v3285_v46 = vrot.slane %v3278_v63, %v12246_v4  ;;  %v3343_v12 = vrot.slane %v3336_v49, %v12246_v4 }
 0x5c5   :  { %3179 = vrot.lane.b32.xlu1 %v3178_v22, %s9231_s2  ;;  %v3187_v1 = vcombine.high %v3169_v15, %v3169_v15  ;;  %v3244_v2 = vcombine.high %v3226_v54, %v3226_v54 }
 0x5c6   :  { %v3304_v0 = vcombine.high %v3285_v46, %v3285_v46  ;;  %v3361_v22 = vcombine.high %v3343_v12, %v3343_v12 }
 0x5c7   :  { %3211 = vrot.lane.b32.xlu0 %v3210_v30, %s9231_s2  ;;  %v12248_v30 = vlaneseq }
 0x5c9   :  { %3236 = vrot.lane.b32.xlu1 %v3235_v62, %s9231_s2  ;;  %vm3157_vm8 = vcmp.ge.s32.totalorder %v12248_v30, 32  ;;  %vm3158_vm9 = vcmp.lt.s32.totalorder %v12248_v30, 288 }
 0x5ca   :  { %vm10387_vm10 = vmand %vm3157_vm8, %vm3158_vm9  ;;  %vm7625_vm8 = vcmask 1024  }
 0x5cb   :  { %3170 = vrot.lane.b32.xlu0 %v3169_v15, %s9231_s2 }
 0x5cd   :  { %3188 = vrot.lane.b32.xlu1 %v3187_v1, %s9231_s2 }
 0x5cf   :  { %3227 = vrot.lane.b32.xlu0 %v3226_v54, %s9231_s2 }
 0x5d1   :  { %3245 = vrot.lane.b32.xlu1 %v3244_v2, %s9231_s2 }
 0x5d3   :  { %3270 = vrot.lane.b32.xlu0 %v3269_v11, %s9231_s2 }
 0x5d5   :  { %3296 = vrot.lane.b32.xlu1 %v3295_v7, %s9231_s2 }
 0x5d7   :  { %3328 = vrot.lane.b32.xlu0 %v3327_v37, %s9231_s2 }
 0x5d9   :  { %3353 = vrot.lane.b32.xlu1 %v3352_v45, %s9231_s2 }
 0x5db   :  { %3286 = vrot.lane.b32.xlu0 %v3285_v46, %s9231_s2 }
 0x5dd   :  { %3305 = vrot.lane.b32.xlu1 %v3304_v0, %s9231_s2 }
 0x5df   :  { %3344 = vrot.lane.b32.xlu0 %v3343_v12, %s9231_s2 }
 0x5e1   :  { %3362 = vrot.lane.b32.xlu1 %v3361_v22, %s9231_s2 }
 0x635   :  { %v3152_v36 = vpop.permute.xlu0 %3151 }
 0x636   :  { %v3153_v43 = vrot.slane %v3152_v36, 7 }
 0x637   :  { %v3180_v62 = vpop.permute.xlu1 %3179 }
 0x638   :  { %v3154_v15 = vsel %vm73_vm2, %v3153_v43, %v3152_v36  ;;  %v3181_v18 = vrot.slane %v3180_v62, 7 }
 0x639   :  { %3160 = vst.msk [vmem:[#allocation3 + $0x18] ss:$8 sm:$0x7] %vm10387_vm10, %v3154_v15  ;;  %v3212_v25 = vpop.permute.xlu0 %3211 }
 0x63a   :  { %v3182_v1 = vsel %vm73_vm2, %v3181_v18, %v3180_v62  ;;  %v3213_v54 = vrot.slane %v3212_v25, 7  ;;  %v10412_v62 = vld [vmem:[#allocation7 + $0x70] ss:$8 sps:$4 sm:$0xff]  }
 0x63b   :  { %3185 = vst.msk [vmem:[#allocation3 + $0x19] ss:$8 sm:$0x7] %vm10387_vm10, %v3182_v1  ;;  %v3237_v3 = vpop.permute.xlu1 %3236 }
 0x63c   :  { %v3214_v57 = vsel %vm73_vm2, %v3213_v54, %v3212_v25  ;;  %v3238_v2 = vrot.slane %v3237_v3, 7 }
 0x63d   :  { %3217 = vst.msk [vmem:[#allocation3 + $0x1a] ss:$8 sm:$0x7] %vm10387_vm10, %v3214_v57  ;;  %v3171_v11 = vpop.permute.xlu0 %3170 }
 0x63e   :  { %v3239_v16 = vsel %vm73_vm2, %v3238_v2, %v3237_v3  ;;  %v3172_v7 = vrot.slane %v3171_v11, 7  ;;  %v10417_v3 = vld [vmem:[#allocation7 + $0x130] ss:$8 sps:$4 sm:$0xff]  }
 0x63f   :  { %3242 = vst.msk [vmem:[#allocation3 + $0x1b] ss:$8 sm:$0x7] %vm10387_vm10, %v3239_v16  ;;  %v3189_v37 = vpop.permute.xlu1 %3188  ;;  %v10419_v16 = vld [vmem:[#allocation7 + $0x64] ss:$8 sps:$4 sm:$0xff]  }
 0x640   :  { %v3173_v63 = vsel %vm73_vm2, %v3172_v7, %v3171_v11  ;;  %v3190_v45 = vrot.slane %v3189_v37, 7 }
 0x641   :  { %3176 = vst.msk [vmem:[#allocation3 + $0x1] ss:$8 sm:$0x7] %vm10387_vm10, %v3173_v63  ;;  %v3228_v46 = vpop.permute.xlu0 %3227 }
 0x642   :  { %v3191_v49 = vsel %vm73_vm2, %v3190_v45, %v3189_v37  ;;  %v3229_v0 = vrot.slane %v3228_v46, 7  ;;  %v10422_v45 = vld [vmem:[#allocation7 + $0x124] ss:$8 sps:$4 sm:$0xff]  }
 0x643   :  { %3194 = vst.msk [vmem:[#allocation3 + $0x2] ss:$8 sm:$0x7] %vm10387_vm10, %v3191_v49  ;;  %v3246_v12 = vpop.permute.xlu1 %3245 }
 0x644   :  { %v3230_v22 = vsel %vm73_vm2, %v3229_v0, %v3228_v46  ;;  %v3247_v36 = vrot.slane %v3246_v12, 7 }
 0x645   :  { %3233 = vst.msk [vmem:[#allocation3 + $0x3] ss:$8 sm:$0x7] %vm10387_vm10, %v3230_v22  ;;  %v3271_v43 = vpop.permute.xlu0 %3270 }
 0x646   :  { %v3248_v15 = vsel %vm73_vm2, %v3247_v36, %v3246_v12  ;;  %v3272_v18 = vrot.slane %v3271_v43, 7  ;;  %v3417_v25 = vld [vmem:[#allocation3 + $0x20] sm:$0xf]  ;;  %v3418_v1 = vld [vmem:[#allocation3 + $0x28] sm:$0xf] }
 0x647   :  { %3251 = vst.msk [vmem:[#allocation3 + $0x4] ss:$8 sm:$0x7] %vm10387_vm10, %v3248_v15  ;;  %v3297_v54 = vpop.permute.xlu1 %3296  ;;  %v3420_v57 = vpack.c.bf16 %v3417_v25, %v3417_v25  ;;  %v3421_v2 = vpack.c.bf16 %v3418_v1, %v3418_v1  ;;  %v3416_v11 = vld [vmem:[#allocation3 + $0x18] sm:$0xf] }
 0x648   :  { %v3273_v7 = vsel %vm73_vm2, %v3272_v18, %v3271_v43  ;;  %v3298_v37 = vrot.slane %v3297_v54, 7  ;;  %v3419_v63 = vpack.c.bf16 %v3416_v11, %v3416_v11  ;;  %v10429_v12 = vld [vmem:[#allocation7 + $0x60] ss:$8 sps:$4 sm:$0xff]   ;;  %v10437_v43 = vld [vmem:[#allocation7 + $0x54] ss:$8 sps:$4 sm:$0xff]  }
 0x649   :  { %3276 = vst.msk [vmem:[#allocation3 + $0x48] ss:$8 sm:$0x7] %vm10387_vm10, %v3273_v7  ;;  %v3329_v46 = vpop.permute.xlu0 %3328  ;;  %3698 = vmatprep.mubr.bf16.mxu0 %v3420_v57  ;;  %7951 = vmatmul.mubr.msk.bf16.vlgmr.msra.gmra.mxu1 %vm2967_vm0, %v3421_v2  ;;  %v10435_v36 = vld [vmem:[#allocation7 + $0x120] ss:$8 sps:$4 sm:$0xff]  }
 0x64a   :  { %v3299_v49 = vsel %vm73_vm2, %v3298_v37, %v3297_v54  ;;  %v3330_v0 = vrot.slane %v3329_v46, 7  ;;  %3952 = vmatpush1.bf16.msra.mxu1 %v10412_v62  ;;  %3699 = vmatmul.mubr.bf16.vlgmr.msra.gmra.mxu0 %v3419_v63  ;;  %v10441_v1 = vld [vmem:[#allocation7 + $0x114] ss:$8 sps:$4 sm:$0xff]   ;;  %v10448_v7 = vld [vmem:[#allocation7 + $0x50] ss:$8 sps:$4 sm:$0xff]  }
 0x64b   :  { %3302 = vst.msk [vmem:[#allocation3 + $0x49] ss:$8 sm:$0x7] %vm10387_vm10, %v3299_v49  ;;  %4001 = vmatpush1.bf16.msra.mxu0 %v10417_v3  ;;  %v3354_v22 = vpop.permute.xlu1 %3353  ;;  %3953 = vmatprep.subr.bf16.mxu1 %v10419_v16  ;;  %12251 = vst [vmem:[#allocation15_spill] sm:$0xff] %v10441_v1  ;;  %v10455_v49 = vld [vmem:[#allocation7 + $0x44] ss:$8 sps:$4 sm:$0xff]  }
 0x64c   :  { %v3331_v15 = vsel %vm73_vm2, %v3330_v0, %v3329_v46  ;;  %v3355_v18 = vrot.slane %v3354_v22, 7  ;;  %4002 = vmatprep.subr.bf16.mxu0 %v10422_v45  ;;  %v3371_v25 = vld [vmem:[#allocation3 + $0x8] sm:$0xf]  ;;  %4024 = vmatprep.mubr.bf16.mxu0 %v12154_v48  ;;  %12252 = vst [vmem:[#allocation16_spill] sm:$0xff] %v10448_v7  ;;  %12254 = vst [vmem:[#allocation18_spill] sm:$0xff] %v10455_v49 }
 0x64d   :  { %3334 = vst.msk [vmem:[#allocation3 + $0x4a] ss:$8 sm:$0x7] %vm10387_vm10, %v3331_v15  ;;  %v3287_v54 = vpop.permute.xlu0 %3286  ;;  %v3374_v57 = vpack.c.bf16 %v3371_v25, %v3371_v25  ;;  %v10453_v46 = vld [vmem:[#allocation7 + $0x110] ss:$8 sps:$4 sm:$0xff]  }
 0x64e   :  { %v3356_v2 = vsel %vm73_vm2, %v3355_v18, %v3354_v22  ;;  %v3288_v11 = vrot.slane %v3287_v54, 7  ;;  %3954 = vmatpush1.bf16.msra.mxu1 %v10429_v12  ;;  %v4034_v37 = vld [vmem:[#allocation3 + $0x8] sm:$0x1e]  ;;  %12253 = vst [vmem:[#allocation17_spill] sm:$0xff] %v10453_v46  ;;  %v10460_v18 = vld [vmem:[#allocation7 + $0x104] ss:$8 sps:$4 sm:$0xff]  }
 0x64f   :  { %3359 = vst.msk [vmem:[#allocation3 + $0x4b] ss:$8 sm:$0x7] %vm10387_vm10, %v3356_v2  ;;  %4003 = vmatpush1.bf16.msra.mxu0 %v10435_v36  ;;  %3983 = vmatprep.mubr.bf16.mxu1 %v3374_v57  ;;  %v3306_v63 = vpop.permute.xlu1 %3305  ;;  %v4037_v0 = vpack.c.bf16 %v4034_v37, %v4034_v37  ;;  %12255 = vst [vmem:[#allocation19_spill] sm:$0xff] %v10460_v18  ;;  %v10466_v37 = vld [vmem:[#allocation7 + $0x40] ss:$8 sps:$4 sm:$0xff]  }
 0x650   :  { %v3289_v22 = vsel %vm73_vm2, %v3288_v11, %v3287_v54  ;;  %v3307_v15 = vrot.slane %v3306_v63, 7  ;;  %3955 = vmatprep.subr.bf16.mxu1 %v10437_v43  ;;  %4004 = vmatprep.subr.bf16.mxu0 %v10441_v1  ;;  %12256 = vst [vmem:[#allocation20_spill] sm:$0xff] %v10466_v37  ;;  %v10472_v11 = vld [vmem:[#allocation7 + $0x100] ss:$8 sps:$4 sm:$0xff]  }
 0x651   :  { %3293 = vst.msk [vmem:[#allocation3 + $0x31] ss:$8 sm:$0x7] %vm10387_vm10, %v3289_v22  ;;  %v3345_v25 = vpop.permute.xlu0 %3344  ;;  %v4090_v57 = vshll.u32 %v4037_v0, 16  ;;  %12257 = vst [vmem:[#allocation21_spill] sm:$0xff] %v10472_v11 }
 0x652   :  { %v3308_v2 = vsel %vm73_vm2, %v3307_v15, %v3306_v63  ;;  %v3346_v30 = vrot.slane %v3345_v25, 7  ;;  %3956 = vmatpush1.bf16.msra.mxu1 %v10448_v7  ;;  %v10474_v22 = vld [vmem:[#allocation7 + $0x34] ss:$8 sps:$4 sm:$0xff]  }
 0x653   :  { %3311 = vst.msk [vmem:[#allocation3 + $0x32] ss:$8 sm:$0x7] %vm10387_vm10, %v3308_v2  ;;  %4005 = vmatpush1.bf16.msra.mxu0 %v10453_v46  ;;  %v3363_v54 = vpop.permute.xlu1 %3362  ;;  %3957 = vmatprep.subr.bf16.mxu1 %v10455_v49  ;;  %12258 = vst [vmem:[#allocation22_spill] sm:$0xff] %v10474_v22  ;;  %v10478_v15 = vld [vmem:[#allocation7 + $0x2f4] ss:$8 sps:$4 sm:$0xff]  }
 0x654   :  { %v3347_v29 = vsel %vm73_vm2, %v3346_v30, %v3345_v25  ;;  %v3364_v63 = vrot.slane %v3363_v54, 7  ;;  %4006 = vmatprep.subr.bf16.mxu0 %v10460_v18  ;;  %12259 = vst [vmem:[#allocation23_spill] sm:$0xff] %v10478_v15  ;;  %v3372_v2 = vld [vmem:[#allocation3 + $0x10] sm:$0xf]  ;;  %v4092_v4 = vrot.slane %v4090_v57, 1  ;;  %v4088_v25 = vshrl.u32 %v4037_v0, 16 }
 0x655   :  { %3350 = vst.msk [vmem:[#allocation3 + $0x33] ss:$8 sm:$0x7] %vm10387_vm10, %v3347_v29  ;;  %v10484_v49 = vld [vmem:[#allocation7 + $0x30] ss:$8 sps:$4 sm:$0xff]   ;;  %v3375_v18 = vpack.c.bf16 %v3372_v2, %v3372_v2 }
 0x656   :  { %v3365_v56 = vsel %vm73_vm2, %v3364_v63, %v3363_v54  ;;  %3958 = vmatpush1.bf16.msra.mxu1 %v10466_v37  ;;  %12260 = vst [vmem:[#allocation24_spill] sm:$0xff] %v10484_v49  ;;  %v10490_v30 = vld [vmem:[#allocation7 + $0x2f0] ss:$8 sps:$4 sm:$0xff]   ;;  %v10493_v29 = vld [vmem:[#allocation7 + $0x24] ss:$8 sps:$4 sm:$0xff]   ;;  %v4093_v54 = vor.u32 %v4092_v4, %v4088_v25  ;;  %vm5165_vm2 = vcmask 1043456  }
 0x657   :  { %3368 = vst.msk [vmem:[#allocation3 + $0x34] ss:$8 sm:$0x7] %vm10387_vm10, %v3365_v56  ;;  %4007 = vmatpush1.bf16.msra.mxu0 %v10472_v11  ;;  %3959 = vmatprep.subr.bf16.mxu1 %v10474_v22  ;;  %12261 = vst [vmem:[#allocation25_spill] sm:$0xff] %v10490_v30  ;;  %v10495_v57 = vld [vmem:[#allocation7 + $0x2e4] ss:$8 sps:$4 sm:$0xff]  }
 0x658   :  { %4306 = vmatprep.subr.bf16.mxu0 %v10478_v15  ;;  %12262 = vst [vmem:[#allocation26_spill] sm:$0xff] %v10493_v29  ;;  %12263 = vst [vmem:[#allocation27_spill] sm:$0xff] %v10495_v57  ;;  %v10499_v56 = vld [vmem:[#allocation7 + $0x20] ss:$8 sps:$4 sm:$0xff]   ;;  %v10504_v0 = vld [vmem:[#allocation7 + $0x14] ss:$8 sps:$4 sm:$0xff]  }
 0x659   :  { %12264 = vst [vmem:[#allocation28_spill] sm:$0xff] %v10499_v56  ;;  %12266 = vst [vmem:[#allocation30_spill] sm:$0xff] %v10504_v0  ;;  %v10508_v63 = vld [vmem:[#allocation7 + $0x2d4] ss:$8 sps:$4 sm:$0xff]   ;;  %v10511_v4 = vld [vmem:[#allocation7 + $0x10] ss:$8 sps:$4 sm:$0xff]  }
 0x65a   :  { %3960 = vmatpush1.bf16.msra.mxu1 %v10484_v49  ;;  %7992 = vmatmul.mubr.msk.bf16.vlgmr.msra.gmra.mxu0 %vm2967_vm0, %v3375_v18  ;;  %12267 = vst [vmem:[#allocation31_spill] sm:$0xff] %v10508_v63  ;;  %12268 = vst [vmem:[#allocation32_spill] sm:$0xff] %v10511_v4  ;;  %v10515_v18 = vld [vmem:[#allocation7 + $0x2d0] ss:$8 sps:$4 sm:$0xff]   ;;  %v10517_v2 = vld [vmem:[#allocation7 + $0x4] ss:$8 sps:$4 sm:$0xff]  }
 0x65b   :  { %4307 = vmatpush1.bf16.msra.mxu0 %v10490_v30  ;;  %4338 = vmatprep.mubr.bf16.mxu0 %v4093_v54  ;;  %12269 = vst [vmem:[#allocation33_spill] sm:$0xff] %v10515_v18  ;;  %12270 = vst [vmem:[#allocation34_spill] sm:$0xff] %v10517_v2  ;;  %v10520_v25 = vld [vmem:[#allocation7 + $0x2c4] ss:$8 sps:$4 sm:$0xff]   ;;  %v10523_v54 = vld [vmem:[#allocation7] ss:$8 sps:$4 sm:$0xff]  }
 0x65c   :  { %3961 = vmatprep.subr.bf16.mxu1 %v10493_v29  ;;  %4308 = vmatprep.subr.bf16.mxu0 %v10495_v57  ;;  %12271 = vst [vmem:[#allocation35_spill] sm:$0xff] %v10520_v25  ;;  %12272 = vst [vmem:[#allocation36_spill] sm:$0xff] %v10523_v54  ;;  %v10628_v57 = vld [vmem:[#allocation7 + $0x334] ss:$8 sps:$4 sm:$0xff]   ;;  %v10640_v29 = vld [vmem:[#allocation7 + $0x324] ss:$8 sps:$4 sm:$0xff]  }
 0x65d   :  { %12307 = vst [vmem:[#allocation71_spill] sm:$0xff] %v10628_v57  ;;  %12311 = vst [vmem:[#allocation75_spill] sm:$0xff] %v10640_v29  ;;  %v4033_v30 = vld [vmem:[#allocation3] sm:$0x1e] }
 0x65e   :  { %3962 = vmatpush1.bf16.msra.mxu1 %v10499_v56  ;;  %v10527_v56 = vld [vmem:[#allocation7 + $0x2c0] ss:$8 sps:$4 sm:$0xff]   ;;  %v4036_v49 = vpack.c.bf16 %v4033_v30, %v4033_v30  ;;  %v10656_v15 = vld [vmem:[#allocation7 + $0x390] ss:$8 sps:$4 sm:$0xff]   ;;  %v10677_v11 = vld [vmem:[#allocation7 + $0x4f4] ss:$8 sps:$4 sm:$0xff]  }
 0x65f   :  { %4309 = vmatpush1.bf16.msra.mxu0 %v10502_v40  ;;  %3963 = vmatprep.subr.bf16.mxu1 %v10504_v0  ;;  %12273 = vst [vmem:[#allocation37_spill] sm:$0xff] %v10527_v56  ;;  %v10529_v40 = vld [vmem:[#allocation7 + $0xf4] ss:$8 sps:$4 sm:$0xff]   ;;  %12316 = vst [vmem:[#allocation80_spill] sm:$0xff] %v10656_v15 }
 0x660   :  { %4310 = vmatprep.subr.bf16.mxu0 %v10508_v63  ;;  %12274 = vst [vmem:[#allocation38_spill] sm:$0xff] %v10529_v40  ;;  %v10532_v0 = vld [vmem:[#allocation7 + $0x2b4] ss:$8 sps:$4 sm:$0xff]   ;;  %v10535_v63 = vld [vmem:[#allocation7 + $0xf0] ss:$8 sps:$4 sm:$0xff]   ;;  %v4081_v7 = vshrl.u32 %v4036_v49, 16 }
 0x661   :  { %12275 = vst [vmem:[#allocation39_spill] sm:$0xff] %v10532_v0  ;;  %12276 = vst [vmem:[#allocation40_spill] sm:$0xff] %v10535_v63 }
 0x662   :  { %3964 = vmatpush1.bf16.msra.mxu1 %v10511_v4  ;;  %v10539_v4 = vld [vmem:[#allocation7 + $0x2b0] ss:$8 sps:$4 sm:$0xff]  }
 0x663   :  { %4311 = vmatpush1.bf16.msra.mxu0 %v10515_v18  ;;  %3965 = vmatprep.subr.bf16.mxu1 %v10517_v2  ;;  %12277 = vst [vmem:[#allocation41_spill] sm:$0xff] %v10539_v4  ;;  %v10541_v18 = vld [vmem:[#allocation7 + $0xe4] ss:$8 sps:$4 sm:$0xff]  }
 0x664   :  { %4312 = vmatprep.subr.bf16.mxu0 %v10520_v25  ;;  %12278 = vst [vmem:[#allocation42_spill] sm:$0xff] %v10541_v18  ;;  %v10544_v2 = vld [vmem:[#allocation7 + $0x2a4] ss:$8 sps:$4 sm:$0xff]   ;;  %v10547_v25 = vld [vmem:[#allocation7 + $0xe0] ss:$8 sps:$4 sm:$0xff]  }
 0x665   :  { %12279 = vst [vmem:[#allocation43_spill] sm:$0xff] %v10544_v2  ;;  %12280 = vst [vmem:[#allocation44_spill] sm:$0xff] %v10547_v25 }
 0x666   :  { %3966 = vmatpush1.bf16.msra.mxu1 %v10523_v54  ;;  %v10551_v54 = vld [vmem:[#allocation7 + $0x2a0] ss:$8 sps:$4 sm:$0xff]  }
 0x667   :  { %4313 = vmatpush1.bf16.msra.mxu0 %v10527_v56  ;;  %3967 = vmatprep.subr.bf16.mxu1 %v10529_v40  ;;  %12281 = vst [vmem:[#allocation45_spill] sm:$0xff] %v10551_v54  ;;  %v10553_v56 = vld [vmem:[#allocation7 + $0xd4] ss:$8 sps:$4 sm:$0xff]  }
 0x668   :  { %4314 = vmatprep.subr.bf16.mxu0 %v10532_v0  ;;  %12282 = vst [vmem:[#allocation46_spill] sm:$0xff] %v10553_v56  ;;  %v10556_v40 = vld [vmem:[#allocation7 + $0x294] ss:$8 sps:$4 sm:$0xff]   ;;  %v10559_v0 = vld [vmem:[#allocation7 + $0xd0] ss:$8 sps:$4 sm:$0xff]  }
 0x669   :  { %12283 = vst [vmem:[#allocation47_spill] sm:$0xff] %v10556_v40  ;;  %12284 = vst [vmem:[#allocation48_spill] sm:$0xff] %v10559_v0 }
 0x66a   :  { %3968 = vmatpush2.bf16.msra.mxu1 %v10535_v63  ;;  %v10563_v63 = vld [vmem:[#allocation7 + $0x290] ss:$8 sps:$4 sm:$0xff]  }
 0x66b   :  { %4315 = vmatpush1.bf16.msra.mxu0 %v10539_v4  ;;  %3969 = vmatprep.subr.bf16.mxu1 %v10541_v18  ;;  %12285 = vst [vmem:[#allocation49_spill] sm:$0xff] %v10563_v63  ;;  %v10565_v4 = vld [vmem:[#allocation7 + $0xc4] ss:$8 sps:$4 sm:$0xff]  }
 0x66c   :  { %4316 = vmatprep.subr.bf16.mxu0 %v10544_v2  ;;  %12286 = vst [vmem:[#allocation50_spill] sm:$0xff] %v10565_v4  ;;  %v10568_v18 = vld [vmem:[#allocation7 + $0x284] ss:$8 sps:$4 sm:$0xff]   ;;  %v10571_v2 = vld [vmem:[#allocation7 + $0xc0] ss:$8 sps:$4 sm:$0xff]  }
 0x66d   :  { %12287 = vst [vmem:[#allocation51_spill] sm:$0xff] %v10568_v18  ;;  %12288 = vst [vmem:[#allocation52_spill] sm:$0xff] %v10571_v2 }
 0x66e   :  { %3970 = vmatpush2.bf16.msra.mxu1 %v10547_v25  ;;  %v10575_v25 = vld [vmem:[#allocation7 + $0x280] ss:$8 sps:$4 sm:$0xff]  }
 0x66f   :  { %4317 = vmatpush1.bf16.msra.mxu0 %v10551_v54  ;;  %3971 = vmatprep.subr.bf16.mxu1 %v10553_v56  ;;  %12289 = vst [vmem:[#allocation53_spill] sm:$0xff] %v10575_v25  ;;  %v10577_v54 = vld [vmem:[#allocation7 + $0xb4] ss:$8 sps:$4 sm:$0xff]  }
 0x670   :  { %4318 = vmatprep.subr.bf16.mxu0 %v10556_v40  ;;  %12290 = vst [vmem:[#allocation54_spill] sm:$0xff] %v10577_v54  ;;  %v10580_v56 = vld [vmem:[#allocation7 + $0x374] ss:$8 sps:$4 sm:$0xff]   ;;  %v10583_v40 = vld [vmem:[#allocation7 + $0xb0] ss:$8 sps:$4 sm:$0xff]  }
 0x671   :  { %12291 = vst [vmem:[#allocation55_spill] sm:$0xff] %v10580_v56  ;;  %12292 = vst [vmem:[#allocation56_spill] sm:$0xff] %v10583_v40 }
 0x672   :  { %3972 = vmatpush2.bf16.msra.mxu1 %v10559_v0  ;;  %v10587_v0 = vld [vmem:[#allocation7 + $0x370] ss:$8 sps:$4 sm:$0xff]  }
 0x673   :  { %4319 = vmatpush1.bf16.msra.mxu0 %v10563_v63  ;;  %3973 = vmatprep.subr.bf16.mxu1 %v10565_v4  ;;  %12293 = vst [vmem:[#allocation57_spill] sm:$0xff] %v10587_v0  ;;  %v10589_v63 = vld [vmem:[#allocation7 + $0xa4] ss:$8 sps:$4 sm:$0xff]  }
 0x674   :  { %4320 = vmatprep.subr.bf16.mxu0 %v10568_v18  ;;  %12294 = vst [vmem:[#allocation58_spill] sm:$0xff] %v10589_v63  ;;  %v10592_v4 = vld [vmem:[#allocation7 + $0x364] ss:$8 sps:$4 sm:$0xff]   ;;  %v10595_v18 = vld [vmem:[#allocation7 + $0xa0] ss:$8 sps:$4 sm:$0xff]  }
 0x675   :  { %12295 = vst [vmem:[#allocation59_spill] sm:$0xff] %v10592_v4  ;;  %12296 = vst [vmem:[#allocation60_spill] sm:$0xff] %v10595_v18 }
 0x676   :  { %3974 = vmatpush2.bf16.msra.mxu1 %v10571_v2  ;;  %v10599_v2 = vld [vmem:[#allocation7 + $0x360] ss:$8 sps:$4 sm:$0xff]  }
 0x677   :  { %4321 = vmatpush1.bf16.msra.mxu0 %v10575_v25  ;;  %3975 = vmatprep.subr.bf16.mxu1 %v10577_v54  ;;  %12297 = vst [vmem:[#allocation61_spill] sm:$0xff] %v10599_v2  ;;  %v10601_v25 = vld [vmem:[#allocation7 + $0x94] ss:$8 sps:$4 sm:$0xff]  }
 0x678   :  { %4322 = vmatprep.subr.bf16.mxu0 %v10580_v56  ;;  %12298 = vst [vmem:[#allocation62_spill] sm:$0xff] %v10601_v25  ;;  %v10604_v54 = vld [vmem:[#allocation7 + $0x354] ss:$8 sps:$4 sm:$0xff]   ;;  %v10607_v56 = vld [vmem:[#allocation7 + $0x90] ss:$8 sps:$4 sm:$0xff]  }
 0x679   :  { %12299 = vst [vmem:[#allocation63_spill] sm:$0xff] %v10604_v54  ;;  %12300 = vst [vmem:[#allocation64_spill] sm:$0xff] %v10607_v56 }
 0x67a   :  { %3976 = vmatpush2.bf16.msra.mxu1 %v10583_v40  ;;  %v10611_v40 = vld [vmem:[#allocation7 + $0x350] ss:$8 sps:$4 sm:$0xff]  }
 0x67b   :  { %4323 = vmatpush2.bf16.msra.mxu0 %v10587_v0  ;;  %3977 = vmatprep.subr.bf16.mxu1 %v10589_v63  ;;  %12301 = vst [vmem:[#allocation65_spill] sm:$0xff] %v10611_v40  ;;  %v10613_v0 = vld [vmem:[#allocation7 + $0x84] ss:$8 sps:$4 sm:$0xff]  }
 0x67c   :  { %4324 = vmatprep.subr.bf16.mxu0 %v10592_v4  ;;  %12302 = vst [vmem:[#allocation66_spill] sm:$0xff] %v10613_v0  ;;  %v10616_v63 = vld [vmem:[#allocation7 + $0x344] ss:$8 sps:$4 sm:$0xff]   ;;  %v10619_v4 = vld [vmem:[#allocation7 + $0x80] ss:$8 sps:$4 sm:$0xff]  }
 0x67d   :  { %12303 = vst [vmem:[#allocation67_spill] sm:$0xff] %v10616_v63  ;;  %12304 = vst [vmem:[#allocation68_spill] sm:$0xff] %v10619_v4 }
 0x67e   :  { %3978 = vmatpush2.bf16.msra.mxu1 %v10595_v18  ;;  %v10623_v18 = vld [vmem:[#allocation7 + $0x340] ss:$8 sps:$4 sm:$0xff]  }
 0x67f   :  { %4325 = vmatpush2.bf16.msra.mxu0 %v10599_v2  ;;  %3979 = vmatprep.subr.bf16.mxu1 %v10601_v25  ;;  %12305 = vst [vmem:[#allocation69_spill] sm:$0xff] %v10623_v18  ;;  %v10625_v2 = vld [vmem:[#allocation7 + $0x3b4] ss:$8 sps:$4 sm:$0xff]   ;;  %v3370_v25 = vld [vmem:[#allocation3] sm:$0xf] }
 0x680   :  { %4326 = vmatprep.subr.bf16.mxu0 %v10604_v54  ;;  %12306 = vst [vmem:[#allocation70_spill] sm:$0xff] %v10625_v2  ;;  %v10631_v54 = vld [vmem:[#allocation7 + $0x3b0] ss:$8 sps:$4 sm:$0xff]  }
 0x681   :  { %12308 = vst [vmem:[#allocation72_spill] sm:$0xff] %v10631_v54 }
 0x682   :  { %3980 = vmatpush2.bf16.msra.mxu1 %v10607_v56  ;;  %v3373_v56 = vpack.c.bf16 %v3370_v25, %v3370_v25  ;;  %v4391_v25 = vld [vmem:[#allocation3 + $0x20] sm:$0x1e] }
 0x683   :  { %4327 = vmatpush2.bf16.msra.mxu0 %v10611_v40  ;;  %3981 = vmatprep.subr.bf16.mxu1 %v10613_v0  ;;  %v10635_v40 = vld [vmem:[#allocation7 + $0x330] ss:$8 sps:$4 sm:$0xff]   ;;  %v10637_v0 = vld [vmem:[#allocation7 + $0x3a4] ss:$8 sps:$4 sm:$0xff]  }
 0x684   :  { %4328 = vmatprep.subr.bf16.mxu0 %v10616_v63  ;;  %12309 = vst [vmem:[#allocation73_spill] sm:$0xff] %v10635_v40  ;;  %12310 = vst [vmem:[#allocation74_spill] sm:$0xff] %v10637_v0  ;;  %v4035_v63 = vld [vmem:[#allocation3 + $0x10] sm:$0x1e] }
 0x686   :  { %3982 = vmatpush2.bf16.msra.mxu1 %v10619_v4  ;;  %v10643_v4 = vld [vmem:[#allocation7 + $0x3a0] ss:$8 sps:$4 sm:$0xff]  }
 0x687   :  { %4329 = vmatpush2.bf16.msra.mxu0 %v10623_v18  ;;  %4355 = vmatprep.subr.bf16.mxu1 %v10625_v2  ;;  %12312 = vst [vmem:[#allocation76_spill] sm:$0xff] %v10643_v4  ;;  %v10648_v2 = vld [vmem:[#allocation7 + $0x320] ss:$8 sps:$4 sm:$0xff]   ;;  %v10650_v18 = vld [vmem:[#allocation7 + $0x394] ss:$8 sps:$4 sm:$0xff]  }
 0x688   :  { %4330 = vmatprep.subr.bf16.mxu0 %v10628_v57  ;;  %12313 = vst [vmem:[#allocation77_spill] sm:$0xff] %v10648_v2  ;;  %12314 = vst [vmem:[#allocation78_spill] sm:$0xff] %v10650_v18  ;;  %v4038_v57 = vpack.c.bf16 %v4035_v63, %v4035_v63  ;;  %v10665_v63 = vld [vmem:[#allocation7 + $0x304] ss:$8 sps:$4 sm:$0xff]  }
 0x689   :  { %3984 = vmatmul.mubr.bf16.vlgmr.msra.gmra.mxu1 %v3373_v56  ;;  %v10653_v56 = vld [vmem:[#allocation7 + $0x314] ss:$8 sps:$4 sm:$0xff]  }
 0x68a   :  { %4356 = vmatpush1.bf16.msra.mxu1 %v10631_v54  ;;  %4379 = vmatprep.mubr.bf16.mxu1 %v12154_v48  ;;  %12315 = vst [vmem:[#allocation79_spill] sm:$0xff] %v10653_v56  ;;  %v4394_v54 = vpack.c.bf16 %v4391_v25, %v4391_v25  ;;  %v4097_v22 = vshll.u32 %v4038_v57, 16  ;;  %v10668_v25 = vld [vmem:[#allocation7 + $0x380] ss:$8 sps:$4 sm:$0xff]   ;;  %v4095_v37 = vshrl.u32 %v4038_v57, 16 }
 0x68b   :  { %4331 = vmatpush2.bf16.msra.mxu0 %v10635_v40  ;;  %4357 = vmatprep.subr.bf16.mxu1 %v10637_v0  ;;  %v10660_v0 = vld [vmem:[#allocation7 + $0x310] ss:$8 sps:$4 sm:$0xff]   ;;  %v10662_v40 = vld [vmem:[#allocation7 + $0x384] ss:$8 sps:$4 sm:$0xff]   ;;  %12319 = vst [vmem:[#allocation83_spill] sm:$0xff] %v10668_v25 }
 0x68c   :  { %4332 = vmatprep.subr.bf16.mxu0 %v10640_v29  ;;  %12317 = vst [vmem:[#allocation81_spill] sm:$0xff] %v10660_v0  ;;  %12318 = vst [vmem:[#allocation82_spill] sm:$0xff] %v10662_v40  ;;  %v4083_v29 = vshll.u32 %v4036_v49, 16  ;;  %v4447_v30 = vshll.u32 %v4394_v54, 16  ;;  %v10689_v57 = vld [vmem:[#allocation7 + $0x4e4] ss:$8 sps:$4 sm:$0xff]  }
 0x68d   :  { %12320 = vst [vmem:[#allocation84_spill] sm:$0xff] %v10689_v57  ;;  %v10693_v49 = vld [vmem:[#allocation7 + $0x420] ss:$8 sps:$4 sm:$0xff]  }
 0x68e   :  { %4358 = vmatpush1.bf16.msra.mxu1 %v10643_v4  ;;  %v10674_v4 = vld [vmem:[#allocation7 + $0x434] ss:$8 sps:$4 sm:$0xff]   ;;  %v4449_v46 = vrot.slane %v4447_v30, 1  ;;  %12321 = vst [vmem:[#allocation85_spill] sm:$0xff] %v10693_v49 }
 0x68f   :  { %4333 = vmatpush2.bf16.msra.mxu0 %v10648_v2  ;;  %4359 = vmatprep.subr.bf16.mxu1 %v10650_v18  ;;  %v10672_v18 = vld [vmem:[#allocation7 + $0x300] ss:$8 sps:$4 sm:$0xff]   ;;  %v4099_v2 = vrot.slane %v4097_v22, 1  ;;  %v4445_v22 = vshrl.u32 %v4394_v54, 16  ;;  %v10712_v54 = vld [vmem:[#allocation7 + $0x404] ss:$8 sps:$4 sm:$0xff]  }
 0x690   :  { %4334 = vmatprep.subr.bf16.mxu0 %v10653_v56  ;;  %v4085_v56 = vrot.slane %v4083_v29, 1  ;;  %v10687_v29 = vld [vmem:[#allocation7 + $0x424] ss:$8 sps:$4 sm:$0xff]   ;;  %12327 = vst [vmem:[#allocation91_spill] sm:$0xff] %v10712_v54 }
 0x691   :  { %v4450_v30 = vor.u32 %v4449_v46, %v4445_v22 }
 0x692   :  { %4360 = vmatpush1.bf16.msra.mxu1 %v10656_v15  ;;  %v10680_v15 = vld [vmem:[#allocation7 + $0x430] ss:$8 sps:$4 sm:$0xff]   ;;  %v4086_v1 = vor.u32 %v4085_v56, %v4081_v7  ;;  %v10698_v7 = vld [vmem:[#allocation7 + $0x414] ss:$8 sps:$4 sm:$0xff]   ;;  %v10715_v56 = vld [vmem:[#allocation7 + $0x4c4] ss:$8 sps:$4 sm:$0xff]  }
 0x693   :  { %4335 = vmatpush2.bf16.msra.mxu0 %v10660_v0  ;;  %4361 = vmatprep.subr.bf16.mxu1 %v10662_v40  ;;  %v4100_v40 = vor.u32 %v4099_v2, %v4095_v37  ;;  %v10684_v0 = vld [vmem:[#allocation7 + $0x4f0] ss:$8 sps:$4 sm:$0xff]   ;;  %v10696_v37 = vld [vmem:[#allocation7 + $0x4e0] ss:$8 sps:$4 sm:$0xff]   ;;  %12323 = vst [vmem:[#allocation87_spill] sm:$0xff] %v10698_v7 }
 0x694   :  { %4336 = vmatprep.subr.bf16.mxu0 %v10665_v63  ;;  %12322 = vst [vmem:[#allocation86_spill] sm:$0xff] %v10696_v37  ;;  %v10702_v2 = vld [vmem:[#allocation7 + $0x4d4] ss:$8 sps:$4 sm:$0xff]  }
 0x695   :  { %12324 = vst [vmem:[#allocation88_spill] sm:$0xff] %v10702_v2 }
 0x696   :  { %4362 = vmatpush1.bf16.msra.mxu1 %v10668_v25  ;;  %v4392_v25 = vld [vmem:[#allocation3 + $0x28] sm:$0x1e] }
 0x697   :  { %4337 = vmatpush2.bf16.msra.mxu0 %v10672_v18  ;;  %4663 = vmatprep.subr.bf16.mxu1 %v10674_v4  ;;  %v4395_v46 = vpack.c.bf16 %v4392_v25, %v4392_v25  ;;  %v10718_v25 = vld [vmem:[#allocation7 + $0x400] ss:$8 sps:$4 sm:$0xff]  }
 0x698   :  { %4712 = vmatprep.subr.bf16.mxu0 %v10677_v11 }
 0x699   :  { %8033 = vmatmul.mubr.msk.bf16.vlgmr.msra.gmra.mxu1 %vm2967_vm0, %v4100_v40  ;;  %v10710_v40 = vld [vmem:[#allocation7 + $0x4d0] ss:$8 sps:$4 sm:$0xff]   ;;  %v4454_v22 = vshll.u32 %v4395_v46, 16 }
 0x69a   :  { %4339 = vmatmul.mubr.bf16.vlgmr.msra.gmra.mxu0 %v4086_v1  ;;  %4664 = vmatpush1.bf16.msra.mxu1 %v10680_v15  ;;  %v10706_v1 = vld [vmem:[#allocation7 + $0x410] ss:$8 sps:$4 sm:$0xff]   ;;  %12326 = vst [vmem:[#allocation90_spill] sm:$0xff] %v10710_v40 }
 0x69b   :  { %4695 = vmatprep.mubr.bf16.mxu1 %v4450_v30  ;;  %4713 = vmatpush1.bf16.msra.mxu0 %v10684_v0  ;;  %12325 = vst [vmem:[#allocation89_spill] sm:$0xff] %v10706_v1  ;;  %v10722_v30 = vld [vmem:[#allocation7 + $0x4c0] ss:$8 sps:$4 sm:$0xff]  }
 0x69c   :  { %4665 = vmatprep.subr.bf16.mxu1 %v10687_v29  ;;  %4714 = vmatprep.subr.bf16.mxu0 %v10689_v57  ;;  %v4754_v57 = vld [vmem:[#allocation3 + $0x50] sm:$0xf] }
 0x69d   :  { %4736 = vmatprep.mubr.bf16.mxu0 %v12154_v48 }
 0x69e   :  { %4666 = vmatpush1.bf16.msra.mxu1 %v10693_v49  ;;  %v4452_v49 = vshrl.u32 %v4395_v46, 16  ;;  %v10740_v46 = vld [vmem:[#allocation7 + $0x3d4] ss:$8 sps:$4 sm:$0xff]  }
 0x69f   :  { %4715 = vmatpush1.bf16.msra.mxu0 %v10696_v37  ;;  %4667 = vmatprep.subr.bf16.mxu1 %v10698_v7  ;;  %v10724_v7 = vld [vmem:[#allocation7 + $0x3f4] ss:$8 sps:$4 sm:$0xff]   ;;  %v4456_v37 = vrot.slane %v4454_v22, 1  ;;  %v10737_v22 = vld [vmem:[#allocation7 + $0x3e0] ss:$8 sps:$4 sm:$0xff]  }
 0x6a0   :  { %4716 = vmatprep.subr.bf16.mxu0 %v10702_v2  ;;  %v10728_v2 = vld [vmem:[#allocation7 + $0x3f0] ss:$8 sps:$4 sm:$0xff]  }
 0x6a2   :  { %4668 = vmatpush1.bf16.msra.mxu1 %v10706_v1  ;;  %v4757_v1 = vpack.c.bf16 %v4754_v57, %v4754_v57  ;;  %v10749_v57 = vld [vmem:[#allocation7 + $0x3c4] ss:$8 sps:$4 sm:$0xff]  }
 0x6a3   :  { %4717 = vmatpush1.bf16.msra.mxu0 %v10710_v40  ;;  %4669 = vmatprep.subr.bf16.mxu1 %v10712_v54  ;;  %v4457_v40 = vor.u32 %v4456_v37, %v4452_v49  ;;  %v10733_v54 = vld [vmem:[#allocation7 + $0x3e4] ss:$8 sps:$4 sm:$0xff]  }
 0x6a4   :  { %4718 = vmatprep.subr.bf16.mxu0 %v10715_v56  ;;  %v4390_v49 = vld [vmem:[#allocation3 + $0x18] sm:$0x1e] }
 0x6a5   :  { %v4393_v37 = vpack.c.bf16 %v4390_v49, %v4390_v49  ;;  %v9119_v49 = vld [vmem:[#allocation7 + $0x210] ss:$8 sps:$4 sm:$0xff]  }
 0x6a6   :  { %4670 = vmatpush1.bf16.msra.mxu1 %v10718_v25 }
 0x6a7   :  { %4719 = vmatpush1.bf16.msra.mxu0 %v10722_v30  ;;  %4671 = vmatprep.subr.bf16.mxu1 %v10724_v7 }
 0x6a8   :  { %4762 = vmatprep.subr.bf16.mxu0 %v10224_v5  ;;  %v10745_v5 = vld [vmem:[#allocation7 + $0x3d0] ss:$8 sps:$4 sm:$0xff]  }
 0x6aa   :  { %4672 = vmatpush1.bf16.msra.mxu1 %v10728_v2  ;;  %8074 = vmatmul.mubr.msk.bf16.vlgmr.msra.gmra.mxu0 %vm2967_vm0, %v4457_v40  ;;  %v9117_v40 = vld [vmem:[#allocation7 + $0x220] ss:$8 sps:$4 sm:$0xff]  }
 0x6ab   :  { %4763 = vmatpush1.bf16.msra.mxu0 %v10222_v38  ;;  %4794 = vmatprep.mubr.bf16.mxu0 %v4757_v1  ;;  %v10753_v38 = vld [vmem:[#allocation7 + $0x3c0] ss:$8 sps:$4 sm:$0xff]   ;;  %v9116_v1 = vld [vmem:[#allocation7 + $0x224] ss:$8 sps:$4 sm:$0xff]  }
 0x6ac   :  { %4673 = vmatprep.subr.bf16.mxu1 %v10733_v54  ;;  %4764 = vmatprep.subr.bf16.mxu0 %v10226_v8  ;;  %v10757_v8 = vld [vmem:[#allocation7 + $0x4b4] ss:$8 sps:$4 sm:$0xff]  }
 0x6ae   :  { %4674 = vmatpush1.bf16.msra.mxu1 %v10737_v22 }
 0x6af   :  { %4765 = vmatpush1.bf16.msra.mxu0 %v10230_v19  ;;  %4675 = vmatprep.subr.bf16.mxu1 %v10740_v46  ;;  %v10761_v19 = vld [vmem:[#allocation7 + $0x4b0] ss:$8 sps:$4 sm:$0xff]  }
 0x6b0   :  { %4766 = vmatprep.subr.bf16.mxu0 %v10233_v13  ;;  %v10765_v13 = vld [vmem:[#allocation7 + $0x4a4] ss:$8 sps:$4 sm:$0xff]  }
 0x6b2   :  { %4676 = vmatpush1.bf16.msra.mxu1 %v10745_v5 }
 0x6b3   :  { %4767 = vmatpush1.bf16.msra.mxu0 %v10236_v59  ;;  %4677 = vmatprep.subr.bf16.mxu1 %v10749_v57  ;;  %v10769_v59 = vld [vmem:[#allocation7 + $0x4a0] ss:$8 sps:$4 sm:$0xff]  }
 0x6b4   :  { %4768 = vmatprep.subr.bf16.mxu0 %v10239_v47  ;;  %v10773_v47 = vld [vmem:[#allocation7 + $0x494] ss:$8 sps:$4 sm:$0xff]  }
 0x6b6   :  { %4678 = vmatpush1.bf16.msra.mxu1 %v10753_v38 }
 0x6b7   :  { %4769 = vmatpush1.bf16.msra.mxu0 %v10246_v28  ;;  %4679 = vmatprep.subr.bf16.mxu1 %v10757_v8  ;;  %v10777_v28 = vld [vmem:[#allocation7 + $0x490] ss:$8 sps:$4 sm:$0xff]  }
 0x6b8   :  { %4770 = vmatprep.subr.bf16.mxu0 %v10249_v6  ;;  %v10781_v6 = vld [vmem:[#allocation7 + $0x484] ss:$8 sps:$4 sm:$0xff]  }
 0x6ba   :  { %4680 = vmatpush2.bf16.msra.mxu1 %v10761_v19 }
 0x6bb   :  { %4771 = vmatpush1.bf16.msra.mxu0 %v10252_v33  ;;  %4681 = vmatprep.subr.bf16.mxu1 %v10765_v13  ;;  %v10785_v33 = vld [vmem:[#allocation7 + $0x480] ss:$8 sps:$4 sm:$0xff]  }
 0x6bc   :  { %4772 = vmatprep.subr.bf16.mxu0 %v10255_v24  ;;  %v10789_v24 = vld [vmem:[#allocation7 + $0x474] ss:$8 sps:$4 sm:$0xff]  }
 0x6bd   :  { %12328 = vst [vmem:[#allocation92_spill] sm:$0xff] %v10789_v24 }
 0x6be   :  { %4682 = vmatpush2.bf16.msra.mxu1 %v10769_v59 }
 0x6bf   :  { %4773 = vmatpush1.bf16.msra.mxu0 %v10258_v26  ;;  %4683 = vmatprep.subr.bf16.mxu1 %v10773_v47  ;;  %v10793_v26 = vld [vmem:[#allocation7 + $0x470] ss:$8 sps:$4 sm:$0xff]  }
 0x6c0   :  { %4774 = vmatprep.subr.bf16.mxu0 %v10261_v58  ;;  %12329 = vst [vmem:[#allocation93_spill] sm:$0xff] %v10793_v26  ;;  %v10797_v58 = vld [vmem:[#allocation7 + $0x464] ss:$8 sps:$4 sm:$0xff]  }
 0x6c1   :  { %12330 = vst [vmem:[#allocation94_spill] sm:$0xff] %v10797_v58 }
 0x6c2   :  { %4684 = vmatpush2.bf16.msra.mxu1 %v10777_v28 }
 0x6c3   :  { %4775 = vmatpush1.bf16.msra.mxu0 %v10264_v44  ;;  %4685 = vmatprep.subr.bf16.mxu1 %v10781_v6  ;;  %v10801_v44 = vld [vmem:[#allocation7 + $0x460] ss:$8 sps:$4 sm:$0xff]  }
 0x6c4   :  { %4776 = vmatprep.subr.bf16.mxu0 %v10267_v42  ;;  %12331 = vst [vmem:[#allocation95_spill] sm:$0xff] %v10801_v44  ;;  %v10805_v42 = vld [vmem:[#allocation7 + $0x454] ss:$8 sps:$4 sm:$0xff]  }
 0x6c5   :  { %12332 = vst [vmem:[#allocation96_spill] sm:$0xff] %v10805_v42 }
 0x6c6   :  { %4686 = vmatpush2.bf16.msra.mxu1 %v10785_v33 }
 0x6c7   :  { %4777 = vmatpush1.bf16.msra.mxu0 %v10270_v53  ;;  %4687 = vmatprep.subr.bf16.mxu1 %v10789_v24  ;;  %v10808_v53 = vld [vmem:[#allocation7 + $0x450] ss:$8 sps:$4 sm:$0xff]   ;;  %v9118_v24 = vld [vmem:[#allocation7 + $0x214] ss:$8 sps:$4 sm:$0xff]  }
 0x6c8   :  { %4778 = vmatprep.subr.bf16.mxu0 %v10273_v14  ;;  %v10811_v14 = vld [vmem:[#allocation7 + $0x444] ss:$8 sps:$4 sm:$0xff]  }
 0x6ca   :  { %4688 = vmatpush2.bf16.msra.mxu1 %v10793_v26  ;;  %v4440_v26 = vshll.u32 %v4393_v37, 16 }
 0x6cb   :  { %4779 = vmatpush2.bf16.msra.mxu0 %v10276_v61  ;;  %4689 = vmatprep.subr.bf16.mxu1 %v10797_v58  ;;  %v10814_v61 = vld [vmem:[#allocation7 + $0x440] ss:$8 sps:$4 sm:$0xff]   ;;  %v4438_v58 = vshrl.u32 %v4393_v37, 16  ;;  %v12349_v37 = vld [vmem:[#allocation31_spill] sm:$0xff] }
 0x6cc   :  { %4780 = vmatprep.subr.bf16.mxu0 %v9116_v1  ;;  %v4442_v1 = vrot.slane %v4440_v26, 1  ;;  %v12345_v26 = vld [vmem:[#allocation27_spill] sm:$0xff] }
 0x6ce   :  { %4690 = vmatpush2.bf16.msra.mxu1 %v10801_v44  ;;  %v9120_v44 = vld [vmem:[#allocation7 + $0x204] ss:$8 sps:$4 sm:$0xff]  }
 0x6cf   :  { %4781 = vmatpush2.bf16.msra.mxu0 %v9117_v40  ;;  %4691 = vmatprep.subr.bf16.mxu1 %v10805_v42  ;;  %v9121_v40 = vld [vmem:[#allocation7 + $0x200] ss:$8 sps:$4 sm:$0xff]   ;;  %v4443_v42 = vor.u32 %v4442_v1, %v4438_v58 }
 0x6d0   :  { %4782 = vmatprep.subr.bf16.mxu0 %v9118_v24  ;;  %v12344_v24 = vld [vmem:[#allocation26_spill] sm:$0xff]  ;;  %v12346_v58 = vld [vmem:[#allocation28_spill] sm:$0xff]  ;;  %v12351_v1 = vld [vmem:[#allocation33_spill] sm:$0xff] }
 0x6d2   :  { %4692 = vmatpush2.bf16.msra.mxu1 %v10808_v53 }
 0x6d3   :  { %4783 = vmatpush2.bf16.msra.mxu0 %v9119_v49  ;;  %4693 = vmatprep.subr.bf16.mxu1 %v10811_v14  ;;  %v12350_v49 = vld [vmem:[#allocation32_spill] sm:$0xff] }
 0x6d4   :  { %4784 = vmatprep.subr.bf16.mxu0 %v9120_v44  ;;  %v12347_v44 = vld [vmem:[#allocation29_spill] sm:$0xff] }
 0x6d6   :  { %4694 = vmatpush2.bf16.msra.mxu1 %v10814_v61 }
 0x6d7   :  { %4785 = vmatpush2.bf16.msra.mxu0 %v9121_v40  ;;  %4811 = vmatprep.subr.bf16.mxu1 %v10301_v32  ;;  %v4755_v32 = vld [vmem:[#allocation3 + $0x58] sm:$0xf]  ;;  %v12352_v40 = vld [vmem:[#allocation34_spill] sm:$0xff] }
 0x6d8   :  { %4786 = vmatprep.subr.bf16.mxu0 %v10305_v10  ;;  %v4748_v10 = vld [vmem:[#allocation3 + $0x38] sm:$0xf] }
 0x6d9   :  { %4696 = vmatmul.mubr.bf16.vlgmr.msra.gmra.mxu1 %v4443_v42  ;;  %v12348_v42 = vld [vmem:[#allocation30_spill] sm:$0xff] }
 0x6da   :  { %4812 = vmatpush1.bf16.msra.mxu1 %v10303_v35  ;;  %4835 = vmatprep.mubr.bf16.mxu1 %v12154_v48  ;;  %v4753_v35 = vld [vmem:[#allocation3 + $0x48] sm:$0xf] }
 0x6db   :  { %4787 = vmatpush2.bf16.msra.mxu0 %v10310_v17  ;;  %4813 = vmatprep.subr.bf16.mxu1 %v10317_v27  ;;  %v4758_v17 = vpack.c.bf16 %v4755_v32, %v4755_v32  ;;  %v4751_v27 = vpack.c.bf16 %v4748_v10, %v4748_v10  ;;  %v12353_v32 = vld [vmem:[#allocation35_spill] sm:$0xff]  ;;  %v12355_v10 = vld [vmem:[#allocation37_spill] sm:$0xff] }
 0x6dc   :  { %4788 = vmatprep.subr.bf16.mxu0 %v10319_v31  ;;  %v4930_v31 = vld [vmem:[#allocation3 + $0x38] sm:$0x1e] }
 0x6de   :  { %4814 = vmatpush1.bf16.msra.mxu1 %v10315_v20  ;;  %v4756_v20 = vpack.c.bf16 %v4753_v35, %v4753_v35  ;;  %v12354_v35 = vld [vmem:[#allocation36_spill] sm:$0xff] }
 0x6df   :  { %4789 = vmatpush2.bf16.msra.mxu0 %v10321_v39  ;;  %4815 = vmatprep.subr.bf16.mxu1 %v10329_v50  ;;  %v4933_v39 = vpack.c.bf16 %v4930_v31, %v4930_v31  ;;  %v12333_v50 = vld [vmem:[#allocation15_spill] sm:$0xff]  ;;  %v12358_v31 = vld [vmem:[#allocation40_spill] sm:$0xff] }
 0x6e0   :  { %4790 = vmatprep.subr.bf16.mxu0 %v10333_v9  ;;  %v12334_v9 = vld [vmem:[#allocation16_spill] sm:$0xff] }
 0x6e2   :  { %4816 = vmatpush1.bf16.msra.mxu1 %v10331_v51  ;;  %v4945_v51 = vshll.u32 %v4933_v39, 16 }
 0x6e3   :  { %4791 = vmatpush2.bf16.msra.mxu0 %v10337_v21  ;;  %4817 = vmatprep.subr.bf16.mxu1 %v10342_v41  ;;  %v12335_v21 = vld [vmem:[#allocation17_spill] sm:$0xff]  ;;  %v12336_v41 = vld [vmem:[#allocation18_spill] sm:$0xff] }
 0x6e4   :  { %4792 = vmatprep.subr.bf16.mxu0 %v10347_v55  ;;  %v4749_v55 = vld [vmem:[#allocation3 + $0x40] sm:$0xf] }
 0x6e6   :  { %4818 = vmatpush1.bf16.msra.mxu1 %v10345_v52  ;;  %v12337_v52 = vld [vmem:[#allocation19_spill] sm:$0xff] }
 0x6e7   :  { %4793 = vmatpush2.bf16.msra.mxu0 %v10351_v60  ;;  %4847 = vmatprep.subr.bf16.mxu1 %v10357_v23  ;;  %v4947_v60 = vrot.slane %v4945_v51, 1  ;;  %v12338_v23 = vld [vmem:[#allocation20_spill] sm:$0xff]  ;;  %v12359_v51 = vld [vmem:[#allocation41_spill] sm:$0xff] }
 0x6e8   :  { %4896 = vmatprep.subr.bf16.mxu0 %v10360_v34  ;;  %v12339_v34 = vld [vmem:[#allocation21_spill] sm:$0xff] }
 0x6e9   :  { %8075 = vmatmul.mubr.msk.bf16.vlgmr.msra.gmra.mxu1 %vm2967_vm0, %v4758_v17  ;;  %v12356_v17 = vld [vmem:[#allocation38_spill] sm:$0xff] }
 0x6ea   :  { %4795 = vmatmul.mubr.bf16.vlgmr.msra.gmra.mxu0 %v4756_v20  ;;  %4848 = vmatpush1.bf16.msra.mxu1 %v10412_v62  ;;  %v12340_v62 = vld [vmem:[#allocation22_spill] sm:$0xff]  ;;  %v12357_v20 = vld [vmem:[#allocation39_spill] sm:$0xff] }
 0x6eb   :  { %4879 = vmatprep.mubr.bf16.mxu1 %v4751_v27  ;;  %4897 = vmatpush1.bf16.msra.mxu0 %v10417_v3  ;;  %v4943_v3 = vshrl.u32 %v4933_v39, 16 }
 0x6ec   :  { %4849 = vmatprep.subr.bf16.mxu1 %v10419_v16  ;;  %4898 = vmatprep.subr.bf16.mxu0 %v10422_v45  ;;  %v4752_v16 = vpack.c.bf16 %v4749_v55, %v4749_v55  ;;  %v12341_v45 = vld [vmem:[#allocation23_spill] sm:$0xff] }
 0x6ed   :  { %4920 = vmatprep.mubr.bf16.mxu0 %v12154_v48 }
 0x6ee   :  { %4850 = vmatpush1.bf16.msra.mxu1 %v10429_v12  ;;  %v4948_v12 = vor.u32 %v4947_v60, %v4943_v3 }
 0x6ef   :  { %4899 = vmatpush1.bf16.msra.mxu0 %v10435_v36  ;;  %4851 = vmatprep.subr.bf16.mxu1 %v10437_v43  ;;  %v12342_v36 = vld [vmem:[#allocation24_spill] sm:$0xff]  ;;  %v12343_v43 = vld [vmem:[#allocation25_spill] sm:$0xff] }
 0x6f0   :  { %4900 = vmatprep.subr.bf16.mxu0 %v12333_v50 }
 0x6f2   :  { %4852 = vmatpush1.bf16.msra.mxu1 %v12334_v9 }
 0x6f3   :  { %4901 = vmatpush1.bf16.msra.mxu0 %v12335_v21  ;;  %4853 = vmatprep.subr.bf16.mxu1 %v12336_v41  ;;  %v12360_v21 = vld [vmem:[#allocation42_spill] sm:$0xff] }
 0x6f4   :  { %4902 = vmatprep.subr.bf16.mxu0 %v12337_v52  ;;  %v12361_v52 = vld [vmem:[#allocation43_spill] sm:$0xff] }
 0x6f6   :  { %4854 = vmatpush1.bf16.msra.mxu1 %v12338_v23  ;;  %v12362_v23 = vld [vmem:[#allocation44_spill] sm:$0xff] }
 0x6f7   :  { %4903 = vmatpush1.bf16.msra.mxu0 %v12339_v34  ;;  %4855 = vmatprep.subr.bf16.mxu1 %v12340_v62  ;;  %v12363_v62 = vld [vmem:[#allocation45_spill] sm:$0xff] }
 0x6f8   :  { %4961 = vmatprep.subr.bf16.mxu0 %v12341_v45 }
 0x6fa   :  { %4856 = vmatpush1.bf16.msra.mxu1 %v12342_v36  ;;  %8076 = vmatmul.mubr.msk.bf16.vlgmr.msra.gmra.mxu0 %vm2967_vm0, %v4752_v16  ;;  %v12364_v16 = vld [vmem:[#allocation46_spill] sm:$0xff]  ;;  %v12366_v36 = vld [vmem:[#allocation48_spill] sm:$0xff] }
 0x6fb   :  { %4962 = vmatpush1.bf16.msra.mxu0 %v12343_v43  ;;  %4993 = vmatprep.mubr.bf16.mxu0 %v4948_v12  ;;  %v12365_v12 = vld [vmem:[#allocation47_spill] sm:$0xff]  ;;  %v12367_v43 = vld [vmem:[#allocation49_spill] sm:$0xff] }
 0x6fc   :  { %4857 = vmatprep.subr.bf16.mxu1 %v12344_v24  ;;  %4963 = vmatprep.subr.bf16.mxu0 %v12345_v26  ;;  %v12368_v24 = vld [vmem:[#allocation50_spill] sm:$0xff]  ;;  %v12369_v26 = vld [vmem:[#allocation51_spill] sm:$0xff] }
 0x6fe   :  { %4858 = vmatpush1.bf16.msra.mxu1 %v12346_v58  ;;  %v12370_v58 = vld [vmem:[#allocation52_spill] sm:$0xff] }
 0x6ff   :  { %4964 = vmatpush1.bf16.msra.mxu0 %v12347_v44  ;;  %4859 = vmatprep.subr.bf16.mxu1 %v12348_v42  ;;  %v12371_v44 = vld [vmem:[#allocation53_spill] sm:$0xff]  ;;  %v12372_v42 = vld [vmem:[#allocation54_spill] sm:$0xff] }
 0x700   :  { %4965 = vmatprep.subr.bf16.mxu0 %v12349_v37  ;;  %v12373_v37 = vld [vmem:[#allocation55_spill] sm:$0xff] }
 0x702   :  { %4860 = vmatpush1.bf16.msra.mxu1 %v12350_v49 }
 0x703   :  { %4966 = vmatpush1.bf16.msra.mxu0 %v12351_v1  ;;  %4861 = vmatprep.subr.bf16.mxu1 %v12352_v40  ;;  %v12374_v1 = vld [vmem:[#allocation56_spill] sm:$0xff]  ;;  %v12375_v40 = vld [vmem:[#allocation57_spill] sm:$0xff] }
 0x704   :  { %4967 = vmatprep.subr.bf16.mxu0 %v12353_v32  ;;  %v12376_v32 = vld [vmem:[#allocation58_spill] sm:$0xff] }
 0x706   :  { %4862 = vmatpush1.bf16.msra.mxu1 %v12354_v35 }
 0x707   :  { %4968 = vmatpush1.bf16.msra.mxu0 %v12355_v10  ;;  %4863 = vmatprep.subr.bf16.mxu1 %v12356_v17  ;;  %v12377_v10 = vld [vmem:[#allocation59_spill] sm:$0xff] }
 0x708   :  { %4969 = vmatprep.subr.bf16.mxu0 %v12357_v20  ;;  %v12378_v20 = vld [vmem:[#allocation60_spill] sm:$0xff] }
 0x709   :  { %v3741_v27 = vpop.f32.mrf.mxu1 }
 0x70a   :  { %4864 = vmatpush2.bf16.msra.mxu1 %v12358_v31  ;;  %v3700_v39 = vpop.f32.mrf.mxu0  ;;  %v12380_v31 = vld [vmem:[#allocation62_spill] sm:$0xff] }
 0x70b   :  { %v10873_v50 = vadd.f32 %v3741_v27, %v3700_v39  ;;  %4970 = vmatpush1.bf16.msra.mxu0 %v12359_v51  ;;  %v3743_v9 = vpop.f32.mrf.mxu1  ;;  %4865 = vmatprep.subr.bf16.mxu1 %v12360_v21  ;;  %v12379_v27 = vld [vmem:[#allocation61_spill] sm:$0xff]  ;;  %v12381_v51 = vld [vmem:[#allocation63_spill] sm:$0xff] }
 0x70c   :  { %v3702_v41 = vpop.f32.mrf.mxu0  ;;  %4971 = vmatprep.subr.bf16.mxu0 %v12361_v52  ;;  %v12383_v21 = vld [vmem:[#allocation65_spill] sm:$0xff]  ;;  %v12385_v52 = vld [vmem:[#allocation67_spill] sm:$0xff] }
 0x70d   :  { %v10878_v55 = vadd.f32 %v3743_v9, %v3702_v41  ;;  %v3745_v60 = vpop.f32.mrf.mxu1  ;;  %v12382_v9 = vld [vmem:[#allocation64_spill] sm:$0xff]  ;;  %v12384_v41 = vld [vmem:[#allocation66_spill] sm:$0xff] }
 0x70e   :  { %4866 = vmatpush2.bf16.msra.mxu1 %v12362_v23  ;;  %v3704_v34 = vpop.f32.mrf.mxu0  ;;  %v4747_v60 = vld [vmem:[#allocation3 + $0x30] sm:$0xf] }
 0x70f   :  { %4972 = vmatpush1.bf16.msra.mxu0 %v12363_v62  ;;  %v3746_v3 = vpop.f32.mrf.mxu1  ;;  %4867 = vmatprep.subr.bf16.mxu1 %v12364_v16  ;;  %v12386_v23 = vld [vmem:[#allocation68_spill] sm:$0xff]  ;;  %v12387_v34 = vld [vmem:[#allocation69_spill] sm:$0xff]  ;;  %v4750_v62 = vpack.c.bf16 %v4747_v60, %v4747_v60  ;;  %v12389_v16 = vld [vmem:[#allocation71_spill] sm:$0xff] }
 0x710   :  { %v3705_v45 = vpop.f32.mrf.mxu0  ;;  %4973 = vmatprep.subr.bf16.mxu0 %v12365_v12  ;;  %v12388_v3 = vld [vmem:[#allocation70_spill] sm:$0xff]  ;;  %v4929_v12 = vld [vmem:[#allocation3 + $0x30] sm:$0x1e]  ;;  %v12401_v60 = vld [vmem:[#allocation83_spill] sm:$0xff] }
 0x711   :  { %v4931_v45 = vld [vmem:[#allocation3 + $0x40] sm:$0x1e] }
 0x712   :  { %4868 = vmatpush2.bf16.msra.mxu1 %v12366_v36  ;;  %v12390_v36 = vld [vmem:[#allocation72_spill] sm:$0xff] }
 0x713   :  { %4974 = vmatpush1.bf16.msra.mxu0 %v12367_v43  ;;  %4869 = vmatprep.subr.bf16.mxu1 %v12368_v24  ;;  %v5046_v43 = vld [vmem:[#allocation3 + $0x50] sm:$0x1e]  ;;  %v12391_v24 = vld [vmem:[#allocation73_spill] sm:$0xff] }
 0x714   :  { %4975 = vmatprep.subr.bf16.mxu0 %v12369_v26  ;;  %v12392_v26 = vld [vmem:[#allocation74_spill] sm:$0xff] }
 0x716   :  { %4870 = vmatpush2.bf16.msra.mxu1 %v12370_v58  ;;  %v4934_v58 = vpack.c.bf16 %v4931_v45, %v4931_v45  ;;  %v5047_v45 = vld [vmem:[#allocation3 + $0x58] sm:$0x1e] }
 0x717   :  { %4976 = vmatpush1.bf16.msra.mxu0 %v12371_v44  ;;  %4871 = vmatprep.subr.bf16.mxu1 %v12372_v42  ;;  %v12393_v44 = vld [vmem:[#allocation75_spill] sm:$0xff]  ;;  %v4932_v42 = vpack.c.bf16 %v4929_v12, %v4929_v12 }
 0x718   :  { %4977 = vmatprep.subr.bf16.mxu0 %v12373_v37  ;;  %v5049_v37 = vpack.c.bf16 %v5046_v43, %v5046_v43  ;;  %v12405_v12 = vld [vmem:[#allocation87_spill] sm:$0xff] }
 0x71a   :  { %v10892_v49 = vpop.f32.mrf.mxu0  ;;  %4872 = vmatpush2.bf16.msra.mxu1 %v12374_v1  ;;  %v12394_v1 = vld [vmem:[#allocation76_spill] sm:$0xff] }
 0x71b   :  { %4978 = vmatpush2.bf16.msra.mxu0 %v12375_v40  ;;  %4873 = vmatprep.subr.bf16.mxu1 %v12376_v32  ;;  %v12395_v40 = vld [vmem:[#allocation77_spill] sm:$0xff]  ;;  %v12396_v32 = vld [vmem:[#allocation78_spill] sm:$0xff] }
 0x71c   :  { %v10897_v35 = vpop.f32.mrf.mxu0  ;;  %4979 = vmatprep.subr.bf16.mxu0 %v12377_v10  ;;  %v4952_v10 = vshll.u32 %v4934_v58, 16 }
 0x71e   :  { %v4030_v17 = vpop.f32.mrf.mxu0  ;;  %4874 = vmatpush2.bf16.msra.mxu1 %v12378_v20  ;;  %v4938_v20 = vshll.u32 %v4932_v42, 16 }
 0x71f   :  { %4980 = vmatpush2.bf16.msra.mxu0 %v12379_v27  ;;  %4875 = vmatprep.subr.bf16.mxu1 %v12380_v31  ;;  %v12397_v17 = vld [vmem:[#allocation79_spill] sm:$0xff]  ;;  %v5061_v27 = vshll.u32 %v5049_v37, 16  ;;  %v12398_v31 = vld [vmem:[#allocation80_spill] sm:$0xff] }
 0x720   :  { %v4031_v39 = vpop.f32.mrf.mxu0  ;;  %4981 = vmatprep.subr.bf16.mxu0 %v12381_v51  ;;  %v12400_v51 = vld [vmem:[#allocation82_spill] sm:$0xff] }
 0x721   :  { %v12399_v39 = vld [vmem:[#allocation81_spill] sm:$0xff] }
 0x722   :  { %4876 = vmatpush2.bf16.msra.mxu1 %v12382_v9  ;;  %v4954_v9 = vrot.slane %v4952_v10, 1  ;;  %v12412_v10 = vld [vmem:[#allocation94_spill] sm:$0xff] }
 0x723   :  { %4982 = vmatpush2.bf16.msra.mxu0 %v12383_v21  ;;  %4877 = vmatprep.subr.bf16.mxu1 %v12384_v41  ;;  %v4940_v21 = vrot.slane %v4938_v20, 1  ;;  %v4950_v41 = vshrl.u32 %v4934_v58, 16 }
 0x724   :  { %4983 = vmatprep.subr.bf16.mxu0 %v12385_v52  ;;  %v5063_v52 = vrot.slane %v5061_v27, 1  ;;  %v12413_v27 = vld [vmem:[#allocation95_spill] sm:$0xff] }
 0x726   :  { %4878 = vmatpush2.bf16.msra.mxu1 %v12386_v23  ;;  %v4936_v23 = vshrl.u32 %v4932_v42, 16 }
 0x727   :  { %4984 = vmatpush2.bf16.msra.mxu0 %v12387_v34  ;;  %5010 = vmatprep.subr.bf16.mxu1 %v12388_v3  ;;  %v4955_v34 = vor.u32 %v4954_v9, %v4950_v41 }
 0x728   :  { %4985 = vmatprep.subr.bf16.mxu0 %v12389_v16  ;;  %v4941_v3 = vor.u32 %v4940_v21, %v4936_v23 }
 0x729   :  { %4880 = vmatmul.mubr.bf16.vlgmr.msra.gmra.mxu1 %v4750_v62  ;;  %v5059_v62 = vshrl.u32 %v5049_v37, 16 }
 0x72a   :  { %5011 = vmatpush1.bf16.msra.mxu1 %v12390_v36  ;;  %5034 = vmatprep.mubr.bf16.mxu1 %v12154_v48  ;;  %v12406_v36 = vld [vmem:[#allocation88_spill] sm:$0xff] }
 0x72b   :  { %4986 = vmatpush2.bf16.msra.mxu0 %v12391_v24  ;;  %5012 = vmatprep.subr.bf16.mxu1 %v12392_v26  ;;  %v5064_v16 = vor.u32 %v5063_v52, %v5059_v62  ;;  %v12408_v24 = vld [vmem:[#allocation90_spill] sm:$0xff] }
 0x72c   :  { %4987 = vmatprep.subr.bf16.mxu0 %v12393_v44 }
 0x72e   :  { %5013 = vmatpush1.bf16.msra.mxu1 %v12394_v1 }
 0x72f   :  { %4988 = vmatpush2.bf16.msra.mxu0 %v12395_v40  ;;  %5014 = vmatprep.subr.bf16.mxu1 %v12396_v32  ;;  %v12411_v32 = vld [vmem:[#allocation93_spill] sm:$0xff] }
 0x730   :  { %4989 = vmatprep.subr.bf16.mxu0 %v12397_v17 }
 0x732   :  { %5015 = vmatpush1.bf16.msra.mxu1 %v12398_v31 }
 0x733   :  { %4990 = vmatpush2.bf16.msra.mxu0 %v12399_v39  ;;  %5016 = vmatprep.subr.bf16.mxu1 %v12400_v51 }
 0x734   :  { %4991 = vmatprep.subr.bf16.mxu0 %v10665_v63  ;;  %v5050_v63 = vpack.c.bf16 %v5047_v45, %v5047_v45 }
 0x736   :  { %5017 = vmatpush1.bf16.msra.mxu1 %v12401_v60  ;;  %v5068_v43 = vshll.u32 %v5050_v63, 16  ;;  %v5066_v26 = vshrl.u32 %v5050_v63, 16 }
 0x737   :  { %4992 = vmatpush2.bf16.msra.mxu0 %v10672_v18  ;;  %5077 = vmatprep.subr.bf16.mxu1 %v10674_v4  ;;  %v12402_v18 = vld [vmem:[#allocation84_spill] sm:$0xff]  ;;  %v12403_v4 = vld [vmem:[#allocation85_spill] sm:$0xff] }
 0x738   :  { %5126 = vmatprep.subr.bf16.mxu0 %v10677_v11  ;;  %v12404_v11 = vld [vmem:[#allocation86_spill] sm:$0xff] }
 0x739   :  { %8077 = vmatmul.mubr.msk.bf16.vlgmr.msra.gmra.mxu1 %vm2967_vm0, %v4955_v34 }
 0x73a   :  { %4994 = vmatmul.mubr.bf16.vlgmr.msra.gmra.mxu0 %v4941_v3  ;;  %5078 = vmatpush1.bf16.msra.mxu1 %v10680_v15  ;;  %v12407_v15 = vld [vmem:[#allocation89_spill] sm:$0xff] }
 0x73b   :  { %5109 = vmatprep.mubr.bf16.mxu1 %v5064_v16  ;;  %5127 = vmatpush1.bf16.msra.mxu0 %v10684_v0  ;;  %v12409_v0 = vld [vmem:[#allocation91_spill] sm:$0xff] }
 0x73c   :  { %5079 = vmatprep.subr.bf16.mxu1 %v10687_v29  ;;  %5128 = vmatprep.subr.bf16.mxu0 %v12402_v18  ;;  %v5070_v29 = vrot.slane %v5068_v43, 1 }
 0x73d   :  { %5150 = vmatprep.mubr.bf16.mxu0 %v12154_v48 }
 0x73e   :  { %5080 = vmatpush1.bf16.msra.mxu1 %v12403_v4  ;;  %v5071_v58 = vor.u32 %v5070_v29, %v5066_v26 }
 0x73f   :  { %5129 = vmatpush1.bf16.msra.mxu0 %v12404_v11  ;;  %5081 = vmatprep.subr.bf16.mxu1 %v12405_v12 }
 0x740   :  { %5130 = vmatprep.subr.bf16.mxu0 %v12406_v36 }
 0x742   :  { %5082 = vmatpush1.bf16.msra.mxu1 %v12407_v15 }
 0x743   :  { %5131 = vmatpush1.bf16.msra.mxu0 %v12408_v24  ;;  %5083 = vmatprep.subr.bf16.mxu1 %v12409_v0 }
 0x744   :  { %5132 = vmatprep.subr.bf16.mxu0 %v10715_v56 }
 0x746   :  { %5084 = vmatpush1.bf16.msra.mxu1 %v10718_v25 }
 0x747   :  { %5133 = vmatpush1.bf16.msra.mxu0 %v10722_v30  ;;  %5085 = vmatprep.subr.bf16.mxu1 %v10724_v7 }
 0x749   :  { %v3985_v44 = vpop.f32.mrf.mxu1 }
 0x74a   :  { %v3986_v42 = vadd.f32 %v3985_v44, %v10873_v50  ;;  %5086 = vmatpush1.bf16.msra.mxu1 %v10728_v2  ;;  %8078 = vmatmul.mubr.msk.bf16.vlgmr.msra.gmra.mxu0 %vm2967_vm0, %v5071_v58 }
 0x74b   :  { %v3987_v37 = vpop.f32.mrf.mxu1  ;;  %5087 = vmatprep.subr.bf16.mxu1 %v10733_v54 }
 0x74c   :  { %v4027_v56 = vadd.f32 %v10892_v49, %v3986_v42  ;;  %v3988_v25 = vadd.f32 %v3987_v37, %v10878_v55 }
 0x74d   :  { %v3989_v1 = vpop.f32.mrf.mxu1 }
 0x74e   :  { %v4029_v30 = vadd.f32 %v10897_v35, %v3988_v25  ;;  %5088 = vmatpush1.bf16.msra.mxu1 %v10737_v22 }
 0x74f   :  { %v3990_v7 = vpop.f32.mrf.mxu1  ;;  %5089 = vmatprep.subr.bf16.mxu1 %v10740_v46 }
 0x752   :  { %5090 = vmatpush1.bf16.msra.mxu1 %v10745_v5 }
 0x753   :  { %5091 = vmatprep.subr.bf16.mxu1 %v10749_v57 }
 0x756   :  { %5092 = vmatpush1.bf16.msra.mxu1 %v10753_v38 }
 0x757   :  { %5093 = vmatprep.subr.bf16.mxu1 %v10757_v8  ;;  %v12410_v8 = vld [vmem:[#allocation92_spill] sm:$0xff] }
 0x759   :  { %v4381_v2 = vpop.f32.mrf.mxu1 }
 0x75a   :  { %v4340_v54 = vpop.f32.mrf.mxu0  ;;  %5094 = vmatpush2.bf16.msra.mxu1 %v10761_v19  ;;  %v5045_v19 = vld [vmem:[#allocation3 + $0x48] sm:$0x1e] }
 0x75b   :  { %v4382_v50 = vadd.f32 %v4381_v2, %v4340_v54  ;;  %v4383_v55 = vpop.f32.mrf.mxu1  ;;  %5095 = vmatprep.subr.bf16.mxu1 %v10765_v13 }
 0x75c   :  { %v4342_v22 = vpop.f32.mrf.mxu0 }
 0x75d   :  { %v4388_v49 = vadd.f32 %v4382_v50, %v4027_v56  ;;  %v4384_v35 = vadd.f32 %v4383_v55, %v4342_v22  ;;  %v4385_v46 = vpop.f32.mrf.mxu1 }
 0x75e   :  { %v4344_v40 = vpop.f32.mrf.mxu0  ;;  %5096 = vmatpush2.bf16.msra.mxu1 %v10769_v59  ;;  %v5048_v59 = vpack.c.bf16 %v5045_v19, %v5045_v19 }
 0x75f   :  { %v4389_v5 = vadd.f32 %v4384_v35, %v4029_v30  ;;  %v4386_v57 = vpop.f32.mrf.mxu1  ;;  %5097 = vmatprep.subr.bf16.mxu1 %v10773_v47  ;;  %v12414_v47 = vld [vmem:[#allocation96_spill] sm:$0xff] }
 0x760   :  { %v4345_v38 = vpop.f32.mrf.mxu0 }
 0x762   :  { %5098 = vmatpush2.bf16.msra.mxu1 %v10777_v28  ;;  %v5054_v28 = vshll.u32 %v5048_v59, 16 }
 0x763   :  { %5099 = vmatprep.subr.bf16.mxu1 %v10781_v6 }
 0x764   :  { %v5056_v6 = vrot.slane %v5054_v28, 1 }
 0x766   :  { %5100 = vmatpush2.bf16.msra.mxu1 %v10785_v33  ;;  %v5052_v33 = vshrl.u32 %v5048_v59, 16 }
 0x767   :  { %5101 = vmatprep.subr.bf16.mxu1 %v12410_v8 }
 0x768   :  { %v5057_v39 = vor.u32 %v5056_v6, %v5052_v33 }
 0x76a   :  { %v4738_v13 = vpop.f32.mrf.mxu0  ;;  %5102 = vmatpush2.bf16.msra.mxu1 %v12411_v32 }
 0x76b   :  { %5103 = vmatprep.subr.bf16.mxu1 %v12412_v10 }
 0x76c   :  { %v4740_v17 = vpop.f32.mrf.mxu0 }
 0x76e   :  { %v4742_v20 = vpop.f32.mrf.mxu0  ;;  %5104 = vmatpush2.bf16.msra.mxu1 %v12413_v27 }
 0x76f   :  { %5105 = vmatprep.subr.bf16.mxu1 %v12414_v47 }
 0x770   :  { %v4743_v31 = vpop.f32.mrf.mxu0 }
 0x772   :  { %5106 = vmatpush2.bf16.msra.mxu1 %v10808_v53 }
 0x773   :  { %5107 = vmatprep.subr.bf16.mxu1 %v10811_v14 }
 0x776   :  { %5108 = vmatpush2.bf16.msra.mxu1 %v10814_v61 }
 0x779   :  { %5110 = vmatmul.mubr.bf16.vlgmr.msra.gmra.mxu1 %v5057_v39 }
 0x77a   :  { %5895 = vmatprep.mubr.bf16.mxu1 %v12154_v48 }
 0x799   :  { %v4697_v51 = vpop.f32.mrf.mxu1 }
 0x79a   :  { %v4739_v9 = vadd.f32 %v4738_v13, %v4697_v51 }
 0x79b   :  { %v4699_v21 = vpop.f32.mrf.mxu1 }
 0x79c   :  { %v10975_v41 = vadd.f32 %v4739_v9, %v4388_v49  ;;  %v4741_v52 = vadd.f32 %v4740_v17, %v4699_v21 }
 0x79d   :  { %v4701_v60 = vpop.f32.mrf.mxu1 }
 0x79e   :  { %v10977_v23 = vadd.f32 %v4741_v52, %v4389_v5  ;;  %v5166_v35 = vsel %vm5165_vm2, %v10975_v41, 0.0 }
 0x79f   :  { %v4702_v53 = vpop.f32.mrf.mxu1  ;;  %v5167_v40 = vrot.slane %v5166_v35, 4 }
 0x7a0   :  { %v5173_v46 = vsel %vm5165_vm2, %v10977_v23, 0.0 }
 0x7a1   :  { %v5174_v57 = vrot.slane %v5173_v46, 4  ;;  %v5168_v8 = vadd.f32 %v5167_v40, %v5166_v35 }
 0x7a3   :  { %v5175_v10 = vadd.f32 %v5174_v57, %v5173_v46  ;;  %v5169_v28 = vrot.slane %v5168_v8, 2 }
 0x7a5   :  { %v5176_v51 = vrot.slane %v5175_v10, 2  ;;  %v5170_v60 = vadd.f32 %v5169_v28, %v5168_v8 }
 0x7a9   :  { %v4837_v34 = vpop.f32.mrf.mxu1 }
 0x7aa   :  { %v4796_v14 = vpop.f32.mrf.mxu0 }
 0x7ab   :  { %v4838_v62 = vadd.f32 %v4837_v34, %v4796_v14  ;;  %v4839_v3 = vpop.f32.mrf.mxu1  ;;  %v5177_v14 = vadd.f32 %v5176_v51, %v5175_v10 }
 0x7ac   :  { %v4798_v16 = vpop.f32.mrf.mxu0 }
 0x7ad   :  { %v4840_v61 = vadd.f32 %v4839_v3, %v4798_v16  ;;  %v4841_v45 = vpop.f32.mrf.mxu1 }
 0x7ae   :  { %v4800_v18 = vpop.f32.mrf.mxu0  ;;  %v5178_v45 = vrot.slane %v5177_v14, 1 }
 0x7af   :  { %v4842_v63 = vpop.f32.mrf.mxu1 }
 0x7b0   :  { %v4801_v4 = vpop.f32.mrf.mxu0 }
 0x7ba   :  { %v4922_v11 = vpop.f32.mrf.mxu0 }
 0x7bc   :  { %v4924_v12 = vpop.f32.mrf.mxu0 }
 0x7be   :  { %v4926_v36 = vpop.f32.mrf.mxu0 }
 0x7bf   :  { %v5179_v36 = vadd.f32 %v5178_v45, %v5177_v14 }
 0x7c0   :  { %v4927_v43 = vpop.f32.mrf.mxu0 }
 0x7e9   :  { %v4881_v15 = vpop.f32.mrf.mxu1 }
 0x7ea   :  { %v4882_v24 = vadd.f32 %v4881_v15, %v4838_v62  ;;  %v5171_v62 = vrot.slane %v5170_v60, 1 }
 0x7eb   :  { %v4883_v0 = vpop.f32.mrf.mxu1 }
 0x7ec   :  { %v4923_v29 = vadd.f32 %v4922_v11, %v4882_v24  ;;  %v4884_v26 = vadd.f32 %v4883_v0, %v4840_v61  ;;  %v5172_v63 = vadd.f32 %v5171_v62, %v5170_v60 }
 0x7ed   :  { %v4885_v58 = vpop.f32.mrf.mxu1 }
 0x7ee   :  { %v4925_v44 = vadd.f32 %v4924_v12, %v4884_v26 }
 0x7ef   :  { %v4886_v42 = vpop.f32.mrf.mxu1 }
 0x7f9   :  { %v5036_v37 = vpop.f32.mrf.mxu1 }
 0x7fa   :  { %v4995_v56 = vpop.f32.mrf.mxu0 }
 0x7fb   :  { %v5038_v25 = vpop.f32.mrf.mxu1  ;;  %v5037_v5 = vadd.f32 %v5036_v37, %v4995_v56  ;;  %v12415_v56 = vld [vmem:[#allocation12_spill] sm:$0xff] }
 0x7fc   :  { %v4997_v1 = vpop.f32.mrf.mxu0 }
 0x7fd   :  { %v5040_v30 = vpop.f32.mrf.mxu1  ;;  %v5039_v38 = vadd.f32 %v5038_v25, %v4997_v1  ;;  %v5043_v13 = vadd.f32 %v5037_v5, %v4923_v29 }
 0x7fe   :  { %v4999_v7 = vpop.f32.mrf.mxu0 }
 0x7ff   :  { %v5041_v2 = vpop.f32.mrf.mxu1  ;;  %v5044_v17 = vadd.f32 %v5039_v38, %v4925_v44 }
 0x800   :  { %v5000_v54 = vpop.f32.mrf.mxu0 }
 0x80a   :  { %v5152_v50 = vpop.f32.mrf.mxu0 }
 0x80c   :  { %v5154_v55 = vpop.f32.mrf.mxu0 }
 0x80e   :  { %v5156_v22 = vpop.f32.mrf.mxu0 }
 0x810   :  { %v5157_v49 = vpop.f32.mrf.mxu0 }
 0x839   :  { %v5111_v19 = vpop.f32.mrf.mxu1 }
 0x83a   :  { %v5153_v32 = vadd.f32 %v5152_v50, %v5111_v19 }
 0x83b   :  { %v5113_v59 = vpop.f32.mrf.mxu1 }
 0x83c   :  { %v10983_v20 = vadd.f32 %v5153_v32, %v5043_v13  ;;  %v5155_v27 = vadd.f32 %v5154_v55, %v5113_v59 }
 0x83d   :  { %v5115_v47 = vpop.f32.mrf.mxu1 }
 0x83e   :  { %v5180_v31 = vsel %vm5165_vm2, %v10983_v20, 0.0  ;;  %v10987_v6 = vadd.f32 %v5155_v27, %v5044_v17 }
 0x83f   :  { %v5181_v33 = vrot.slane %v5180_v31, 4  ;;  %v5116_v39 = vpop.f32.mrf.mxu1 }
 0x840   :  { %v5187_v9 = vsel %vm5165_vm2, %v10987_v6, 0.0 }
 0x841   :  { %v5182_v21 = vadd.f32 %v5181_v33, %v5180_v31  ;;  %v5188_v52 = vrot.slane %v5187_v9, 4 }
 0x843   :  { %v5189_v53 = vadd.f32 %v5188_v52, %v5187_v9  ;;  %v5183_v34 = vrot.slane %v5182_v21, 2 }
 0x845   :  { %v5184_v3 = vadd.f32 %v5183_v34, %v5182_v21  ;;  %v5190_v16 = vrot.slane %v5189_v53, 2 }
 0x847   :  { %v5185_v61 = vrot.slane %v5184_v3, 1  ;;  %v5191_v18 = vadd.f32 %v5190_v16, %v5189_v53 }
 0x849   :  { %v5186_v4 = vadd.f32 %v5185_v61, %v5184_v3  ;;  %v5192_v11 = vrot.slane %v5191_v18, 1 }
 0x84b   :  { %v5194_v12 = vadd.f32 %v5186_v4, %v5172_v63  ;;  %v5193_v43 = vadd.f32 %v5192_v11, %v5191_v18  ;;  %v8776_v4 = vld [vmem:[#allocation9 + $0x1f0] ss:$8 sps:$4 sm:$0xff]   ;;  %v8778_v11 = vld [vmem:[#allocation9 + $0x1f4] ss:$8 sps:$4 sm:$0xff]  }
 0x84c   :  { %5822 = vmatprep.subr.bf16.mxu0 %v8778_v11 }
 0x84d   :  { %5197 = vrot.lane.b32.xlu0 %v5194_v12, %s9229_s3  ;;  %v5195_v15 = vadd.f32 %v5193_v43, %v5179_v36  ;;  %5823 = vmatpush1.bf16.msra.mxu0 %v8776_v4  ;;  %v8779_v36 = vld [vmem:[#allocation9 + $0x1e0] ss:$8 sps:$4 sm:$0xff]   ;;  %v8784_v43 = vld [vmem:[#allocation9 + $0x1d4] ss:$8 sps:$4 sm:$0xff]  }
 0x84f   :  { %5203 = vrot.lane.b32.xlu1 %v5195_v15, %s9229_s3 }
 0x8bf   :  { %v5198_v24 = vpop.permute.xlu0 %5197 }
 0x8c0   :  { %v5200_v0 = vadd.f32 %v5198_v24, %v5194_v12  ;;  %v8781_v12 = vld [vmem:[#allocation9 + $0x1e4] ss:$8 sps:$4 sm:$0xff]   ;;  %v8802_v24 = vld [vmem:[#allocation9 + $0x2f4] ss:$8 sps:$4 sm:$0xff]  }
 0x8c1   :  { %v5204_v26 = vpop.permute.xlu1 %5203  ;;  %5824 = vmatprep.subr.bf16.mxu0 %v8781_v12  ;;  %5863 = vmatprep.subr.bf16.mxu1 %v8802_v24 }
 0x8c2   :  { %v5201_v29 = vadd.f32 %v5200_v0, %v5195_v15  ;;  %v8800_v15 = vld [vmem:[#allocation9 + $0x2f0] ss:$8 sps:$4 sm:$0xff]   ;;  %5825 = vmatpush1.bf16.msra.mxu0 %v8779_v36 }
 0x8c3   :  { %v8782_v0 = vld [vmem:[#allocation9 + $0x1d0] ss:$8 sps:$4 sm:$0xff]   ;;  %5826 = vmatprep.subr.bf16.mxu0 %v8784_v43  ;;  %5864 = vmatpush1.bf16.msra.mxu1 %v8800_v15 }
 0x8c4   :  { %v5206_v58 = vadd.f32 %v5204_v26, %v5201_v29  ;;  %v8808_v29 = vld [vmem:[#allocation9 + $0x2e4] ss:$8 sps:$4 sm:$0xff]  }
 0x8c5   :  { %v8787_v26 = vld [vmem:[#allocation9 + $0x1c4] ss:$8 sps:$4 sm:$0xff]   ;;  %5865 = vmatprep.subr.bf16.mxu1 %v8808_v29  ;;  %v11037_v29 = vld [vmem:[#allocation9 + $0x234] ss:$8 sps:$4 sm:$0xff]  }
 0x8c6   :  { %5208 = vrot.lane.b32.xlu0 %v5206_v58, %s9229_s3  ;;  %5827 = vmatpush1.bf16.msra.mxu0 %v8782_v0  ;;  %v11035_v0 = vld [vmem:[#allocation9 + $0x230] ss:$8 sps:$4 sm:$0xff]  }
 0x8c7   :  { %5828 = vmatprep.subr.bf16.mxu0 %v8787_v26 }
 0x938   :  { %v5209_v44 = vpop.permute.xlu0 %5208 }
 0x939   :  { %v5211_v42 = vsel %vm2967_vm0, %v5206_v58, %v5209_v44  ;;  %v8806_v58 = vld [vmem:[#allocation9 + $0x2e0] ss:$8 sps:$4 sm:$0xff]   ;;  %v8814_v44 = vld [vmem:[#allocation9 + $0x2d4] ss:$8 sps:$4 sm:$0xff]  }
 0x93a   :  { %v10995_v37 = vmul.f32 0.03125, %v5211_v42  ;;  %v8785_v42 = vld [vmem:[#allocation9 + $0x1c0] ss:$8 sps:$4 sm:$0xff]   ;;  %5866 = vmatpush1.bf16.msra.mxu1 %v8806_v58 }
 0x93b   :  { %5867 = vmatprep.subr.bf16.mxu1 %v8814_v44  ;;  %5829 = vmatpush1.bf16.msra.mxu0 %v8785_v42  ;;  %v11041_v44 = vld [vmem:[#allocation9 + $0x2a0] ss:$8 sps:$4 sm:$0xff]   ;;  %v11043_v42 = vld [vmem:[#allocation9 + $0x2a4] ss:$8 sps:$4 sm:$0xff]  }
 0x93c   :  { %v5216_v25 = vrot.slane %v10995_v37, %v12415_v56 }
 0x93e   :  { %v5218_v1 = vsub.f32 %v10977_v23, %v5216_v25  ;;  %v5236_v30 = vsub.f32 %v10987_v6, %v5216_v25  ;;  %v5217_v7 = vsub.f32 %v10975_v41, %v5216_v25  ;;  %v5235_v2 = vsub.f32 %v10983_v20, %v5216_v25  ;;  %v8790_v25 = vld [vmem:[#allocation9 + $0x1b4] ss:$8 sps:$4 sm:$0xff]  }
 0x93f   :  { %5830 = vmatprep.subr.bf16.mxu0 %v8790_v25 }
 0x940   :  { %v5220_v54 = vmul.f32 %v5218_v1, %v5218_v1  ;;  %v5238_v50 = vmul.f32 %v5236_v30, %v5236_v30  ;;  %v5219_v55 = vmul.f32 %v5217_v7, %v5217_v7  ;;  %v5237_v22 = vmul.f32 %v5235_v2, %v5235_v2  ;;  %v8812_v1 = vld [vmem:[#allocation9 + $0x2d0] ss:$8 sps:$4 sm:$0xff]   ;;  %v8820_v30 = vld [vmem:[#allocation9 + $0x2c4] ss:$8 sps:$4 sm:$0xff]  }
 0x941   :  { %v8788_v7 = vld [vmem:[#allocation9 + $0x1b0] ss:$8 sps:$4 sm:$0xff]   ;;  %v8793_v2 = vld [vmem:[#allocation9 + $0x1a4] ss:$8 sps:$4 sm:$0xff]   ;;  %5868 = vmatpush1.bf16.msra.mxu1 %v8812_v1 }
 0x942   :  { %v5228_v49 = vsel %vm5165_vm2, %v5220_v54, 0.0  ;;  %v5246_v35 = vsel %vm5165_vm2, %v5238_v50, 0.0  ;;  %v5221_v46 = vsel %vm5165_vm2, %v5219_v55, 0.0  ;;  %v5239_v40 = vsel %vm5165_vm2, %v5237_v22, 0.0  ;;  %v8818_v54 = vld [vmem:[#allocation9 + $0x2c0] ss:$8 sps:$4 sm:$0xff]   ;;  %5869 = vmatprep.subr.bf16.mxu1 %v8820_v30  ;;  %5831 = vmatpush1.bf16.msra.mxu0 %v8788_v7 }
 0x943   :  { %v5229_v5 = vrot.slane %v5228_v49, 4  ;;  %v5247_v57 = vrot.slane %v5246_v35, 4  ;;  %v5222_v38 = vrot.slane %v5221_v46, 4  ;;  %v5240_v8 = vrot.slane %v5239_v40, 4  ;;  %v8826_v50 = vld [vmem:[#allocation9 + $0x2b4] ss:$8 sps:$4 sm:$0xff]   ;;  %5832 = vmatprep.subr.bf16.mxu0 %v8793_v2 }
 0x944   :  { %v8791_v55 = vld [vmem:[#allocation9 + $0x1a0] ss:$8 sps:$4 sm:$0xff]   ;;  %v8796_v22 = vld [vmem:[#allocation9 + $0x194] ss:$8 sps:$4 sm:$0xff]   ;;  %v11047_v2 = vld [vmem:[#allocation9 + $0x224] ss:$8 sps:$4 sm:$0xff]  }
 0x945   :  { %v5230_v19 = vadd.f32 %v5229_v5, %v5228_v49  ;;  %v5248_v13 = vadd.f32 %v5247_v57, %v5246_v35  ;;  %v5223_v32 = vadd.f32 %v5222_v38, %v5221_v46  ;;  %v5241_v10 = vadd.f32 %v5240_v8, %v5239_v40  ;;  %5870 = vmatpush1.bf16.msra.mxu1 %v8818_v54  ;;  %v8824_v49 = vld [vmem:[#allocation9 + $0x2b0] ss:$8 sps:$4 sm:$0xff]   ;;  %v8799_v46 = vld [vmem:[#allocation9 + $0x184] ss:$8 sps:$4 sm:$0xff]   ;;  %v8797_v40 = vld [vmem:[#allocation9 + $0x180] ss:$8 sps:$4 sm:$0xff]  }
 0x946   :  { %5871 = vmatprep.subr.bf16.mxu1 %v8826_v50  ;;  %5833 = vmatpush1.bf16.msra.mxu0 %v8791_v55  ;;  %v8794_v35 = vld [vmem:[#allocation9 + $0x190] ss:$8 sps:$4 sm:$0xff]   ;;  %v8805_v5 = vld [vmem:[#allocation9 + $0x274] ss:$8 sps:$4 sm:$0xff]   ;;  %v8811_v38 = vld [vmem:[#allocation9 + $0x264] ss:$8 sps:$4 sm:$0xff]  }
 0x947   :  { %v5231_v59 = vrot.slane %v5230_v19, 2  ;;  %v5249_v17 = vrot.slane %v5248_v13, 2  ;;  %v5224_v27 = vrot.slane %v5223_v32, 2  ;;  %v5242_v47 = vrot.slane %v5241_v10, 2  ;;  %5834 = vmatprep.subr.bf16.mxu0 %v8796_v22  ;;  %v8803_v57 = vld [vmem:[#allocation9 + $0x270] ss:$8 sps:$4 sm:$0xff]  }
 0x948   :  { %v8809_v8 = vld [vmem:[#allocation9 + $0x260] ss:$8 sps:$4 sm:$0xff]   ;;  %v11053_v55 = vld [vmem:[#allocation9 + $0x290] ss:$8 sps:$4 sm:$0xff]   ;;  %v11055_v22 = vld [vmem:[#allocation9 + $0x294] ss:$8 sps:$4 sm:$0xff]  }
 0x949   :  { %v5232_v28 = vadd.f32 %v5231_v59, %v5230_v19  ;;  %v5250_v31 = vadd.f32 %v5249_v17, %v5248_v13  ;;  %v5225_v33 = vadd.f32 %v5224_v27, %v5223_v32  ;;  %v5243_v39 = vadd.f32 %v5242_v47, %v5241_v10  ;;  %5872 = vmatpush1.bf16.msra.mxu1 %v8824_v49  ;;  %v8817_v19 = vld [vmem:[#allocation9 + $0x254] ss:$8 sps:$4 sm:$0xff]   ;;  %v8815_v13 = vld [vmem:[#allocation9 + $0x250] ss:$8 sps:$4 sm:$0xff]   ;;  %v8823_v32 = vld [vmem:[#allocation9 + $0x244] ss:$8 sps:$4 sm:$0xff]  }
 0x94a   :  { %5835 = vmatpush1.bf16.msra.mxu0 %v8794_v35  ;;  %v8821_v10 = vld [vmem:[#allocation9 + $0x240] ss:$8 sps:$4 sm:$0xff]   ;;  %5873 = vmatprep.subr.bf16.mxu1 %v11043_v42 }
 0x94b   :  { %v5233_v51 = vrot.slane %v5232_v28, 1  ;;  %v5251_v9 = vrot.slane %v5250_v31, 1  ;;  %v5226_v21 = vrot.slane %v5225_v33, 1  ;;  %v5244_v52 = vrot.slane %v5243_v39, 1  ;;  %5836 = vmatprep.subr.bf16.mxu0 %v8799_v46  ;;  %v11045_v7 = vld [vmem:[#allocation9 + $0x220] ss:$8 sps:$4 sm:$0xff]  }
 0x94c   :  { %v11060_v46 = vld [vmem:[#allocation9 + $0x210] ss:$8 sps:$4 sm:$0xff]  }
 0x94d   :  { %v5234_v60 = vadd.f32 %v5233_v51, %v5232_v28  ;;  %v5252_v53 = vadd.f32 %v5251_v9, %v5250_v31  ;;  %v5227_v34 = vadd.f32 %v5226_v21, %v5225_v33  ;;  %v5245_v14 = vadd.f32 %v5244_v52, %v5243_v39  ;;  %v12416_v33 = vld [vmem:[#allocation14_spill] sm:$0xff]  ;;  %5874 = vmatpush1.bf16.msra.mxu1 %v11041_v44 }
 0x94e   :  { %5837 = vmatpush1.bf16.msra.mxu0 %v8797_v40  ;;  %v8079_v51 = vld [vmem:[%s11857_s5 + $0x3] ss:$8 sm:$0x3]  ;;  %5875 = vmatprep.subr.bf16.mxu1 %v11055_v22  ;;  %v11062_v40 = vld [vmem:[#allocation9 + $0x214] ss:$8 sps:$4 sm:$0xff]  }
 0x94f   :  { %v5254_v62 = vadd.f32 %v5252_v53, %v5234_v60  ;;  %v5253_v3 = vadd.f32 %v5245_v14, %v5227_v34  ;;  %5838 = vmatprep.subr.bf16.mxu0 %v8805_v5  ;;  %v12417_v60 = vld [vmem:[#allocation13_spill] sm:$0xff] }
 0x951   :  { %5262 = vrot.lane.b32.xlu0 %v5254_v62, %s9229_s3  ;;  %5256 = vrot.lane.b32.xlu1 %v5253_v3, %s9229_s3 }
 0x952   :  { %5839 = vmatpush2.bf16.msra.mxu0 %v8803_v57  ;;  %5876 = vmatpush1.bf16.msra.mxu1 %v11053_v55 }
 0x953   :  { %5840 = vmatprep.subr.bf16.mxu0 %v8811_v38 }
 0x956   :  { %5841 = vmatpush2.bf16.msra.mxu0 %v8809_v8  ;;  %v11068_v8 = vld [vmem:[#allocation9 + $0x280] ss:$8 sps:$4 sm:$0xff]  }
 0x957   :  { %5842 = vmatprep.subr.bf16.mxu0 %v8817_v19  ;;  %v11070_v19 = vld [vmem:[#allocation9 + $0x284] ss:$8 sps:$4 sm:$0xff]  }
 0x958   :  { %5877 = vmatprep.subr.bf16.mxu1 %v11070_v19 }
 0x959   :  { %5878 = vmatpush1.bf16.msra.mxu1 %v11068_v8 }
 0x95a   :  { %5843 = vmatpush2.bf16.msra.mxu0 %v8815_v13  ;;  %v11075_v13 = vld [vmem:[#allocation9 + $0x200] ss:$8 sps:$4 sm:$0xff]  }
 0x95b   :  { %5844 = vmatprep.subr.bf16.mxu0 %v8823_v32  ;;  %v11077_v32 = vld [vmem:[#allocation9 + $0x204] ss:$8 sps:$4 sm:$0xff]  }
 0x95e   :  { %5845 = vmatpush2.bf16.msra.mxu0 %v8821_v10 }
 0x95f   :  { %5846 = vmatprep.subr.bf16.mxu0 %v11037_v29 }
 0x962   :  { %5847 = vmatpush2.bf16.msra.mxu0 %v11035_v0 }
 0x963   :  { %5848 = vmatprep.subr.bf16.mxu0 %v11047_v2 }
 0x966   :  { %5849 = vmatpush2.bf16.msra.mxu0 %v11045_v7 }
 0x967   :  { %5850 = vmatprep.subr.bf16.mxu0 %v11062_v40 }
 0x96a   :  { %5851 = vmatpush2.bf16.msra.mxu0 %v11060_v46 }
 0x96b   :  { %5852 = vmatprep.subr.bf16.mxu0 %v11077_v32 }
 0x96e   :  { %5853 = vmatpush2.bf16.msra.mxu0 %v11075_v13 }
 0x9c3   :  { %v5257_v16 = vpop.permute.xlu1 %5256  ;;  %v5263_v18 = vpop.permute.xlu0 %5262 }
 0x9c4   :  { %v5259_v61 = vadd.f32 %v5257_v16, %v5253_v3  ;;  %v8080_v16 = vld [vmem:[%s11857_s5 + $0x4] ss:$8 sm:$0x3] }
 0x9c6   :  { %v5260_v45 = vadd.f32 %v5259_v61, %v5254_v62 }
 0x9c8   :  { %v11009_v63 = vadd.f32 %v5263_v18, %v5260_v45 }
 0x9ca   :  { %5267 = vrot.lane.b32.xlu1 %v11009_v63, %s9229_s3 }
 0xa3c   :  { %v5268_v59 = vpop.permute.xlu1 %5267 }
 0xa3d   :  { %v5270_v17 = vsel %vm2967_vm0, %v11009_v63, %v5268_v59 }
 0xa3e   :  { %v5271_v27 = vmul.f32 0.03125, %v5270_v17 }
 0xa40   :  { %v5272_v47 = vadd.f32 1e-05, %v5271_v27  ;;  %v11083_v27 = vld [vmem:[#allocation9 + $0x74] ss:$8 sps:$4 sm:$0xff]  }
 0xa41   :  { %6144 = vmatprep.subr.bf16.mxu1 %v11083_v27 }
 0xa42   :  { %9074 = vrsqrt.f32 %v5272_v47  ;;  %v11086_v47 = vld [vmem:[#allocation9 + $0x174] ss:$8 sps:$4 sm:$0xff]  }
 0xa43   :  { %6185 = vmatprep.subr.bf16.mxu0 %v11086_v47 }
 0xa4f   :  { %v9075_v28 = vpop.eup %9074 }
 0xa50   :  { %v5275_v31 = vcombine.low %v9075_v28, %v9075_v28 }
 0xa52   :  { %v5282_v39 = vrot.slane %v5275_v31, %v12416_v33 }
 0xa54   :  { %v5289_v9 = vrot.slane %v5282_v39, %v12416_v33 }
 0xa56   :  { %v5291_v21 = vmul.f32 %v8079_v51, %v5289_v9  ;;  %v12418_v51 = vlaneseq }
 0xa58   :  { %v5296_v52 = vrot.slane %v5291_v21, %v12415_v56  ;;  %v5300_v53 = vrot.slane %v5291_v21, %v12417_v60  ;;  %vm5378_vm15 = vcmp.ge.s32.totalorder %v12418_v51, 64  ;;  %vm5379_vm1 = vcmp.lt.s32.totalorder %v12418_v51, 320  ;;  %v11155_v51 = vld [vmem:[#allocation9 + $0x44] ss:$8 sps:$4 sm:$0xff]   ;;  %v11163_v21 = vld [vmem:[#allocation9 + $0x40] ss:$8 sps:$4 sm:$0xff]  }
 0xa59   :  { %vm11099_vm3 = vmand %vm5378_vm15, %vm5379_vm1 }
 0xa5a   :  { %v5303_v34 = vmul.f32 %v5296_v52, %v10995_v37  ;;  %v5304_v14 = vmul.f32 %v5300_v53, %v10995_v37  ;;  %v5324_v18 = vmul.f32 %v5296_v52, %v10975_v41  ;;  %v5325_v63 = vmul.f32 %v5300_v53, %v10977_v23 }
 0xa5b   :  { %v5339_v37 = vmul.f32 %v5296_v52, %v10983_v20  ;;  %v5340_v12 = vmul.f32 %v5300_v53, %v10987_v6 }
 0xa5c   :  { %v5307_v62 = vcombine.low %v5303_v34, %v5304_v14 }
 0xa5e   :  { %v5314_v3 = vrot.slane %v5307_v62, %v12416_v33 }
 0xa60   :  { %v5321_v61 = vrot.slane %v5314_v3, %v12416_v33 }
 0xa62   :  { %v5323_v45 = vsub.f32 %v8080_v16, %v5321_v61 }
 0xa64   :  { %v5330_v4 = vrot.slane %v5323_v45, %v12415_v56  ;;  %v5334_v11 = vrot.slane %v5323_v45, %v12417_v60  ;;  %v11241_v60 = vld [vmem:[#allocation9 + $0x364] ss:$8 sps:$4 sm:$0xff]   ;;  %v11244_v56 = vld [vmem:[#allocation9 + $0xd4] ss:$8 sps:$4 sm:$0xff]  }
 0xa65   :  { %12430 = vst [vmem:[#allocation24_spill] sm:$0xff] %v11241_v60  ;;  %12431 = vst [vmem:[#allocation25_spill] sm:$0xff] %v11244_v56 }
 0xa66   :  { %v5337_v36 = vadd.f32 %v5330_v4, %v5324_v18  ;;  %v5338_v43 = vadd.f32 %v5334_v11, %v5325_v63  ;;  %v5341_v15 = vadd.f32 %v5339_v37, %v5330_v4  ;;  %v5342_v24 = vadd.f32 %v5340_v12, %v5334_v11 }
 0xa68   :  { %vm5343_vm11 = vcmp.ge.f32.partialorder %v5337_v36, 0.0  ;;  %vm5344_vm12 = vcmp.ge.f32.partialorder %v5338_v43, 0.0  ;;  %v5345_v41 = vmul.f32 0.2, %v5337_v36  ;;  %v5346_v23 = vmul.f32 0.2, %v5338_v43 }
 0xa69   :  { %vm5349_vm13 = vcmp.ge.f32.partialorder %v5341_v15, 0.0  ;;  %vm5350_vm14 = vcmp.ge.f32.partialorder %v5342_v24, 0.0  ;;  %v5351_v26 = vmul.f32 0.2, %v5341_v15  ;;  %v5352_v58 = vmul.f32 0.2, %v5342_v24 }
 0xa6a   :  { %v5347_v20 = vsel %vm5343_vm11, %v5337_v36, %v5345_v41  ;;  %v5348_v6 = vsel %vm5344_vm12, %v5338_v43, %v5346_v23 }
 0xa6b   :  { %v5357_v25 = vcombine.low %v5347_v20, %v5348_v6  ;;  %v5353_v1 = vsel %vm5349_vm13, %v5341_v15, %v5351_v26  ;;  %v5354_v30 = vsel %vm5350_vm14, %v5342_v24, %v5352_v58  ;;  %v11118_v15 = vld [vmem:[#allocation9 + $0x70] ss:$8 sps:$4 sm:$0xff]  }
 0xa6c   :  { %v5415_v50 = vcombine.low %v5353_v1, %v5354_v30 }
 0xa6d   :  { %v5364_v54 = vrot.slane %v5357_v25, %v12416_v33  ;;  %v11123_v25 = vld [vmem:[#allocation9 + $0x64] ss:$8 sps:$4 sm:$0xff]  }
 0xa6e   :  { %v5422_v38 = vrot.slane %v5415_v50, %v12416_v33 }
 0xa6f   :  { %v5371_v49 = vrot.slane %v5364_v54, %v12416_v33  ;;  %v5382_v35 = vcombine.high %v5364_v54, %v5364_v54 }
 0xa70   :  { %v5429_v59 = vrot.slane %v5422_v38, %v12416_v33  ;;  %v5437_v17 = vcombine.high %v5422_v38, %v5422_v38  ;;  %v11136_v38 = vld [vmem:[#allocation9 + $0x60] ss:$8 sps:$4 sm:$0xff]  }
 0xa71   :  { %5372 = vrot.lane.b32.xlu0 %v5371_v49, %s9229_s3  ;;  %v5397_v5 = vcombine.high %v5371_v49, %v5371_v49  ;;  %v5389_v57 = vrot.slane %v5382_v35, %v12416_v33  ;;  %v11130_v49 = vld [vmem:[#allocation9 + $0x170] ss:$8 sps:$4 sm:$0xff]  }
 0xa72   :  { %v5453_v28 = vcombine.high %v5429_v59, %v5429_v59  ;;  %v5444_v31 = vrot.slane %v5437_v17, %v12416_v33  ;;  %v11143_v17 = vld [vmem:[#allocation9 + $0x54] ss:$8 sps:$4 sm:$0xff]  }
 0xa73   :  { %5398 = vrot.lane.b32.xlu1 %v5397_v5, %s9229_s3  ;;  %v5405_v10 = vcombine.high %v5389_v57, %v5389_v57 }
 0xa74   :  { %v5461_v39 = vcombine.high %v5444_v31, %v5444_v31 }
 0xa75   :  { %5390 = vrot.lane.b32.xlu0 %v5389_v57, %s9229_s3 }
 0xa77   :  { %5406 = vrot.lane.b32.xlu1 %v5405_v10, %s9229_s3  ;;  %v11138_v10 = vld [vmem:[#allocation9 + $0x164] ss:$8 sps:$4 sm:$0xff]  }
 0xa79   :  { %5430 = vrot.lane.b32.xlu0 %v5429_v59, %s9229_s3 }
 0xa7b   :  { %5454 = vrot.lane.b32.xlu1 %v5453_v28, %s9229_s3  ;;  %v11146_v28 = vld [vmem:[#allocation9 + $0x160] ss:$8 sps:$4 sm:$0xff]  }
 0xa7d   :  { %5445 = vrot.lane.b32.xlu0 %v5444_v31, %s9229_s3  ;;  %v11150_v31 = vld [vmem:[#allocation9 + $0x50] ss:$8 sps:$4 sm:$0xff]  }
 0xa7f   :  { %5462 = vrot.lane.b32.xlu1 %v5461_v39, %s9229_s3  ;;  %v11152_v39 = vld [vmem:[#allocation9 + $0x154] ss:$8 sps:$4 sm:$0xff]  }
 0xae3   :  { %v5373_v9 = vpop.permute.xlu0 %5372 }
 0xae4   :  { %v5374_v52 = vrot.slane %v5373_v9, 7 }
 0xae5   :  { %v5399_v53 = vpop.permute.xlu1 %5398 }
 0xae6   :  { %v5375_v34 = vsel %vm2967_vm0, %v5374_v52, %v5373_v9  ;;  %v5400_v14 = vrot.slane %v5399_v53, 7  ;;  %v11159_v9 = vld [vmem:[#allocation9 + $0x150] ss:$8 sps:$4 sm:$0xff]   ;;  %v11165_v52 = vld [vmem:[#allocation9 + $0x144] ss:$8 sps:$4 sm:$0xff]  }
 0xae7   :  { %5381 = vst.msk [vmem:[#allocation4 + $0xc] ss:$4 sm:$0x7] %vm11099_vm3, %v5375_v34  ;;  %v5391_v62 = vpop.permute.xlu0 %5390  ;;  %v11171_v34 = vld [vmem:[#allocation9 + $0x140] ss:$8 sps:$4 sm:$0xff]  }
 0xae8   :  { %v5401_v3 = vsel %vm2967_vm0, %v5400_v14, %v5399_v53  ;;  %v5392_v16 = vrot.slane %v5391_v62, 7  ;;  %v11168_v53 = vld [vmem:[#allocation9 + $0x34] ss:$8 sps:$4 sm:$0xff]   ;;  %v11175_v14 = vld [vmem:[#allocation9 + $0x30] ss:$8 sps:$4 sm:$0xff]  }
 0xae9   :  { %5404 = vst.msk [vmem:[#allocation4 + $0xd] ss:$4 sm:$0x7] %vm11099_vm3, %v5401_v3  ;;  %v5407_v61 = vpop.permute.xlu1 %5406  ;;  %v11180_v3 = vld [vmem:[#allocation9 + $0x24] ss:$8 sps:$4 sm:$0xff]  }
 0xaea   :  { %v5393_v45 = vsel %vm2967_vm0, %v5392_v16, %v5391_v62  ;;  %v5408_v18 = vrot.slane %v5407_v61, 7  ;;  %v11177_v62 = vld [vmem:[#allocation9 + $0x134] ss:$8 sps:$4 sm:$0xff]  }
 0xaeb   :  { %5396 = vst.msk [vmem:[#allocation4 + $0x1] ss:$4 sm:$0x7] %vm11099_vm3, %v5393_v45  ;;  %v5431_v63 = vpop.permute.xlu0 %5430  ;;  %v11189_v45 = vld [vmem:[#allocation9 + $0x20] ss:$8 sps:$4 sm:$0xff]  }
 0xaec   :  { %v5409_v4 = vsel %vm2967_vm0, %v5408_v18, %v5407_v61  ;;  %v5432_v11 = vrot.slane %v5431_v63, 7  ;;  %v11185_v61 = vld [vmem:[#allocation9 + $0x130] ss:$8 sps:$4 sm:$0xff]   ;;  %v11191_v18 = vld [vmem:[#allocation9 + $0x124] ss:$8 sps:$4 sm:$0xff]  }
 0xaed   :  { %5412 = vst.msk [vmem:[#allocation4 + $0x2] ss:$4 sm:$0x7] %vm11099_vm3, %v5409_v4  ;;  %v5455_v37 = vpop.permute.xlu1 %5454 }
 0xaee   :  { %v5433_v12 = vsel %vm2967_vm0, %v5432_v11, %v5431_v63  ;;  %v5456_v36 = vrot.slane %v5455_v37, 7  ;;  %v11194_v63 = vld [vmem:[#allocation9 + $0x14] ss:$8 sps:$4 sm:$0xff]   ;;  %v11199_v11 = vld [vmem:[#allocation9 + $0x120] ss:$8 sps:$4 sm:$0xff]  }
 0xaef   :  { %5436 = vst.msk [vmem:[#allocation4 + $0x24] ss:$4 sm:$0x7] %vm11099_vm3, %v5433_v12  ;;  %v5446_v43 = vpop.permute.xlu0 %5445  ;;  %v11205_v12 = vld [vmem:[#allocation9 + $0x114] ss:$8 sps:$4 sm:$0xff]  }
 0xaf0   :  { %v5457_v24 = vsel %vm2967_vm0, %v5456_v36, %v5455_v37  ;;  %v5447_v41 = vrot.slane %v5446_v43, 7  ;;  %v5526_v23 = vld [vmem:[#allocation4 + $0x14] sm:$0x3]  ;;  %v5525_v26 = vld [vmem:[#allocation4 + $0xc] sm:$0x33] }
 0xaf1   :  { %5460 = vst.msk [vmem:[#allocation4 + $0x25] ss:$4 sm:$0x7] %vm11099_vm3, %v5457_v24  ;;  %v5463_v58 = vpop.permute.xlu1 %5462  ;;  %v5532_v20 = vpack.c.bf16 %v5526_v23, %v5526_v23  ;;  %v5528_v6 = vcombine.high %v5525_v26, %v5525_v26  ;;  %v5530_v57 = vpack.c.bf16 %v5525_v26, %v5525_v26  ;;  %v11203_v37 = vld [vmem:[#allocation9 + $0x10] ss:$8 sps:$4 sm:$0xff]  }
 0xaf2   :  { %v5448_v1 = vsel %vm2967_vm0, %v5447_v41, %v5446_v43  ;;  %v5464_v30 = vrot.slane %v5463_v58, 7  ;;  %v11126_v54 = vld [vmem:[#allocation4] sm:$0x33]  ;;  %v11208_v36 = vld [vmem:[#allocation9 + $0x4] ss:$8 sps:$4 sm:$0xff]  }
 0xaf3   :  { %5452 = vst.msk [vmem:[#allocation4 + $0x19] ss:$4 sm:$0x7] %vm11099_vm3, %v5448_v1  ;;  %5896 = vmatmul.mubr.bf16.vlgmr.msra.gmra.mxu1 %v5532_v20  ;;  %v5531_v50 = vpack.c.bf16 %v5528_v6, %v5528_v6  ;;  %v5472_v35 = vcombine.high %v11126_v54, %v11126_v54  ;;  %v11211_v24 = vld [vmem:[#allocation9 + $0x110] ss:$8 sps:$4 sm:$0xff]  }
 0xaf4   :  { %v5465_v5 = vsel %vm2967_vm0, %v5464_v30, %v5463_v58  ;;  %6145 = vmatpush1.bf16.msra.mxu1 %v11118_v15  ;;  %v11182_v16 = vld [vmem:[#allocation4] sm:$0x66]  ;;  %v11215_v41 = vld [vmem:[#allocation9] ss:$8 sps:$4 sm:$0xff]   ;;  %v11217_v23 = vld [vmem:[#allocation9 + $0x104] ss:$8 sps:$4 sm:$0xff]  }
 0xaf5   :  { %5468 = vst.msk [vmem:[#allocation4 + $0x1a] ss:$4 sm:$0x7] %vm11099_vm3, %v5465_v5  ;;  %5854 = vmatprep.mubr.bf16.mxu0 %v5531_v50  ;;  %6146 = vmatprep.subr.bf16.mxu1 %v11123_v25  ;;  %v5475_v59 = vpack.c.bf16 %v5472_v35, %v5472_v35  ;;  %v6229_v4 = vcombine.high %v11182_v16, %v11182_v16  ;;  %12421 = vst [vmem:[#allocation15_spill] sm:$0xff] %v11215_v41  ;;  %v11220_v26 = vld [vmem:[#allocation9 + $0xf4] ss:$8 sps:$4 sm:$0xff]  }
 0xaf6   :  { %5855 = vmatmul.mubr.bf16.vlgmr.msra.gmra.mxu0 %v5530_v57  ;;  %12422 = vst [vmem:[#allocation16_spill] sm:$0xff] %v11217_v23  ;;  %12423 = vst [vmem:[#allocation17_spill] sm:$0xff] %v11220_v26  ;;  %v11223_v20 = vld [vmem:[#allocation9 + $0x100] ss:$8 sps:$4 sm:$0xff]   ;;  %v11227_v6 = vld [vmem:[#allocation9 + $0xf0] ss:$8 sps:$4 sm:$0xff]  }
 0xaf7   :  { %6186 = vmatpush1.bf16.msra.mxu0 %v11130_v49  ;;  %6176 = vmatprep.mubr.bf16.mxu1 %v5475_v59  ;;  %v6232_v43 = vpack.c.bf16 %v6229_v4, %v6229_v4  ;;  %12424 = vst [vmem:[#allocation18_spill] sm:$0xff] %v11223_v20  ;;  %12425 = vst [vmem:[#allocation19_spill] sm:$0xff] %v11227_v6  ;;  %v11229_v1 = vld [vmem:[#allocation9 + $0x374] ss:$8 sps:$4 sm:$0xff]   ;;  %v5470_v30 = vld [vmem:[#allocation4 + $0x8] sm:$0x3] }
 0xaf8   :  { %6147 = vmatpush1.bf16.msra.mxu1 %v11136_v38  ;;  %6187 = vmatprep.subr.bf16.mxu0 %v11138_v10  ;;  %12426 = vst [vmem:[#allocation20_spill] sm:$0xff] %v11229_v1  ;;  %v11232_v50 = vld [vmem:[#allocation9 + $0xe4] ss:$8 sps:$4 sm:$0xff]   ;;  %v11235_v5 = vld [vmem:[#allocation9 + $0x370] ss:$8 sps:$4 sm:$0xff]   ;;  %v5476_v59 = vpack.c.bf16 %v5470_v30, %v5470_v30  ;;  %vm7452_vm0 = vcmask 1041408  }
 0xaf9   :  { %6148 = vmatprep.subr.bf16.mxu1 %v11143_v17  ;;  %6217 = vmatprep.mubr.bf16.mxu0 %v12154_v48  ;;  %v6293_v58 = vshll.u32 %v6232_v43, 16  ;;  %12427 = vst [vmem:[#allocation21_spill] sm:$0xff] %v11232_v50  ;;  %12428 = vst [vmem:[#allocation22_spill] sm:$0xff] %v11235_v5  ;;  %v6291_v57 = vshrl.u32 %v6232_v43, 16  ;;  %v11239_v4 = vld [vmem:[#allocation9 + $0xe0] ss:$8 sps:$4 sm:$0xff]  }
 0xafa   :  { %12429 = vst [vmem:[#allocation23_spill] sm:$0xff] %v11239_v4  ;;  %v11251_v43 = vld [vmem:[#allocation9 + $0xd0] ss:$8 sps:$4 sm:$0xff]   ;;  %v11253_v30 = vld [vmem:[#allocation9 + $0x354] ss:$8 sps:$4 sm:$0xff]  }
 0xafb   :  { %6188 = vmatpush1.bf16.msra.mxu0 %v11146_v28  ;;  %v6295_v35 = vrot.slane %v6293_v58, 1  ;;  %v11247_v58 = vld [vmem:[#allocation9 + $0x360] ss:$8 sps:$4 sm:$0xff]   ;;  %12433 = vst [vmem:[#allocation27_spill] sm:$0xff] %v11251_v43  ;;  %12434 = vst [vmem:[#allocation28_spill] sm:$0xff] %v11253_v30 }
 0xafc   :  { %6149 = vmatpush1.bf16.msra.mxu1 %v11150_v31  ;;  %6189 = vmatprep.subr.bf16.mxu0 %v11152_v39  ;;  %12432 = vst [vmem:[#allocation26_spill] sm:$0xff] %v11247_v58 }
 0xafd   :  { %6150 = vmatprep.subr.bf16.mxu1 %v11155_v51  ;;  %v6296_v33 = vor.u32 %v6295_v35, %v6291_v57  ;;  %v11259_v35 = vld [vmem:[#allocation9 + $0x350] ss:$8 sps:$4 sm:$0xff]   ;;  %v11265_v57 = vld [vmem:[#allocation9 + $0x344] ss:$8 sps:$4 sm:$0xff]  }
 0xafe   :  { %12436 = vst [vmem:[#allocation30_spill] sm:$0xff] %v11259_v35  ;;  %12438 = vst [vmem:[#allocation32_spill] sm:$0xff] %v11265_v57 }
 0xaff   :  { %6190 = vmatpush1.bf16.msra.mxu0 %v11159_v9 }
 0xb00   :  { %6151 = vmatpush1.bf16.msra.mxu1 %v11163_v21  ;;  %6191 = vmatprep.subr.bf16.mxu0 %v11165_v52 }
 0xb01   :  { %6152 = vmatprep.subr.bf16.mxu1 %v11168_v53 }
 0xb03   :  { %6192 = vmatpush1.bf16.msra.mxu0 %v11171_v34 }
 0xb04   :  { %6153 = vmatpush1.bf16.msra.mxu1 %v11175_v14  ;;  %6193 = vmatprep.subr.bf16.mxu0 %v11177_v62 }
 0xb05   :  { %6154 = vmatprep.subr.bf16.mxu1 %v11180_v3 }
 0xb07   :  { %6194 = vmatpush1.bf16.msra.mxu0 %v11185_v61 }
 0xb08   :  { %6155 = vmatpush1.bf16.msra.mxu1 %v11189_v45  ;;  %6195 = vmatprep.subr.bf16.mxu0 %v11191_v18 }
 0xb09   :  { %6156 = vmatprep.subr.bf16.mxu1 %v11194_v63 }
 0xb0b   :  { %6196 = vmatpush1.bf16.msra.mxu0 %v11199_v11 }
 0xb0c   :  { %6157 = vmatpush1.bf16.msra.mxu1 %v11203_v37  ;;  %6197 = vmatprep.subr.bf16.mxu0 %v11205_v12 }
 0xb0d   :  { %6158 = vmatprep.subr.bf16.mxu1 %v11208_v36 }
 0xb0f   :  { %6198 = vmatpush1.bf16.msra.mxu0 %v11211_v24 }
 0xb10   :  { %6159 = vmatpush1.bf16.msra.mxu1 %v11215_v41  ;;  %6199 = vmatprep.subr.bf16.mxu0 %v11217_v23 }
 0xb11   :  { %6160 = vmatprep.subr.bf16.mxu1 %v11220_v26 }
 0xb13   :  { %6200 = vmatpush1.bf16.msra.mxu0 %v11223_v20 }
 0xb14   :  { %6161 = vmatpush2.bf16.msra.mxu1 %v11227_v6  ;;  %6547 = vmatprep.subr.bf16.mxu0 %v11229_v1  ;;  %v11398_v1 = vld [vmem:[#allocation9 + $0x3a0] ss:$8 sps:$4 sm:$0xff]   ;;  %v11421_v6 = vld [vmem:[#allocation9 + $0x4f4] ss:$8 sps:$4 sm:$0xff]  }
 0xb15   :  { %6162 = vmatprep.subr.bf16.mxu1 %v11232_v50  ;;  %v11256_v50 = vld [vmem:[#allocation9 + $0xc4] ss:$8 sps:$4 sm:$0xff]   ;;  %12480 = vst [vmem:[#allocation74_spill] sm:$0xff] %v11398_v1 }
 0xb16   :  { %6218 = vmatmul.mubr.bf16.vlgmr.msra.gmra.mxu0 %v5476_v59  ;;  %12435 = vst [vmem:[#allocation29_spill] sm:$0xff] %v11256_v50  ;;  %v11268_v59 = vld [vmem:[#allocation9 + $0xb4] ss:$8 sps:$4 sm:$0xff]  }
 0xb17   :  { %6548 = vmatpush1.bf16.msra.mxu0 %v11235_v5  ;;  %6579 = vmatprep.mubr.bf16.mxu0 %v6296_v33  ;;  %v11263_v33 = vld [vmem:[#allocation9 + $0xc0] ss:$8 sps:$4 sm:$0xff]   ;;  %12439 = vst [vmem:[#allocation33_spill] sm:$0xff] %v11268_v59 }
 0xb18   :  { %6163 = vmatpush2.bf16.msra.mxu1 %v11239_v4  ;;  %6549 = vmatprep.subr.bf16.mxu0 %v11241_v60  ;;  %12437 = vst [vmem:[#allocation31_spill] sm:$0xff] %v11263_v33  ;;  %v11386_v60 = vld [vmem:[#allocation9 + $0x3b0] ss:$8 sps:$4 sm:$0xff]  }
 0xb19   :  { %6164 = vmatprep.subr.bf16.mxu1 %v11244_v56  ;;  %v11271_v56 = vld [vmem:[#allocation9 + $0x340] ss:$8 sps:$4 sm:$0xff]   ;;  %12476 = vst [vmem:[#allocation70_spill] sm:$0xff] %v11386_v60 }
 0xb1a   :  { %12440 = vst [vmem:[#allocation34_spill] sm:$0xff] %v11271_v56 }
 0xb1b   :  { %6550 = vmatpush1.bf16.msra.mxu0 %v11247_v58  ;;  %v11275_v58 = vld [vmem:[#allocation9 + $0xb0] ss:$8 sps:$4 sm:$0xff]  }
 0xb1c   :  { %6165 = vmatpush2.bf16.msra.mxu1 %v11251_v43  ;;  %6551 = vmatprep.subr.bf16.mxu0 %v11253_v30  ;;  %12441 = vst [vmem:[#allocation35_spill] sm:$0xff] %v11275_v58  ;;  %v11277_v43 = vld [vmem:[#allocation9 + $0x334] ss:$8 sps:$4 sm:$0xff]   ;;  %v11280_v30 = vld [vmem:[#allocation9 + $0xa4] ss:$8 sps:$4 sm:$0xff]  }
 0xb1d   :  { %6166 = vmatprep.subr.bf16.mxu1 %v11256_v50  ;;  %12442 = vst [vmem:[#allocation36_spill] sm:$0xff] %v11277_v43  ;;  %12443 = vst [vmem:[#allocation37_spill] sm:$0xff] %v11280_v30  ;;  %v11283_v50 = vld [vmem:[#allocation9 + $0x330] ss:$8 sps:$4 sm:$0xff]  }
 0xb1e   :  { %12444 = vst [vmem:[#allocation38_spill] sm:$0xff] %v11283_v50 }
 0xb1f   :  { %6552 = vmatpush1.bf16.msra.mxu0 %v11259_v35  ;;  %v11287_v35 = vld [vmem:[#allocation9 + $0xa0] ss:$8 sps:$4 sm:$0xff]  }
 0xb20   :  { %6167 = vmatpush2.bf16.msra.mxu1 %v11263_v33  ;;  %6553 = vmatprep.subr.bf16.mxu0 %v11265_v57  ;;  %12445 = vst [vmem:[#allocation39_spill] sm:$0xff] %v11287_v35  ;;  %v11289_v33 = vld [vmem:[#allocation9 + $0x324] ss:$8 sps:$4 sm:$0xff]   ;;  %v11292_v57 = vld [vmem:[#allocation9 + $0x94] ss:$8 sps:$4 sm:$0xff]  }
 0xb21   :  { %6168 = vmatprep.subr.bf16.mxu1 %v11268_v59  ;;  %12446 = vst [vmem:[#allocation40_spill] sm:$0xff] %v11289_v33  ;;  %12447 = vst [vmem:[#allocation41_spill] sm:$0xff] %v11292_v57  ;;  %v11295_v59 = vld [vmem:[#allocation9 + $0x320] ss:$8 sps:$4 sm:$0xff]  }
 0xb22   :  { %12448 = vst [vmem:[#allocation42_spill] sm:$0xff] %v11295_v59 }
 0xb23   :  { %6554 = vmatpush1.bf16.msra.mxu0 %v11271_v56  ;;  %v11299_v56 = vld [vmem:[#allocation9 + $0x90] ss:$8 sps:$4 sm:$0xff]  }
 0xb24   :  { %6169 = vmatpush2.bf16.msra.mxu1 %v11275_v58  ;;  %6555 = vmatprep.subr.bf16.mxu0 %v11277_v43  ;;  %12449 = vst [vmem:[#allocation43_spill] sm:$0xff] %v11299_v56  ;;  %v11301_v58 = vld [vmem:[#allocation9 + $0x314] ss:$8 sps:$4 sm:$0xff]   ;;  %v11304_v43 = vld [vmem:[#allocation9 + $0x84] ss:$8 sps:$4 sm:$0xff]  }
 0xb25   :  { %6170 = vmatprep.subr.bf16.mxu1 %v11280_v30  ;;  %12450 = vst [vmem:[#allocation44_spill] sm:$0xff] %v11301_v58  ;;  %12451 = vst [vmem:[#allocation45_spill] sm:$0xff] %v11304_v43  ;;  %v11307_v30 = vld [vmem:[#allocation9 + $0x310] ss:$8 sps:$4 sm:$0xff]  }
 0xb26   :  { %12452 = vst [vmem:[#allocation46_spill] sm:$0xff] %v11307_v30 }
 0xb27   :  { %6556 = vmatpush1.bf16.msra.mxu0 %v11283_v50  ;;  %v11311_v50 = vld [vmem:[#allocation9 + $0x80] ss:$8 sps:$4 sm:$0xff]  }
 0xb28   :  { %6171 = vmatpush2.bf16.msra.mxu1 %v11287_v35  ;;  %6557 = vmatprep.subr.bf16.mxu0 %v11289_v33  ;;  %12453 = vst [vmem:[#allocation47_spill] sm:$0xff] %v11311_v50  ;;  %v11313_v35 = vld [vmem:[#allocation9 + $0x304] ss:$8 sps:$4 sm:$0xff]   ;;  %v11316_v33 = vld [vmem:[#allocation9 + $0x474] ss:$8 sps:$4 sm:$0xff]  }
 0xb29   :  { %6172 = vmatprep.subr.bf16.mxu1 %v11292_v57  ;;  %12454 = vst [vmem:[#allocation48_spill] sm:$0xff] %v11313_v35  ;;  %12455 = vst [vmem:[#allocation49_spill] sm:$0xff] %v11316_v33  ;;  %v11319_v57 = vld [vmem:[#allocation9 + $0x300] ss:$8 sps:$4 sm:$0xff]  }
 0xb2a   :  { %12456 = vst [vmem:[#allocation50_spill] sm:$0xff] %v11319_v57 }
 0xb2b   :  { %6558 = vmatpush1.bf16.msra.mxu0 %v11295_v59  ;;  %v11323_v59 = vld [vmem:[#allocation9 + $0x470] ss:$8 sps:$4 sm:$0xff]  }
 0xb2c   :  { %6173 = vmatpush2.bf16.msra.mxu1 %v11299_v56  ;;  %6559 = vmatprep.subr.bf16.mxu0 %v11301_v58  ;;  %12457 = vst [vmem:[#allocation51_spill] sm:$0xff] %v11323_v59  ;;  %v11325_v56 = vld [vmem:[#allocation9 + $0x3f4] ss:$8 sps:$4 sm:$0xff]   ;;  %v5474_v58 = vpack.c.bf16 %v11126_v54, %v11126_v54 }
 0xb2d   :  { %6174 = vmatprep.subr.bf16.mxu1 %v11304_v43  ;;  %12458 = vst [vmem:[#allocation52_spill] sm:$0xff] %v11325_v56  ;;  %v11330_v43 = vld [vmem:[#allocation9 + $0x464] ss:$8 sps:$4 sm:$0xff]   ;;  %v11342_v54 = vld [vmem:[#allocation9 + $0x454] ss:$8 sps:$4 sm:$0xff]  }
 0xb2e   :  { %12459 = vst [vmem:[#allocation53_spill] sm:$0xff] %v11330_v43  ;;  %12463 = vst [vmem:[#allocation57_spill] sm:$0xff] %v11342_v54 }
 0xb2f   :  { %6560 = vmatpush1.bf16.msra.mxu0 %v11307_v30  ;;  %v11333_v30 = vld [vmem:[#allocation9 + $0x3f0] ss:$8 sps:$4 sm:$0xff]  }
 0xb30   :  { %6175 = vmatpush2.bf16.msra.mxu1 %v11311_v50  ;;  %6561 = vmatprep.subr.bf16.mxu0 %v11313_v35  ;;  %12460 = vst [vmem:[#allocation54_spill] sm:$0xff] %v11333_v30  ;;  %v11337_v35 = vld [vmem:[#allocation9 + $0x460] ss:$8 sps:$4 sm:$0xff]   ;;  %v11339_v50 = vld [vmem:[#allocation9 + $0x3e4] ss:$8 sps:$4 sm:$0xff]  }
 0xb31   :  { %6588 = vmatprep.subr.bf16.mxu1 %v11316_v33  ;;  %12461 = vst [vmem:[#allocation55_spill] sm:$0xff] %v11337_v35  ;;  %12462 = vst [vmem:[#allocation56_spill] sm:$0xff] %v11339_v50  ;;  %v11372_v33 = vld [vmem:[#allocation4 + $0xc] sm:$0x66] }
 0xb33   :  { %6177 = vmatmul.mubr.bf16.vlgmr.msra.gmra.mxu1 %v5474_v58  ;;  %6562 = vmatpush1.bf16.msra.mxu0 %v11319_v57  ;;  %v11346_v58 = vld [vmem:[#allocation9 + $0x3e0] ss:$8 sps:$4 sm:$0xff]   ;;  %v11355_v57 = vld [vmem:[#allocation9 + $0x444] ss:$8 sps:$4 sm:$0xff]  }
 0xb34   :  { %6589 = vmatpush1.bf16.msra.mxu1 %v11323_v59  ;;  %6563 = vmatprep.subr.bf16.mxu0 %v11325_v56  ;;  %12464 = vst [vmem:[#allocation58_spill] sm:$0xff] %v11346_v58  ;;  %v11350_v59 = vld [vmem:[#allocation9 + $0x450] ss:$8 sps:$4 sm:$0xff]   ;;  %v11352_v56 = vld [vmem:[#allocation9 + $0x3d4] ss:$8 sps:$4 sm:$0xff]   ;;  %12467 = vst [vmem:[#allocation61_spill] sm:$0xff] %v11355_v57 }
 0xb35   :  { %6590 = vmatprep.subr.bf16.mxu1 %v11330_v43  ;;  %6620 = vmatprep.mubr.bf16.mxu1 %v12154_v48  ;;  %12465 = vst [vmem:[#allocation59_spill] sm:$0xff] %v11350_v59  ;;  %12466 = vst [vmem:[#allocation60_spill] sm:$0xff] %v11352_v56  ;;  %v11358_v43 = vld [vmem:[#allocation9 + $0x3d0] ss:$8 sps:$4 sm:$0xff]  }
 0xb36   :  { %12468 = vst [vmem:[#allocation62_spill] sm:$0xff] %v11358_v43 }
 0xb37   :  { %6564 = vmatpush2.bf16.msra.mxu0 %v11333_v30  ;;  %v11362_v30 = vld [vmem:[#allocation9 + $0x440] ss:$8 sps:$4 sm:$0xff]  }
 0xb38   :  { %6591 = vmatpush1.bf16.msra.mxu1 %v11337_v35  ;;  %6565 = vmatprep.subr.bf16.mxu0 %v11339_v50  ;;  %12469 = vst [vmem:[#allocation63_spill] sm:$0xff] %v11362_v30  ;;  %v11364_v35 = vld [vmem:[#allocation9 + $0x3c4] ss:$8 sps:$4 sm:$0xff]   ;;  %v11367_v50 = vld [vmem:[#allocation9 + $0x434] ss:$8 sps:$4 sm:$0xff]  }
 0xb39   :  { %6592 = vmatprep.subr.bf16.mxu1 %v11342_v54  ;;  %12470 = vst [vmem:[#allocation64_spill] sm:$0xff] %v11364_v35  ;;  %12471 = vst [vmem:[#allocation65_spill] sm:$0xff] %v11367_v50  ;;  %v11370_v54 = vld [vmem:[#allocation9 + $0x3c0] ss:$8 sps:$4 sm:$0xff]  }
 0xb3a   :  { %12472 = vst [vmem:[#allocation66_spill] sm:$0xff] %v11370_v54 }
 0xb3b   :  { %6566 = vmatpush2.bf16.msra.mxu0 %v11346_v58  ;;  %v11381_v58 = vld [vmem:[#allocation9 + $0x424] ss:$8 sps:$4 sm:$0xff]  }
 0xb3c   :  { %6593 = vmatpush1.bf16.msra.mxu1 %v11350_v59  ;;  %6567 = vmatprep.subr.bf16.mxu0 %v11352_v56  ;;  %v11376_v59 = vld [vmem:[#allocation9 + $0x430] ss:$8 sps:$4 sm:$0xff]   ;;  %v11378_v56 = vld [vmem:[#allocation9 + $0x3b4] ss:$8 sps:$4 sm:$0xff]   ;;  %12475 = vst [vmem:[#allocation69_spill] sm:$0xff] %v11381_v58 }
 0xb3d   :  { %6594 = vmatprep.subr.bf16.mxu1 %v11355_v57  ;;  %12473 = vst [vmem:[#allocation67_spill] sm:$0xff] %v11376_v59  ;;  %12474 = vst [vmem:[#allocation68_spill] sm:$0xff] %v11378_v56  ;;  %v6227_v57 = vld [vmem:[#allocation4 + $0x8] sm:$0x6] }
 0xb3e   :  { %v6233_v4 = vpack.c.bf16 %v6227_v57, %v6227_v57 }
 0xb3f   :  { %6568 = vmatpush2.bf16.msra.mxu0 %v11358_v43  ;;  %v6634_v43 = vcombine.high %v11372_v33, %v11372_v33 }
 0xb40   :  { %6595 = vmatpush1.bf16.msra.mxu1 %v11362_v30  ;;  %6569 = vmatprep.subr.bf16.mxu0 %v11364_v35  ;;  %v11390_v35 = vld [vmem:[#allocation9 + $0x420] ss:$8 sps:$4 sm:$0xff]   ;;  %v11392_v30 = vld [vmem:[#allocation9 + $0x3a4] ss:$8 sps:$4 sm:$0xff]   ;;  %v6298_v26 = vshrl.u32 %v6233_v4, 16 }
 0xb41   :  { %6596 = vmatprep.subr.bf16.mxu1 %v11367_v50  ;;  %12477 = vst [vmem:[#allocation71_spill] sm:$0xff] %v11390_v35  ;;  %12478 = vst [vmem:[#allocation72_spill] sm:$0xff] %v11392_v30  ;;  %v11395_v50 = vld [vmem:[#allocation9 + $0x414] ss:$8 sps:$4 sm:$0xff]   ;;  %v6637_v5 = vpack.c.bf16 %v6634_v43, %v6634_v43  ;;  %v6300_v43 = vshll.u32 %v6233_v4, 16 }
 0xb42   :  { %12479 = vst [vmem:[#allocation73_spill] sm:$0xff] %v11395_v50  ;;  %v11436_v4 = vld [vmem:[#allocation9 + $0x5f0] ss:$8 sps:$4 sm:$0xff]  }
 0xb43   :  { %6570 = vmatpush2.bf16.msra.mxu0 %v11370_v54  ;;  %v6231_v54 = vpack.c.bf16 %v11182_v16, %v11182_v16  ;;  %v6698_v57 = vshll.u32 %v6637_v5, 16  ;;  %v11416_v16 = vld [vmem:[#allocation9 + $0x400] ss:$8 sps:$4 sm:$0xff]   ;;  %12487 = vst [vmem:[#allocation81_spill] sm:$0xff] %v11436_v4 }
 0xb44   :  { %6597 = vmatpush1.bf16.msra.mxu1 %v11376_v59  ;;  %6571 = vmatprep.subr.bf16.mxu0 %v11378_v56  ;;  %v11404_v56 = vld [vmem:[#allocation9 + $0x410] ss:$8 sps:$4 sm:$0xff]   ;;  %v11406_v59 = vld [vmem:[#allocation9 + $0x394] ss:$8 sps:$4 sm:$0xff]  }
 0xb45   :  { %6598 = vmatprep.subr.bf16.mxu1 %v11381_v58  ;;  %12481 = vst [vmem:[#allocation75_spill] sm:$0xff] %v11404_v56  ;;  %12482 = vst [vmem:[#allocation76_spill] sm:$0xff] %v11406_v59  ;;  %v11409_v58 = vld [vmem:[#allocation9 + $0x404] ss:$8 sps:$4 sm:$0xff]   ;;  %v6700_v20 = vrot.slane %v6698_v57, 1 }
 0xb46   :  { %12483 = vst [vmem:[#allocation77_spill] sm:$0xff] %v11409_v58 }
 0xb47   :  { %6572 = vmatpush2.bf16.msra.mxu0 %v11386_v60  ;;  %v11412_v60 = vld [vmem:[#allocation9 + $0x390] ss:$8 sps:$4 sm:$0xff]  }
 0xb48   :  { %6599 = vmatpush1.bf16.msra.mxu1 %v11390_v35  ;;  %6573 = vmatprep.subr.bf16.mxu0 %v11392_v30  ;;  %12484 = vst [vmem:[#allocation78_spill] sm:$0xff] %v11412_v60  ;;  %v11418_v30 = vld [vmem:[#allocation9 + $0x384] ss:$8 sps:$4 sm:$0xff]   ;;  %v6286_v35 = vshll.u32 %v6231_v54, 16 }
 0xb49   :  { %6600 = vmatprep.subr.bf16.mxu1 %v11395_v50  ;;  %12485 = vst [vmem:[#allocation79_spill] sm:$0xff] %v11418_v30  ;;  %v6302_v50 = vrot.slane %v6300_v43, 1  ;;  %v11431_v43 = vld [vmem:[#allocation9 + $0x5f4] ss:$8 sps:$4 sm:$0xff]  }
 0xb4a   :  { %v6288_v23 = vrot.slane %v6286_v35, 1  ;;  %v11467_v35 = vld [vmem:[#allocation9 + $0x5c4] ss:$8 sps:$4 sm:$0xff]  }
 0xb4b   :  { %6574 = vmatpush2.bf16.msra.mxu0 %v11398_v1  ;;  %v11424_v1 = vld [vmem:[#allocation9 + $0x380] ss:$8 sps:$4 sm:$0xff]   ;;  %v6303_v41 = vor.u32 %v6302_v50, %v6298_v26  ;;  %v11441_v26 = vld [vmem:[#allocation9 + $0x5e4] ss:$8 sps:$4 sm:$0xff]   ;;  %v11445_v50 = vld [vmem:[#allocation9 + $0x4d4] ss:$8 sps:$4 sm:$0xff]  }
 0xb4c   :  { %6601 = vmatpush1.bf16.msra.mxu1 %v11404_v56  ;;  %6575 = vmatprep.subr.bf16.mxu0 %v11406_v59  ;;  %v11428_v59 = vld [vmem:[#allocation9 + $0x4f0] ss:$8 sps:$4 sm:$0xff]   ;;  %v6696_v56 = vshrl.u32 %v6637_v5, 16  ;;  %v11439_v5 = vld [vmem:[#allocation9 + $0x4e0] ss:$8 sps:$4 sm:$0xff]   ;;  %12489 = vst [vmem:[#allocation83_spill] sm:$0xff] %v11441_v26 }
 0xb4d   :  { %6602 = vmatprep.subr.bf16.mxu1 %v11409_v58  ;;  %v11433_v58 = vld [vmem:[#allocation9 + $0x4e4] ss:$8 sps:$4 sm:$0xff]   ;;  %12488 = vst [vmem:[#allocation82_spill] sm:$0xff] %v11439_v5  ;;  %12490 = vst [vmem:[#allocation84_spill] sm:$0xff] %v11445_v50 }
 0xb4e   :  { %12486 = vst [vmem:[#allocation80_spill] sm:$0xff] %v11433_v58  ;;  %v6701_v57 = vor.u32 %v6700_v20, %v6696_v56  ;;  %v11448_v56 = vld [vmem:[#allocation9 + $0x5e0] ss:$8 sps:$4 sm:$0xff]   ;;  %v11461_v20 = vld [vmem:[#allocation9 + $0x5d0] ss:$8 sps:$4 sm:$0xff]   ;;  %12497 = vst [vmem:[#allocation91_spill] sm:$0xff] %v11467_v35 }
 0xb4f   :  { %6576 = vmatpush2.bf16.msra.mxu0 %v11412_v60  ;;  %v6284_v60 = vshrl.u32 %v6231_v54, 16  ;;  %12491 = vst [vmem:[#allocation85_spill] sm:$0xff] %v11448_v56  ;;  %12495 = vst [vmem:[#allocation89_spill] sm:$0xff] %v11461_v20  ;;  %v11470_v54 = vld [vmem:[#allocation9 + $0x4b4] ss:$8 sps:$4 sm:$0xff]  }
 0xb50   :  { %6603 = vmatpush1.bf16.msra.mxu1 %v11416_v16  ;;  %6577 = vmatprep.subr.bf16.mxu0 %v11418_v30  ;;  %12498 = vst [vmem:[#allocation92_spill] sm:$0xff] %v11470_v54 }
 0xb51   :  { %6952 = vmatprep.subr.bf16.mxu1 %v11421_v6  ;;  %v6289_v30 = vor.u32 %v6288_v23, %v6284_v60  ;;  %v11453_v60 = vld [vmem:[#allocation9 + $0x4d0] ss:$8 sps:$4 sm:$0xff]   ;;  %v11458_v23 = vld [vmem:[#allocation9 + $0x4c4] ss:$8 sps:$4 sm:$0xff]  }
 0xb52   :  { %12492 = vst [vmem:[#allocation86_spill] sm:$0xff] %v11453_v60  ;;  %12494 = vst [vmem:[#allocation88_spill] sm:$0xff] %v11458_v23 }
 0xb53   :  { %6578 = vmatpush2.bf16.msra.mxu0 %v11424_v1  ;;  %6621 = vmatmul.mubr.bf16.vlgmr.msra.gmra.mxu1 %v6303_v41  ;;  %v11455_v41 = vld [vmem:[#allocation9 + $0x5d4] ss:$8 sps:$4 sm:$0xff]  }
 0xb54   :  { %6953 = vmatpush1.bf16.msra.mxu1 %v11428_v59  ;;  %6984 = vmatprep.mubr.bf16.mxu1 %v6701_v57  ;;  %12493 = vst [vmem:[#allocation87_spill] sm:$0xff] %v11455_v41  ;;  %v11473_v57 = vld [vmem:[#allocation9 + $0x5c0] ss:$8 sps:$4 sm:$0xff]  }
 0xb55   :  { %6993 = vmatprep.subr.bf16.mxu0 %v11431_v43  ;;  %6954 = vmatprep.subr.bf16.mxu1 %v11433_v58  ;;  %12499 = vst [vmem:[#allocation93_spill] sm:$0xff] %v11473_v57  ;;  %v9122_v58 = vld [vmem:[#allocation9 + $0x1f4] ss:$8 sps:$4 sm:$0xff]  }
 0xb56   :  { %6580 = vmatmul.mubr.bf16.vlgmr.msra.gmra.mxu0 %v6289_v30  ;;  %v11465_v30 = vld [vmem:[#allocation9 + $0x4c0] ss:$8 sps:$4 sm:$0xff]  }
 0xb57   :  { %6994 = vmatpush1.bf16.msra.mxu0 %v11436_v4  ;;  %7025 = vmatprep.mubr.bf16.mxu0 %v12154_v48  ;;  %12496 = vst [vmem:[#allocation90_spill] sm:$0xff] %v11465_v30 }
 0xb58   :  { %6955 = vmatpush1.bf16.msra.mxu1 %v11439_v5  ;;  %6995 = vmatprep.subr.bf16.mxu0 %v11441_v26  ;;  %v11506_v26 = vld [vmem:[#allocation9 + $0x484] ss:$8 sps:$4 sm:$0xff]  }
 0xb59   :  { %6956 = vmatprep.subr.bf16.mxu1 %v11445_v50  ;;  %v6632_v50 = vld [vmem:[#allocation4 + $0x14] sm:$0x6]  ;;  %12510 = vst [vmem:[#allocation104_spill] sm:$0xff] %v11506_v26 }
 0xb5a   :  { %v11530_v5 = vld [vmem:[#allocation9 + $0x564] ss:$8 sps:$4 sm:$0xff]  }
 0xb5b   :  { %6996 = vmatpush1.bf16.msra.mxu0 %v11448_v56  ;;  %v11477_v56 = vld [vmem:[#allocation9 + $0x4b0] ss:$8 sps:$4 sm:$0xff]   ;;  %12517 = vst [vmem:[#allocation111_spill] sm:$0xff] %v11530_v5 }
 0xb5c   :  { %6957 = vmatpush1.bf16.msra.mxu1 %v11453_v60  ;;  %6997 = vmatprep.subr.bf16.mxu0 %v11455_v41  ;;  %12500 = vst [vmem:[#allocation94_spill] sm:$0xff] %v11477_v56  ;;  %v11479_v60 = vld [vmem:[#allocation9 + $0x5b4] ss:$8 sps:$4 sm:$0xff]   ;;  %v11482_v41 = vld [vmem:[#allocation9 + $0x4a4] ss:$8 sps:$4 sm:$0xff]  }
 0xb5d   :  { %6958 = vmatprep.subr.bf16.mxu1 %v11458_v23  ;;  %12501 = vst [vmem:[#allocation95_spill] sm:$0xff] %v11479_v60  ;;  %12502 = vst [vmem:[#allocation96_spill] sm:$0xff] %v11482_v41  ;;  %v11485_v23 = vld [vmem:[#allocation9 + $0x5b0] ss:$8 sps:$4 sm:$0xff]  }
 0xb5e   :  { %12503 = vst [vmem:[#allocation97_spill] sm:$0xff] %v11485_v23 }
 0xb5f   :  { %6998 = vmatpush1.bf16.msra.mxu0 %v11461_v20  ;;  %v11489_v20 = vld [vmem:[#allocation9 + $0x4a0] ss:$8 sps:$4 sm:$0xff]  }
 0xb60   :  { %6959 = vmatpush1.bf16.msra.mxu1 %v11465_v30  ;;  %6999 = vmatprep.subr.bf16.mxu0 %v11467_v35  ;;  %12504 = vst [vmem:[#allocation98_spill] sm:$0xff] %v11489_v20  ;;  %v11491_v30 = vld [vmem:[#allocation9 + $0x5a4] ss:$8 sps:$4 sm:$0xff]   ;;  %v11494_v35 = vld [vmem:[#allocation9 + $0x494] ss:$8 sps:$4 sm:$0xff]  }
 0xb61   :  { %6960 = vmatprep.subr.bf16.mxu1 %v11470_v54  ;;  %12505 = vst [vmem:[#allocation99_spill] sm:$0xff] %v11491_v30  ;;  %12506 = vst [vmem:[#allocation100_spill] sm:$0xff] %v11494_v35  ;;  %v11497_v54 = vld [vmem:[#allocation9 + $0x5a0] ss:$8 sps:$4 sm:$0xff]  }
 0xb62   :  { %12507 = vst [vmem:[#allocation101_spill] sm:$0xff] %v11497_v54 }
 0xb63   :  { %7000 = vmatpush1.bf16.msra.mxu0 %v11473_v57  ;;  %v6638_v57 = vpack.c.bf16 %v6632_v50, %v6632_v50  ;;  %v11518_v50 = vld [vmem:[#allocation9 + $0x574] ss:$8 sps:$4 sm:$0xff]  }
 0xb64   :  { %6961 = vmatpush1.bf16.msra.mxu1 %v11477_v56  ;;  %7001 = vmatprep.subr.bf16.mxu0 %v11479_v60  ;;  %v11501_v56 = vld [vmem:[#allocation9 + $0x490] ss:$8 sps:$4 sm:$0xff]   ;;  %v11503_v60 = vld [vmem:[#allocation9 + $0x594] ss:$8 sps:$4 sm:$0xff]   ;;  %12514 = vst [vmem:[#allocation108_spill] sm:$0xff] %v11518_v50 }
 0xb65   :  { %6962 = vmatprep.subr.bf16.mxu1 %v11482_v41  ;;  %12508 = vst [vmem:[#allocation102_spill] sm:$0xff] %v11501_v56  ;;  %12509 = vst [vmem:[#allocation103_spill] sm:$0xff] %v11503_v60  ;;  %v11509_v41 = vld [vmem:[#allocation9 + $0x590] ss:$8 sps:$4 sm:$0xff]   ;;  %v6703_v4 = vshrl.u32 %v6638_v57, 16 }
 0xb66   :  { %12511 = vst [vmem:[#allocation105_spill] sm:$0xff] %v11509_v41 }
 0xb67   :  { %7002 = vmatpush1.bf16.msra.mxu0 %v11485_v23  ;;  %v6705_v23 = vshll.u32 %v6638_v57, 16  ;;  %v9124_v57 = vld [vmem:[#allocation9 + $0x1e4] ss:$8 sps:$4 sm:$0xff]  }
 0xb68   :  { %6963 = vmatpush1.bf16.msra.mxu1 %v11489_v20  ;;  %7003 = vmatprep.subr.bf16.mxu0 %v11491_v30  ;;  %v11513_v20 = vld [vmem:[#allocation9 + $0x480] ss:$8 sps:$4 sm:$0xff]   ;;  %v11515_v30 = vld [vmem:[#allocation9 + $0x584] ss:$8 sps:$4 sm:$0xff]  }
 0xb69   :  { %6964 = vmatprep.subr.bf16.mxu1 %v11494_v35  ;;  %12512 = vst [vmem:[#allocation106_spill] sm:$0xff] %v11513_v20  ;;  %12513 = vst [vmem:[#allocation107_spill] sm:$0xff] %v11515_v30  ;;  %v11520_v35 = vld [vmem:[#allocation4 + $0x24] sm:$0x33] }
 0xb6b   :  { %7004 = vmatpush1.bf16.msra.mxu0 %v11497_v54  ;;  %v11523_v54 = vld [vmem:[#allocation9 + $0x580] ss:$8 sps:$4 sm:$0xff]  }
 0xb6c   :  { %6965 = vmatpush1.bf16.msra.mxu1 %v11501_v56  ;;  %7005 = vmatprep.subr.bf16.mxu0 %v11503_v60  ;;  %12515 = vst [vmem:[#allocation109_spill] sm:$0xff] %v11523_v54  ;;  %v11527_v60 = vld [vmem:[#allocation9 + $0x570] ss:$8 sps:$4 sm:$0xff]   ;;  %v6707_v56 = vrot.slane %v6705_v23, 1 }
 0xb6d   :  { %6966 = vmatprep.subr.bf16.mxu1 %v11506_v26  ;;  %12516 = vst [vmem:[#allocation110_spill] sm:$0xff] %v11527_v60  ;;  %v7047_v26 = vcombine.high %v11520_v35, %v11520_v35 }
 0xb6f   :  { %7006 = vmatpush1.bf16.msra.mxu0 %v11509_v41  ;;  %v6708_v41 = vor.u32 %v6707_v56, %v6703_v4  ;;  %v7050_v23 = vpack.c.bf16 %v7047_v26, %v7047_v26  ;;  %v9125_v4 = vld [vmem:[#allocation9 + $0x1e0] ss:$8 sps:$4 sm:$0xff]   ;;  %v9126_v26 = vld [vmem:[#allocation9 + $0x1d4] ss:$8 sps:$4 sm:$0xff]  }
 0xb70   :  { %6967 = vmatpush1.bf16.msra.mxu1 %v11513_v20  ;;  %7007 = vmatprep.subr.bf16.mxu0 %v11515_v30  ;;  %v11536_v20 = vld [vmem:[#allocation9 + $0x560] ss:$8 sps:$4 sm:$0xff]   ;;  %v11539_v30 = vld [vmem:[#allocation9 + $0x554] ss:$8 sps:$4 sm:$0xff]  }
 0xb71   :  { %6968 = vmatprep.subr.bf16.mxu1 %v11518_v50  ;;  %12518 = vst [vmem:[#allocation112_spill] sm:$0xff] %v11536_v20  ;;  %12519 = vst [vmem:[#allocation113_spill] sm:$0xff] %v11539_v30  ;;  %v9123_v50 = vld [vmem:[#allocation9 + $0x1f0] ss:$8 sps:$4 sm:$0xff]   ;;  %v11548_v56 = vld [vmem:[#allocation9 + $0x540] ss:$8 sps:$4 sm:$0xff]  }
 0xb72   :  { %12522 = vst [vmem:[#allocation116_spill] sm:$0xff] %v11548_v56 }
 0xb73   :  { %7008 = vmatpush1.bf16.msra.mxu0 %v11523_v54  ;;  %v11542_v54 = vld [vmem:[#allocation9 + $0x550] ss:$8 sps:$4 sm:$0xff]  }
 0xb74   :  { %6969 = vmatpush2.bf16.msra.mxu1 %v11527_v60  ;;  %7052 = vmatprep.subr.bf16.mxu0 %v9122_v58  ;;  %12520 = vst [vmem:[#allocation114_spill] sm:$0xff] %v11542_v54  ;;  %v11545_v58 = vld [vmem:[#allocation9 + $0x544] ss:$8 sps:$4 sm:$0xff]  }
 0xb75   :  { %6970 = vmatprep.subr.bf16.mxu1 %v11530_v5  ;;  %12521 = vst [vmem:[#allocation115_spill] sm:$0xff] %v11545_v58  ;;  %v9137_v5 = vld [vmem:[#allocation9 + $0x2f4] ss:$8 sps:$4 sm:$0xff]   ;;  %v9141_v60 = vld [vmem:[#allocation9 + $0x2e4] ss:$8 sps:$4 sm:$0xff]  }
 0xb76   :  { %7026 = vmatmul.mubr.bf16.vlgmr.msra.gmra.mxu0 %v6708_v41  ;;  %v11551_v41 = vld [vmem:[#allocation9 + $0x534] ss:$8 sps:$4 sm:$0xff]  }
 0xb77   :  { %7053 = vmatpush1.bf16.msra.mxu0 %v9123_v50  ;;  %7084 = vmatprep.mubr.bf16.mxu0 %v7050_v23  ;;  %12523 = vst [vmem:[#allocation117_spill] sm:$0xff] %v11551_v41  ;;  %v9127_v50 = vld [vmem:[#allocation9 + $0x1d0] ss:$8 sps:$4 sm:$0xff]   ;;  %v9128_v23 = vld [vmem:[#allocation9 + $0x1c4] ss:$8 sps:$4 sm:$0xff]  }
 0xb78   :  { %6971 = vmatpush2.bf16.msra.mxu1 %v11536_v20  ;;  %7054 = vmatprep.subr.bf16.mxu0 %v9124_v57  ;;  %v11554_v57 = vld [vmem:[#allocation9 + $0x530] ss:$8 sps:$4 sm:$0xff]  }
 0xb79   :  { %6972 = vmatprep.subr.bf16.mxu1 %v11539_v30  ;;  %12524 = vst [vmem:[#allocation118_spill] sm:$0xff] %v11554_v57  ;;  %v9133_v30 = vld [vmem:[#allocation9 + $0x1a0] ss:$8 sps:$4 sm:$0xff]  }
 0xb7b   :  { %7055 = vmatpush1.bf16.msra.mxu0 %v9125_v4  ;;  %v11557_v4 = vld [vmem:[#allocation9 + $0x524] ss:$8 sps:$4 sm:$0xff]  }
 0xb7c   :  { %6973 = vmatpush2.bf16.msra.mxu1 %v11542_v54  ;;  %7056 = vmatprep.subr.bf16.mxu0 %v9126_v26  ;;  %12525 = vst [vmem:[#allocation119_spill] sm:$0xff] %v11557_v4  ;;  %v9129_v54 = vld [vmem:[#allocation9 + $0x1c0] ss:$8 sps:$4 sm:$0xff]   ;;  %v9130_v26 = vld [vmem:[#allocation9 + $0x1b4] ss:$8 sps:$4 sm:$0xff]  }
 0xb7d   :  { %6974 = vmatprep.subr.bf16.mxu1 %v11545_v58  ;;  %v11560_v58 = vld [vmem:[#allocation9 + $0x520] ss:$8 sps:$4 sm:$0xff]  }
 0xb7e   :  { %12526 = vst [vmem:[#allocation120_spill] sm:$0xff] %v11560_v58 }
 0xb7f   :  { %7057 = vmatpush1.bf16.msra.mxu0 %v9127_v50  ;;  %v6636_v50 = vpack.c.bf16 %v11372_v33, %v11372_v33  ;;  %v9134_v33 = vld [vmem:[#allocation9 + $0x194] ss:$8 sps:$4 sm:$0xff]  }
 0xb80   :  { %6975 = vmatpush2.bf16.msra.mxu1 %v11548_v56  ;;  %7058 = vmatprep.subr.bf16.mxu0 %v9128_v23  ;;  %v11565_v23 = vld [vmem:[#allocation9 + $0x514] ss:$8 sps:$4 sm:$0xff]   ;;  %v9131_v56 = vld [vmem:[#allocation9 + $0x1b0] ss:$8 sps:$4 sm:$0xff]  }
 0xb81   :  { %6976 = vmatprep.subr.bf16.mxu1 %v11551_v41  ;;  %12527 = vst [vmem:[#allocation121_spill] sm:$0xff] %v11565_v23  ;;  %v9132_v41 = vld [vmem:[#allocation9 + $0x1a4] ss:$8 sps:$4 sm:$0xff]  }
 0xb83   :  { %7059 = vmatpush1.bf16.msra.mxu0 %v9129_v54  ;;  %v11568_v54 = vld [vmem:[#allocation9 + $0x510] ss:$8 sps:$4 sm:$0xff]  }
 0xb84   :  { %6977 = vmatpush2.bf16.msra.mxu1 %v11554_v57  ;;  %7060 = vmatprep.subr.bf16.mxu0 %v9130_v26  ;;  %12528 = vst [vmem:[#allocation122_spill] sm:$0xff] %v11568_v54  ;;  %v11571_v26 = vld [vmem:[#allocation9 + $0x504] ss:$8 sps:$4 sm:$0xff]   ;;  %v6691_v57 = vshll.u32 %v6636_v50, 16 }
 0xb85   :  { %6978 = vmatprep.subr.bf16.mxu1 %v11557_v4  ;;  %v11574_v4 = vld [vmem:[#allocation9 + $0x500] ss:$8 sps:$4 sm:$0xff]  }
 0xb87   :  { %7061 = vmatpush1.bf16.msra.mxu0 %v9131_v56  ;;  %v6693_v56 = vrot.slane %v6691_v57, 1  ;;  %v9143_v57 = vld [vmem:[#allocation9 + $0x2e0] ss:$8 sps:$4 sm:$0xff]  }
 0xb88   :  { %6979 = vmatpush2.bf16.msra.mxu1 %v11560_v58  ;;  %7062 = vmatprep.subr.bf16.mxu0 %v9132_v41  ;;  %v9135_v58 = vld [vmem:[#allocation9 + $0x190] ss:$8 sps:$4 sm:$0xff]   ;;  %v6689_v41 = vshrl.u32 %v6636_v50, 16  ;;  %v9144_v50 = vld [vmem:[#allocation9 + $0x264] ss:$8 sps:$4 sm:$0xff]  }
 0xb89   :  { %6980 = vmatprep.subr.bf16.mxu1 %v11565_v23  ;;  %v9136_v23 = vld [vmem:[#allocation9 + $0x184] ss:$8 sps:$4 sm:$0xff]  }
 0xb8a   :  { %v6694_v20 = vor.u32 %v6693_v56, %v6689_v41  ;;  %v9148_v56 = vld [vmem:[#allocation9 + $0x254] ss:$8 sps:$4 sm:$0xff]   ;;  %v9150_v41 = vld [vmem:[#allocation9 + $0x250] ss:$8 sps:$4 sm:$0xff]  }
 0xb8b   :  { %7063 = vmatpush1.bf16.msra.mxu0 %v9133_v30  ;;  %v9138_v30 = vld [vmem:[#allocation9 + $0x180] ss:$8 sps:$4 sm:$0xff]  }
 0xb8c   :  { %6981 = vmatpush2.bf16.msra.mxu1 %v11568_v54  ;;  %7064 = vmatprep.subr.bf16.mxu0 %v9134_v33  ;;  %v9139_v54 = vld [vmem:[#allocation9 + $0x2f0] ss:$8 sps:$4 sm:$0xff]   ;;  %v9140_v33 = vld [vmem:[#allocation9 + $0x274] ss:$8 sps:$4 sm:$0xff]  }
 0xb8d   :  { %6982 = vmatprep.subr.bf16.mxu1 %v11571_v26 }
 0xb8f   :  { %7065 = vmatpush1.bf16.msra.mxu0 %v9135_v58  ;;  %v9142_v58 = vld [vmem:[#allocation9 + $0x270] ss:$8 sps:$4 sm:$0xff]  }
 0xb90   :  { %6983 = vmatpush2.bf16.msra.mxu1 %v11574_v4  ;;  %7066 = vmatprep.subr.bf16.mxu0 %v9136_v23  ;;  %v9145_v23 = vld [vmem:[#allocation9 + $0x2d4] ss:$8 sps:$4 sm:$0xff]  }
 0xb91   :  { %7093 = vmatprep.subr.bf16.mxu1 %v9137_v5  ;;  %v9146_v5 = vld [vmem:[#allocation9 + $0x260] ss:$8 sps:$4 sm:$0xff]  }
 0xb93   :  { %6985 = vmatmul.mubr.bf16.vlgmr.msra.gmra.mxu1 %v6694_v20  ;;  %7067 = vmatpush1.bf16.msra.mxu0 %v9138_v30  ;;  %v9147_v20 = vld [vmem:[#allocation9 + $0x2d0] ss:$8 sps:$4 sm:$0xff]   ;;  %v9152_v30 = vld [vmem:[#allocation9 + $0x244] ss:$8 sps:$4 sm:$0xff]  }
 0xb94   :  { %7094 = vmatpush1.bf16.msra.mxu1 %v9139_v54  ;;  %7068 = vmatprep.subr.bf16.mxu0 %v9140_v33  ;;  %v9149_v54 = vld [vmem:[#allocation9 + $0x2c4] ss:$8 sps:$4 sm:$0xff]   ;;  %v9153_v33 = vld [vmem:[#allocation9 + $0x2b4] ss:$8 sps:$4 sm:$0xff]  }
 0xb95   :  { %7095 = vmatprep.subr.bf16.mxu1 %v9141_v60  ;;  %7125 = vmatprep.mubr.bf16.mxu1 %v12154_v48  ;;  %v9151_v60 = vld [vmem:[#allocation9 + $0x2c0] ss:$8 sps:$4 sm:$0xff]  }
 0xb97   :  { %7069 = vmatpush2.bf16.msra.mxu0 %v9142_v58  ;;  %v9154_v58 = vld [vmem:[#allocation9 + $0x240] ss:$8 sps:$4 sm:$0xff]  }
 0xb98   :  { %7096 = vmatpush1.bf16.msra.mxu1 %v9143_v57  ;;  %7070 = vmatprep.subr.bf16.mxu0 %v9144_v50  ;;  %v9155_v57 = vld [vmem:[#allocation9 + $0x2b0] ss:$8 sps:$4 sm:$0xff]   ;;  %v11586_v50 = vld [vmem:[#allocation4 + $0x18] sm:$0x33] }
 0xb99   :  { %7097 = vmatprep.subr.bf16.mxu1 %v9145_v23  ;;  %v12545_v23 = vld [vmem:[#allocation31_spill] sm:$0xff] }
 0xb9b   :  { %7071 = vmatpush2.bf16.msra.mxu0 %v9146_v5  ;;  %v12546_v5 = vld [vmem:[#allocation32_spill] sm:$0xff] }
 0xb9c   :  { %7098 = vmatpush1.bf16.msra.mxu1 %v9147_v20  ;;  %7072 = vmatprep.subr.bf16.mxu0 %v9148_v56  ;;  %v12547_v20 = vld [vmem:[#allocation33_spill] sm:$0xff]  ;;  %v12548_v56 = vld [vmem:[#allocation34_spill] sm:$0xff] }
 0xb9d   :  { %7099 = vmatprep.subr.bf16.mxu1 %v9149_v54  ;;  %v12549_v54 = vld [vmem:[#allocation35_spill] sm:$0xff] }
 0xb9f   :  { %7073 = vmatpush2.bf16.msra.mxu0 %v9150_v41  ;;  %v12550_v41 = vld [vmem:[#allocation36_spill] sm:$0xff] }
 0xba0   :  { %7100 = vmatpush1.bf16.msra.mxu1 %v9151_v60  ;;  %7074 = vmatprep.subr.bf16.mxu0 %v9152_v30  ;;  %v12551_v60 = vld [vmem:[#allocation37_spill] sm:$0xff]  ;;  %v12552_v30 = vld [vmem:[#allocation38_spill] sm:$0xff] }
 0xba1   :  { %7101 = vmatprep.subr.bf16.mxu1 %v9153_v33  ;;  %v12553_v33 = vld [vmem:[#allocation39_spill] sm:$0xff] }
 0xba3   :  { %7075 = vmatpush2.bf16.msra.mxu0 %v9154_v58  ;;  %v12554_v58 = vld [vmem:[#allocation40_spill] sm:$0xff] }
 0xba4   :  { %7102 = vmatpush1.bf16.msra.mxu1 %v9155_v57  ;;  %7076 = vmatprep.subr.bf16.mxu0 %v11037_v29  ;;  %v7045_v29 = vld [vmem:[#allocation4 + $0x2c] sm:$0x3]  ;;  %v12555_v57 = vld [vmem:[#allocation41_spill] sm:$0xff] }
 0xba5   :  { %7103 = vmatprep.subr.bf16.mxu1 %v11043_v42 }
 0xba7   :  { %7077 = vmatpush2.bf16.msra.mxu0 %v11035_v0  ;;  %v7039_v0 = vcombine.high %v11586_v50, %v11586_v50 }
 0xba8   :  { %7104 = vmatpush1.bf16.msra.mxu1 %v11041_v44  ;;  %7078 = vmatprep.subr.bf16.mxu0 %v11047_v2  ;;  %v7051_v44 = vpack.c.bf16 %v7045_v29, %v7045_v29  ;;  %v7049_v2 = vpack.c.bf16 %v11520_v35, %v11520_v35  ;;  %v12544_v35 = vld [vmem:[#allocation30_spill] sm:$0xff] }
 0xba9   :  { %7105 = vmatprep.subr.bf16.mxu1 %v11055_v22  ;;  %v7042_v42 = vpack.c.bf16 %v7039_v0, %v7039_v0  ;;  %v12556_v29 = vld [vmem:[#allocation42_spill] sm:$0xff]  ;;  %v12557_v0 = vld [vmem:[#allocation43_spill] sm:$0xff] }
 0xbab   :  { %7079 = vmatpush2.bf16.msra.mxu0 %v11045_v7 }
 0xbac   :  { %7106 = vmatpush1.bf16.msra.mxu1 %v11053_v55  ;;  %7080 = vmatprep.subr.bf16.mxu0 %v11062_v40 }
 0xbad   :  { %7107 = vmatprep.subr.bf16.mxu1 %v11070_v19 }
 0xbaf   :  { %7081 = vmatpush2.bf16.msra.mxu0 %v11060_v46 }
 0xbb0   :  { %7108 = vmatpush1.bf16.msra.mxu1 %v11068_v8  ;;  %7082 = vmatprep.subr.bf16.mxu0 %v11077_v32 }
 0xbb1   :  { %7134 = vmatprep.subr.bf16.mxu1 %v11083_v27 }
 0xbb3   :  { %7083 = vmatpush2.bf16.msra.mxu0 %v11075_v13  ;;  %7126 = vmatmul.mubr.bf16.vlgmr.msra.gmra.mxu1 %v7051_v44  ;;  %v5897_v7 = vpop.f32.mrf.mxu1  ;;  %v12558_v44 = vld [vmem:[#allocation44_spill] sm:$0xff] }
 0xbb4   :  { %7135 = vmatpush1.bf16.msra.mxu1 %v11118_v15  ;;  %7166 = vmatprep.mubr.bf16.mxu1 %v7042_v42  ;;  %v12559_v42 = vld [vmem:[#allocation45_spill] sm:$0xff] }
 0xbb5   :  { %v5899_v55 = vpop.f32.mrf.mxu1  ;;  %7175 = vmatprep.subr.bf16.mxu0 %v11086_v47  ;;  %7136 = vmatprep.subr.bf16.mxu1 %v11123_v25  ;;  %v11620_v47 = vld [vmem:[#allocation4 + $0x18] sm:$0x66] }
 0xbb6   :  { %7085 = vmatmul.mubr.bf16.vlgmr.msra.gmra.mxu0 %v7049_v2  ;;  %v5856_v22 = vpop.f32.mrf.mxu0  ;;  %v7219_v15 = vcombine.high %v11620_v47, %v11620_v47  ;;  %v12561_v2 = vld [vmem:[#allocation47_spill] sm:$0xff] }
 0xbb7   :  { %v11603_v46 = vadd.f32 %v5897_v7, %v5856_v22  ;;  %7176 = vmatpush1.bf16.msra.mxu0 %v11130_v49  ;;  %v5901_v40 = vpop.f32.mrf.mxu1  ;;  %7207 = vmatprep.mubr.bf16.mxu0 %v12154_v48  ;;  %v12560_v7 = vld [vmem:[#allocation46_spill] sm:$0xff]  ;;  %v7041_v22 = vpack.c.bf16 %v11586_v50, %v11586_v50 }
 0xbb8   :  { %7137 = vmatpush1.bf16.msra.mxu1 %v11136_v38  ;;  %v5858_v8 = vpop.f32.mrf.mxu0  ;;  %7177 = vmatprep.subr.bf16.mxu0 %v11138_v10  ;;  %v7222_v25 = vpack.c.bf16 %v7219_v15, %v7219_v15  ;;  %v12529_v38 = vld [vmem:[#allocation15_spill] sm:$0xff]  ;;  %v12530_v10 = vld [vmem:[#allocation16_spill] sm:$0xff]  ;;  %v12563_v40 = vld [vmem:[#allocation49_spill] sm:$0xff] }
 0xbb9   :  { %v11609_v19 = vadd.f32 %v5899_v55, %v5858_v8  ;;  %v5902_v13 = vpop.f32.mrf.mxu1  ;;  %7138 = vmatprep.subr.bf16.mxu1 %v11143_v17  ;;  %v12531_v17 = vld [vmem:[#allocation17_spill] sm:$0xff]  ;;  %v12562_v55 = vld [vmem:[#allocation48_spill] sm:$0xff] }
 0xbba   :  { %v5860_v32 = vpop.f32.mrf.mxu0  ;;  %v7234_v49 = vshll.u32 %v7222_v25, 16  ;;  %v12564_v13 = vld [vmem:[#allocation50_spill] sm:$0xff]  ;;  %v12566_v15 = vld [vmem:[#allocation52_spill] sm:$0xff] }
 0xbbb   :  { %7178 = vmatpush1.bf16.msra.mxu0 %v11146_v28  ;;  %v7037_v28 = vld [vmem:[#allocation4 + $0x20] sm:$0x3] }
 0xbbc   :  { %7139 = vmatpush1.bf16.msra.mxu1 %v11150_v31  ;;  %v5861_v27 = vpop.f32.mrf.mxu0  ;;  %7179 = vmatprep.subr.bf16.mxu0 %v11152_v39  ;;  %v7236_v31 = vrot.slane %v7234_v49, 1  ;;  %v12532_v39 = vld [vmem:[#allocation18_spill] sm:$0xff]  ;;  %v12567_v49 = vld [vmem:[#allocation53_spill] sm:$0xff] }
 0xbbd   :  { %7140 = vmatprep.subr.bf16.mxu1 %v11155_v51  ;;  %v7232_v51 = vshrl.u32 %v7222_v25, 16  ;;  %v12565_v27 = vld [vmem:[#allocation51_spill] sm:$0xff] }
 0xbbf   :  { %7180 = vmatpush1.bf16.msra.mxu0 %v11159_v9  ;;  %v12533_v9 = vld [vmem:[#allocation19_spill] sm:$0xff] }
 0xbc0   :  { %7141 = vmatpush1.bf16.msra.mxu1 %v11163_v21  ;;  %7181 = vmatprep.subr.bf16.mxu0 %v11165_v52  ;;  %v7043_v21 = vpack.c.bf16 %v7037_v28, %v7037_v28  ;;  %v12534_v52 = vld [vmem:[#allocation20_spill] sm:$0xff] }
 0xbc1   :  { %7142 = vmatprep.subr.bf16.mxu1 %v11168_v53  ;;  %v12535_v53 = vld [vmem:[#allocation21_spill] sm:$0xff] }
 0xbc3   :  { %7182 = vmatpush1.bf16.msra.mxu0 %v11171_v34  ;;  %v7237_v34 = vor.u32 %v7236_v31, %v7232_v51  ;;  %v12569_v31 = vld [vmem:[#allocation55_spill] sm:$0xff]  ;;  %v12571_v51 = vld [vmem:[#allocation57_spill] sm:$0xff] }
 0xbc4   :  { %7143 = vmatpush1.bf16.msra.mxu1 %v11175_v14  ;;  %7183 = vmatprep.subr.bf16.mxu0 %v11177_v62  ;;  %v12536_v62 = vld [vmem:[#allocation22_spill] sm:$0xff] }
 0xbc5   :  { %7144 = vmatprep.subr.bf16.mxu1 %v11180_v3 }
 0xbc7   :  { %7184 = vmatpush1.bf16.msra.mxu0 %v11185_v61  ;;  %v12537_v61 = vld [vmem:[#allocation23_spill] sm:$0xff] }
 0xbc8   :  { %7145 = vmatpush1.bf16.msra.mxu1 %v11189_v45  ;;  %7185 = vmatprep.subr.bf16.mxu0 %v11191_v18  ;;  %v12538_v45 = vld [vmem:[#allocation24_spill] sm:$0xff]  ;;  %v12539_v18 = vld [vmem:[#allocation25_spill] sm:$0xff] }
 0xbc9   :  { %7146 = vmatprep.subr.bf16.mxu1 %v11194_v63 }
 0xbcb   :  { %7186 = vmatpush1.bf16.msra.mxu0 %v11199_v11  ;;  %v12540_v11 = vld [vmem:[#allocation26_spill] sm:$0xff] }
 0xbcc   :  { %7147 = vmatpush1.bf16.msra.mxu1 %v11203_v37  ;;  %7187 = vmatprep.subr.bf16.mxu0 %v11205_v12  ;;  %v12541_v12 = vld [vmem:[#allocation27_spill] sm:$0xff] }
 0xbcd   :  { %7148 = vmatprep.subr.bf16.mxu1 %v11208_v36  ;;  %v12542_v36 = vld [vmem:[#allocation28_spill] sm:$0xff] }
 0xbcf   :  { %7188 = vmatpush1.bf16.msra.mxu0 %v11211_v24  ;;  %v12543_v24 = vld [vmem:[#allocation29_spill] sm:$0xff] }
 0xbd0   :  { %7149 = vmatpush1.bf16.msra.mxu1 %v12529_v38  ;;  %7189 = vmatprep.subr.bf16.mxu0 %v12530_v10 }
 0xbd1   :  { %7150 = vmatprep.subr.bf16.mxu1 %v12531_v17  ;;  %v12568_v17 = vld [vmem:[#allocation54_spill] sm:$0xff] }
 0xbd3   :  { %7190 = vmatpush1.bf16.msra.mxu0 %v12532_v39 }
 0xbd4   :  { %7151 = vmatpush2.bf16.msra.mxu1 %v12533_v9  ;;  %7248 = vmatprep.subr.bf16.mxu0 %v12534_v52  ;;  %v12572_v9 = vld [vmem:[#allocation58_spill] sm:$0xff]  ;;  %v12574_v52 = vld [vmem:[#allocation60_spill] sm:$0xff] }
 0xbd5   :  { %7152 = vmatprep.subr.bf16.mxu1 %v12535_v53  ;;  %v12575_v53 = vld [vmem:[#allocation61_spill] sm:$0xff] }
 0xbd6   :  { %v6219_v14 = vpop.f32.mrf.mxu0  ;;  %7208 = vmatmul.mubr.bf16.vlgmr.msra.gmra.mxu0 %v7043_v21  ;;  %v12573_v21 = vld [vmem:[#allocation59_spill] sm:$0xff] }
 0xbd7   :  { %7249 = vmatpush1.bf16.msra.mxu0 %v12536_v62  ;;  %7280 = vmatprep.mubr.bf16.mxu0 %v7237_v34  ;;  %v11694_v34 = vld [vmem:[#allocation4 + $0x24] sm:$0x66]  ;;  %v12578_v62 = vld [vmem:[#allocation64_spill] sm:$0xff] }
 0xbd8   :  { %v6221_v3 = vpop.f32.mrf.mxu0  ;;  %7153 = vmatpush2.bf16.msra.mxu1 %v12537_v61  ;;  %7250 = vmatprep.subr.bf16.mxu0 %v12538_v45  ;;  %v7217_v61 = vld [vmem:[#allocation4 + $0x20] sm:$0x6]  ;;  %v7335_v45 = vcombine.high %v11694_v34, %v11694_v34 }
 0xbd9   :  { %7154 = vmatprep.subr.bf16.mxu1 %v12539_v18  ;;  %v12580_v18 = vld [vmem:[#allocation66_spill] sm:$0xff] }
 0xbda   :  { %v6223_v63 = vpop.f32.mrf.mxu0 }
 0xbdb   :  { %7251 = vmatpush1.bf16.msra.mxu0 %v12540_v11  ;;  %v12581_v63 = vld [vmem:[#allocation67_spill] sm:$0xff]  ;;  %v12582_v11 = vld [vmem:[#allocation68_spill] sm:$0xff] }
 0xbdc   :  { %v6224_v37 = vpop.f32.mrf.mxu0  ;;  %7155 = vmatpush2.bf16.msra.mxu1 %v12541_v12  ;;  %7252 = vmatprep.subr.bf16.mxu0 %v12542_v36  ;;  %v7223_v12 = vpack.c.bf16 %v7217_v61, %v7217_v61  ;;  %v7338_v36 = vpack.c.bf16 %v7335_v45, %v7335_v45  ;;  %v12611_v61 = vld [vmem:[#allocation97_spill] sm:$0xff]  ;;  %v12612_v45 = vld [vmem:[#allocation98_spill] sm:$0xff] }
 0xbdd   :  { %7156 = vmatprep.subr.bf16.mxu1 %v12543_v24  ;;  %v12583_v37 = vld [vmem:[#allocation69_spill] sm:$0xff]  ;;  %v12584_v24 = vld [vmem:[#allocation70_spill] sm:$0xff] }
 0xbdf   :  { %7253 = vmatpush1.bf16.msra.mxu0 %v12544_v35  ;;  %v7221_v35 = vpack.c.bf16 %v11620_v47, %v11620_v47  ;;  %v12592_v47 = vld [vmem:[#allocation78_spill] sm:$0xff] }
 0xbe0   :  { %7157 = vmatpush2.bf16.msra.mxu1 %v12545_v23  ;;  %7254 = vmatprep.subr.bf16.mxu0 %v12546_v5  ;;  %v12585_v23 = vld [vmem:[#allocation71_spill] sm:$0xff]  ;;  %v12586_v5 = vld [vmem:[#allocation72_spill] sm:$0xff] }
 0xbe1   :  { %7158 = vmatprep.subr.bf16.mxu1 %v12547_v20  ;;  %v12587_v20 = vld [vmem:[#allocation73_spill] sm:$0xff] }
 0xbe3   :  { %7255 = vmatpush1.bf16.msra.mxu0 %v12548_v56  ;;  %v7241_v56 = vshll.u32 %v7223_v12, 16 }
 0xbe4   :  { %7159 = vmatpush2.bf16.msra.mxu1 %v12549_v54  ;;  %7256 = vmatprep.subr.bf16.mxu0 %v12550_v41  ;;  %v7350_v54 = vshll.u32 %v7338_v36, 16  ;;  %v12588_v41 = vld [vmem:[#allocation74_spill] sm:$0xff] }
 0xbe5   :  { %7160 = vmatprep.subr.bf16.mxu1 %v12551_v60  ;;  %v12589_v60 = vld [vmem:[#allocation75_spill] sm:$0xff] }
 0xbe7   :  { %7257 = vmatpush1.bf16.msra.mxu0 %v12552_v30  ;;  %v12590_v30 = vld [vmem:[#allocation76_spill] sm:$0xff] }
 0xbe8   :  { %7161 = vmatpush2.bf16.msra.mxu1 %v12553_v33  ;;  %7258 = vmatprep.subr.bf16.mxu0 %v12554_v58  ;;  %v7227_v33 = vshll.u32 %v7221_v35, 16  ;;  %v12591_v58 = vld [vmem:[#allocation77_spill] sm:$0xff] }
 0xbe9   :  { %7162 = vmatprep.subr.bf16.mxu1 %v12555_v57  ;;  %v7243_v57 = vrot.slane %v7241_v56, 1 }
 0xbeb   :  { %7259 = vmatpush1.bf16.msra.mxu0 %v12556_v29  ;;  %v7352_v29 = vrot.slane %v7350_v54, 1  ;;  %v12622_v54 = vld [vmem:[#allocation108_spill] sm:$0xff] }
 0xbec   :  { %7163 = vmatpush2.bf16.msra.mxu1 %v12557_v0  ;;  %7260 = vmatprep.subr.bf16.mxu0 %v12558_v44  ;;  %v7239_v0 = vshrl.u32 %v7223_v12, 16  ;;  %v12593_v44 = vld [vmem:[#allocation79_spill] sm:$0xff]  ;;  %v12616_v12 = vld [vmem:[#allocation102_spill] sm:$0xff] }
 0xbed   :  { %7164 = vmatprep.subr.bf16.mxu1 %v12559_v42  ;;  %v7348_v42 = vshrl.u32 %v7338_v36, 16  ;;  %v12617_v36 = vld [vmem:[#allocation103_spill] sm:$0xff] }
 0xbef   :  { %7261 = vmatpush1.bf16.msra.mxu0 %v12560_v7  ;;  %v7229_v7 = vrot.slane %v7227_v33, 1 }
 0xbf0   :  { %7165 = vmatpush2.bf16.msra.mxu1 %v12561_v2  ;;  %7262 = vmatprep.subr.bf16.mxu0 %v12562_v55  ;;  %v7244_v2 = vor.u32 %v7243_v57, %v7239_v0  ;;  %v7353_v55 = vor.u32 %v7352_v29, %v7348_v42  ;;  %v12627_v0 = vld [vmem:[#allocation113_spill] sm:$0xff] }
 0xbf1   :  { %7289 = vmatprep.subr.bf16.mxu1 %v12563_v40 }
 0xbf3   :  { %v6178_v8 = vpop.f32.mrf.mxu1  ;;  %7167 = vmatmul.mubr.bf16.vlgmr.msra.gmra.mxu1 %v7041_v22  ;;  %7263 = vmatpush1.bf16.msra.mxu0 %v12564_v13  ;;  %v7225_v22 = vshrl.u32 %v7221_v35, 16  ;;  %v12618_v35 = vld [vmem:[#allocation104_spill] sm:$0xff] }
 0xbf4   :  { %v6179_v32 = vadd.f32 %v6178_v8, %v11603_v46  ;;  %7290 = vmatpush1.bf16.msra.mxu1 %v12565_v27  ;;  %7264 = vmatprep.subr.bf16.mxu0 %v12566_v15  ;;  %v12570_v46 = vld [vmem:[#allocation56_spill] sm:$0xff] }
 0xbf5   :  { %v6180_v25 = vpop.f32.mrf.mxu1  ;;  %7291 = vmatprep.subr.bf16.mxu1 %v12567_v49  ;;  %7321 = vmatprep.mubr.bf16.mxu1 %v12154_v48  ;;  %v7230_v8 = vor.u32 %v7229_v7, %v7225_v22  ;;  %v12597_v49 = vld [vmem:[#allocation83_spill] sm:$0xff]  ;;  %v12628_v7 = vld [vmem:[#allocation114_spill] sm:$0xff]  ;;  %v12631_v22 = vld [vmem:[#allocation117_spill] sm:$0xff] }
 0xbf6   :  { %v11680_v38 = vadd.f32 %v6219_v14, %v6179_v32  ;;  %v6181_v50 = vadd.f32 %v6180_v25, %v11609_v19  ;;  %v12576_v19 = vld [vmem:[#allocation62_spill] sm:$0xff]  ;;  %v12577_v14 = vld [vmem:[#allocation63_spill] sm:$0xff] }
 0xbf7   :  { %v6182_v10 = vpop.f32.mrf.mxu1  ;;  %7265 = vmatpush2.bf16.msra.mxu0 %v12568_v17 }
 0xbf8   :  { %v11684_v28 = vadd.f32 %v6221_v3, %v6181_v50  ;;  %7292 = vmatpush1.bf16.msra.mxu1 %v12569_v31  ;;  %7266 = vmatprep.subr.bf16.mxu0 %v12570_v46  ;;  %v12579_v3 = vld [vmem:[#allocation65_spill] sm:$0xff]  ;;  %v12598_v10 = vld [vmem:[#allocation84_spill] sm:$0xff] }
 0xbf9   :  { %v6183_v39 = vpop.f32.mrf.mxu1  ;;  %7293 = vmatprep.subr.bf16.mxu1 %v12571_v51  ;;  %v12599_v46 = vld [vmem:[#allocation85_spill] sm:$0xff]  ;;  %v12601_v51 = vld [vmem:[#allocation87_spill] sm:$0xff] }
 0xbfb   :  { %7267 = vmatpush2.bf16.msra.mxu0 %v12572_v9  ;;  %v12602_v9 = vld [vmem:[#allocation88_spill] sm:$0xff] }
 0xbfc   :  { %7294 = vmatpush1.bf16.msra.mxu1 %v12573_v21  ;;  %7268 = vmatprep.subr.bf16.mxu0 %v12574_v52  ;;  %v12603_v21 = vld [vmem:[#allocation89_spill] sm:$0xff]  ;;  %v12605_v52 = vld [vmem:[#allocation91_spill] sm:$0xff] }
 0xbfd   :  { %7295 = vmatprep.subr.bf16.mxu1 %v12575_v53  ;;  %v12606_v53 = vld [vmem:[#allocation92_spill] sm:$0xff] }
 0xbff   :  { %7269 = vmatpush2.bf16.msra.mxu0 %v12576_v19  ;;  %v12607_v19 = vld [vmem:[#allocation93_spill] sm:$0xff] }
 0xc00   :  { %7296 = vmatpush1.bf16.msra.mxu1 %v12577_v14  ;;  %7270 = vmatprep.subr.bf16.mxu0 %v12578_v62  ;;  %v12609_v14 = vld [vmem:[#allocation95_spill] sm:$0xff]  ;;  %v12610_v62 = vld [vmem:[#allocation96_spill] sm:$0xff] }
 0xc01   :  { %7297 = vmatprep.subr.bf16.mxu1 %v12579_v3  ;;  %v7333_v3 = vld [vmem:[#allocation4 + $0x2c] sm:$0x6] }
 0xc03   :  { %7271 = vmatpush2.bf16.msra.mxu0 %v12580_v18  ;;  %v12613_v18 = vld [vmem:[#allocation99_spill] sm:$0xff] }
 0xc04   :  { %7298 = vmatpush1.bf16.msra.mxu1 %v12581_v63  ;;  %7272 = vmatprep.subr.bf16.mxu0 %v12582_v11  ;;  %v7339_v63 = vpack.c.bf16 %v7333_v3, %v7333_v3  ;;  %v12614_v11 = vld [vmem:[#allocation100_spill] sm:$0xff] }
 0xc05   :  { %7299 = vmatprep.subr.bf16.mxu1 %v12583_v37  ;;  %v12615_v37 = vld [vmem:[#allocation101_spill] sm:$0xff] }
 0xc07   :  { %7273 = vmatpush2.bf16.msra.mxu0 %v12584_v24  ;;  %v7357_v24 = vshll.u32 %v7339_v63, 16 }
 0xc08   :  { %7300 = vmatpush1.bf16.msra.mxu1 %v12585_v23  ;;  %7274 = vmatprep.subr.bf16.mxu0 %v12586_v5  ;;  %v12619_v23 = vld [vmem:[#allocation105_spill] sm:$0xff]  ;;  %v12620_v5 = vld [vmem:[#allocation106_spill] sm:$0xff] }
 0xc09   :  { %7301 = vmatprep.subr.bf16.mxu1 %v12587_v20  ;;  %v12621_v20 = vld [vmem:[#allocation107_spill] sm:$0xff]  ;;  %v7359_v56 = vrot.slane %v7357_v24, 1 }
 0xc0b   :  { %7275 = vmatpush2.bf16.msra.mxu0 %v12588_v41  ;;  %v7355_v41 = vshrl.u32 %v7339_v63, 16 }
 0xc0c   :  { %7302 = vmatpush1.bf16.msra.mxu1 %v12589_v60  ;;  %7276 = vmatprep.subr.bf16.mxu0 %v12590_v30  ;;  %v12623_v60 = vld [vmem:[#allocation109_spill] sm:$0xff]  ;;  %v12624_v30 = vld [vmem:[#allocation110_spill] sm:$0xff] }
 0xc0d   :  { %7303 = vmatprep.subr.bf16.mxu1 %v12591_v58  ;;  %v7360_v33 = vor.u32 %v7359_v56, %v7355_v41  ;;  %v12625_v58 = vld [vmem:[#allocation111_spill] sm:$0xff] }
 0xc0f   :  { %7277 = vmatpush2.bf16.msra.mxu0 %v12592_v47  ;;  %v12626_v47 = vld [vmem:[#allocation112_spill] sm:$0xff] }
 0xc10   :  { %7304 = vmatpush1.bf16.msra.mxu1 %v11416_v16  ;;  %7278 = vmatprep.subr.bf16.mxu0 %v12593_v44  ;;  %v12594_v16 = vld [vmem:[#allocation80_spill] sm:$0xff] }
 0xc11   :  { %7364 = vmatprep.subr.bf16.mxu1 %v11421_v6  ;;  %v12595_v6 = vld [vmem:[#allocation81_spill] sm:$0xff] }
 0xc13   :  { %v6622_v40 = vpop.f32.mrf.mxu1  ;;  %7279 = vmatpush2.bf16.msra.mxu0 %v11424_v1  ;;  %7322 = vmatmul.mubr.bf16.vlgmr.msra.gmra.mxu1 %v7244_v2  ;;  %v12596_v1 = vld [vmem:[#allocation82_spill] sm:$0xff]  ;;  %v12629_v2 = vld [vmem:[#allocation115_spill] sm:$0xff] }
 0xc14   :  { %7365 = vmatpush1.bf16.msra.mxu1 %v11428_v59  ;;  %7396 = vmatprep.mubr.bf16.mxu1 %v7353_v55  ;;  %v12630_v55 = vld [vmem:[#allocation116_spill] sm:$0xff] }
 0xc15   :  { %v6624_v13 = vpop.f32.mrf.mxu1  ;;  %7405 = vmatprep.subr.bf16.mxu0 %v11431_v43  ;;  %7366 = vmatprep.subr.bf16.mxu1 %v12594_v16  ;;  %v12634_v16 = vld [vmem:[#allocation120_spill] sm:$0xff] }
 0xc16   :  { %v6581_v32 = vpop.f32.mrf.mxu0  ;;  %7281 = vmatmul.mubr.bf16.vlgmr.msra.gmra.mxu0 %v7230_v8  ;;  %v7337_v8 = vpack.c.bf16 %v11694_v34, %v11694_v34 }
 0xc17   :  { %v6623_v27 = vadd.f32 %v6622_v40, %v6581_v32  ;;  %v6626_v15 = vpop.f32.mrf.mxu1  ;;  %7406 = vmatpush1.bf16.msra.mxu0 %v12595_v6  ;;  %7437 = vmatprep.mubr.bf16.mxu0 %v12154_v48  ;;  %v12600_v48 = vld [vmem:[#allocation86_spill] sm:$0xff]  ;;  %v12635_v32 = vld [vmem:[#allocation121_spill] sm:$0xff] }
 0xc18   :  { %v6583_v25 = vpop.f32.mrf.mxu0  ;;  %7367 = vmatpush1.bf16.msra.mxu1 %v12596_v1  ;;  %7407 = vmatprep.subr.bf16.mxu0 %v12597_v49  ;;  %v12632_v40 = vld [vmem:[#allocation118_spill] sm:$0xff] }
 0xc19   :  { %v11728_v59 = vadd.f32 %v6623_v27, %v11680_v38  ;;  %v6625_v50 = vadd.f32 %v6624_v13, %v6583_v25  ;;  %v6627_v43 = vpop.f32.mrf.mxu1  ;;  %7368 = vmatprep.subr.bf16.mxu1 %v12598_v10  ;;  %v12604_v38 = vld [vmem:[#allocation90_spill] sm:$0xff]  ;;  %v12633_v13 = vld [vmem:[#allocation119_spill] sm:$0xff]  ;;  %v7343_v27 = vshll.u32 %v7337_v8, 16  ;;  %v7341_v25 = vshrl.u32 %v7337_v8, 16 }
 0xc1a   :  { %v6585_v17 = vpop.f32.mrf.mxu0  ;;  %v12636_v15 = vld [vmem:[#allocation122_spill] sm:$0xff] }
 0xc1b   :  { %v11732_v31 = vadd.f32 %v6625_v50, %v11684_v28  ;;  %7408 = vmatpush1.bf16.msra.mxu0 %v12599_v46  ;;  %v12608_v28 = vld [vmem:[#allocation94_spill] sm:$0xff]  ;;  %v7345_v6 = vrot.slane %v7343_v27, 1 }
 0xc1c   :  { %v6586_v39 = vpop.f32.mrf.mxu0  ;;  %7369 = vmatpush1.bf16.msra.mxu1 %v12600_v48  ;;  %7409 = vmatprep.subr.bf16.mxu0 %v12601_v51 }
 0xc1d   :  { %7370 = vmatprep.subr.bf16.mxu1 %v12602_v9  ;;  %v7346_v1 = vor.u32 %v7345_v6, %v7341_v25 }
 0xc1f   :  { %7410 = vmatpush1.bf16.msra.mxu0 %v12603_v21 }
 0xc20   :  { %7371 = vmatpush1.bf16.msra.mxu1 %v12604_v38  ;;  %7411 = vmatprep.subr.bf16.mxu0 %v12605_v52 }
 0xc21   :  { %7372 = vmatprep.subr.bf16.mxu1 %v12606_v53 }
 0xc23   :  { %7412 = vmatpush1.bf16.msra.mxu0 %v12607_v19 }
 0xc24   :  { %7373 = vmatpush1.bf16.msra.mxu1 %v12608_v28  ;;  %7413 = vmatprep.subr.bf16.mxu0 %v12609_v14 }
 0xc25   :  { %7374 = vmatprep.subr.bf16.mxu1 %v12610_v62 }
 0xc27   :  { %7414 = vmatpush1.bf16.msra.mxu0 %v12611_v61 }
 0xc28   :  { %7375 = vmatpush1.bf16.msra.mxu1 %v12612_v45  ;;  %7415 = vmatprep.subr.bf16.mxu0 %v12613_v18 }
 0xc29   :  { %7376 = vmatprep.subr.bf16.mxu1 %v12614_v11 }
 0xc2b   :  { %7416 = vmatpush1.bf16.msra.mxu0 %v12615_v37 }
 0xc2c   :  { %7377 = vmatpush1.bf16.msra.mxu1 %v12616_v12  ;;  %7417 = vmatprep.subr.bf16.mxu0 %v12617_v36 }
 0xc2d   :  { %7378 = vmatprep.subr.bf16.mxu1 %v12618_v35 }
 0xc2f   :  { %7418 = vmatpush1.bf16.msra.mxu0 %v12619_v23 }
 0xc30   :  { %7379 = vmatpush1.bf16.msra.mxu1 %v12620_v5  ;;  %7419 = vmatprep.subr.bf16.mxu0 %v12621_v20 }
 0xc31   :  { %7380 = vmatprep.subr.bf16.mxu1 %v12622_v54 }
 0xc33   :  { %7420 = vmatpush1.bf16.msra.mxu0 %v12623_v60 }
 0xc34   :  { %7381 = vmatpush2.bf16.msra.mxu1 %v12624_v30 }
 0xc35   :  { %7382 = vmatprep.subr.bf16.mxu1 %v12625_v58 }
 0xc36   :  { %v7027_v57 = vpop.f32.mrf.mxu0  ;;  %7438 = vmatmul.mubr.bf16.vlgmr.msra.gmra.mxu0 %v7360_v33 }
 0xc38   :  { %v7029_v29 = vpop.f32.mrf.mxu0  ;;  %7383 = vmatpush2.bf16.msra.mxu1 %v12626_v47 }
 0xc39   :  { %7384 = vmatprep.subr.bf16.mxu1 %v12627_v0 }
 0xc3a   :  { %v7031_v44 = vpop.f32.mrf.mxu0 }
 0xc3c   :  { %v7032_v42 = vpop.f32.mrf.mxu0  ;;  %7385 = vmatpush2.bf16.msra.mxu1 %v12628_v7 }
 0xc3d   :  { %7386 = vmatprep.subr.bf16.mxu1 %v12629_v2 }
 0xc40   :  { %7387 = vmatpush2.bf16.msra.mxu1 %v12630_v55 }
 0xc41   :  { %7388 = vmatprep.subr.bf16.mxu1 %v12631_v22 }
 0xc44   :  { %7389 = vmatpush2.bf16.msra.mxu1 %v12632_v40 }
 0xc45   :  { %7390 = vmatprep.subr.bf16.mxu1 %v12633_v13 }
 0xc48   :  { %7391 = vmatpush2.bf16.msra.mxu1 %v12634_v16 }
 0xc49   :  { %7392 = vmatprep.subr.bf16.mxu1 %v12635_v32 }
 0xc4c   :  { %7393 = vmatpush2.bf16.msra.mxu1 %v12636_v15 }
 0xc4d   :  { %7394 = vmatprep.subr.bf16.mxu1 %v11571_v26 }
 0xc50   :  { %7395 = vmatpush2.bf16.msra.mxu1 %v11574_v4 }
 0xc53   :  { %v6986_v49 = vpop.f32.mrf.mxu1  ;;  %7397 = vmatmul.mubr.bf16.vlgmr.msra.gmra.mxu1 %v7346_v1 }
 0xc54   :  { %v7028_v50 = vadd.f32 %v7027_v57, %v6986_v49 }
 0xc55   :  { %v6988_v34 = vpop.f32.mrf.mxu1 }
 0xc56   :  { %v11777_v43 = vadd.f32 %v7028_v50, %v11728_v59  ;;  %v7030_v10 = vadd.f32 %v7029_v29, %v6988_v34 }
 0xc57   :  { %v6990_v17 = vpop.f32.mrf.mxu1 }
 0xc58   :  { %v11780_v46 = vadd.f32 %v7030_v10, %v11732_v31  ;;  %v7453_v57 = vsel %vm7452_vm0, %v11777_v43, 0.0 }
 0xc59   :  { %v6991_v39 = vpop.f32.mrf.mxu1  ;;  %v7454_v47 = vrot.slane %v7453_v57, 4 }
 0xc5a   :  { %v7460_v29 = vsel %vm7452_vm0, %v11780_v46, 0.0 }
 0xc5b   :  { %v7461_v0 = vrot.slane %v7460_v29, 4  ;;  %v7455_v2 = vadd.f32 %v7454_v47, %v7453_v57 }
 0xc5d   :  { %v7462_v55 = vadd.f32 %v7461_v0, %v7460_v29  ;;  %v7456_v15 = vrot.slane %v7455_v2, 2 }
 0xc5f   :  { %v7463_v6 = vrot.slane %v7462_v55, 2  ;;  %v7457_v10 = vadd.f32 %v7456_v15, %v7455_v2 }
 0xc61   :  { %v7464_v17 = vadd.f32 %v7463_v6, %v7462_v55 }
 0xc73   :  { %v7127_v48 = vpop.f32.mrf.mxu1 }
 0xc75   :  { %v7129_v26 = vpop.f32.mrf.mxu1 }
 0xc76   :  { %v7086_v51 = vpop.f32.mrf.mxu0 }
 0xc77   :  { %v7128_v9 = vadd.f32 %v7127_v48, %v7086_v51  ;;  %v7131_v21 = vpop.f32.mrf.mxu1 }
 0xc78   :  { %v7088_v4 = vpop.f32.mrf.mxu0  ;;  %v7465_v21 = vrot.slane %v7464_v17, 1 }
 0xc79   :  { %v7130_v38 = vadd.f32 %v7129_v26, %v7088_v4  ;;  %v7132_v52 = vpop.f32.mrf.mxu1 }
 0xc7a   :  { %v7090_v53 = vpop.f32.mrf.mxu0 }
 0xc7c   :  { %v7091_v19 = vpop.f32.mrf.mxu0 }
 0xc96   :  { %v7209_v28 = vpop.f32.mrf.mxu0 }
 0xc98   :  { %v7211_v14 = vpop.f32.mrf.mxu0 }
 0xc9a   :  { %v7213_v59 = vpop.f32.mrf.mxu0 }
 0xc9c   :  { %v7214_v62 = vpop.f32.mrf.mxu0 }
 0xcb3   :  { %v7168_v3 = vpop.f32.mrf.mxu1 }
 0xcb4   :  { %v7169_v61 = vadd.f32 %v7168_v3, %v7128_v9  ;;  %v7458_v9 = vrot.slane %v7457_v10, 1 }
 0xcb5   :  { %v7170_v45 = vpop.f32.mrf.mxu1 }
 0xcb6   :  { %v7210_v31 = vadd.f32 %v7209_v28, %v7169_v61  ;;  %v7171_v18 = vadd.f32 %v7170_v45, %v7130_v38  ;;  %v7459_v19 = vadd.f32 %v7458_v9, %v7457_v10  ;;  %v7466_v28 = vadd.f32 %v7465_v21, %v7464_v17  ;;  %v12637_v45 = vld [vmem:[#allocation12_spill] sm:$0xff]  ;;  %v8273_v9 = vld [vmem:[%s11857_s5 + $0x5] ss:$8 sm:$0x3] }
 0xcb7   :  { %v7172_v63 = vpop.f32.mrf.mxu1 }
 0xcb8   :  { %v7212_v11 = vadd.f32 %v7211_v14, %v7171_v18 }
 0xcb9   :  { %v7173_v37 = vpop.f32.mrf.mxu1 }
 0xcd3   :  { %v7323_v12 = vpop.f32.mrf.mxu1 }
 0xcd5   :  { %v7325_v36 = vpop.f32.mrf.mxu1 }
 0xcd6   :  { %v7282_v24 = vpop.f32.mrf.mxu0 }
 0xcd7   :  { %v7324_v35 = vadd.f32 %v7323_v12, %v7282_v24  ;;  %v7327_v23 = vpop.f32.mrf.mxu1 }
 0xcd8   :  { %v7284_v5 = vpop.f32.mrf.mxu0 }
 0xcd9   :  { %v7330_v20 = vadd.f32 %v7324_v35, %v7210_v31  ;;  %v7328_v56 = vpop.f32.mrf.mxu1  ;;  %v7326_v44 = vadd.f32 %v7325_v36, %v7284_v5 }
 0xcda   :  { %v7286_v54 = vpop.f32.mrf.mxu0 }
 0xcdb   :  { %v7331_v40 = vadd.f32 %v7326_v44, %v7212_v11 }
 0xcdc   :  { %v7287_v41 = vpop.f32.mrf.mxu0 }
 0xcf6   :  { %v7439_v60 = vpop.f32.mrf.mxu0 }
 0xcf8   :  { %v7441_v30 = vpop.f32.mrf.mxu0 }
 0xcfa   :  { %v7443_v33 = vpop.f32.mrf.mxu0 }
 0xcfc   :  { %v7444_v58 = vpop.f32.mrf.mxu0 }
 0xd13   :  { %v7398_v42 = vpop.f32.mrf.mxu1 }
 0xd14   :  { %v7440_v7 = vadd.f32 %v7439_v60, %v7398_v42 }
 0xd15   :  { %v7400_v22 = vpop.f32.mrf.mxu1 }
 0xd16   :  { %v11786_v8 = vadd.f32 %v7440_v7, %v7330_v20  ;;  %v7442_v13 = vadd.f32 %v7441_v30, %v7400_v22 }
 0xd17   :  { %v7402_v16 = vpop.f32.mrf.mxu1 }
 0xd18   :  { %v7467_v32 = vsel %vm7452_vm0, %v11786_v8, 0.0  ;;  %v11790_v27 = vadd.f32 %v7442_v13, %v7331_v40 }
 0xd19   :  { %v7468_v25 = vrot.slane %v7467_v32, 4  ;;  %v7403_v1 = vpop.f32.mrf.mxu1 }
 0xd1a   :  { %v7474_v49 = vsel %vm7452_vm0, %v11790_v27, 0.0 }
 0xd1b   :  { %v7469_v50 = vadd.f32 %v7468_v25, %v7467_v32  ;;  %v7475_v34 = vrot.slane %v7474_v49, 4 }
 0xd1d   :  { %v7470_v39 = vrot.slane %v7469_v50, 2  ;;  %v7476_v48 = vadd.f32 %v7475_v34, %v7474_v49 }
 0xd1f   :  { %v7471_v26 = vadd.f32 %v7470_v39, %v7469_v50  ;;  %v7477_v51 = vrot.slane %v7476_v48, 2 }
 0xd21   :  { %v7472_v4 = vrot.slane %v7471_v26, 1  ;;  %v7478_v38 = vadd.f32 %v7477_v51, %v7476_v48 }
 0xd23   :  { %v7473_v52 = vadd.f32 %v7472_v4, %v7471_v26  ;;  %v7479_v53 = vrot.slane %v7478_v38, 1  ;;  %v12638_v26 = vld [vmem:[#allocation14_spill] sm:$0xff] }
 0xd25   :  { %v7480_v14 = vadd.f32 %v7479_v53, %v7478_v38  ;;  %v7481_v59 = vadd.f32 %v7473_v52, %v7459_v19  ;;  %v12639_v52 = vld [vmem:[#allocation13_spill] sm:$0xff] }
 0xd27   :  { %v7482_v62 = vadd.f32 %v7480_v14, %v7466_v28 }
 0xd29   :  { %v7483_v3 = vadd.f32 %v7482_v62, %v7481_v59  ;;  %v8274_v62 = vld [vmem:[%s11857_s5 + $0x6] ss:$8 sm:$0x3] }
 0xd2b   :  { %v7484_v61 = vmul.f32 0.125, %v7483_v3 }
 0xd2d   :  { %v7488_v31 = vrot.slane %v7484_v61, %v12637_v45 }
 0xd2f   :  { %v7489_v18 = vsub.f32 %v11777_v43, %v7488_v31  ;;  %v7490_v63 = vsub.f32 %v11780_v46, %v7488_v31  ;;  %v7507_v11 = vsub.f32 %v11786_v8, %v7488_v31  ;;  %v7508_v37 = vsub.f32 %v11790_v27, %v7488_v31 }
 0xd31   :  { %v7491_v12 = vmul.f32 %v7489_v18, %v7489_v18  ;;  %v7492_v36 = vmul.f32 %v7490_v63, %v7490_v63  ;;  %v7509_v24 = vmul.f32 %v7507_v11, %v7507_v11  ;;  %v7510_v35 = vmul.f32 %v7508_v37, %v7508_v37 }
 0xd33   :  { %v7493_v23 = vsel %vm7452_vm0, %v7491_v12, 0.0  ;;  %v7500_v5 = vsel %vm7452_vm0, %v7492_v36, 0.0  ;;  %v7511_v20 = vsel %vm7452_vm0, %v7509_v24, 0.0  ;;  %v7518_v56 = vsel %vm7452_vm0, %v7510_v35, 0.0 }
 0xd34   :  { %v7494_v54 = vrot.slane %v7493_v23, 4  ;;  %v7501_v41 = vrot.slane %v7500_v5, 4  ;;  %v7512_v60 = vrot.slane %v7511_v20, 4  ;;  %v7519_v30 = vrot.slane %v7518_v56, 4 }
 0xd36   :  { %v7495_v33 = vadd.f32 %v7494_v54, %v7493_v23  ;;  %v7502_v58 = vadd.f32 %v7501_v41, %v7500_v5  ;;  %v7513_v57 = vadd.f32 %v7512_v60, %v7511_v20  ;;  %v7520_v29 = vadd.f32 %v7519_v30, %v7518_v56  ;;  %v8275_v5 = vld [vmem:[%s11858_s6] ss:$0 sm:$0xff] }
 0xd38   :  { %v7496_v47 = vrot.slane %v7495_v33, 2  ;;  %v7503_v0 = vrot.slane %v7502_v58, 2  ;;  %v7514_v44 = vrot.slane %v7513_v57, 2  ;;  %v7521_v42 = vrot.slane %v7520_v29, 2 }
 0xd3a   :  { %v7497_v7 = vadd.f32 %v7496_v47, %v7495_v33  ;;  %v7504_v2 = vadd.f32 %v7503_v0, %v7502_v58  ;;  %v7515_v55 = vadd.f32 %v7514_v44, %v7513_v57  ;;  %v7522_v22 = vadd.f32 %v7521_v42, %v7520_v29  ;;  %v7631_v0 = vld [vmem:[%s11859_s7 + $0x2] sm:$0x3]  ;;  %v7623_v44 = vld [vmem:[%s11859_s7] sm:$0x3] }
 0xd3c   :  { %v7498_v40 = vrot.slane %v7497_v7, 1  ;;  %v7505_v13 = vrot.slane %v7504_v2, 1  ;;  %v7516_v16 = vrot.slane %v7515_v55, 1  ;;  %v7523_v32 = vrot.slane %v7522_v22, 1 }
 0xd3e   :  { %v7499_v15 = vadd.f32 %v7498_v40, %v7497_v7  ;;  %v7506_v6 = vadd.f32 %v7505_v13, %v7504_v2  ;;  %v7517_v25 = vadd.f32 %v7516_v16, %v7515_v55  ;;  %v7524_v1 = vadd.f32 %v7523_v32, %v7522_v22  ;;  %v7638_v22 = vld [vmem:[%s11859_s7] sm:$0x3]  ;;  %v7645_v16 = vld [vmem:[%s11859_s7 + $0x2] sm:$0x3] }
 0xd40   :  { %v7525_v49 = vadd.f32 %v7517_v25, %v7499_v15  ;;  %v7526_v50 = vadd.f32 %v7524_v1, %v7506_v6 }
 0xd42   :  { %v7527_v34 = vadd.f32 %v7526_v50, %v7525_v49 }
 0xd44   :  { %v7528_v10 = vmul.f32 0.125, %v7527_v34 }
 0xd46   :  { %v7529_v17 = vadd.f32 1e-05, %v7528_v10 }
 0xd48   :  { %9076 = vrsqrt.f32 %v7529_v17 }
 0xd55   :  { %v9077_v39 = vpop.eup %9076 }
 0xd56   :  { %v7532_v48 = vcombine.low %v9077_v39, %v9077_v39 }
 0xd58   :  { %v7539_v51 = vrot.slane %v7532_v48, %v12638_v26 }
 0xd5a   :  { %v7546_v21 = vrot.slane %v7539_v51, %v12638_v26 }
 0xd5c   :  { %v7548_v4 = vmul.f32 %v8273_v9, %v7546_v21 }
 0xd5e   :  { %v7553_v38 = vrot.slane %v7548_v4, %v12637_v45  ;;  %v7557_v53 = vrot.slane %v7548_v4, %v12639_v52 }
 0xd60   :  { %v7561_v19 = vmul.f32 %v7557_v53, %v7484_v61  ;;  %v7560_v28 = vmul.f32 %v7553_v38, %v7484_v61  ;;  %v7597_v18 = vmul.f32 %v7557_v53, %v11790_v27  ;;  %v7582_v63 = vmul.f32 %v7557_v53, %v11780_v46 }
 0xd61   :  { %v7581_v37 = vmul.f32 %v7553_v38, %v11777_v43  ;;  %v7596_v12 = vmul.f32 %v7553_v38, %v11786_v8 }
 0xd62   :  { %v7564_v14 = vcombine.low %v7560_v28, %v7561_v19 }
 0xd64   :  { %v7571_v59 = vrot.slane %v7564_v14, %v12638_v26 }
 0xd66   :  { %v7578_v3 = vrot.slane %v7571_v59, %v12638_v26 }
 0xd68   :  { %v7580_v31 = vsub.f32 %v8274_v62, %v7578_v3 }
 0xd6a   :  { %v7591_v11 = vrot.slane %v7580_v31, %v12639_v52  ;;  %v7587_v61 = vrot.slane %v7580_v31, %v12637_v45 }
 0xd6c   :  { %v7595_v36 = vadd.f32 %v7591_v11, %v7582_v63  ;;  %v7594_v24 = vadd.f32 %v7587_v61, %v7581_v37  ;;  %v7598_v35 = vadd.f32 %v7596_v12, %v7587_v61  ;;  %v7599_v23 = vadd.f32 %v7597_v18, %v7591_v11 }
 0xd6e   :  { %vm7601_vm4 = vcmp.ge.f32.partialorder %v7595_v36, 0.0  ;;  %v7603_v27 = vmul.f32 0.2, %v7595_v36  ;;  %vm7600_vm5 = vcmp.ge.f32.partialorder %v7594_v24, 0.0  ;;  %v7602_v46 = vmul.f32 0.2, %v7594_v24 }
 0xd6f   :  { %vm7606_vm6 = vcmp.ge.f32.partialorder %v7598_v35, 0.0  ;;  %v7608_v20 = vmul.f32 0.2, %v7598_v35  ;;  %v7609_v54 = vmul.f32 0.2, %v7599_v23  ;;  %vm7607_vm7 = vcmp.ge.f32.partialorder %v7599_v23, 0.0 }
 0xd70   :  { %v7605_v56 = vsel %vm7601_vm4, %v7595_v36, %v7603_v27  ;;  %v7604_v43 = vsel %vm7600_vm5, %v7594_v24, %v7602_v46 }
 0xd71   :  { %v7627_v45 = vmul.f32 %v8275_v5, %v7605_v56  ;;  %v7619_v41 = vmul.f32 %v8275_v5, %v7604_v43  ;;  %v7610_v8 = vsel %vm7606_vm6, %v7598_v35, %v7608_v20  ;;  %v7611_v58 = vsel %vm7607_vm7, %v7599_v23, %v7609_v54 }
 0xd72   :  { %v7634_v33 = vmul.f32 %v8275_v5, %v7610_v8  ;;  %v7641_v29 = vmul.f32 %v8275_v5, %v7611_v58 }
 0xd73   :  { %v7628_v60 = vsel %vm7452_vm0, %v7627_v45, 0.0  ;;  %v7620_v30 = vsel %vm7452_vm0, %v7619_v41, 0.0 }
 0xd74   :  { %7629 = vadd.xlane.f32.xlu1 %v7628_v60  ;;  %7621 = vadd.xlane.f32.xlu0 %v7620_v30  ;;  %v7635_v57 = vsel %vm7452_vm0, %v7634_v33, 0.0  ;;  %v7642_v47 = vsel %vm7452_vm0, %v7641_v29, 0.0 }
 0xd78   :  { %7636 = vadd.xlane.f32.xlu0 %v7635_v57 }
 0xd7c   :  { %7643 = vadd.xlane.f32.xlu0 %v7642_v47 }
 0xdfd   :  { %v7630_v42 = vpop.xlane.xlu1 %7629  ;;  %v7622_v7 = vpop.xlane.xlu0 %7621 }
 0xdfe   :  { %v7632_v2 = vadd.f32 %v7631_v0, %v7630_v42  ;;  %v7624_v55 = vadd.f32 %v7623_v44, %v7622_v7 }
 0xe00   :  { %7633 = vst.msk [vmem:[%s11860_s8 + $0x2] sm:$0x3] %vm7625_vm8, %v7632_v2  ;;  %7626 = vst.msk [vmem:[%s11860_s8] sm:$0x3] %vm7625_vm8, %v7624_v55 }
 0xe01   :  { %v7637_v40 = vpop.xlane.xlu0 %7636 }
 0xe02   :  { %v7639_v13 = vadd.f32 %v7638_v22, %v7637_v40 }
 0xe04   :  { %7640 = vst.msk [vmem:[%s11860_s8 + $0x4] sm:$0x3] %vm7625_vm8, %v7639_v13 }
 0xe05   :  { %v7644_v32 = vpop.xlane.xlu0 %7643 }
 0xe06   :  { %v7646_v15 = vadd.f32 %v7645_v16, %v7644_v32 }
 0xe08   :  { %7647 = vst.msk [vmem:[%s11860_s8 + $0x6] sm:$0x3] %vm7625_vm8, %v7646_v15 }
 0xe09   :  { %7652 = vsyncpa [#allocation6], 1 }
 0xe0a   :  { %7653 = vsyncpa [#allocation8], 1 }

</bundles_post_ra>
